<compile_context>
chip_gen: v5e
topology: v5e:2x2
jax: 0.10.0
libtpu: 0.0.40
codegen_flags: <defaults>
</compile_context>

<pallas_src>
import functools

import jax
import jax.numpy as jnp
import numpy as np
from jax.experimental import pallas as pl
from jax.experimental.pallas import tpu as pltpu


def _pick_rows(Hp, B, max_steps=8, min_rows=8):
    """Patch-rows per grid step: a divisor of Hp, >= min_rows (or Hp itself),
    such that the total grid (B * Hp/R) has at most ~max_steps steps."""
    cands = [r for r in range(1, Hp + 1)
             if Hp % r == 0
             and r >= min(min_rows, Hp)
             and B * (Hp // r) <= max_steps]
    return min(cands) if cands else Hp


def _patch_embed_kernel(x_ref, s_ref, w_ref, b_ref, o_ref, *, C, p, Wp, R):
    # x_ref: (1, C, R, p, Wpad)  contiguous NCHW slab = R patch-rows of the image
    # s_ref: (Wpad, p*Wp)        0/1 lane-deinterleave matrix (resident)
    # w_ref: (p, E, C*p)         projection weight, w_ref[pw, e, c*p+ph] (resident)
    # b_ref: (E, 1)              bias (resident, f32)
    # o_ref: (1, E, 1, R, Wp)    output slab (channels-major final layout)
    sel = s_ref[...]
    wmat = w_ref[...]
    bias = b_ref[...]
    for r in range(R):                                   # static unroll, R small
        slab = x_ref[0, :, r, :, :]                      # (C, p, Wpad)
        slab2 = slab.reshape(C * p, slab.shape[-1])      # (C*p, Wpad)
        # Lane deinterleave (w*p + pw) -> (pw*Wp + w) on the MXU (exact 0/1 matmul).
        pr = jnp.dot(slab2, sel,
                     preferred_element_type=slab2.dtype,
                     precision=jax.lax.Precision.HIGHEST)        # (C*p, p*Wp)
        acc = None
        for pw in range(p):
            piece = pr[:, pw * Wp:(pw + 1) * Wp]                 # (C*p, Wp)
            term = jnp.dot(wmat[pw], piece,
                           preferred_element_type=jnp.float32,
                           precision=jax.lax.Precision.HIGHEST)  # (E, Wp)
            acc = term if acc is None else acc + term
        o_ref[0, :, 0, r, :] = (acc + bias).astype(o_ref.dtype)


def patch_embed_forward(x, weight, bias, patch_size=4, out_dtype=None):
    """x: (B, C, H, W); weight: (E, C, p, p); bias: (E,). Returns (B, E, Hp, Wp)."""
    B, C, H, W = x.shape
    E = weight.shape[0]
    p = patch_size
    if out_dtype is None:
        out_dtype = x.dtype

    # Same padding semantics as the PyTorch forward (right/bottom zero pad).
    pad_h = (-H) % p
    pad_w = (-W) % p
    if pad_h or pad_w:
        x = jnp.pad(x, ((0, 0), (0, 0), (0, pad_h), (0, pad_w)))
    Hpad, Wpad = H + pad_h, W + pad_w
    Hp, Wp = Hpad // p, Wpad // p

    R = _pick_rows(Hp, B)
    nc = Hp // R

    # Free (metadata-only) 5-D view: split Hpad -> (Hp, p).
    x5 = x.reshape(B, C, Hp, p, Wpad)

    # 0/1 selection matrix reordering lanes (w*p + pw) -> (pw*Wp + w); resident.
    idx = np.arange(Wpad)
    sel_np = np.zeros((Wpad, p * Wp), dtype=np.float32)
    sel_np[idx, (idx % p) * Wp + (idx // p)] = 1.0
    sel = jnp.asarray(sel_np, dtype=x.dtype)

    # Weight rearranged to (pw, E, C*p) -- matches the (c, ph) row order of the
    # in-kernel slab; bias kept in f32 (added to the f32 accumulator).
    w_r = jnp.asarray(weight, dtype=x.dtype).transpose(3, 0, 1, 2).reshape(p, E, C * p)
    b_col = jnp.asarray(bias, dtype=jnp.float32).reshape(E, 1)

    kernel = functools.partial(_patch_embed_kernel, C=C, p=p, Wp=Wp, R=R)
    out5 = pl.pallas_call(
        kernel,
        out_shape=jax.ShapeDtypeStruct((B, E, nc, R, Wp), out_dtype),
        grid=(B, nc),
        in_specs=[
            pl.BlockSpec((1, C, R, p, Wpad), lambda b, j: (b, 0, j, 0, 0)),  # streamed image slab
            pl.BlockSpec((Wpad, p * Wp), lambda b, j: (0, 0)),               # resident selection
            pl.BlockSpec((p, E, C * p), lambda b, j: (0, 0, 0)),             # resident weights
            pl.BlockSpec((E, 1), lambda b, j: (0, 0)),                       # resident bias
        ],
        out_specs=pl.BlockSpec((1, E, 1, R, Wp), lambda b, j: (b, 0, j, 0, 0)),
        compiler_params=pltpu.CompilerParams(
            dimension_semantics=("parallel", "parallel"),   # megacore split on v7x
            vmem_limit_bytes=32 * 1024 * 1024,
        ),
    )(x5, sel, w_r, b_col)

    # (B, E, nc, R, Wp) -> (B, E, Hp, Wp): adjacent-dim merge, free (no transpose).
    return out5.reshape(B, E, Hp, Wp)


def _reference(x, weight, bias, p):
    pad_w = (-x.shape[3]) % p
    pad_h = (-x.shape[2]) % p
    if pad_w or pad_h:
        x = jnp.pad(x, ((0, 0), (0, 0), (0, pad_h), (0, pad_w)))
    out = jax.lax.conv_general_dilated(
        x, weight,
        window_strides=(p, p),
        padding="VALID",
        dimension_numbers=("NCHW", "OIHW", "NCHW"),
        precision=jax.lax.Precision.HIGHEST,
    )
    return out + bias.reshape(1, -1, 1, 1)


if __name__ == "__main__":
    patch_size = 4
    in_chans = 3
    embed_dim = 96

    key = jax.random.PRNGKey(0)
    kx, kw, kb = jax.random.split(key, 3)
    weight = jax.random.normal(
        kw, (embed_dim, in_chans, patch_size, patch_size), dtype=jnp.float32) * 0.02
    bias = jax.random.normal(kb, (embed_dim,), dtype=jnp.float32) * 0.02

    fwd = jax.jit(patch_embed_forward, static_argnames=("patch_size", "out_dtype"))

    # Check 1: divisible spatial dims (B=2, 16x16) -> grid (2, 1).
    x1 = jax.random.normal(kx, (2, in_chans, 16, 16), dtype=jnp.float32)
    out1 = jax.block_until_ready(fwd(x1, weight, bias, patch_size=patch_size))
    ref1 = jax.block_until_ready(_reference(x1, weight, bias, patch_size))
    assert out1.shape == (2, embed_dim, 4, 4), out1.shape
    assert np.allclose(np.asarray(out1), np.asarray(ref1), atol=1e-4, rtol=1e-4)

    # Check 2: non-divisible spatial dims (18x18 -> right/bottom pad to 20x20).
    x2 = jax.random.normal(jax.random.PRNGKey(1), (2, in_chans, 18, 18),
                           dtype=jnp.float32)
    out2 = jax.block_until_ready(fwd(x2, weight, bias, patch_size=patch_size))
    ref2 = jax.block_until_ready(_reference(x2, weight, bias, patch_size))
    assert out2.shape == (2, embed_dim, 5, 5), out2.shape
    assert np.allclose(np.asarray(out2), np.asarray(ref2), atol=1e-4, rtol=1e-4)

    # Check 3: multi-chunk grid (64x64 -> Hp=16, R=8 -> grid (2, 2)).
    x3 = jax.random.normal(jax.random.PRNGKey(2), (2, in_chans, 64, 64),
                           dtype=jnp.float32)
    out3 = jax.block_until_ready(fwd(x3, weight, bias, patch_size=patch_size))
    ref3 = jax.block_until_ready(_reference(x3, weight, bias, patch_size))
    assert out3.shape == (2, embed_dim, 16, 16), out3.shape
    assert np.allclose(np.asarray(out3), np.asarray(ref3), atol=1e-4, rtol=1e-4)

    # Check 4: bf16 streaming path (halved HBM traffic), f32 accumulation.
    x4 = jax.random.normal(jax.random.PRNGKey(3), (2, in_chans, 32, 32),
                           dtype=jnp.float32).astype(jnp.bfloat16)
    out4 = jax.block_until_ready(fwd(x4, weight, bias, patch_size=patch_size))
    ref4 = jax.block_until_ready(
        _reference(x4.astype(jnp.float32), weight, bias, patch_size))
    assert out4.shape == (2, embed_dim, 8, 8), out4.shape
    assert out4.dtype == jnp.bfloat16
    assert np.allclose(np.asarray(out4, dtype=np.float32), np.asarray(ref4),
                       atol=2e-2, rtol=2e-2)

    print("KERNEL_OK")
</pallas_src>

<mosaic_0001>
module attributes {stable_mosaic.version = 11 : i64} {
  func.func @_patch_embed_kernel(%arg0: i32, %arg1: i32, %arg2: memref<1x3x4x4x16xf32, #tpu.memory_space<vmem>>, %arg3: memref<16x16xf32, #tpu.memory_space<vmem>>, %arg4: memref<4x96x12xf32, #tpu.memory_space<vmem>>, %arg5: memref<96x1xf32, #tpu.memory_space<vmem>>, %arg6: memref<1x96x1x4x4xf32, #tpu.memory_space<vmem>>) attributes {dimension_semantics = [#tpu.dimension_semantics<parallel>, #tpu.dimension_semantics<parallel>], iteration_bounds = array<i64: 2, 1>, scalar_prefetch = 0 : i64, scratch_operands = 0 : i64, tpu.core_type = #tpu.core_type<tc>, window_params = [{transform_indices = @transform_0, window_bounds = array<i64: 1, 3, 4, 4, 16>}, {pipeline_mode = #tpu.pipeline_mode<synchronous>, transform_indices = @transform_1, window_bounds = array<i64: 16, 16>}, {pipeline_mode = #tpu.pipeline_mode<synchronous>, transform_indices = @transform_2, window_bounds = array<i64: 4, 96, 12>}, {pipeline_mode = #tpu.pipeline_mode<synchronous>, transform_indices = @transform_3, window_bounds = array<i64: 96, 1>}, {transform_indices = @transform_4, window_bounds = array<i64: 1, 96, 1, 4, 4>}]} {
    %c0 = arith.constant 0 : index
    %c0_0 = arith.constant 0 : index
    %0 = vector.load %arg3[%c0, %c0_0] : memref<16x16xf32, #tpu.memory_space<vmem>>, vector<16x16xf32>
    %c0_1 = arith.constant 0 : index
    %c0_2 = arith.constant 0 : index
    %c0_3 = arith.constant 0 : index
    %1 = vector.load %arg4[%c0_1, %c0_2, %c0_3] : memref<4x96x12xf32, #tpu.memory_space<vmem>>, vector<4x96x12xf32>
    %c0_4 = arith.constant 0 : index
    %c0_5 = arith.constant 0 : index
    %2 = vector.load %arg5[%c0_4, %c0_5] : memref<96x1xf32, #tpu.memory_space<vmem>>, vector<96x1xf32>
    %c0_6 = arith.constant 0 : index
    %c0_7 = arith.constant 0 : index
    %c0_8 = arith.constant 0 : index
    %c0_9 = arith.constant 0 : index
    %c0_10 = arith.constant 0 : index
    %3 = vector.load %arg2[%c0_6, %c0_7, %c0_8, %c0_9, %c0_10] : memref<1x3x4x4x16xf32, #tpu.memory_space<vmem>>, vector<1x3x1x4x16xf32>
    %4 = vector.shape_cast %3 : vector<1x3x1x4x16xf32> to vector<3x4x16xf32>
    %5 = vector.shape_cast %4 : vector<3x4x16xf32> to vector<12x16xf32>
    %cst = arith.constant dense<0.000000e+00> : vector<12x16xf32>
    %6 = tpu.matmul %5, %0, %cst {dimension_numbers = #tpu.dot_dimension_numbers<[1], [0], [0], [1], [0, 0, 1, 1], [], []>, precision = #tpu.contract_precision<fp32>} : vector<12x16xf32>, vector<16x16xf32>, vector<12x16xf32> -> vector<12x16xf32>
    %7 = vector.extract_strided_slice %6 {offsets = [0, 0], sizes = [12, 4], strides = [1, 1]} : vector<12x16xf32> to vector<12x4xf32>
    %8 = vector.extract_strided_slice %1 {offsets = [0, 0, 0], sizes = [1, 96, 12], strides = [1, 1, 1]} : vector<4x96x12xf32> to vector<1x96x12xf32>
    %9 = vector.shape_cast %8 : vector<1x96x12xf32> to vector<96x12xf32>
    %cst_11 = arith.constant dense<0.000000e+00> : vector<96x4xf32>
    %10 = tpu.matmul %9, %7, %cst_11 {dimension_numbers = #tpu.dot_dimension_numbers<[1], [0], [0], [1], [0, 0, 1, 1], [], []>, precision = #tpu.contract_precision<fp32>} : vector<96x12xf32>, vector<12x4xf32>, vector<96x4xf32> -> vector<96x4xf32>
    %11 = vector.extract_strided_slice %6 {offsets = [0, 4], sizes = [12, 4], strides = [1, 1]} : vector<12x16xf32> to vector<12x4xf32>
    %12 = vector.extract_strided_slice %1 {offsets = [1, 0, 0], sizes = [1, 96, 12], strides = [1, 1, 1]} : vector<4x96x12xf32> to vector<1x96x12xf32>
    %13 = vector.shape_cast %12 : vector<1x96x12xf32> to vector<96x12xf32>
    %cst_12 = arith.constant dense<0.000000e+00> : vector<96x4xf32>
    %14 = tpu.matmul %13, %11, %cst_12 {dimension_numbers = #tpu.dot_dimension_numbers<[1], [0], [0], [1], [0, 0, 1, 1], [], []>, precision = #tpu.contract_precision<fp32>} : vector<96x12xf32>, vector<12x4xf32>, vector<96x4xf32> -> vector<96x4xf32>
    %15 = arith.addf %10, %14 : vector<96x4xf32>
    %16 = vector.extract_strided_slice %6 {offsets = [0, 8], sizes = [12, 4], strides = [1, 1]} : vector<12x16xf32> to vector<12x4xf32>
    %17 = vector.extract_strided_slice %1 {offsets = [2, 0, 0], sizes = [1, 96, 12], strides = [1, 1, 1]} : vector<4x96x12xf32> to vector<1x96x12xf32>
    %18 = vector.shape_cast %17 : vector<1x96x12xf32> to vector<96x12xf32>
    %cst_13 = arith.constant dense<0.000000e+00> : vector<96x4xf32>
    %19 = tpu.matmul %18, %16, %cst_13 {dimension_numbers = #tpu.dot_dimension_numbers<[1], [0], [0], [1], [0, 0, 1, 1], [], []>, precision = #tpu.contract_precision<fp32>} : vector<96x12xf32>, vector<12x4xf32>, vector<96x4xf32> -> vector<96x4xf32>
    %20 = arith.addf %15, %19 : vector<96x4xf32>
    %21 = vector.extract_strided_slice %6 {offsets = [0, 12], sizes = [12, 4], strides = [1, 1]} : vector<12x16xf32> to vector<12x4xf32>
    %22 = vector.extract_strided_slice %1 {offsets = [3, 0, 0], sizes = [1, 96, 12], strides = [1, 1, 1]} : vector<4x96x12xf32> to vector<1x96x12xf32>
    %23 = vector.shape_cast %22 : vector<1x96x12xf32> to vector<96x12xf32>
    %cst_14 = arith.constant dense<0.000000e+00> : vector<96x4xf32>
    %24 = tpu.matmul %23, %21, %cst_14 {dimension_numbers = #tpu.dot_dimension_numbers<[1], [0], [0], [1], [0, 0, 1, 1], [], []>, precision = #tpu.contract_precision<fp32>} : vector<96x12xf32>, vector<12x4xf32>, vector<96x4xf32> -> vector<96x4xf32>
    %25 = arith.addf %20, %24 : vector<96x4xf32>
    %26 = vector.broadcast %2 : vector<96x1xf32> to vector<96x4xf32>
    %27 = arith.addf %25, %26 : vector<96x4xf32>
    %c0_15 = arith.constant 0 : index
    %c0_16 = arith.constant 0 : index
    %c0_17 = arith.constant 0 : index
    %c0_18 = arith.constant 0 : index
    %c0_19 = arith.constant 0 : index
    %28 = vector.load %arg6[%c0_15, %c0_16, %c0_17, %c0_18, %c0_19] : memref<1x96x1x4x4xf32, #tpu.memory_space<vmem>>, vector<1x96x1x1x4xf32>
    %29 = vector.shape_cast %28 : vector<1x96x1x1x4xf32> to vector<96x4xf32>
    %30 = vector.shape_cast %27 : vector<96x4xf32> to vector<1x96x1x1x4xf32>
    tpu.vector_store %arg6[%c0_15, %c0_16, %c0_17, %c0_18, %c0_19], %30 {strides = array<i32>} : memref<1x96x1x4x4xf32, #tpu.memory_space<vmem>>, vector<1x96x1x1x4xf32>,
    %c0_20 = arith.constant 0 : index
    %c0_21 = arith.constant 0 : index
    %c1 = arith.constant 1 : index
    %c0_22 = arith.constant 0 : index
    %c0_23 = arith.constant 0 : index
    %31 = vector.load %arg2[%c0_20, %c0_21, %c1, %c0_22, %c0_23] : memref<1x3x4x4x16xf32, #tpu.memory_space<vmem>>, vector<1x3x1x4x16xf32>
    %32 = vector.shape_cast %31 : vector<1x3x1x4x16xf32> to vector<3x4x16xf32>
    %33 = vector.shape_cast %32 : vector<3x4x16xf32> to vector<12x16xf32>
    %cst_24 = arith.constant dense<0.000000e+00> : vector<12x16xf32>
    %34 = tpu.matmul %33, %0, %cst_24 {dimension_numbers = #tpu.dot_dimension_numbers<[1], [0], [0], [1], [0, 0, 1, 1], [], []>, precision = #tpu.contract_precision<fp32>} : vector<12x16xf32>, vector<16x16xf32>, vector<12x16xf32> -> vector<12x16xf32>
    %35 = vector.extract_strided_slice %34 {offsets = [0, 0], sizes = [12, 4], strides = [1, 1]} : vector<12x16xf32> to vector<12x4xf32>
    %36 = vector.extract_strided_slice %1 {offsets = [0, 0, 0], sizes = [1, 96, 12], strides = [1, 1, 1]} : vector<4x96x12xf32> to vector<1x96x12xf32>
    %37 = vector.shape_cast %36 : vector<1x96x12xf32> to vector<96x12xf32>
    %cst_25 = arith.constant dense<0.000000e+00> : vector<96x4xf32>
    %38 = tpu.matmul %37, %35, %cst_25 {dimension_numbers = #tpu.dot_dimension_numbers<[1], [0], [0], [1], [0, 0, 1, 1], [], []>, precision = #tpu.contract_precision<fp32>} : vector<96x12xf32>, vector<12x4xf32>, vector<96x4xf32> -> vector<96x4xf32>
    %39 = vector.extract_strided_slice %34 {offsets = [0, 4], sizes = [12, 4], strides = [1, 1]} : vector<12x16xf32> to vector<12x4xf32>
    %40 = vector.extract_strided_slice %1 {offsets = [1, 0, 0], sizes = [1, 96, 12], strides = [1, 1, 1]} : vector<4x96x12xf32> to vector<1x96x12xf32>
    %41 = vector.shape_cast %40 : vector<1x96x12xf32> to vector<96x12xf32>
    %cst_26 = arith.constant dense<0.000000e+00> : vector<96x4xf32>
    %42 = tpu.matmul %41, %39, %cst_26 {dimension_numbers = #tpu.dot_dimension_numbers<[1], [0], [0], [1], [0, 0, 1, 1], [], []>, precision = #tpu.contract_precision<fp32>} : vector<96x12xf32>, vector<12x4xf32>, vector<96x4xf32> -> vector<96x4xf32>
    %43 = arith.addf %38, %42 : vector<96x4xf32>
    %44 = vector.extract_strided_slice %34 {offsets = [0, 8], sizes = [12, 4], strides = [1, 1]} : vector<12x16xf32> to vector<12x4xf32>
    %45 = vector.extract_strided_slice %1 {offsets = [2, 0, 0], sizes = [1, 96, 12], strides = [1, 1, 1]} : vector<4x96x12xf32> to vector<1x96x12xf32>
    %46 = vector.shape_cast %45 : vector<1x96x12xf32> to vector<96x12xf32>
    %cst_27 = arith.constant dense<0.000000e+00> : vector<96x4xf32>
    %47 = tpu.matmul %46, %44, %cst_27 {dimension_numbers = #tpu.dot_dimension_numbers<[1], [0], [0], [1], [0, 0, 1, 1], [], []>, precision = #tpu.contract_precision<fp32>} : vector<96x12xf32>, vector<12x4xf32>, vector<96x4xf32> -> vector<96x4xf32>
    %48 = arith.addf %43, %47 : vector<96x4xf32>
    %49 = vector.extract_strided_slice %34 {offsets = [0, 12], sizes = [12, 4], strides = [1, 1]} : vector<12x16xf32> to vector<12x4xf32>
    %50 = vector.extract_strided_slice %1 {offsets = [3, 0, 0], sizes = [1, 96, 12], strides = [1, 1, 1]} : vector<4x96x12xf32> to vector<1x96x12xf32>
    %51 = vector.shape_cast %50 : vector<1x96x12xf32> to vector<96x12xf32>
    %cst_28 = arith.constant dense<0.000000e+00> : vector<96x4xf32>
    %52 = tpu.matmul %51, %49, %cst_28 {dimension_numbers = #tpu.dot_dimension_numbers<[1], [0], [0], [1], [0, 0, 1, 1], [], []>, precision = #tpu.contract_precision<fp32>} : vector<96x12xf32>, vector<12x4xf32>, vector<96x4xf32> -> vector<96x4xf32>
    %53 = arith.addf %48, %52 : vector<96x4xf32>
    %54 = vector.broadcast %2 : vector<96x1xf32> to vector<96x4xf32>
    %55 = arith.addf %53, %54 : vector<96x4xf32>
    %c0_29 = arith.constant 0 : index
    %c0_30 = arith.constant 0 : index
    %c0_31 = arith.constant 0 : index
    %c1_32 = arith.constant 1 : index
    %c0_33 = arith.constant 0 : index
    %56 = vector.load %arg6[%c0_29, %c0_30, %c0_31, %c1_32, %c0_33] : memref<1x96x1x4x4xf32, #tpu.memory_space<vmem>>, vector<1x96x1x1x4xf32>
    %57 = vector.shape_cast %56 : vector<1x96x1x1x4xf32> to vector<96x4xf32>
    %58 = vector.shape_cast %55 : vector<96x4xf32> to vector<1x96x1x1x4xf32>
    tpu.vector_store %arg6[%c0_29, %c0_30, %c0_31, %c1_32, %c0_33], %58 {strides = array<i32>} : memref<1x96x1x4x4xf32, #tpu.memory_space<vmem>>, vector<1x96x1x1x4xf32>,
    %c0_34 = arith.constant 0 : index
    %c0_35 = arith.constant 0 : index
    %c2 = arith.constant 2 : index
    %c0_36 = arith.constant 0 : index
    %c0_37 = arith.constant 0 : index
    %59 = vector.load %arg2[%c0_34, %c0_35, %c2, %c0_36, %c0_37] : memref<1x3x4x4x16xf32, #tpu.memory_space<vmem>>, vector<1x3x1x4x16xf32>
    %60 = vector.shape_cast %59 : vector<1x3x1x4x16xf32> to vector<3x4x16xf32>
    %61 = vector.shape_cast %60 : vector<3x4x16xf32> to vector<12x16xf32>
    %cst_38 = arith.constant dense<0.000000e+00> : vector<12x16xf32>
    %62 = tpu.matmul %61, %0, %cst_38 {dimension_numbers = #tpu.dot_dimension_numbers<[1], [0], [0], [1], [0, 0, 1, 1], [], []>, precision = #tpu.contract_precision<fp32>} : vector<12x16xf32>, vector<16x16xf32>, vector<12x16xf32> -> vector<12x16xf32>
    %63 = vector.extract_strided_slice %62 {offsets = [0, 0], sizes = [12, 4], strides = [1, 1]} : vector<12x16xf32> to vector<12x4xf32>
    %64 = vector.extract_strided_slice %1 {offsets = [0, 0, 0], sizes = [1, 96, 12], strides = [1, 1, 1]} : vector<4x96x12xf32> to vector<1x96x12xf32>
    %65 = vector.shape_cast %64 : vector<1x96x12xf32> to vector<96x12xf32>
    %cst_39 = arith.constant dense<0.000000e+00> : vector<96x4xf32>
    %66 = tpu.matmul %65, %63, %cst_39 {dimension_numbers = #tpu.dot_dimension_numbers<[1], [0], [0], [1], [0, 0, 1, 1], [], []>, precision = #tpu.contract_precision<fp32>} : vector<96x12xf32>, vector<12x4xf32>, vector<96x4xf32> -> vector<96x4xf32>
    %67 = vector.extract_strided_slice %62 {offsets = [0, 4], sizes = [12, 4], strides = [1, 1]} : vector<12x16xf32> to vector<12x4xf32>
    %68 = vector.extract_strided_slice %1 {offsets = [1, 0, 0], sizes = [1, 96, 12], strides = [1, 1, 1]} : vector<4x96x12xf32> to vector<1x96x12xf32>
    %69 = vector.shape_cast %68 : vector<1x96x12xf32> to vector<96x12xf32>
    %cst_40 = arith.constant dense<0.000000e+00> : vector<96x4xf32>
    %70 = tpu.matmul %69, %67, %cst_40 {dimension_numbers = #tpu.dot_dimension_numbers<[1], [0], [0], [1], [0, 0, 1, 1], [], []>, precision = #tpu.contract_precision<fp32>} : vector<96x12xf32>, vector<12x4xf32>, vector<96x4xf32> -> vector<96x4xf32>
    %71 = arith.addf %66, %70 : vector<96x4xf32>
    %72 = vector.extract_strided_slice %62 {offsets = [0, 8], sizes = [12, 4], strides = [1, 1]} : vector<12x16xf32> to vector<12x4xf32>
    %73 = vector.extract_strided_slice %1 {offsets = [2, 0, 0], sizes = [1, 96, 12], strides = [1, 1, 1]} : vector<4x96x12xf32> to vector<1x96x12xf32>
    %74 = vector.shape_cast %73 : vector<1x96x12xf32> to vector<96x12xf32>
    %cst_41 = arith.constant dense<0.000000e+00> : vector<96x4xf32>
    %75 = tpu.matmul %74, %72, %cst_41 {dimension_numbers = #tpu.dot_dimension_numbers<[1], [0], [0], [1], [0, 0, 1, 1], [], []>, precision = #tpu.contract_precision<fp32>} : vector<96x12xf32>, vector<12x4xf32>, vector<96x4xf32> -> vector<96x4xf32>
    %76 = arith.addf %71, %75 : vector<96x4xf32>
    %77 = vector.extract_strided_slice %62 {offsets = [0, 12], sizes = [12, 4], strides = [1, 1]} : vector<12x16xf32> to vector<12x4xf32>
    %78 = vector.extract_strided_slice %1 {offsets = [3, 0, 0], sizes = [1, 96, 12], strides = [1, 1, 1]} : vector<4x96x12xf32> to vector<1x96x12xf32>
    %79 = vector.shape_cast %78 : vector<1x96x12xf32> to vector<96x12xf32>
    %cst_42 = arith.constant dense<0.000000e+00> : vector<96x4xf32>
    %80 = tpu.matmul %79, %77, %cst_42 {dimension_numbers = #tpu.dot_dimension_numbers<[1], [0], [0], [1], [0, 0, 1, 1], [], []>, precision = #tpu.contract_precision<fp32>} : vector<96x12xf32>, vector<12x4xf32>, vector<96x4xf32> -> vector<96x4xf32>
    %81 = arith.addf %76, %80 : vector<96x4xf32>
    %82 = vector.broadcast %2 : vector<96x1xf32> to vector<96x4xf32>
    %83 = arith.addf %81, %82 : vector<96x4xf32>
    %c0_43 = arith.constant 0 : index
    %c0_44 = arith.constant 0 : index
    %c0_45 = arith.constant 0 : index
    %c2_46 = arith.constant 2 : index
    %c0_47 = arith.constant 0 : index
    %84 = vector.load %arg6[%c0_43, %c0_44, %c0_45, %c2_46, %c0_47] : memref<1x96x1x4x4xf32, #tpu.memory_space<vmem>>, vector<1x96x1x1x4xf32>
    %85 = vector.shape_cast %84 : vector<1x96x1x1x4xf32> to vector<96x4xf32>
    %86 = vector.shape_cast %83 : vector<96x4xf32> to vector<1x96x1x1x4xf32>
    tpu.vector_store %arg6[%c0_43, %c0_44, %c0_45, %c2_46, %c0_47], %86 {strides = array<i32>} : memref<1x96x1x4x4xf32, #tpu.memory_space<vmem>>, vector<1x96x1x1x4xf32>,
    %c0_48 = arith.constant 0 : index
    %c0_49 = arith.constant 0 : index
    %c3 = arith.constant 3 : index
    %c0_50 = arith.constant 0 : index
    %c0_51 = arith.constant 0 : index
    %87 = vector.load %arg2[%c0_48, %c0_49, %c3, %c0_50, %c0_51] : memref<1x3x4x4x16xf32, #tpu.memory_space<vmem>>, vector<1x3x1x4x16xf32>
    %88 = vector.shape_cast %87 : vector<1x3x1x4x16xf32> to vector<3x4x16xf32>
    %89 = vector.shape_cast %88 : vector<3x4x16xf32> to vector<12x16xf32>
    %cst_52 = arith.constant dense<0.000000e+00> : vector<12x16xf32>
    %90 = tpu.matmul %89, %0, %cst_52 {dimension_numbers = #tpu.dot_dimension_numbers<[1], [0], [0], [1], [0, 0, 1, 1], [], []>, precision = #tpu.contract_precision<fp32>} : vector<12x16xf32>, vector<16x16xf32>, vector<12x16xf32> -> vector<12x16xf32>
    %91 = vector.extract_strided_slice %90 {offsets = [0, 0], sizes = [12, 4], strides = [1, 1]} : vector<12x16xf32> to vector<12x4xf32>
    %92 = vector.extract_strided_slice %1 {offsets = [0, 0, 0], sizes = [1, 96, 12], strides = [1, 1, 1]} : vector<4x96x12xf32> to vector<1x96x12xf32>
    %93 = vector.shape_cast %92 : vector<1x96x12xf32> to vector<96x12xf32>
    %cst_53 = arith.constant dense<0.000000e+00> : vector<96x4xf32>
    %94 = tpu.matmul %93, %91, %cst_53 {dimension_numbers = #tpu.dot_dimension_numbers<[1], [0], [0], [1], [0, 0, 1, 1], [], []>, precision = #tpu.contract_precision<fp32>} : vector<96x12xf32>, vector<12x4xf32>, vector<96x4xf32> -> vector<96x4xf32>
    %95 = vector.extract_strided_slice %90 {offsets = [0, 4], sizes = [12, 4], strides = [1, 1]} : vector<12x16xf32> to vector<12x4xf32>
    %96 = vector.extract_strided_slice %1 {offsets = [1, 0, 0], sizes = [1, 96, 12], strides = [1, 1, 1]} : vector<4x96x12xf32> to vector<1x96x12xf32>
    %97 = vector.shape_cast %96 : vector<1x96x12xf32> to vector<96x12xf32>
    %cst_54 = arith.constant dense<0.000000e+00> : vector<96x4xf32>
    %98 = tpu.matmul %97, %95, %cst_54 {dimension_numbers = #tpu.dot_dimension_numbers<[1], [0], [0], [1], [0, 0, 1, 1], [], []>, precision = #tpu.contract_precision<fp32>} : vector<96x12xf32>, vector<12x4xf32>, vector<96x4xf32> -> vector<96x4xf32>
    %99 = arith.addf %94, %98 : vector<96x4xf32>
    %100 = vector.extract_strided_slice %90 {offsets = [0, 8], sizes = [12, 4], strides = [1, 1]} : vector<12x16xf32> to vector<12x4xf32>
    %101 = vector.extract_strided_slice %1 {offsets = [2, 0, 0], sizes = [1, 96, 12], strides = [1, 1, 1]} : vector<4x96x12xf32> to vector<1x96x12xf32>
    %102 = vector.shape_cast %101 : vector<1x96x12xf32> to vector<96x12xf32>
    %cst_55 = arith.constant dense<0.000000e+00> : vector<96x4xf32>
    %103 = tpu.matmul %102, %100, %cst_55 {dimension_numbers = #tpu.dot_dimension_numbers<[1], [0], [0], [1], [0, 0, 1, 1], [], []>, precision = #tpu.contract_precision<fp32>} : vector<96x12xf32>, vector<12x4xf32>, vector<96x4xf32> -> vector<96x4xf32>
    %104 = arith.addf %99, %103 : vector<96x4xf32>
    %105 = vector.extract_strided_slice %90 {offsets = [0, 12], sizes = [12, 4], strides = [1, 1]} : vector<12x16xf32> to vector<12x4xf32>
    %106 = vector.extract_strided_slice %1 {offsets = [3, 0, 0], sizes = [1, 96, 12], strides = [1, 1, 1]} : vector<4x96x12xf32> to vector<1x96x12xf32>
    %107 = vector.shape_cast %106 : vector<1x96x12xf32> to vector<96x12xf32>
    %cst_56 = arith.constant dense<0.000000e+00> : vector<96x4xf32>
    %108 = tpu.matmul %107, %105, %cst_56 {dimension_numbers = #tpu.dot_dimension_numbers<[1], [0], [0], [1], [0, 0, 1, 1], [], []>, precision = #tpu.contract_precision<fp32>} : vector<96x12xf32>, vector<12x4xf32>, vector<96x4xf32> -> vector<96x4xf32>
    %109 = arith.addf %104, %108 : vector<96x4xf32>
    %110 = vector.broadcast %2 : vector<96x1xf32> to vector<96x4xf32>
    %111 = arith.addf %109, %110 : vector<96x4xf32>
    %c0_57 = arith.constant 0 : index
    %c0_58 = arith.constant 0 : index
    %c0_59 = arith.constant 0 : index
    %c3_60 = arith.constant 3 : index
    %c0_61 = arith.constant 0 : index
    %112 = vector.load %arg6[%c0_57, %c0_58, %c0_59, %c3_60, %c0_61] : memref<1x96x1x4x4xf32, #tpu.memory_space<vmem>>, vector<1x96x1x1x4xf32>
    %113 = vector.shape_cast %112 : vector<1x96x1x1x4xf32> to vector<96x4xf32>
    %114 = vector.shape_cast %111 : vector<96x4xf32> to vector<1x96x1x1x4xf32>
    tpu.vector_store %arg6[%c0_57, %c0_58, %c0_59, %c3_60, %c0_61], %114 {strides = array<i32>} : memref<1x96x1x4x4xf32, #tpu.memory_space<vmem>>, vector<1x96x1x1x4xf32>,
    return
  }
  func.func @transform_0(%arg0: i32, %arg1: i32) -> (i32, i32, i32, i32, i32) {
    %c0_i32 = arith.constant 0 : i32
    %c0_i32_0 = arith.constant 0 : i32
    %c0_i32_1 = arith.constant 0 : i32
    %c0_i32_2 = arith.constant 0 : i32
    return %arg0, %c0_i32, %arg1, %c0_i32_0, %c0_i32_1 : i32, i32, i32, i32, i32
  }
  func.func @transform_1(%arg0: i32, %arg1: i32) -> (i32, i32) {
    %c0_i32 = arith.constant 0 : i32
    %c0_i32_0 = arith.constant 0 : i32
    %c0_i32_1 = arith.constant 0 : i32
    return %c0_i32, %c0_i32_0 : i32, i32
  }
  func.func @transform_2(%arg0: i32, %arg1: i32) -> (i32, i32, i32) {
    %c0_i32 = arith.constant 0 : i32
    %c0_i32_0 = arith.constant 0 : i32
    %c0_i32_1 = arith.constant 0 : i32
    %c0_i32_2 = arith.constant 0 : i32
    return %c0_i32, %c0_i32_0, %c0_i32_1 : i32, i32, i32
  }
  func.func @transform_3(%arg0: i32, %arg1: i32) -> (i32, i32) {
    %c0_i32 = arith.constant 0 : i32
    %c0_i32_0 = arith.constant 0 : i32
    %c0_i32_1 = arith.constant 0 : i32
    return %c0_i32, %c0_i32_0 : i32, i32
  }
  func.func @transform_4(%arg0: i32, %arg1: i32) -> (i32, i32, i32, i32, i32) {
    %c0_i32 = arith.constant 0 : i32
    %c0_i32_0 = arith.constant 0 : i32
    %c0_i32_1 = arith.constant 0 : i32
    %c0_i32_2 = arith.constant 0 : i32
    return %arg0, %c0_i32, %arg1, %c0_i32_0, %c0_i32_1 : i32, i32, i32, i32, i32
  }
}

</mosaic_0001>

<bundles_post_ra>
// kernel: patch_embed_forward.1
= control target key start
LH: loop header
LB: loop body
LE: loop exit
PB: predicated region body
PF: predicated region fallthrough
CT: control target
= control target key end

     0   :  { %s10870_s15 = smov 0   ;;  %s10872_s16 = smov 0   ;;  %s15567_s0 = inlined_call_operand.vmem [shape: f32[2,3,4,4,16], index: 0, kind: input, shape index: {}]   ;;  %s15568_s1 = inlined_call_operand.vmem [shape: f32[16,16], index: 1, kind: input, shape index: {}]   ;;  %s15569_s2 = inlined_call_operand.vmem [shape: f32[4,96,12], index: 2, kind: input, shape index: {}]   ;;  %s15570_s3 = inlined_call_operand.vmem [shape: f32[96,1], index: 3, kind: input, shape index: {}]   ;;  %s15571_s4 = inlined_call_operand.vmem [shape: f32[2,96,1,4,4], index: 4, kind: output, shape index: {}]  }
   0x1   :  { %s10874_s17 = smov 0  }
   0x2 LB: > { %s26_s18 = sadd.s32 1, %s10835_s16  ;;  %p10770_p0 = scmp.ge.s32.totalorder %s10839_s17, 1  ;;  %s10839_s17 = sphi %s10874_s17, %s14_s17   ;;  %s10835_s16 = sphi %s10872_s16, %s17215_s16   ;;  %s10831_s15 = sphi %s10870_s15, %s17214_s15  }
   0x3   : > { %p28_p1 = scmp.ge.s32.totalorder %s26_s18, 2  ;;  %p183_p2 = scmp.lt.s32.totalorder %s10839_s17, 3 }
   0x5   : > { %s17217_s18 = smov (%p28_p1, %s26_s18), 0  ;;  %p184_p3 = pnand %p10770_p0, %p183_p2 }
   0x7   : > { %187 = sbr.rel (%p184_p3) target bundleno = 3738 (0xe9a), region = 36 }
   0xc   : > { %v235_v0 = vld [vmem:[%s15568_s1 + $0x8] sm:$0xff]  ;;  %v234_v1 = vld [vmem:[%s15568_s1] sm:$0xff]  ;;  %p217_p4 = scmp.lt.s32.totalorder %s10831_s15, 1  ;;  %vm309_vm0 = vcmask 130048   ;;  %s10841_s27 = smov 116   ;;  %vm511_vm1 = vcmask 97280  }
   0xd   : > { %v10894_v2 = vand.u32 4294901760, %v235_v0  ;;  %v10896_v3 = vand.u32 4294901760, %v234_v1  ;;  %s10842_s28 = smov 120   ;;  %s10843_s29 = smov 124   ;;  %v248_v54 = vld [vmem:[%s15569_s2 + $0x60] sm:$0xff]  ;;  %vm548_vm2 = vcmask 1043456  }
   0xe   : > { %s17219_s15 = smov (!%p217_p4, %s10831_s15), 1  ;;  %v513_v55 = vsel %vm511_vm1, %v248_v54, 0  ;;  %v249_v58 = vld [vmem:[%s15569_s2 + $0x68] sm:$0xff]  ;;  %vm2951_vm3 = vcmask 24576  }
   0xf   : > { %16044 = vst [vmem:[#allocation2_spill] sm:$0xff] %v10894_v2  ;;  %v10901_v4 = vsub.f32 %v235_v0, %v10894_v2  ;;  %v10904_v5 = vsub.f32 %v234_v1, %v10896_v3  ;;  %430 = vmatpush.msra.mxu3 %v10894_v2  ;;  %329 = vmatpush.msra.mxu0 %v10894_v2  ;;  %s10784_s23 = smul.u32 48, %s17219_s15  ;;  %v10956_v56 = vand.u32 4294901760, %v513_v55  ;;  %v516_v62 = vsel %vm511_vm1, %v249_v58, 0 }
  0x10   : > { %16045 = vst [vmem:[#allocation3_spill] sm:$0xff] %v10896_v3  ;;  %s10785_s11 = smul.u32 384, %s17219_s15 }
  0x11   : > { %16046 = vst [vmem:[#allocation4_spill] sm:$0xff] %v10901_v4  ;;  %400 = vmatpush.msra.mxu2 %v10901_v4  ;;  %v10911_v6 = vand.u32 4294901760, %v10901_v4  ;;  %432 = vmatpush.msra.mxu3 %v10896_v3  ;;  %v10915_v7 = vand.u32 4294901760, %v10904_v5  ;;  %s10920_s26 = scalar_lea.vmem %s15567_s0, %s10784_s23  ;;  %v10965_v60 = vsub.f32 %v513_v55, %v10956_v56 }
  0x12   : > { %16047 = vst [vmem:[#allocation5_spill] sm:$0xff] %v10904_v5  ;;  %331 = vmatpush.msra.mxu0 %v10896_v3  ;;  %v296_v8 = vld [vmem:[%s10920_s26] sm:$0xf]  ;;  %v297_v9 = vld [vmem:[%s10920_s26 + $0x10] sm:$0xf]  ;;  %s13866_s14 = scalar_lea.vmem %s15571_s4, %s10785_s11 }
  0x13   : > { %16048 = vst [vmem:[#allocation6_spill] sm:$0xff] %v10911_v6  ;;  %403 = vmatpush.msra.mxu2 %v10904_v5  ;;  %v366_v10 = vsub.f32 %v10901_v4, %v10911_v6  ;;  %v372_v11 = vsub.f32 %v10904_v5, %v10915_v7  ;;  %v298_v12 = vld [vmem:[%s10920_s26 + $0x20] sm:$0xf]  ;;  %v10773_v15 = vld [vmem:[%s10920_s26 + $0x4] sm:$0xf]  ;;  %v10972_v1 = vand.u32 4294901760, %v10965_v60 }
  0x14   : > { %16049 = vst [vmem:[#allocation7_spill] sm:$0xff] %v10915_v7  ;;  %463 = vmatpush.msrb.mxu0 %v10911_v6  ;;  %v10774_v16 = vld [vmem:[%s10920_s26 + $0x14] sm:$0xf]  ;;  %v10775_v18 = vld [vmem:[%s10920_s26 + $0x24] sm:$0xf] }
  0x15   : > { %302 = vst [vmem:[#allocation1] ss:$2 sm:$0xff] %v296_v8  ;;  %v10932_v13 = vand.u32 4294901760, %v366_v10  ;;  %v10934_v14 = vand.u32 4294901760, %v372_v11 }
  0x16   : > { %304 = vst [vmem:[#allocation1 + $0x1] ss:$2 sm:$0xff] %v297_v9  ;;  %467 = vmatpush.msrb.mxu0 %v10915_v7  ;;  %v10975_v9 = vand.u32 4294901760, %v516_v62 }
  0x17   : > { %16050 = vst [vmem:[#allocation8_spill] sm:$0xff] %v10932_v13  ;;  %368 = vmatpush.msra.mxu1 %v10932_v13 }
  0x18   : > { %16051 = vst [vmem:[#allocation9_spill] sm:$0xff] %v10934_v14 }
  0x19   : > { %306 = vst [vmem:[#allocation1 + $0x10] ss:$2 sm:$0xff] %v298_v12  ;;  %374 = vmatpush.msra.mxu1 %v10934_v14  ;;  %v250_v12 = vld [vmem:[%s15569_s2 + $0x70] sm:$0xff] }
  0x1a   : > { %16052 = vst [vmem:[#allocation10_spill] sm:$0xff] %v10956_v56 }
  0x1b   : > { %492 = vmatpush.msrb.mxu1 %v10894_v2  ;;  %16053 = vst [vmem:[#allocation11_spill] sm:$0xff] %v10965_v60 }
  0x1c   : > { %16054 = vst [vmem:[#allocation12_spill] sm:$0xff] %v10972_v1 }
  0x1d   : > { %v307_v17 = vld.sshfl [vmem:[#allocation1] sm:$0xff pattern:$0x75316420]  ;;  %494 = vmatpush.msrb.mxu1 %v10896_v3  ;;  %16055 = vst [vmem:[#allocation13_spill] sm:$0xff] %v10975_v9 }
  0x1e   : > { %v310_v19 = vsel %vm309_vm0, %v307_v17, 0  ;;  %3055 = vst [vmem:[#allocation1] ss:$2 sm:$0xff] %v10773_v15 }
  0x1f   : > { %v332_v21 = vand.u32 4294901760, %v310_v19  ;;  %3057 = vst [vmem:[#allocation1 + $0x1] ss:$2 sm:$0xff] %v10774_v16  ;;  %v572_v16 = vsub.f32 %v10965_v60, %v10972_v1 }
  0x20   : > { %v308_v20 = vld.sshfl [vmem:[#allocation1 + $0x10] sm:$0xff pattern:$0x75316420] }
  0x21   : > { %v312_v22 = vsel %vm309_vm0, %v308_v20, 0  ;;  %3059 = vst [vmem:[#allocation1 + $0x10] ss:$2 sm:$0xff] %v10775_v18  ;;  %v333_v24 = vsub.f32 %v310_v19, %v332_v21  ;;  %376 = vmatmul.f32.vlgmr.msra.gmra.mxu1 %v332_v21  ;;  %v10984_v18 = vsub.f32 %v516_v62, %v10975_v9 }
  0x22   : > { %v340_v23 = vand.u32 4294901760, %v312_v22 }
  0x23   : > { %406 = vmatmul.f32.vlgmr.msra.gmra.mxu2 %v333_v24  ;;  %v334_v26 = vand.u32 4294901760, %v333_v24  ;;  %16056 = vst [vmem:[#allocation14_spill] sm:$0xff] %v10984_v18 }
  0x24   : > { %v341_v25 = vsub.f32 %v312_v22, %v340_v23 }
  0x25   : > { %436 = vmatmul.f32.vlgmr.msra.gmra.mxu3 %v334_v26  ;;  %v335_v27 = vsub.f32 %v333_v24, %v334_v26 }
  0x26   : > { %v342_v28 = vand.u32 4294901760, %v341_v25 }
  0x27   : > { %v336_v29 = vand.u32 4294901760, %v335_v27  ;;  %v10990_v27 = vand.u32 4294901760, %v10984_v18 }
  0x28   : > { %v343_v30 = vsub.f32 %v341_v25, %v342_v28 }
  0x29   : > { %337 = vmatmul.f32.vlgmr.msra.gmra.mxu0 %v336_v29  ;;  %380 = vmatmul.f32.gmra.mxu1 %v340_v23  ;;  %16058 = vst [vmem:[#allocation16_spill] sm:$0xff] %v10990_v27 }
  0x2a   : > { %v344_v31 = vand.u32 4294901760, %v343_v30 }
  0x2b   : > { %411 = vmatmul.f32.gmra.mxu2 %v341_v25 }
  0x2d   : > { %442 = vmatmul.f32.gmra.mxu3 %v342_v28 }
  0x31   : > { %345 = vmatmul.f32.gmra.mxu0 %v344_v31  ;;  %496 = vmatmul.f32.vlgmr.msrb.gmra.mxu1 %v332_v21 }
  0x39   : > { %469 = vmatmul.f32.vlgmr.msrb.gmra.mxu0 %v332_v21  ;;  %500 = vmatmul.f32.gmra.mxu1 %v340_v23  ;;  %v519_v21 = vsel %vm511_vm1, %v250_v12, 0 }
  0x3a   : > { %v10992_v28 = vand.u32 4294901760, %v519_v21 }
  0x3c   : > { %16059 = vst [vmem:[#allocation17_spill] sm:$0xff] %v10992_v28 }
  0x41   : > { %473 = vmatmul.f32.gmra.mxu0 %v340_v23  ;;  %v10987_v23 = vand.u32 4294901760, %v572_v16 }
  0x43   : > { %16057 = vst [vmem:[#allocation15_spill] sm:$0xff] %v10987_v23 }
  0x9e   : > { %v377_v32 = vpop.f32.mrf.mxu1 }
  0xa6   : > { %v338_v33 = vpop.f32.mrf.mxu0  ;;  %v407_v34 = vpop.f32.mrf.mxu2 }
  0xa7   : > { %v381_v35 = vpop.f32.mrf.mxu1  ;;  %v378_v44 = vadd.f32 %v377_v32, %v338_v33  ;;  %v251_v32 = vld [vmem:[%s15569_s2 + $0x78] sm:$0xff] }
  0xa8   : > { %v437_v37 = vpop.f32.mrf.mxu3 }
  0xa9   : > { %v408_v48 = vadd.f32 %v407_v34, %v378_v44  ;;  %v252_v44 = vld [vmem:[%s15569_s2 + $0x80] sm:$0xff] }
  0xab   : > { %v438_v51 = vadd.f32 %v437_v37, %v408_v48 }
  0xae   : > { %v346_v36 = vpop.f32.mrf.mxu0  ;;  %v412_v40 = vpop.f32.mrf.mxu2 }
  0xaf   : > { %v497_v38 = vpop.f32.mrf.mxu1  ;;  %v382_v39 = vadd.f32 %v381_v35, %v346_v36  ;;  %v580_v35 = vsub.f32 %v10984_v18, %v10990_v27  ;;  %v11002_v36 = vsub.f32 %v519_v21, %v10992_v28  ;;  %v256_v21 = vld [vmem:[%s15569_s2 + $0xa0] sm:$0xff] }
  0xb0   : > { %v443_v43 = vpop.f32.mrf.mxu3 }
  0xb1   : > { %v413_v42 = vadd.f32 %v412_v40, %v382_v39  ;;  %16060 = vst [vmem:[#allocation18_spill] sm:$0xff] %v11002_v36 }
  0xb3   : > { %v444_v45 = vadd.f32 %v443_v43, %v413_v42  ;;  %v11011_v42 = vand.u32 4294901760, %v11002_v36 }
  0xb5   : > { %16062 = vst [vmem:[#allocation20_spill] sm:$0xff] %v11011_v42 }
  0xb6   : > { %v470_v41 = vpop.f32.mrf.mxu0 }
  0xb7   : > { %v501_v47 = vpop.f32.mrf.mxu1  ;;  %v471_v52 = vadd.f32 %v470_v41, %v438_v51  ;;  %v11008_v41 = vand.u32 4294901760, %v580_v35  ;;  %v253_v51 = vld [vmem:[%s15569_s2 + $0x88] sm:$0xff] }
  0xb8   : > { %v528_v54 = vsel %vm511_vm1, %v253_v51, 0 }
  0xb9   : > { %v498_v53 = vadd.f32 %v497_v38, %v471_v52  ;;  %v522_v38 = vsel %vm511_vm1, %v251_v32, 0  ;;  %16061 = vst [vmem:[#allocation19_spill] sm:$0xff] %v11008_v41  ;;  %v11057_v58 = vand.u32 4294901760, %v528_v54 }
  0xba   : > { %v11013_v43 = vand.u32 4294901760, %v522_v38 }
  0xbb   : > { %v10967_v61 = vand.u32 4294901760, %v498_v53  ;;  %16071 = vst [vmem:[#allocation29_spill] sm:$0xff] %v11057_v58  ;;  %v11066_v62 = vsub.f32 %v528_v54, %v11057_v58  ;;  %v259_v54 = vld [vmem:[%s15569_s2 + $0xb8] sm:$0xff] }
  0xbc   : > { %16063 = vst [vmem:[#allocation21_spill] sm:$0xff] %v11013_v43 }
  0xbd   : > { %v1225_v11 = vsub.f32 %v498_v53, %v10967_v61  ;;  %16072 = vst [vmem:[#allocation30_spill] sm:$0xff] %v11066_v62 }
  0xbe   : > { %v474_v46 = vpop.f32.mrf.mxu0 }
  0xbf   : > { %v475_v49 = vadd.f32 %v474_v46, %v444_v45  ;;  %v1226_v20 = vand.u32 4294901760, %v1225_v11  ;;  %v588_v45 = vsub.f32 %v11002_v36, %v11011_v42  ;;  %v11024_v46 = vsub.f32 %v522_v38, %v11013_v43 }
  0xc1   : > { %v502_v50 = vadd.f32 %v501_v47, %v475_v49  ;;  %v1227_v30 = vsub.f32 %v1225_v11, %v1226_v20  ;;  %16064 = vst [vmem:[#allocation22_spill] sm:$0xff] %v11024_v46  ;;  %v525_v47 = vsel %vm511_vm1, %v252_v44, 0  ;;  %v11030_v48 = vand.u32 4294901760, %v588_v45 }
  0xc2   : > { %v11033_v49 = vand.u32 4294901760, %v11024_v46 }
  0xc3   : > { %2146 = vrot.lane.b32.xlu2 %v502_v50, %s10841_s27  ;;  %1591 = vrot.lane.b32.xlu1 %v502_v50, %s10842_s28  ;;  %v1087_v57 = vsel %vm548_vm2, %v502_v50, 0  ;;  %v1228_v37 = vand.u32 4294901760, %v1227_v30  ;;  %16065 = vst [vmem:[#allocation23_spill] sm:$0xff] %v11030_v48 }
  0xc4   : > { %508 = vrot.lane.b32.xlu0 %v502_v50, %s10843_s29  ;;  %v10962_v59 = vand.u32 4294901760, %v1087_v57  ;;  %16066 = vst [vmem:[#allocation24_spill] sm:$0xff] %v11033_v49  ;;  %v11035_v50 = vand.u32 4294901760, %v525_v47  ;;  %v596_v52 = vsub.f32 %v11024_v46, %v11033_v49 }
  0xc6   : > { %v1219_v63 = vsub.f32 %v1087_v57, %v10962_v59  ;;  %16067 = vst [vmem:[#allocation25_spill] sm:$0xff] %v11035_v50  ;;  %v11052_v55 = vand.u32 4294901760, %v596_v52 }
  0xc8   : > { %v1220_v17 = vand.u32 4294901760, %v1219_v63  ;;  %16069 = vst [vmem:[#allocation27_spill] sm:$0xff] %v11052_v55 }
  0xca   : > { %v1221_v25 = vsub.f32 %v1219_v63, %v1220_v17 }
  0xcb   : > { %2144 = vrot.lane.b32.xlu2 %v498_v53, %s10841_s27  ;;  %1589 = vrot.lane.b32.xlu1 %v498_v53, %s10842_s28 }
  0xcc   : > { %506 = vrot.lane.b32.xlu0 %v498_v53, %s10843_s29  ;;  %v1222_v33 = vand.u32 4294901760, %v1221_v25  ;;  %v11046_v53 = vsub.f32 %v525_v47, %v11035_v50  ;;  %v537_v25 = vsel %vm511_vm1, %v256_v21, 0 }
  0xcd   : > { %v11117_v30 = vand.u32 4294901760, %v537_v25 }
  0xce   : > { %16068 = vst [vmem:[#allocation26_spill] sm:$0xff] %v11046_v53  ;;  %v11055_v57 = vand.u32 4294901760, %v11046_v53 }
  0xcf   : > { %16083 = vst [vmem:[#allocation41_spill] sm:$0xff] %v11117_v30 }
  0xd0   : > { %16070 = vst [vmem:[#allocation28_spill] sm:$0xff] %v11055_v57 }
 0x136   : > { %v509_v0 = vpop.permute.xlu0 %508 }
 0x137   : > { %v549_v8 = vsel %vm548_vm2, %v509_v0, 0 }
 0x138   : > { %v565_v10 = vand.u32 4294901760, %v549_v8 }
 0x13a   : > { %v681_v15 = vsub.f32 %v549_v8, %v565_v10  ;;  %566 = vmatpush.msrb.mxu2 %v565_v10  ;;  %837 = vmatpush.msra.mxu1 %v565_v10  ;;  %v11075_v8 = vand.u32 4294901760, %v11066_v62 }
 0x13c   : > { %757 = vmatpush.msra.mxu0 %v681_v15  ;;  %v682_v19 = vand.u32 4294901760, %v681_v15  ;;  %16074 = vst [vmem:[#allocation32_spill] sm:$0xff] %v11075_v8  ;;  %v612_v12 = vsub.f32 %v11066_v62, %v11075_v8 }
 0x13e   : > { %v507_v22 = vpop.permute.xlu0 %506  ;;  %v683_v24 = vsub.f32 %v681_v15, %v682_v19 }
 0x13f   : > { %v567_v26 = vand.u32 4294901760, %v507_v22 }
 0x140   : > { %v684_v29 = vand.u32 4294901760, %v683_v24 }
 0x141   : > { %v687_v31 = vsub.f32 %v507_v22, %v567_v26  ;;  %568 = vmatpush.msrb.mxu2 %v567_v26  ;;  %839 = vmatpush.msra.mxu1 %v567_v26 }
 0x142   : > { %574 = vmatmul.f32.vlgmr.msrb.gmra.mxu2 %v10987_v23  ;;  %685 = vmatpush.msrb.mxu3 %v684_v29 }
 0x143   : > { %843 = vmatmul.f32.vlgmr.msra.gmra.mxu1 %v10972_v1  ;;  %930 = vmatpush.msra.mxu2 %v682_v19  ;;  %v688_v34 = vand.u32 4294901760, %v687_v31 }
 0x144   : > { %1223 = vmatpush.msrb.mxu1 %v1222_v33  ;;  %760 = vmatpush.msra.mxu0 %v687_v31  ;;  %v11126_v33 = vsub.f32 %v537_v25, %v11117_v30  ;;  %v236_v25 = vld [vmem:[%s15569_s2] sm:$0xff] }
 0x145   : > { %763 = vmatmul.f32.vlgmr.msra.gmra.mxu0 %v10965_v60  ;;  %934 = vmatpush.msra.mxu2 %v688_v34  ;;  %v689_v39 = vsub.f32 %v687_v31, %v688_v34  ;;  %v257_v31 = vld [vmem:[%s15569_s2 + $0xa8] sm:$0xff] }
 0x146   : > { %1104 = vmatpush.msrb.mxu0 %v10962_v59  ;;  %1229 = vmatpush.msrb.mxu1 %v1228_v37  ;;  %16084 = vst [vmem:[#allocation42_spill] sm:$0xff] %v11126_v33  ;;  %v540_v34 = vsel %vm511_vm1, %v257_v31, 0  ;;  %v11135_v37 = vand.u32 4294901760, %v11126_v33 }
 0x147   : > { %1295 = vmatpush.msrb.mxu2 %v1219_v63  ;;  %v690_v40 = vand.u32 4294901760, %v689_v39  ;;  %v11137_v38 = vand.u32 4294901760, %v540_v34  ;;  %v258_v39 = vld [vmem:[%s15569_s2 + $0xb0] sm:$0xff] }
 0x148   : > { %1537 = vmatpush.msra.mxu1 %v10962_v59  ;;  %1106 = vmatpush.msrb.mxu0 %v10967_v61  ;;  %16086 = vst [vmem:[#allocation44_spill] sm:$0xff] %v11135_v37  ;;  %v543_v45 = vsel %vm511_vm1, %v258_v39, 0  ;;  %v1592_v39 = vpop.permute.xlu1 %1591 }
 0x149   : > { %1298 = vmatpush.msrb.mxu2 %v1225_v11  ;;  %691 = vmatpush.msrb.mxu3 %v690_v40  ;;  %v255_v11 = vld [vmem:[%s15569_s2 + $0x98] sm:$0xff]  ;;  %16087 = vst [vmem:[#allocation45_spill] sm:$0xff] %v11137_v38  ;;  %v636_v40 = vsub.f32 %v11126_v33, %v11135_v37  ;;  %v11146_v44 = vsub.f32 %v540_v34, %v11137_v38  ;;  %v11157_v52 = vand.u32 4294901760, %v543_v45  ;;  %v1052_v34 = vsel %vm511_vm1, %v236_v25, 0 }
 0x14a   : > { %1468 = vmatpush.msra.mxu0 %v1220_v17  ;;  %1539 = vmatpush.msra.mxu1 %v10967_v61  ;;  %v534_v16 = vsel %vm511_vm1, %v255_v11, 0  ;;  %v11092_v17 = vand.u32 4294901760, %v612_v12  ;;  %v1630_v25 = vsel %vm548_vm2, %v1592_v39, 0 }
 0x14b   : > { %582 = vmatmul.f32.gmra.mxu2 %v11008_v41  ;;  %693 = vmatmul.f32.vlgmr.msrb.gmra.mxu3 %v10956_v56  ;;  %16088 = vst [vmem:[#allocation46_spill] sm:$0xff] %v11146_v44  ;;  %v11152_v47 = vand.u32 4294901760, %v636_v40  ;;  %v11155_v51 = vand.u32 4294901760, %v11146_v44  ;;  %v11197_v40 = vand.u32 4294901760, %v1052_v34 }
 0x14c   : > { %1472 = vmatpush.msra.mxu0 %v1226_v20  ;;  %849 = vmatmul.f32.gmra.mxu1 %v10990_v27  ;;  %16077 = vst [vmem:[#allocation35_spill] sm:$0xff] %v11092_v17  ;;  %v11097_v20 = vand.u32 4294901760, %v534_v16 }
 0x14d   : > { %999 = vmatpush.msra.mxu3 %v565_v10  ;;  %768 = vmatmul.f32.gmra.mxu0 %v10984_v18  ;;  %16089 = vst [vmem:[#allocation47_spill] sm:$0xff] %v11152_v47 }
 0x14e   : > { %16079 = vst [vmem:[#allocation37_spill] sm:$0xff] %v11097_v20  ;;  %v11106_v24 = vsub.f32 %v534_v16, %v11097_v20 }
 0x14f   : > { %1001 = vmatpush.msra.mxu3 %v567_v26  ;;  %16090 = vst [vmem:[#allocation48_spill] sm:$0xff] %v11155_v51 }
 0x150   : > { %16080 = vst [vmem:[#allocation38_spill] sm:$0xff] %v11106_v24  ;;  %v11115_v29 = vand.u32 4294901760, %v11106_v24 }
 0x151   : > { %1375 = vmatpush.msrb.mxu3 %v10962_v59  ;;  %v254_v59 = vld [vmem:[%s15569_s2 + $0x90] sm:$0xff]  ;;  %16091 = vst [vmem:[#allocation49_spill] sm:$0xff] %v11157_v52 }
 0x152   : > { %v531_v63 = vsel %vm511_vm1, %v254_v59, 0  ;;  %16082 = vst [vmem:[#allocation40_spill] sm:$0xff] %v11115_v29  ;;  %v628_v32 = vsub.f32 %v11106_v24, %v11115_v29  ;;  %v644_v59 = vsub.f32 %v11146_v44, %v11155_v51 }
 0x153   : > { %1377 = vmatpush.msrb.mxu3 %v10967_v61  ;;  %590 = vmatmul.f32.gmra.mxu2 %v11030_v48  ;;  %v604_v61 = vsub.f32 %v11046_v53, %v11055_v57  ;;  %v11077_v10 = vand.u32 4294901760, %v531_v63  ;;  %16099 = vst [vmem:[#allocation57_spill] sm:$0xff] %v11197_v40 }
 0x154   : > { %697 = vmatmul.f32.gmra.mxu3 %v10975_v9  ;;  %855 = vmatmul.f32.gmra.mxu1 %v11011_v42  ;;  %v11132_v35 = vand.u32 4294901760, %v628_v32  ;;  %v11172_v11 = vand.u32 4294901760, %v644_v59  ;;  %v11209_v59 = vsub.f32 %v1052_v34, %v11197_v40  ;;  %v238_v34 = vld [vmem:[%s15569_s2 + $0x10] sm:$0xff] }
 0x155   : > { %773 = vmatmul.f32.gmra.mxu0 %v11002_v36  ;;  %v11072_v0 = vand.u32 4294901760, %v604_v61  ;;  %16075 = vst [vmem:[#allocation33_spill] sm:$0xff] %v11077_v10  ;;  %v11086_v15 = vsub.f32 %v531_v63, %v11077_v10  ;;  %v11166_v61 = vsub.f32 %v543_v45, %v11157_v52  ;;  %v546_v63 = vsel %vm511_vm1, %v259_v54, 0  ;;  %v237_v54 = vld [vmem:[%s15569_s2 + $0x8] sm:$0xff] }
 0x156   : > { %16085 = vst [vmem:[#allocation43_spill] sm:$0xff] %v11132_v35  ;;  %v11177_v16 = vand.u32 4294901760, %v546_v63 }
 0x157   : > { %16073 = vst [vmem:[#allocation31_spill] sm:$0xff] %v11072_v0  ;;  %v11095_v19 = vand.u32 4294901760, %v11086_v15  ;;  %v11175_v12 = vand.u32 4294901760, %v11166_v61 }
 0x158   : > { %16076 = vst [vmem:[#allocation34_spill] sm:$0xff] %v11086_v15 }
 0x159   : > { %16078 = vst [vmem:[#allocation36_spill] sm:$0xff] %v11095_v19  ;;  %v620_v22 = vsub.f32 %v11086_v15, %v11095_v19  ;;  %v652_v21 = vsub.f32 %v11166_v61, %v11175_v12 }
 0x15a   : > { %16092 = vst [vmem:[#allocation50_spill] sm:$0xff] %v11166_v61 }
 0x15b   : > { %598 = vmatmul.f32.gmra.mxu2 %v11052_v55  ;;  %v11112_v26 = vand.u32 4294901760, %v620_v22  ;;  %16093 = vst [vmem:[#allocation51_spill] sm:$0xff] %v11172_v11  ;;  %v11183_v22 = vsub.f32 %v546_v63, %v11177_v16  ;;  %v11191_v31 = vand.u32 4294901760, %v652_v21  ;;  %v1055_v21 = vsel %vm511_vm1, %v237_v54, 0 }
 0x15c   : > { %701 = vmatmul.f32.gmra.mxu3 %v10992_v28  ;;  %861 = vmatmul.f32.gmra.mxu1 %v11033_v49  ;;  %16094 = vst [vmem:[#allocation52_spill] sm:$0xff] %v11175_v12 }
 0x15d   : > { %778 = vmatmul.f32.gmra.mxu0 %v11024_v46  ;;  %16081 = vst [vmem:[#allocation39_spill] sm:$0xff] %v11112_v26  ;;  %v11194_v32 = vand.u32 4294901760, %v11183_v22 }
 0x15e   : > { %16095 = vst [vmem:[#allocation53_spill] sm:$0xff] %v11177_v16 }
 0x15f   : > { %16096 = vst [vmem:[#allocation54_spill] sm:$0xff] %v11183_v22  ;;  %v660_v45 = vsub.f32 %v11183_v22, %v11194_v32 }
 0x160   : > { %16097 = vst [vmem:[#allocation55_spill] sm:$0xff] %v11191_v31 }
 0x161   : > { %16098 = vst [vmem:[#allocation56_spill] sm:$0xff] %v11194_v32  ;;  %v11211_v63 = vand.u32 4294901760, %v660_v45 }
 0x162   : > { %16100 = vst [vmem:[#allocation58_spill] sm:$0xff] %v11209_v59 }
 0x163   : > { %606 = vmatmul.f32.gmra.mxu2 %v11072_v0  ;;  %16101 = vst [vmem:[#allocation59_spill] sm:$0xff] %v11211_v63 }
 0x164   : > { %705 = vmatmul.f32.gmra.mxu3 %v11013_v43  ;;  %867 = vmatmul.f32.gmra.mxu1 %v11055_v57 }
 0x165   : > { %783 = vmatmul.f32.gmra.mxu0 %v11046_v53 }
 0x16b   : > { %614 = vmatmul.f32.gmra.mxu2 %v11092_v17 }
 0x16c   : > { %709 = vmatmul.f32.gmra.mxu3 %v11035_v50  ;;  %873 = vmatmul.f32.gmra.mxu1 %v11075_v8 }
 0x16d   : > { %788 = vmatmul.f32.gmra.mxu0 %v11066_v62 }
 0x173   : > { %622 = vmatmul.f32.gmra.mxu2 %v11112_v26 }
 0x174   : > { %713 = vmatmul.f32.gmra.mxu3 %v11057_v58  ;;  %879 = vmatmul.f32.gmra.mxu1 %v11095_v19 }
 0x175   : > { %793 = vmatmul.f32.gmra.mxu0 %v11086_v15 }
 0x17b   : > { %630 = vmatmul.f32.gmra.mxu2 %v11132_v35 }
 0x17c   : > { %717 = vmatmul.f32.gmra.mxu3 %v11077_v10  ;;  %885 = vmatmul.f32.gmra.mxu1 %v11115_v29 }
 0x17d   : > { %798 = vmatmul.f32.gmra.mxu0 %v11106_v24 }
 0x183   : > { %638 = vmatmul.f32.gmra.mxu2 %v11152_v47 }
 0x184   : > { %721 = vmatmul.f32.gmra.mxu3 %v11097_v20  ;;  %891 = vmatmul.f32.gmra.mxu1 %v11135_v37 }
 0x185   : > { %803 = vmatmul.f32.gmra.mxu0 %v11126_v33 }
 0x18b   : > { %646 = vmatmul.f32.gmra.mxu2 %v11172_v11 }
 0x18c   : > { %725 = vmatmul.f32.gmra.mxu3 %v11117_v30  ;;  %897 = vmatmul.f32.gmra.mxu1 %v11155_v51  ;;  %v11220_v51 = vand.u32 4294901760, %v1630_v25 }
 0x18d   : > { %808 = vmatmul.f32.gmra.mxu0 %v11146_v44  ;;  %v11216_v44 = vand.u32 4294901760, %v11209_v59 }
 0x18f   : > { %16102 = vst [vmem:[#allocation60_spill] sm:$0xff] %v11216_v44  ;;  %v1110_v39 = vsub.f32 %v11209_v59, %v11216_v44 }
 0x191   : > { %v11243_v11 = vand.u32 4294901760, %v1110_v39 }
 0x193   : > { %654 = vmatmul.f32.gmra.mxu2 %v11191_v31  ;;  %v1590_v31 = vpop.permute.xlu1 %1589  ;;  %16105 = vst [vmem:[#allocation63_spill] sm:$0xff] %v11243_v11 }
 0x194   : > { %729 = vmatmul.f32.gmra.mxu3 %v11137_v38  ;;  %903 = vmatmul.f32.gmra.mxu1 %v11175_v12  ;;  %v11218_v12 = vand.u32 4294901760, %v1055_v21  ;;  %v11228_v45 = vand.u32 4294901760, %v1590_v31 }
 0x195   : > { %813 = vmatmul.f32.gmra.mxu0 %v11166_v61  ;;  %v1058_v61 = vsel %vm511_vm1, %v238_v34, 0 }
 0x196   : > { %16103 = vst [vmem:[#allocation61_spill] sm:$0xff] %v11218_v12  ;;  %v11234_v54 = vsub.f32 %v1055_v21, %v11218_v12 }
 0x198   : > { %16104 = vst [vmem:[#allocation62_spill] sm:$0xff] %v11234_v54  ;;  %v11246_v33 = vand.u32 4294901760, %v11234_v54 }
 0x19a   : > { %16106 = vst [vmem:[#allocation64_spill] sm:$0xff] %v11246_v33 }
 0x19b   : > { %662 = vmatmul.f32.gmra.mxu2 %v11211_v63  ;;  %v11237_v63 = vsub.f32 %v1630_v25, %v11220_v51  ;;  %v1118_v25 = vsub.f32 %v11234_v54, %v11246_v33 }
 0x19c   : > { %733 = vmatmul.f32.gmra.mxu3 %v11157_v52  ;;  %909 = vmatmul.f32.gmra.mxu1 %v11194_v32  ;;  %v11241_v32 = vsub.f32 %v1590_v31, %v11228_v45  ;;  %v239_v31 = vld [vmem:[%s15569_s2 + $0x18] sm:$0xff] }
 0x19d   : > { %818 = vmatmul.f32.gmra.mxu0 %v11183_v22  ;;  %v11248_v22 = vand.u32 4294901760, %v1058_v61  ;;  %v15600_v37 = vand.u32 4294901760, %v11237_v63  ;;  %v1061_v21 = vsel %vm511_vm1, %v239_v31, 0  ;;  %v240_v31 = vld [vmem:[%s15569_s2 + $0x20] sm:$0xff] }
 0x19f   : > { %16107 = vst [vmem:[#allocation65_spill] sm:$0xff] %v11248_v22  ;;  %v11264_v34 = vsub.f32 %v1058_v61, %v11248_v22  ;;  %v1764_v39 = vsub.f32 %v11237_v63, %v15600_v37  ;;  %v11277_v61 = vand.u32 4294901760, %v1118_v25  ;;  %v11282_v37 = vand.u32 4294901760, %v1061_v21 }
 0x1a1   : > { %16108 = vst [vmem:[#allocation66_spill] sm:$0xff] %v11264_v34  ;;  %v11280_v24 = vand.u32 4294901760, %v11264_v34  ;;  %v1765_v29 = vand.u32 4294901760, %v1764_v39  ;;  %v11294_v35 = vsub.f32 %v1061_v21, %v11282_v37  ;;  %v1064_v39 = vsel %vm511_vm1, %v240_v31, 0 }
 0x1a2   : > { %16110 = vst [vmem:[#allocation67_spill] sm:$0xff] %v11277_v61  ;;  %v11302_v26 = vand.u32 4294901760, %v1064_v39 }
 0x1a3   : > { %936 = vmatmul.f32.vlgmr.msra.gmra.mxu2 %v10956_v56  ;;  %16111 = vst [vmem:[#allocation68_spill] sm:$0xff] %v11280_v24  ;;  %v1126_v25 = vsub.f32 %v11264_v34, %v11280_v24  ;;  %v11300_v19 = vand.u32 4294901760, %v11294_v35 }
 0x1a4   : > { %737 = vmatmul.f32.gmra.mxu3 %v11177_v16  ;;  %1231 = vmatmul.f32.vlgmr.msrb.gmra.mxu1 %v11197_v40  ;;  %16112 = vst [vmem:[#allocation69_spill] sm:$0xff] %v11282_v37  ;;  %v11314_v21 = vsub.f32 %v1064_v39, %v11302_v26  ;;  %v242_v39 = vld [vmem:[%s15569_s2 + $0x30] sm:$0xff] }
 0x1a5   : > { %1647 = vmatpush.msra.mxu2 %v11220_v51  ;;  %1918 = vmatpush.msrb.mxu1 %v11220_v51  ;;  %16113 = vst [vmem:[#allocation70_spill] sm:$0xff] %v11294_v35  ;;  %v11297_v15 = vand.u32 4294901760, %v1126_v25 }
 0x1a6   : > { %1112 = vmatmul.f32.vlgmr.msrb.gmra.mxu0 %v11243_v11  ;;  %v16109_v11 = vand.u32 4294901760, %v11241_v32  ;;  %16115 = vst [vmem:[#allocation72_spill] sm:$0xff] %v11300_v19  ;;  %v11320_v25 = vand.u32 4294901760, %v11314_v21 }
 0x1a7   : > { %1649 = vmatpush.msra.mxu2 %v11228_v45  ;;  %1838 = vmatpush.msrb.mxu0 %v11237_v63  ;;  %16114 = vst [vmem:[#allocation71_spill] sm:$0xff] %v11297_v15 }
 0x1a8   : > { %1920 = vmatpush.msrb.mxu1 %v11228_v45  ;;  %v1770_v47 = vsub.f32 %v11241_v32, %v16109_v11  ;;  %16116 = vst [vmem:[#allocation73_spill] sm:$0xff] %v11302_v26 }
 0x1a9   : > { %1841 = vmatpush.msrb.mxu0 %v11241_v32  ;;  %16117 = vst [vmem:[#allocation74_spill] sm:$0xff] %v11314_v21 }
 0x1aa   : > { %v1771_v11 = vand.u32 4294901760, %v1770_v47  ;;  %v1134_v47 = vsub.f32 %v11294_v35, %v11300_v19  ;;  %16119 = vst [vmem:[#allocation76_spill] sm:$0xff] %v11320_v25 }
 0x1ab   : > { %940 = vmatmul.f32.gmra.mxu2 %v10975_v9 }
 0x1ac   : > { %1003 = vmatmul.f32.vlgmr.msra.gmra.mxu3 %v10956_v56  ;;  %1235 = vmatmul.f32.gmra.mxu1 %v11218_v12 }
 0x1ad   : > { %1766 = vmatpush.msra.mxu3 %v1765_v29  ;;  %v241_v29 = vld [vmem:[%s15569_s2 + $0x28] sm:$0xff] }
 0x1ae   : > { %1120 = vmatmul.f32.gmra.mxu0 %v11277_v61  ;;  %v1067_v31 = vsel %vm511_vm1, %v241_v29, 0  ;;  %v1142_v29 = vsub.f32 %v11314_v21, %v11320_v25 }
 0x1af   : > { %1772 = vmatpush.msra.mxu3 %v1771_v11  ;;  %v11317_v11 = vand.u32 4294901760, %v1134_v47  ;;  %v11322_v61 = vand.u32 4294901760, %v1067_v31 }
 0x1b0   : > { %v11337_v8 = vand.u32 4294901760, %v1142_v29 }
 0x1b1   : > { %16118 = vst [vmem:[#allocation75_spill] sm:$0xff] %v11317_v11  ;;  %v11334_v47 = vsub.f32 %v1067_v31, %v11322_v61  ;;  %v243_v31 = vld [vmem:[%s15569_s2 + $0x38] sm:$0xff] }
 0x1b2   : > { %16120 = vst [vmem:[#allocation77_spill] sm:$0xff] %v11322_v61  ;;  %v1073_v0 = vsel %vm511_vm1, %v243_v31, 0 }
 0x1b3   : > { %944 = vmatmul.f32.gmra.mxu2 %v10992_v28  ;;  %16121 = vst [vmem:[#allocation78_spill] sm:$0xff] %v11334_v47  ;;  %v11340_v17 = vand.u32 4294901760, %v11334_v47  ;;  %v11362_v55 = vand.u32 4294901760, %v1073_v0 }
 0x1b4   : > { %1007 = vmatmul.f32.gmra.mxu3 %v10975_v9  ;;  %1239 = vmatmul.f32.gmra.mxu1 %v11248_v22  ;;  %16122 = vst [vmem:[#allocation79_spill] sm:$0xff] %v11337_v8 }
 0x1b5   : > { %16123 = vst [vmem:[#allocation80_spill] sm:$0xff] %v11340_v17  ;;  %v1150_v29 = vsub.f32 %v11334_v47, %v11340_v17 }
 0x1b6   : > { %1128 = vmatmul.f32.gmra.mxu0 %v11297_v15  ;;  %v1070_v15 = vsel %vm511_vm1, %v242_v39, 0  ;;  %16128 = vst [vmem:[#allocation85_spill] sm:$0xff] %v11362_v55 }
 0x1b7   : > { %v11342_v57 = vand.u32 4294901760, %v1070_v15  ;;  %v11357_v49 = vand.u32 4294901760, %v1150_v29 }
 0x1b9   : > { %16124 = vst [vmem:[#allocation81_spill] sm:$0xff] %v11342_v57 }
 0x1ba   : > { %16126 = vst [vmem:[#allocation83_spill] sm:$0xff] %v11357_v49 }
 0x1bb   : > { %948 = vmatmul.f32.gmra.mxu2 %v11013_v43 }
 0x1bc   : > { %1011 = vmatmul.f32.gmra.mxu3 %v10992_v28  ;;  %1243 = vmatmul.f32.gmra.mxu1 %v11282_v37 }
 0x1be   : > { %1136 = vmatmul.f32.gmra.mxu0 %v11317_v11  ;;  %v11354_v11 = vsub.f32 %v1070_v15, %v11342_v57  ;;  %v244_v15 = vld [vmem:[%s15569_s2 + $0x40] sm:$0xff] }
 0x1bf   : > { %v1076_v42 = vsel %vm511_vm1, %v244_v15, 0 }
 0x1c0   : > { %v844_v62 = vpop.f32.mrf.mxu1  ;;  %16125 = vst [vmem:[#allocation82_spill] sm:$0xff] %v11354_v11 }
 0x1c2   : > { %v764_v53 = vpop.f32.mrf.mxu0 }
 0x1c3   : > { %952 = vmatmul.f32.gmra.mxu2 %v11035_v50 }
 0x1c4   : > { %1015 = vmatmul.f32.gmra.mxu3 %v11013_v43  ;;  %1247 = vmatmul.f32.gmra.mxu1 %v11302_v26  ;;  %v11360_v43 = vand.u32 4294901760, %v11354_v11 }
 0x1c5   : > { %v575_v39 = vpop.f32.mrf.mxu2 }
 0x1c6   : > { %1144 = vmatmul.f32.gmra.mxu0 %v11337_v8  ;;  %16127 = vst [vmem:[#allocation84_spill] sm:$0xff] %v11360_v43  ;;  %v1158_v29 = vsub.f32 %v11354_v11, %v11360_v43  ;;  %v11374_v8 = vsub.f32 %v1073_v0, %v11362_v55 }
 0x1c8   : > { %16129 = vst [vmem:[#allocation86_spill] sm:$0xff] %v11374_v8  ;;  %v11377_v18 = vand.u32 4294901760, %v1158_v29  ;;  %v11380_v27 = vand.u32 4294901760, %v11374_v8 }
 0x1c9   : > { %v850_v46 = vpop.f32.mrf.mxu1 }
 0x1ca   : > { %v769_v28 = vpop.f32.mrf.mxu0  ;;  %16130 = vst [vmem:[#allocation87_spill] sm:$0xff] %v11377_v18 }
 0x1cb   : > { %956 = vmatmul.f32.gmra.mxu2 %v11057_v58  ;;  %16131 = vst [vmem:[#allocation88_spill] sm:$0xff] %v11380_v27 }
 0x1cc   : > { %1019 = vmatmul.f32.gmra.mxu3 %v11035_v50  ;;  %1251 = vmatmul.f32.gmra.mxu1 %v11322_v61 }
 0x1ce   : > { %1152 = vmatmul.f32.gmra.mxu0 %v11357_v49  ;;  %v583_v31 = vpop.f32.mrf.mxu2  ;;  %v694_v36 = vpop.f32.mrf.mxu3  ;;  %v11382_v49 = vand.u32 4294901760, %v1076_v42 }
 0x1cf   : > { %v695_v9 = vadd.f32 %v694_v36, %v575_v39 }
 0x1d0   : > { %16132 = vst [vmem:[#allocation89_spill] sm:$0xff] %v11382_v49  ;;  %v11396_v0 = vsub.f32 %v1076_v42, %v11382_v49 }
 0x1d1   : > { %v856_v50 = vpop.f32.mrf.mxu1  ;;  %v765_v48 = vadd.f32 %v764_v53, %v695_v9  ;;  %v245_v9 = vld [vmem:[%s15569_s2 + $0x48] sm:$0xff]  ;;  %v1166_v53 = vsub.f32 %v11374_v8, %v11380_v27 }
 0x1d2   : > { %v774_v56 = vpop.f32.mrf.mxu0  ;;  %16133 = vst [vmem:[#allocation90_spill] sm:$0xff] %v11396_v0  ;;  %v11402_v60 = vand.u32 4294901760, %v11396_v0 }
 0x1d3   : > { %960 = vmatmul.f32.gmra.mxu2 %v11077_v10  ;;  %v11385_v41 = vadd.f32 %v844_v62, %v765_v48  ;;  %v1079_v48 = vsel %vm511_vm1, %v245_v9, 0 }
 0x1d4   : > { %1023 = vmatmul.f32.gmra.mxu3 %v11057_v58  ;;  %1255 = vmatmul.f32.gmra.mxu1 %v11342_v57  ;;  %v11399_v58 = vand.u32 4294901760, %v1166_v53  ;;  %16135 = vst [vmem:[#allocation92_spill] sm:$0xff] %v11402_v60 }
 0x1d6   : > { %1160 = vmatmul.f32.gmra.mxu0 %v11377_v18  ;;  %v591_v36 = vpop.f32.mrf.mxu2  ;;  %16134 = vst [vmem:[#allocation91_spill] sm:$0xff] %v11399_v58  ;;  %v11404_v18 = vand.u32 4294901760, %v1079_v48 }
 0x1d7   : > { %v698_v39 = vpop.f32.mrf.mxu3 }
 0x1d8   : > { %v699_v62 = vadd.f32 %v698_v39, %v583_v31  ;;  %16136 = vst [vmem:[#allocation93_spill] sm:$0xff] %v11404_v18  ;;  %v1174_v31 = vsub.f32 %v11396_v0, %v11402_v60  ;;  %v11418_v9 = vsub.f32 %v1079_v48, %v11404_v18 }
 0x1d9   : > { %v862_v15 = vpop.f32.mrf.mxu1 }
 0x1da   : > { %v770_v29 = vadd.f32 %v769_v28, %v699_v62  ;;  %v779_v1 = vpop.f32.mrf.mxu0  ;;  %v246_v28 = vld [vmem:[%s15569_s2 + $0x50] sm:$0xff]  ;;  %16137 = vst [vmem:[#allocation94_spill] sm:$0xff] %v11418_v9  ;;  %v11424_v7 = vand.u32 4294901760, %v11418_v9 }
 0x1db   : > { %964 = vmatmul.f32.gmra.mxu2 %v11097_v20 }
 0x1dc   : > { %v11407_v23 = vadd.f32 %v850_v46, %v770_v29  ;;  %1027 = vmatmul.f32.gmra.mxu3 %v11077_v10  ;;  %1259 = vmatmul.f32.gmra.mxu1 %v11362_v55  ;;  %v1082_v46 = vsel %vm511_vm1, %v246_v28, 0  ;;  %v11421_v10 = vand.u32 4294901760, %v1174_v31  ;;  %16139 = vst [vmem:[#allocation96_spill] sm:$0xff] %v11424_v7  ;;  %v1182_v48 = vsub.f32 %v11418_v9, %v11424_v7 }
 0x1de   : > { %1168 = vmatmul.f32.gmra.mxu0 %v11399_v58  ;;  %v599_v42 = vpop.f32.mrf.mxu2  ;;  %16138 = vst [vmem:[#allocation95_spill] sm:$0xff] %v11421_v10  ;;  %v11426_v58 = vand.u32 4294901760, %v1082_v46  ;;  %v11443_v13 = vand.u32 4294901760, %v1182_v48 }
 0x1df   : > { %v702_v53 = vpop.f32.mrf.mxu3 }
 0x1e0   : > { %v703_v39 = vadd.f32 %v702_v53, %v591_v36  ;;  %16140 = vst [vmem:[#allocation97_spill] sm:$0xff] %v11426_v58  ;;  %v11440_v28 = vsub.f32 %v1082_v46, %v11426_v58 }
 0x1e1   : > { %v868_v62 = vpop.f32.mrf.mxu1  ;;  %16142 = vst [vmem:[#allocation99_spill] sm:$0xff] %v11443_v13 }
 0x1e2   : > { %v775_v29 = vadd.f32 %v774_v56, %v703_v39  ;;  %v784_v6 = vpop.f32.mrf.mxu0  ;;  %v247_v56 = vld [vmem:[%s15569_s2 + $0x58] sm:$0xff]  ;;  %16141 = vst [vmem:[#allocation98_spill] sm:$0xff] %v11440_v28  ;;  %v2147_v39 = vpop.permute.xlu2 %2146  ;;  %v11446_v5 = vand.u32 4294901760, %v11440_v28 }
 0x1e3   : > { %968 = vmatmul.f32.gmra.mxu2 %v11117_v30  ;;  %v2185_v48 = vsel %vm548_vm2, %v2147_v39, 0 }
 0x1e4   : > { %v11429_v14 = vadd.f32 %v856_v50, %v775_v29  ;;  %1031 = vmatmul.f32.gmra.mxu3 %v11097_v20  ;;  %1263 = vmatmul.f32.gmra.mxu1 %v11382_v49  ;;  %v1085_v50 = vsel %vm511_vm1, %v247_v56, 0  ;;  %16143 = vst [vmem:[#allocation100_spill] sm:$0xff] %v11446_v5 }
 0x1e5   : > { %v11448_v3 = vand.u32 4294901760, %v1085_v50 }
 0x1e6   : > { %1176 = vmatmul.f32.gmra.mxu0 %v11421_v10  ;;  %v607_v36 = vpop.f32.mrf.mxu2 }
 0x1e7   : > { %v706_v31 = vpop.f32.mrf.mxu3  ;;  %16144 = vst [vmem:[#allocation101_spill] sm:$0xff] %v11448_v3  ;;  %v11459_v46 = vsub.f32 %v1085_v50, %v11448_v3 }
 0x1e8   : > { %v707_v53 = vadd.f32 %v706_v31, %v599_v42 }
 0x1e9   : > { %v874_v29 = vpop.f32.mrf.mxu1  ;;  %16145 = vst [vmem:[#allocation102_spill] sm:$0xff] %v11459_v46 }
 0x1ea   : > { %v780_v20 = vadd.f32 %v779_v1, %v707_v53  ;;  %v789_v10 = vpop.f32.mrf.mxu0  ;;  %v1190_v1 = vsub.f32 %v11440_v28, %v11446_v5  ;;  %v2145_v7 = vpop.permute.xlu2 %2144 }
 0x1eb   : > { %972 = vmatmul.f32.gmra.mxu2 %v11137_v38 }
 0x1ec   : > { %v11451_v4 = vadd.f32 %v862_v15, %v780_v20  ;;  %1035 = vmatmul.f32.gmra.mxu3 %v11117_v30  ;;  %1267 = vmatmul.f32.gmra.mxu1 %v11404_v18  ;;  %v11462_v15 = vand.u32 4294901760, %v1190_v1  ;;  %v11465_v30 = vand.u32 4294901760, %v11459_v46 }
 0x1ee   : > { %1184 = vmatmul.f32.gmra.mxu0 %v11443_v13  ;;  %v615_v42 = vpop.f32.mrf.mxu2  ;;  %16146 = vst [vmem:[#allocation103_spill] sm:$0xff] %v11462_v15  ;;  %v11467_v13 = vand.u32 4294901760, %v2185_v48  ;;  %v1198_v50 = vsub.f32 %v11459_v46, %v11465_v30 }
 0x1ef   : > { %v710_v56 = vpop.f32.mrf.mxu3  ;;  %16147 = vst [vmem:[#allocation104_spill] sm:$0xff] %v11465_v30 }
 0x1f0   : > { %v711_v31 = vadd.f32 %v710_v56, %v607_v36  ;;  %v11474_v36 = vand.u32 4294901760, %v2145_v7  ;;  %v11480_v39 = vsub.f32 %v2185_v48, %v11467_v13 }
 0x1f1   : > { %v880_v53 = vpop.f32.mrf.mxu1 }
 0x1f2   : > { %v785_v20 = vadd.f32 %v784_v6, %v711_v31  ;;  %v794_v2 = vpop.f32.mrf.mxu0  ;;  %v15715_v28 = vand.u32 4294901760, %v11480_v39 }
 0x1f3   : > { %976 = vmatmul.f32.gmra.mxu2 %v11157_v52 }
 0x1f4   : > { %v11470_v5 = vadd.f32 %v868_v62, %v785_v20  ;;  %1039 = vmatmul.f32.gmra.mxu3 %v11137_v38  ;;  %1271 = vmatmul.f32.gmra.mxu1 %v11426_v58  ;;  %v11483_v62 = vsub.f32 %v2145_v7, %v11474_v36  ;;  %v11485_v38 = vand.u32 4294901760, %v1198_v50 }
 0x1f6   : > { %1192 = vmatmul.f32.gmra.mxu0 %v11462_v15  ;;  %v623_v6 = vpop.f32.mrf.mxu2  ;;  %16148 = vst [vmem:[#allocation105_spill] sm:$0xff] %v11485_v38 }
 0x1f7   : > { %v714_v1 = vpop.f32.mrf.mxu3 }
 0x1f8   : > { %v715_v56 = vadd.f32 %v714_v1, %v615_v42  ;;  %v15716_v42 = vand.u32 4294901760, %v11483_v62 }
 0x1f9   : > { %v886_v31 = vpop.f32.mrf.mxu1 }
 0x1fa   : > { %v790_v20 = vadd.f32 %v789_v10, %v715_v56  ;;  %v799_v58 = vpop.f32.mrf.mxu0  ;;  %v2319_v10 = vsub.f32 %v11480_v39, %v15715_v28  ;;  %v16149_v28 = vand.u32 4294901760, %v11237_v63 }
 0x1fb   : > { %980 = vmatmul.f32.gmra.mxu2 %v11177_v16 }
 0x1fc   : > { %v11489_v15 = vadd.f32 %v874_v29, %v790_v20  ;;  %1043 = vmatmul.f32.gmra.mxu3 %v11157_v52  ;;  %1275 = vmatmul.f32.gmra.mxu1 %v11448_v3  ;;  %v2325_v29 = vsub.f32 %v11483_v62, %v15716_v42  ;;  %v2320_v52 = vand.u32 4294901760, %v2319_v10 }
 0x1fe   : > { %1200 = vmatmul.f32.gmra.mxu0 %v11485_v38  ;;  %v631_v7 = vpop.f32.mrf.mxu2 }
 0x1ff   : > { %v718_v48 = vpop.f32.mrf.mxu3 }
 0x200   : > { %v719_v50 = vadd.f32 %v718_v48, %v623_v6  ;;  %v16150_v48 = vand.u32 4294901760, %v11241_v32 }
 0x201   : > { %v892_v1 = vpop.f32.mrf.mxu1 }
 0x202   : > { %v795_v56 = vadd.f32 %v794_v2, %v719_v50  ;;  %v804_v20 = vpop.f32.mrf.mxu0  ;;  %v2326_v2 = vand.u32 4294901760, %v2325_v29 }
 0x203   : > { %1301 = vmatmul.f32.vlgmr.msrb.gmra.mxu2 %v11209_v59 }
 0x204   : > { %v11502_v30 = vadd.f32 %v880_v53, %v795_v56  ;;  %1047 = vmatmul.f32.gmra.mxu3 %v11177_v16  ;;  %1541 = vmatmul.f32.vlgmr.msra.gmra.mxu1 %v11197_v40 }
 0x205   : > { %2011 = vmatpush.msrb.mxu2 %v16149_v28  ;;  %2321 = vmatpush.msra.mxu1 %v2320_v52 }
 0x206   : > { %1474 = vmatmul.f32.vlgmr.msra.gmra.mxu0 %v11197_v40  ;;  %v639_v6 = vpop.f32.mrf.mxu2 }
 0x207   : > { %2015 = vmatpush.msrb.mxu2 %v16150_v48  ;;  %2202 = vmatpush.msra.mxu0 %v11467_v13  ;;  %v722_v10 = vpop.f32.mrf.mxu3 }
 0x208   : > { %2327 = vmatpush.msra.mxu1 %v2326_v2  ;;  %v723_v53 = vadd.f32 %v722_v10, %v631_v7 }
 0x209   : > { %2204 = vmatpush.msra.mxu0 %v11474_v36  ;;  %v898_v50 = vpop.f32.mrf.mxu1 }
 0x20a   : > { %v800_v56 = vadd.f32 %v799_v58, %v723_v53  ;;  %v809_v42 = vpop.f32.mrf.mxu0 }
 0x20b   : > { %1306 = vmatmul.f32.gmra.mxu2 %v11234_v54 }
 0x20c   : > { %v11514_v52 = vadd.f32 %v886_v31, %v800_v56  ;;  %1381 = vmatmul.f32.vlgmr.msrb.gmra.mxu3 %v11216_v44  ;;  %1545 = vmatmul.f32.gmra.mxu1 %v11218_v12 }
 0x20d   : > { %2080 = vmatpush.msrb.mxu3 %v11220_v51 }
 0x20e   : > { %1478 = vmatmul.f32.gmra.mxu0 %v11218_v12  ;;  %v647_v32 = vpop.f32.mrf.mxu2 }
 0x20f   : > { %2082 = vmatpush.msrb.mxu3 %v11228_v45  ;;  %v726_v63 = vpop.f32.mrf.mxu3 }
 0x210   : > { %v727_v28 = vadd.f32 %v726_v63, %v639_v6 }
 0x211   : > { %v904_v7 = vpop.f32.mrf.mxu1 }
 0x212   : > { %v805_v58 = vadd.f32 %v804_v20, %v727_v28  ;;  %v814_v29 = vpop.f32.mrf.mxu0 }
 0x213   : > { %1311 = vmatmul.f32.gmra.mxu2 %v11264_v34 }
 0x214   : > { %v11522_v31 = vadd.f32 %v892_v1, %v805_v58  ;;  %1387 = vmatmul.f32.gmra.mxu3 %v11246_v33  ;;  %1549 = vmatmul.f32.gmra.mxu1 %v11248_v22 }
 0x216   : > { %1482 = vmatmul.f32.gmra.mxu0 %v11248_v22  ;;  %v655_v51 = vpop.f32.mrf.mxu2 }
 0x217   : > { %v730_v2 = vpop.f32.mrf.mxu3 }
 0x218   : > { %v731_v48 = vadd.f32 %v730_v2, %v647_v32 }
 0x219   : > { %v910_v10 = vpop.f32.mrf.mxu1 }
 0x21a   : > { %v810_v45 = vadd.f32 %v809_v42, %v731_v48  ;;  %v819_v53 = vpop.f32.mrf.mxu0 }
 0x21b   : > { %1316 = vmatmul.f32.gmra.mxu2 %v11294_v35 }
 0x21c   : > { %v11528_v20 = vadd.f32 %v898_v50, %v810_v45  ;;  %1393 = vmatmul.f32.gmra.mxu3 %v11280_v24  ;;  %1553 = vmatmul.f32.gmra.mxu1 %v11282_v37 }
 0x21e   : > { %1486 = vmatmul.f32.gmra.mxu0 %v11282_v37  ;;  %v663_v1 = vpop.f32.mrf.mxu2 }
 0x21f   : > { %v734_v6 = vpop.f32.mrf.mxu3 }
 0x220   : > { %v735_v56 = vadd.f32 %v734_v6, %v655_v51 }
 0x221   : > { %v1232_v63 = vpop.f32.mrf.mxu1 }
 0x222   : > { %v815_v28 = vadd.f32 %v814_v29, %v735_v56 }
 0x223   : > { %1321 = vmatmul.f32.gmra.mxu2 %v11314_v21  ;;  %v1113_v32 = vpop.f32.mrf.mxu0 }
 0x224   : > { %v11534_v42 = vadd.f32 %v904_v7, %v815_v28  ;;  %1399 = vmatmul.f32.gmra.mxu3 %v11300_v19  ;;  %1557 = vmatmul.f32.gmra.mxu1 %v11302_v26 }
 0x226   : > { %1490 = vmatmul.f32.gmra.mxu0 %v11302_v26  ;;  %v937_v50 = vpop.f32.mrf.mxu2 }
 0x227   : > { %v738_v58 = vpop.f32.mrf.mxu3  ;;  %v938_v2 = vadd.f32 %v937_v50, %v11385_v41 }
 0x228   : > { %v739_v48 = vadd.f32 %v738_v58, %v663_v1 }
 0x229   : > { %v1236_v45 = vpop.f32.mrf.mxu1 }
 0x22a   : > { %v820_v51 = vadd.f32 %v819_v53, %v739_v48 }
 0x22b   : > { %1326 = vmatmul.f32.gmra.mxu2 %v11334_v47  ;;  %v1121_v29 = vpop.f32.mrf.mxu0 }
 0x22c   : > { %v11541_v6 = vadd.f32 %v910_v10, %v820_v51  ;;  %1405 = vmatmul.f32.gmra.mxu3 %v11320_v25  ;;  %1561 = vmatmul.f32.gmra.mxu1 %v11322_v61 }
 0x22e   : > { %1494 = vmatmul.f32.gmra.mxu0 %v11322_v61  ;;  %v941_v7 = vpop.f32.mrf.mxu2 }
 0x22f   : > { %v942_v56 = vadd.f32 %v941_v7, %v11407_v23  ;;  %v1004_v28 = vpop.f32.mrf.mxu3 }
 0x230   : > { %v1005_v19 = vadd.f32 %v1004_v28, %v938_v2 }
 0x231   : > { %v1240_v41 = vpop.f32.mrf.mxu1 }
 0x232   : > { %v1114_v1 = vadd.f32 %v1113_v32, %v1005_v19 }
 0x233   : > { %1331 = vmatmul.f32.gmra.mxu2 %v11354_v11  ;;  %v1129_v53 = vpop.f32.mrf.mxu0 }
 0x234   : > { %v11548_v50 = vadd.f32 %v1232_v63, %v1114_v1  ;;  %1411 = vmatmul.f32.gmra.mxu3 %v11340_v17  ;;  %1565 = vmatmul.f32.gmra.mxu1 %v11342_v57  ;;  %v16164_v17 = vld [vmem:[#allocation104_spill] sm:$0xff] }
 0x236   : > { %1498 = vmatmul.f32.gmra.mxu0 %v11342_v57  ;;  %v945_v10 = vpop.f32.mrf.mxu2 }
 0x237   : > { %v946_v58 = vadd.f32 %v945_v10, %v11429_v14  ;;  %v1008_v48 = vpop.f32.mrf.mxu3 }
 0x238   : > { %v1009_v23 = vadd.f32 %v1008_v48, %v942_v56 }
 0x239   : > { %v1244_v51 = vpop.f32.mrf.mxu1 }
 0x23a   : > { %v1122_v2 = vadd.f32 %v1121_v29, %v1009_v23 }
 0x23b   : > { %1336 = vmatmul.f32.gmra.mxu2 %v11374_v8  ;;  %v1137_v19 = vpop.f32.mrf.mxu0 }
 0x23c   : > { %v11555_v32 = vadd.f32 %v1236_v45, %v1122_v2  ;;  %1417 = vmatmul.f32.gmra.mxu3 %v11360_v43  ;;  %1569 = vmatmul.f32.gmra.mxu1 %v11362_v55 }
 0x23e   : > { %1502 = vmatmul.f32.gmra.mxu0 %v11362_v55  ;;  %v949_v63 = vpop.f32.mrf.mxu2 }
 0x23f   : > { %v950_v7 = vadd.f32 %v949_v63, %v11451_v4  ;;  %v1012_v28 = vpop.f32.mrf.mxu3 }
 0x240   : > { %v1013_v14 = vadd.f32 %v1012_v28, %v946_v58 }
 0x241   : > { %v1248_v1 = vpop.f32.mrf.mxu1 }
 0x242   : > { %v1130_v56 = vadd.f32 %v1129_v53, %v1013_v14  ;;  %v260_v53 = vld [vmem:[%s15569_s2 + $0xc0] sm:$0xff] }
 0x243   : > { %1341 = vmatmul.f32.gmra.mxu2 %v11396_v0  ;;  %v1145_v29 = vpop.f32.mrf.mxu0  ;;  %v1595_v28 = vsel %vm511_vm1, %v260_v53, 0  ;;  %v16159_v0 = vld [vmem:[#allocation100_spill] sm:$0xff] }
 0x244   : > { %v11562_v10 = vadd.f32 %v1240_v41, %v1130_v56  ;;  %1423 = vmatmul.f32.gmra.mxu3 %v11380_v27  ;;  %1573 = vmatmul.f32.gmra.mxu1 %v11382_v49  ;;  %v11579_v56 = vand.u32 4294901760, %v1595_v28 }
 0x246   : > { %1506 = vmatmul.f32.gmra.mxu0 %v11382_v49  ;;  %v953_v45 = vpop.f32.mrf.mxu2  ;;  %16151 = vst [vmem:[#allocation106_spill] sm:$0xff] %v11579_v56  ;;  %v11586_v53 = vsub.f32 %v1595_v28, %v11579_v56 }
 0x247   : > { %v954_v48 = vadd.f32 %v953_v45, %v11470_v5  ;;  %v1016_v23 = vpop.f32.mrf.mxu3 }
 0x248   : > { %v1017_v4 = vadd.f32 %v1016_v23, %v950_v7  ;;  %16153 = vst [vmem:[#allocation107_spill] sm:$0xff] %v11586_v53 }
 0x249   : > { %v1252_v2 = vpop.f32.mrf.mxu1 }
 0x24a   : > { %v1138_v58 = vadd.f32 %v1137_v19, %v1017_v4  ;;  %v16152_v4 = vld [vmem:[#allocation98_spill] sm:$0xff] }
 0x24b   : > { %1346 = vmatmul.f32.gmra.mxu2 %v11418_v9  ;;  %v1153_v41 = vpop.f32.mrf.mxu0  ;;  %v16154_v9 = vld [vmem:[#allocation96_spill] sm:$0xff] }
 0x24c   : > { %v11572_v63 = vadd.f32 %v1244_v51, %v1138_v58  ;;  %1429 = vmatmul.f32.gmra.mxu3 %v11402_v60  ;;  %1577 = vmatmul.f32.gmra.mxu1 %v11404_v18  ;;  %v261_v51 = vld [vmem:[%s15569_s2 + $0xc8] sm:$0xff] }
 0x24e   : > { %1510 = vmatmul.f32.gmra.mxu0 %v11404_v18  ;;  %v957_v5 = vpop.f32.mrf.mxu2 }
 0x24f   : > { %v958_v7 = vadd.f32 %v957_v5, %v11489_v15  ;;  %v1020_v14 = vpop.f32.mrf.mxu3  ;;  %v16155_v15 = vld [vmem:[#allocation97_spill] sm:$0xff] }
 0x250   : > { %v1021_v19 = vadd.f32 %v1020_v14, %v954_v48  ;;  %v1598_v48 = vsel %vm511_vm1, %v261_v51, 0 }
 0x251   : > { %v1256_v45 = vpop.f32.mrf.mxu1 }
 0x252   : > { %v1146_v23 = vadd.f32 %v1145_v29, %v1021_v19  ;;  %v11596_v19 = vand.u32 4294901760, %v11586_v53 }
 0x253   : > { %1351 = vmatmul.f32.gmra.mxu2 %v16152_v4  ;;  %v1161_v58 = vpop.f32.mrf.mxu0  ;;  %v11598_v4 = vand.u32 4294901760, %v1598_v48 }
 0x254   : > { %v11588_v60 = vadd.f32 %v1248_v1, %v1146_v23  ;;  %1435 = vmatmul.f32.gmra.mxu3 %v16154_v9  ;;  %1581 = vmatmul.f32.gmra.mxu1 %v16155_v15  ;;  %16156 = vst [vmem:[#allocation108_spill] sm:$0xff] %v11596_v19  ;;  %v262_v23 = vld [vmem:[%s15569_s2 + $0xd0] sm:$0xff]  ;;  %v1653_v51 = vsub.f32 %v11586_v53, %v11596_v19 }
 0x255   : > { %16157 = vst [vmem:[#allocation109_spill] sm:$0xff] %v11598_v4 }
 0x256   : > { %1514 = vmatmul.f32.gmra.mxu0 %v16155_v15  ;;  %v961_v5 = vpop.f32.mrf.mxu2 }
 0x257   : > { %v962_v14 = vadd.f32 %v961_v5, %v11502_v30  ;;  %v1024_v29 = vpop.f32.mrf.mxu3  ;;  %v11607_v30 = vsub.f32 %v1598_v48, %v11598_v4 }
 0x258   : > { %v1025_v28 = vadd.f32 %v1024_v29, %v958_v7  ;;  %v1601_v7 = vsel %vm511_vm1, %v262_v23, 0 }
 0x259   : > { %v1260_v1 = vpop.f32.mrf.mxu1  ;;  %16158 = vst [vmem:[#allocation110_spill] sm:$0xff] %v11607_v30  ;;  %v11619_v43 = vand.u32 4294901760, %v11607_v30  ;;  %v11621_v48 = vand.u32 4294901760, %v1601_v7 }
 0x25a   : > { %v1154_v9 = vadd.f32 %v1153_v41, %v1025_v28 }
 0x25b   : > { %1356 = vmatmul.f32.gmra.mxu2 %v11459_v46  ;;  %v1169_v27 = vpop.f32.mrf.mxu0  ;;  %v11616_v46 = vand.u32 4294901760, %v1653_v51  ;;  %16161 = vst [vmem:[#allocation112_spill] sm:$0xff] %v11619_v43  ;;  %v11630_v51 = vsub.f32 %v1601_v7, %v11621_v48  ;;  %v16165_v7 = vand.u32 4294901760, %v11480_v39 }
 0x25c   : > { %v11609_v5 = vadd.f32 %v1252_v2, %v1154_v9  ;;  %1441 = vmatmul.f32.gmra.mxu3 %v16159_v0  ;;  %1585 = vmatmul.f32.gmra.mxu1 %v11448_v3  ;;  %16162 = vst [vmem:[#allocation113_spill] sm:$0xff] %v11621_v48  ;;  %v263_v0 = vld [vmem:[%s15569_s2 + $0xd8] sm:$0xff] }
 0x25d   : > { %16160 = vst [vmem:[#allocation111_spill] sm:$0xff] %v11616_v46 }
 0x25e   : > { %1518 = vmatmul.f32.gmra.mxu0 %v11448_v3  ;;  %v965_v41 = vpop.f32.mrf.mxu2  ;;  %16163 = vst [vmem:[#allocation114_spill] sm:$0xff] %v11630_v51 }
 0x25f   : > { %v966_v29 = vadd.f32 %v965_v41, %v11514_v52  ;;  %v1028_v28 = vpop.f32.mrf.mxu3  ;;  %v1661_v52 = vsub.f32 %v11607_v30, %v11619_v43 }
 0x260   : > { %v1029_v9 = vadd.f32 %v1028_v28, %v962_v14  ;;  %v1604_v14 = vsel %vm511_vm1, %v263_v0, 0 }
 0x261   : > { %v1264_v2 = vpop.f32.mrf.mxu1  ;;  %v11649_v0 = vand.u32 4294901760, %v1604_v14 }
 0x262   : > { %v1162_v23 = vadd.f32 %v1161_v58, %v1029_v9  ;;  %v11644_v9 = vand.u32 4294901760, %v1661_v52 }
 0x263   : > { %1655 = vmatmul.f32.vlgmr.msra.gmra.mxu2 %v11616_v46  ;;  %v1177_v41 = vpop.f32.mrf.mxu0  ;;  %16168 = vst [vmem:[#allocation117_spill] sm:$0xff] %v11649_v0 }
 0x264   : > { %v11632_v8 = vadd.f32 %v1256_v45, %v1162_v23  ;;  %1447 = vmatmul.f32.gmra.mxu3 %v16164_v17  ;;  %1924 = vmatmul.f32.vlgmr.msrb.gmra.mxu1 %v11596_v19  ;;  %16166 = vst [vmem:[#allocation115_spill] sm:$0xff] %v11644_v9  ;;  %v11647_v23 = vand.u32 4294901760, %v11630_v51 }
 0x265   : > { %2393 = vmatpush.msra.mxu2 %v11480_v39  ;;  %2635 = vmatpush.msrb.mxu1 %v11467_v13  ;;  %v264_v39 = vld [vmem:[%s15569_s2 + $0xe0] sm:$0xff] }
 0x266   : > { %1844 = vmatmul.f32.vlgmr.msrb.gmra.mxu0 %v11586_v53  ;;  %v969_v58 = vpop.f32.mrf.mxu2  ;;  %16167 = vst [vmem:[#allocation116_spill] sm:$0xff] %v11647_v23  ;;  %v16169_v53 = vand.u32 4294901760, %v11483_v62  ;;  %v1669_v52 = vsub.f32 %v11630_v51, %v11647_v23 }
 0x267   : > { %2396 = vmatpush.msra.mxu2 %v11483_v62  ;;  %2566 = vmatpush.msrb.mxu0 %v16165_v7  ;;  %v970_v45 = vadd.f32 %v969_v58, %v11522_v31  ;;  %v1032_v28 = vpop.f32.mrf.mxu3  ;;  %v11661_v7 = vsub.f32 %v1604_v14, %v11649_v0  ;;  %v1607_v62 = vsel %vm511_vm1, %v264_v39, 0 }
 0x268   : > { %2637 = vmatpush.msrb.mxu1 %v11474_v36  ;;  %v1033_v19 = vadd.f32 %v1032_v28, %v966_v29  ;;  %v11672_v29 = vand.u32 4294901760, %v1669_v52  ;;  %v11677_v14 = vand.u32 4294901760, %v1607_v62 }
 0x269   : > { %2570 = vmatpush.msrb.mxu0 %v16169_v53  ;;  %v1268_v46 = vpop.f32.mrf.mxu1  ;;  %16170 = vst [vmem:[#allocation118_spill] sm:$0xff] %v11661_v7 }
 0x26a   : > { %v1170_v31 = vadd.f32 %v1169_v27, %v1033_v19  ;;  %16171 = vst [vmem:[#allocation119_spill] sm:$0xff] %v11672_v29  ;;  %v11686_v52 = vsub.f32 %v1607_v62, %v11677_v14 }
 0x26b   : > { %1663 = vmatmul.f32.gmra.mxu2 %v11644_v9  ;;  %v1185_v58 = vpop.f32.mrf.mxu0  ;;  %16173 = vst [vmem:[#allocation121_spill] sm:$0xff] %v11677_v14 }
 0x26c   : > { %v11663_v17 = vadd.f32 %v1260_v1, %v1170_v31  ;;  %1774 = vmatmul.f32.vlgmr.msra.gmra.mxu3 %v11579_v56  ;;  %1930 = vmatmul.f32.gmra.mxu1 %v11619_v43  ;;  %v11675_v1 = vand.u32 4294901760, %v11661_v7  ;;  %16174 = vst [vmem:[#allocation122_spill] sm:$0xff] %v11686_v52 }
 0x26d   : > { %2473 = vmatpush.msra.mxu3 %v11467_v13  ;;  %v265_v13 = vld [vmem:[%s15569_s2 + $0xe8] sm:$0xff] }
 0x26e   : > { %v973_v27 = vpop.f32.mrf.mxu2  ;;  %1849 = vmatmul.f32.gmra.mxu0 %v11607_v30  ;;  %16172 = vst [vmem:[#allocation120_spill] sm:$0xff] %v11675_v1  ;;  %v11698_v30 = vand.u32 4294901760, %v11686_v52 }
 0x26f   : > { %2475 = vmatpush.msra.mxu3 %v11474_v36  ;;  %v974_v53 = vadd.f32 %v973_v27, %v11528_v20  ;;  %v1036_v19 = vpop.f32.mrf.mxu3  ;;  %v1677_v36 = vsub.f32 %v11661_v7, %v11675_v1 }
 0x270   : > { %v1037_v28 = vadd.f32 %v1036_v19, %v970_v45  ;;  %v1610_v45 = vsel %vm511_vm1, %v265_v13, 0  ;;  %16176 = vst [vmem:[#allocation124_spill] sm:$0xff] %v11698_v30 }
 0x271   : > { %v1272_v31 = vpop.f32.mrf.mxu1  ;;  %v11700_v62 = vand.u32 4294901760, %v1610_v45 }
 0x272   : > { %v1178_v39 = vadd.f32 %v1177_v41, %v1037_v28 }
 0x273   : > { %1671 = vmatmul.f32.gmra.mxu2 %v11672_v29  ;;  %v1193_v20 = vpop.f32.mrf.mxu0  ;;  %v11695_v29 = vand.u32 4294901760, %v1677_v36  ;;  %16177 = vst [vmem:[#allocation125_spill] sm:$0xff] %v11700_v62  ;;  %v11709_v36 = vsub.f32 %v1610_v45, %v11700_v62 }
 0x274   : > { %v11688_v27 = vadd.f32 %v1264_v2, %v1178_v39  ;;  %1778 = vmatmul.f32.gmra.mxu3 %v11598_v4  ;;  %1936 = vmatmul.f32.gmra.mxu1 %v11647_v23  ;;  %v266_v23 = vld [vmem:[%s15569_s2 + $0xf0] sm:$0xff] }
 0x275   : > { %16175 = vst [vmem:[#allocation123_spill] sm:$0xff] %v11695_v29  ;;  %v11721_v43 = vand.u32 4294901760, %v11709_v36 }
 0x276   : > { %v977_v19 = vpop.f32.mrf.mxu2  ;;  %1854 = vmatmul.f32.gmra.mxu0 %v11630_v51  ;;  %16178 = vst [vmem:[#allocation126_spill] sm:$0xff] %v11709_v36 }
 0x277   : > { %v978_v41 = vadd.f32 %v977_v19, %v11534_v42  ;;  %v1040_v28 = vpop.f32.mrf.mxu3  ;;  %v1685_v42 = vsub.f32 %v11686_v52, %v11698_v30  ;;  %16180 = vst [vmem:[#allocation128_spill] sm:$0xff] %v11721_v43 }
 0x278   : > { %v1041_v2 = vadd.f32 %v1040_v28, %v974_v53  ;;  %v1613_v53 = vsel %vm511_vm1, %v266_v23, 0 }
 0x279   : > { %v1276_v39 = vpop.f32.mrf.mxu1  ;;  %v11723_v45 = vand.u32 4294901760, %v1613_v53 }
 0x27a   : > { %v1186_v13 = vadd.f32 %v1185_v58, %v1041_v2 }
 0x27b   : > { %1679 = vmatmul.f32.gmra.mxu2 %v11695_v29  ;;  %v1201_v19 = vpop.f32.mrf.mxu0  ;;  %v11718_v29 = vand.u32 4294901760, %v1685_v42  ;;  %16181 = vst [vmem:[#allocation129_spill] sm:$0xff] %v11723_v45  ;;  %v11732_v42 = vsub.f32 %v1613_v53, %v11723_v45 }
 0x27c   : > { %v11711_v51 = vadd.f32 %v1268_v46, %v1186_v13  ;;  %1782 = vmatmul.f32.gmra.mxu3 %v11621_v48  ;;  %1942 = vmatmul.f32.gmra.mxu1 %v11675_v1  ;;  %v267_v1 = vld [vmem:[%s15569_s2 + $0xf8] sm:$0xff] }
 0x27d   : > { %16179 = vst [vmem:[#allocation127_spill] sm:$0xff] %v11718_v29  ;;  %v11744_v9 = vand.u32 4294901760, %v11732_v42 }
 0x27e   : > { %v981_v28 = vpop.f32.mrf.mxu2  ;;  %1859 = vmatmul.f32.gmra.mxu0 %v11661_v7  ;;  %16182 = vst [vmem:[#allocation130_spill] sm:$0xff] %v11732_v42 }
 0x27f   : > { %v982_v58 = vadd.f32 %v981_v28, %v11541_v6  ;;  %v1044_v2 = vpop.f32.mrf.mxu3  ;;  %v1693_v6 = vsub.f32 %v11709_v36, %v11721_v43  ;;  %16184 = vst [vmem:[#allocation132_spill] sm:$0xff] %v11744_v9 }
 0x280   : > { %v1045_v46 = vadd.f32 %v1044_v2, %v978_v41  ;;  %v1616_v41 = vsel %vm511_vm1, %v267_v1, 0 }
 0x281   : > { %v1542_v13 = vpop.f32.mrf.mxu1  ;;  %v11746_v53 = vand.u32 4294901760, %v1616_v41 }
 0x282   : > { %v1194_v23 = vadd.f32 %v1193_v20, %v1045_v46 }
 0x283   : > { %1687 = vmatmul.f32.gmra.mxu2 %v11718_v29  ;;  %v1475_v28 = vpop.f32.mrf.mxu0  ;;  %v11741_v29 = vand.u32 4294901760, %v1693_v6  ;;  %16185 = vst [vmem:[#allocation133_spill] sm:$0xff] %v11746_v53  ;;  %v11755_v6 = vsub.f32 %v1616_v41, %v11746_v53 }
 0x284   : > { %v11734_v7 = vadd.f32 %v1272_v31, %v1194_v23  ;;  %1786 = vmatmul.f32.gmra.mxu3 %v11649_v0  ;;  %1948 = vmatmul.f32.gmra.mxu1 %v11698_v30  ;;  %v268_v30 = vld [vmem:[%s15569_s2 + $0x100] sm:$0xff] }
 0x285   : > { %16183 = vst [vmem:[#allocation131_spill] sm:$0xff] %v11741_v29  ;;  %v11767_v11 = vand.u32 4294901760, %v11755_v6 }
 0x286   : > { %v1302_v2 = vpop.f32.mrf.mxu2  ;;  %1864 = vmatmul.f32.gmra.mxu0 %v11686_v52  ;;  %v1701_v52 = vsub.f32 %v11732_v42, %v11744_v9  ;;  %16186 = vst [vmem:[#allocation134_spill] sm:$0xff] %v11755_v6 }
 0x287   : > { %v1048_v20 = vpop.f32.mrf.mxu3  ;;  %v1303_v46 = vadd.f32 %v1302_v2, %v11548_v50  ;;  %16188 = vst [vmem:[#allocation136_spill] sm:$0xff] %v11767_v11 }
 0x288   : > { %v1049_v31 = vadd.f32 %v1048_v20, %v982_v58  ;;  %v1619_v58 = vsel %vm511_vm1, %v268_v30, 0 }
 0x289   : > { %v1546_v23 = vpop.f32.mrf.mxu1  ;;  %v11769_v41 = vand.u32 4294901760, %v1619_v58 }
 0x28a   : > { %v1202_v1 = vadd.f32 %v1201_v19, %v1049_v31 }
 0x28b   : > { %1695 = vmatmul.f32.gmra.mxu2 %v11741_v29  ;;  %v1479_v50 = vpop.f32.mrf.mxu0  ;;  %v11764_v29 = vand.u32 4294901760, %v1701_v52  ;;  %16189 = vst [vmem:[#allocation137_spill] sm:$0xff] %v11769_v41  ;;  %v11778_v52 = vsub.f32 %v1619_v58, %v11769_v41 }
 0x28c   : > { %v11757_v2 = vadd.f32 %v1276_v39, %v1202_v1  ;;  %1790 = vmatmul.f32.gmra.mxu3 %v11677_v14  ;;  %1954 = vmatmul.f32.gmra.mxu1 %v11721_v43  ;;  %v269_v43 = vld [vmem:[%s15569_s2 + $0x108] sm:$0xff] }
 0x28d   : > { %16187 = vst [vmem:[#allocation135_spill] sm:$0xff] %v11764_v29  ;;  %v11790_v25 = vand.u32 4294901760, %v11778_v52 }
 0x28e   : > { %v1307_v20 = vpop.f32.mrf.mxu2  ;;  %1869 = vmatmul.f32.gmra.mxu0 %v11709_v36  ;;  %16190 = vst [vmem:[#allocation138_spill] sm:$0xff] %v11778_v52 }
 0x28f   : > { %v1308_v19 = vadd.f32 %v1307_v20, %v11555_v32  ;;  %v1382_v31 = vpop.f32.mrf.mxu3  ;;  %v1709_v32 = vsub.f32 %v11755_v6, %v11767_v11  ;;  %16192 = vst [vmem:[#allocation140_spill] sm:$0xff] %v11790_v25 }
 0x290   : > { %v1383_v39 = vadd.f32 %v1382_v31, %v1303_v46  ;;  %v1622_v46 = vsel %vm511_vm1, %v269_v43, 0 }
 0x291   : > { %v1550_v1 = vpop.f32.mrf.mxu1  ;;  %v11792_v58 = vand.u32 4294901760, %v1622_v46 }
 0x292   : > { %v1476_v30 = vadd.f32 %v1475_v28, %v1383_v39 }
 0x293   : > { %1703 = vmatmul.f32.gmra.mxu2 %v11764_v29  ;;  %v1483_v20 = vpop.f32.mrf.mxu0  ;;  %v11787_v29 = vand.u32 4294901760, %v1709_v32  ;;  %16193 = vst [vmem:[#allocation141_spill] sm:$0xff] %v11792_v58  ;;  %v11801_v32 = vsub.f32 %v1622_v46, %v11792_v58 }
 0x294   : > { %v11780_v36 = vadd.f32 %v1542_v13, %v1476_v30  ;;  %1794 = vmatmul.f32.gmra.mxu3 %v11700_v62  ;;  %1960 = vmatmul.f32.gmra.mxu1 %v11744_v9  ;;  %v270_v9 = vld [vmem:[%s15569_s2 + $0x110] sm:$0xff] }
 0x295   : > { %16191 = vst [vmem:[#allocation139_spill] sm:$0xff] %v11787_v29  ;;  %v11813_v47 = vand.u32 4294901760, %v11801_v32 }
 0x296   : > { %v1312_v31 = vpop.f32.mrf.mxu2  ;;  %1874 = vmatmul.f32.gmra.mxu0 %v11732_v42  ;;  %16194 = vst [vmem:[#allocation142_spill] sm:$0xff] %v11801_v32 }
 0x297   : > { %v1313_v28 = vadd.f32 %v1312_v31, %v11562_v10  ;;  %v1388_v39 = vpop.f32.mrf.mxu3  ;;  %v1717_v10 = vsub.f32 %v11778_v52, %v11790_v25  ;;  %16196 = vst [vmem:[#allocation144_spill] sm:$0xff] %v11813_v47 }
 0x298   : > { %v1389_v13 = vadd.f32 %v1388_v39, %v1308_v19  ;;  %v1625_v19 = vsel %vm511_vm1, %v270_v9, 0 }
 0x299   : > { %v1554_v30 = vpop.f32.mrf.mxu1  ;;  %v11815_v46 = vand.u32 4294901760, %v1625_v19 }
 0x29a   : > { %v1480_v43 = vadd.f32 %v1479_v50, %v1389_v13 }
 0x29b   : > { %1711 = vmatmul.f32.gmra.mxu2 %v11787_v29  ;;  %v1487_v31 = vpop.f32.mrf.mxu0  ;;  %v11810_v29 = vand.u32 4294901760, %v1717_v10  ;;  %16197 = vst [vmem:[#allocation145_spill] sm:$0xff] %v11815_v46  ;;  %v11824_v10 = vsub.f32 %v1625_v19, %v11815_v46 }
 0x29c   : > { %v11803_v42 = vadd.f32 %v1546_v23, %v1480_v43  ;;  %1798 = vmatmul.f32.gmra.mxu3 %v11723_v45  ;;  %1966 = vmatmul.f32.gmra.mxu1 %v11767_v11  ;;  %v271_v11 = vld [vmem:[%s15569_s2 + $0x118] sm:$0xff] }
 0x29d   : > { %16195 = vst [vmem:[#allocation143_spill] sm:$0xff] %v11810_v29  ;;  %v11836_v21 = vand.u32 4294901760, %v11824_v10 }
 0x29e   : > { %v1317_v39 = vpop.f32.mrf.mxu2  ;;  %1879 = vmatmul.f32.gmra.mxu0 %v11755_v6  ;;  %16198 = vst [vmem:[#allocation146_spill] sm:$0xff] %v11824_v10 }
 0x29f   : > { %v1318_v50 = vadd.f32 %v1317_v39, %v11572_v63  ;;  %v1394_v13 = vpop.f32.mrf.mxu3  ;;  %v1725_v63 = vsub.f32 %v11801_v32, %v11813_v47  ;;  %16200 = vst [vmem:[#allocation148_spill] sm:$0xff] %v11836_v21 }
 0x2a0   : > { %v1395_v23 = vadd.f32 %v1394_v13, %v1313_v28  ;;  %v1628_v28 = vsel %vm511_vm1, %v271_v11, 0  ;;  %v1733_v11 = vsub.f32 %v11824_v10, %v11836_v21 }
 0x2a1   : > { %v1558_v43 = vpop.f32.mrf.mxu1  ;;  %v11838_v19 = vand.u32 4294901760, %v1628_v28 }
 0x2a2   : > { %v1484_v9 = vadd.f32 %v1483_v20, %v1395_v23 }
 0x2a3   : > { %1719 = vmatmul.f32.gmra.mxu2 %v11810_v29  ;;  %v1491_v39 = vpop.f32.mrf.mxu0  ;;  %v11833_v29 = vand.u32 4294901760, %v1725_v63  ;;  %16201 = vst [vmem:[#allocation149_spill] sm:$0xff] %v11838_v19 }
 0x2a4   : > { %v11826_v6 = vadd.f32 %v1550_v1, %v1484_v9  ;;  %1802 = vmatmul.f32.gmra.mxu3 %v11746_v53  ;;  %1972 = vmatmul.f32.gmra.mxu1 %v11790_v25 }
 0x2a5   : > { %16199 = vst [vmem:[#allocation147_spill] sm:$0xff] %v11833_v29 }
 0x2a6   : > { %v1322_v13 = vpop.f32.mrf.mxu2  ;;  %1884 = vmatmul.f32.gmra.mxu0 %v11778_v52  ;;  %v11844_v52 = vsub.f32 %v1628_v28, %v11838_v19 }
 0x2a7   : > { %v1323_v20 = vadd.f32 %v1322_v13, %v11588_v60  ;;  %v1400_v23 = vpop.f32.mrf.mxu3 }
 0x2a8   : > { %v1401_v1 = vadd.f32 %v1400_v23, %v1318_v50  ;;  %16202 = vst [vmem:[#allocation150_spill] sm:$0xff] %v11844_v52  ;;  %v272_v50 = vld [vmem:[%s15569_s2 + $0x120] sm:$0xff]  ;;  %v11855_v23 = vand.u32 4294901760, %v1733_v11  ;;  %v11858_v28 = vand.u32 4294901760, %v11844_v52 }
 0x2a9   : > { %v1562_v9 = vpop.f32.mrf.mxu1 }
 0x2aa   : > { %v1488_v24 = vadd.f32 %v1487_v31, %v1401_v1  ;;  %16203 = vst [vmem:[#allocation151_spill] sm:$0xff] %v11855_v23 }
 0x2ab   : > { %1727 = vmatmul.f32.gmra.mxu2 %v11833_v29  ;;  %v1495_v25 = vpop.f32.mrf.mxu0  ;;  %16204 = vst [vmem:[#allocation152_spill] sm:$0xff] %v11858_v28 }
 0x2ac   : > { %v11846_v60 = vadd.f32 %v1554_v30, %v1488_v24  ;;  %1806 = vmatmul.f32.gmra.mxu3 %v11769_v41  ;;  %1978 = vmatmul.f32.gmra.mxu1 %v11813_v47  ;;  %v2150_v24 = vsel %vm511_vm1, %v272_v50, 0 }
 0x2ad   : > { %v11861_v29 = vand.u32 4294901760, %v2150_v24 }
 0x2ae   : > { %v1327_v31 = vpop.f32.mrf.mxu2  ;;  %1889 = vmatmul.f32.gmra.mxu0 %v11801_v32  ;;  %v1741_v32 = vsub.f32 %v11844_v52, %v11858_v28 }
 0x2af   : > { %v1328_v63 = vadd.f32 %v1327_v31, %v11609_v5  ;;  %v1406_v13 = vpop.f32.mrf.mxu3  ;;  %16205 = vst [vmem:[#allocation153_spill] sm:$0xff] %v11861_v29 }
 0x2b0   : > { %v1407_v30 = vadd.f32 %v1406_v13, %v1323_v20  ;;  %v273_v20 = vld [vmem:[%s15569_s2 + $0x128] sm:$0xff]  ;;  %v11878_v13 = vand.u32 4294901760, %v1741_v32 }
 0x2b1   : > { %v1566_v1 = vpop.f32.mrf.mxu1 }
 0x2b2   : > { %v1492_v47 = vadd.f32 %v1491_v39, %v1407_v30  ;;  %v11875_v39 = vsub.f32 %v2150_v24, %v11861_v29  ;;  %16208 = vst [vmem:[#allocation156_spill] sm:$0xff] %v11878_v13 }
 0x2b3   : > { %1735 = vmatmul.f32.gmra.mxu2 %v11855_v23  ;;  %v1499_v35 = vpop.f32.mrf.mxu0 }
 0x2b4   : > { %v11866_v5 = vadd.f32 %v1558_v43, %v1492_v47  ;;  %1810 = vmatmul.f32.gmra.mxu3 %v11792_v58  ;;  %1984 = vmatmul.f32.gmra.mxu1 %v11836_v21  ;;  %16207 = vst [vmem:[#allocation155_spill] sm:$0xff] %v11875_v39  ;;  %v2153_v47 = vsel %vm511_vm1, %v273_v20, 0  ;;  %v11882_v23 = vand.u32 4294901760, %v11875_v39 }
 0x2b5   : > { %v11884_v33 = vand.u32 4294901760, %v2153_v47 }
 0x2b6   : > { %16206 = vst [vmem:[#allocation154_spill] sm:$0xff] %v11866_v5  ;;  %v1332_v11 = vpop.f32.mrf.mxu2  ;;  %1894 = vmatmul.f32.gmra.mxu0 %v11824_v10 }
 0x2b7   : > { %v1333_v50 = vadd.f32 %v1332_v11, %v11632_v8  ;;  %v1412_v31 = vpop.f32.mrf.mxu3  ;;  %16209 = vst [vmem:[#allocation157_spill] sm:$0xff] %v11882_v23  ;;  %v274_v8 = vld [vmem:[%s15569_s2 + $0x130] sm:$0xff] }
 0x2b8   : > { %v1413_v43 = vadd.f32 %v1412_v31, %v1328_v63  ;;  %16210 = vst [vmem:[#allocation158_spill] sm:$0xff] %v11884_v33  ;;  %v11898_v63 = vsub.f32 %v2153_v47, %v11884_v33  ;;  %v2156_v20 = vsel %vm511_vm1, %v274_v8, 0 }
 0x2b9   : > { %v1570_v30 = vpop.f32.mrf.mxu1 }
 0x2ba   : > { %v1496_v21 = vadd.f32 %v1495_v25, %v1413_v43  ;;  %v2208_v25 = vsub.f32 %v11875_v39, %v11882_v23  ;;  %16212 = vst [vmem:[#allocation160_spill] sm:$0xff] %v11898_v63 }
 0x2bb   : > { %1743 = vmatmul.f32.gmra.mxu2 %v11878_v13  ;;  %v1503_v10 = vpop.f32.mrf.mxu0  ;;  %v11905_v13 = vand.u32 4294901760, %v11898_v63 }
 0x2bc   : > { %v11887_v24 = vadd.f32 %v1562_v9, %v1496_v21  ;;  %1814 = vmatmul.f32.gmra.mxu3 %v11815_v46  ;;  %1990 = vmatmul.f32.gmra.mxu1 %v11858_v28  ;;  %v11902_v28 = vand.u32 4294901760, %v2208_v25 }
 0x2bd   : > { %16214 = vst [vmem:[#allocation162_spill] sm:$0xff] %v11905_v13  ;;  %v2216_v8 = vsub.f32 %v11898_v63, %v11905_v13 }
 0x2be   : > { %16211 = vst [vmem:[#allocation159_spill] sm:$0xff] %v11887_v24  ;;  %v1337_v32 = vpop.f32.mrf.mxu2  ;;  %1899 = vmatmul.f32.gmra.mxu0 %v11844_v52  ;;  %v11907_v52 = vand.u32 4294901760, %v2156_v20 }
 0x2bf   : > { %v1338_v21 = vadd.f32 %v1337_v32, %v11663_v17  ;;  %v1418_v9 = vpop.f32.mrf.mxu3  ;;  %16213 = vst [vmem:[#allocation161_spill] sm:$0xff] %v11902_v28  ;;  %v275_v17 = vld [vmem:[%s15569_s2 + $0x138] sm:$0xff]  ;;  %v11931_v38 = vand.u32 4294901760, %v2216_v8 }
 0x2c0   : > { %v1419_v11 = vadd.f32 %v1418_v9, %v1333_v50  ;;  %16215 = vst [vmem:[#allocation163_spill] sm:$0xff] %v11907_v52  ;;  %v2159_v9 = vsel %vm511_vm1, %v275_v17, 0 }
 0x2c1   : > { %v1574_v31 = vpop.f32.mrf.mxu1  ;;  %16222 = vst [vmem:[#allocation165_spill] sm:$0xff] %v11931_v38 }
 0x2c2   : > { %v1500_v43 = vadd.f32 %v1499_v35, %v1419_v11  ;;  %v16217_v35 = vld [vmem:[#allocation2_spill] sm:$0xff]  ;;  %v16219_v11 = vld [vmem:[#allocation4_spill] sm:$0xff] }
 0x2c3   : > { %2017 = vmatmul.f32.vlgmr.msrb.gmra.mxu2 %v11579_v56  ;;  %v1507_v34 = vpop.f32.mrf.mxu0 }
 0x2c4   : > { %v11910_v47 = vadd.f32 %v1566_v1, %v1500_v43  ;;  %1818 = vmatmul.f32.gmra.mxu3 %v11838_v19  ;;  %2329 = vmatmul.f32.vlgmr.msra.gmra.mxu1 %v11861_v29  ;;  %v11923_v1 = vsub.f32 %v2156_v20, %v11907_v52  ;;  %v16220_v43 = vld [vmem:[#allocation3_spill] sm:$0xff] }
 0x2c5   : > { %3081 = vmatpush.msrb.mxu2 %v16217_v35  ;;  %3182 = vmatpush.msra.mxu1 %v16217_v35 }
 0x2c6   : > { %16216 = vst [vmem:[#allocation164_spill] sm:$0xff] %v11910_v47  ;;  %v1342_v50 = vpop.f32.mrf.mxu2  ;;  %2210 = vmatmul.f32.vlgmr.msra.gmra.mxu0 %v11902_v28  ;;  %v16221_v28 = vld [vmem:[#allocation5_spill] sm:$0xff]  ;;  %v11934_v20 = vand.u32 4294901760, %v11923_v1 }
 0x2c7   : > { %16218 = vst [vmem:[#allocation2_spill] sm:$0xff] %v11923_v1  ;;  %v1343_v32 = vadd.f32 %v1342_v50, %v11688_v27  ;;  %v1424_v25 = vpop.f32.mrf.mxu3  ;;  %3152 = vmatpush.msra.mxu0 %v16219_v11  ;;  %3083 = vmatpush.msrb.mxu2 %v16220_v43  ;;  %v11936_v27 = vand.u32 4294901760, %v2159_v9  ;;  %v16228_v11 = vld [vmem:[#allocation9_spill] sm:$0xff] }
 0x2c8   : > { %v1425_v44 = vadd.f32 %v1424_v25, %v1338_v21  ;;  %3184 = vmatpush.msra.mxu1 %v16220_v43  ;;  %16223 = vst [vmem:[#allocation166_spill] sm:$0xff] %v11934_v20  ;;  %v2224_v8 = vsub.f32 %v11923_v1, %v11934_v20 }
 0x2c9   : > { %v1578_v54 = vpop.f32.mrf.mxu1  ;;  %3155 = vmatpush.msra.mxu0 %v16221_v28  ;;  %16224 = vst [vmem:[#allocation167_spill] sm:$0xff] %v11936_v27  ;;  %v11951_v25 = vsub.f32 %v2159_v9, %v11936_v27 }
 0x2ca   : > { %v1504_v59 = vadd.f32 %v1503_v10, %v1425_v44  ;;  %v276_v44 = vld [vmem:[%s15569_s2 + $0x140] sm:$0xff]  ;;  %v16226_v10 = vld [vmem:[#allocation8_spill] sm:$0xff] }
 0x2cb   : > { %2021 = vmatmul.f32.gmra.mxu2 %v11598_v4  ;;  %v1511_v17 = vpop.f32.mrf.mxu0  ;;  %16227 = vst [vmem:[#allocation169_spill] sm:$0xff] %v11951_v25  ;;  %v2162_v28 = vsel %vm511_vm1, %v276_v44, 0 }
 0x2cc   : > { %v11939_v50 = vadd.f32 %v1570_v30, %v1504_v59  ;;  %2084 = vmatmul.f32.vlgmr.msrb.gmra.mxu3 %v11579_v56  ;;  %2333 = vmatmul.f32.gmra.mxu1 %v11884_v33  ;;  %v11961_v18 = vand.u32 4294901760, %v2162_v28 }
 0x2cd   : > { %3120 = vmatpush.msrb.mxu3 %v16226_v10  ;;  %v11956_v10 = vand.u32 4294901760, %v2224_v8 }
 0x2ce   : > { %16225 = vst [vmem:[#allocation168_spill] sm:$0xff] %v11939_v50  ;;  %v1347_v21 = vpop.f32.mrf.mxu2  ;;  %2218 = vmatmul.f32.gmra.mxu0 %v11931_v38  ;;  %v11959_v38 = vand.u32 4294901760, %v11951_v25 }
 0x2cf   : > { %v1348_v59 = vadd.f32 %v1347_v21, %v11711_v51  ;;  %v1430_v30 = vpop.f32.mrf.mxu3  ;;  %3126 = vmatpush.msrb.mxu3 %v16228_v11  ;;  %16229 = vst [vmem:[#allocation170_spill] sm:$0xff] %v11956_v10 }
 0x2d0   : > { %v1431_v56 = vadd.f32 %v1430_v30, %v1343_v32  ;;  %16230 = vst [vmem:[#allocation171_spill] sm:$0xff] %v11959_v38  ;;  %v2232_v51 = vsub.f32 %v11951_v25, %v11959_v38  ;;  %v11975_v32 = vsub.f32 %v2162_v28, %v11961_v18 }
 0x2d1   : > { %v1582_v3 = vpop.f32.mrf.mxu1  ;;  %16231 = vst [vmem:[#allocation172_spill] sm:$0xff] %v11961_v18 }
 0x2d2   : > { %v1508_v15 = vadd.f32 %v1507_v34, %v1431_v56  ;;  %v277_v34 = vld [vmem:[%s15569_s2 + $0x148] sm:$0xff]  ;;  %16233 = vst [vmem:[#allocation174_spill] sm:$0xff] %v11975_v32  ;;  %v11979_v11 = vand.u32 4294901760, %v2232_v51 }
 0x2d3   : > { %2025 = vmatmul.f32.gmra.mxu2 %v11621_v48  ;;  %v1515_v9 = vpop.f32.mrf.mxu0  ;;  %v2165_v44 = vsel %vm511_vm1, %v277_v34, 0 }
 0x2d4   : > { %v11964_v49 = vadd.f32 %v1574_v31, %v1508_v15  ;;  %2088 = vmatmul.f32.gmra.mxu3 %v11598_v4  ;;  %2337 = vmatmul.f32.gmra.mxu1 %v11907_v52  ;;  %16234 = vst [vmem:[#allocation175_spill] sm:$0xff] %v11979_v11  ;;  %v11982_v4 = vand.u32 4294901760, %v11975_v32 }
 0x2d6   : > { %16232 = vst [vmem:[#allocation173_spill] sm:$0xff] %v11964_v49  ;;  %v1352_v56 = vpop.f32.mrf.mxu2  ;;  %2226 = vmatmul.f32.gmra.mxu0 %v11956_v10  ;;  %v11984_v10 = vand.u32 4294901760, %v2165_v44 }
 0x2d7   : > { %v1353_v15 = vadd.f32 %v1352_v56, %v11734_v7  ;;  %v1436_v31 = vpop.f32.mrf.mxu3  ;;  %16235 = vst [vmem:[#allocation176_spill] sm:$0xff] %v11982_v4  ;;  %v278_v7 = vld [vmem:[%s15569_s2 + $0x150] sm:$0xff] }
 0x2d8   : > { %v1437_v21 = vadd.f32 %v1436_v31, %v1348_v59  ;;  %16236 = vst [vmem:[#allocation177_spill] sm:$0xff] %v11984_v10  ;;  %v2240_v59 = vsub.f32 %v11975_v32, %v11982_v4  ;;  %v11998_v34 = vsub.f32 %v2165_v44, %v11984_v10  ;;  %v2168_v51 = vsel %vm511_vm1, %v278_v7, 0 }
 0x2d9   : > { %v1586_v8 = vpop.f32.mrf.mxu1 }
 0x2da   : > { %v1512_v30 = vadd.f32 %v1511_v17, %v1437_v21  ;;  %16238 = vst [vmem:[#allocation179_spill] sm:$0xff] %v11998_v34  ;;  %v12005_v57 = vand.u32 4294901760, %v11998_v34 }
 0x2db   : > { %2029 = vmatmul.f32.gmra.mxu2 %v11649_v0  ;;  %v1519_v55 = vpop.f32.mrf.mxu0 }
 0x2dc   : > { %v11987_v28 = vadd.f32 %v1578_v54, %v1512_v30  ;;  %2092 = vmatmul.f32.gmra.mxu3 %v11621_v48  ;;  %2341 = vmatmul.f32.gmra.mxu1 %v11936_v27  ;;  %v12002_v48 = vand.u32 4294901760, %v2240_v59  ;;  %16240 = vst [vmem:[#allocation181_spill] sm:$0xff] %v12005_v57 }
 0x2de   : > { %16237 = vst [vmem:[#allocation178_spill] sm:$0xff] %v11987_v28  ;;  %v1357_v17 = vpop.f32.mrf.mxu2  ;;  %2234 = vmatmul.f32.gmra.mxu0 %v11979_v11  ;;  %v12007_v11 = vand.u32 4294901760, %v2168_v51 }
 0x2df   : > { %v1358_v54 = vadd.f32 %v1357_v17, %v11757_v2  ;;  %v1442_v56 = vpop.f32.mrf.mxu3  ;;  %16239 = vst [vmem:[#allocation180_spill] sm:$0xff] %v12002_v48  ;;  %v279_v2 = vld [vmem:[%s15569_s2 + $0x158] sm:$0xff] }
 0x2e0   : > { %v1443_v31 = vadd.f32 %v1442_v56, %v1353_v15  ;;  %16241 = vst [vmem:[#allocation182_spill] sm:$0xff] %v12007_v11  ;;  %v2248_v15 = vsub.f32 %v11998_v34, %v12005_v57  ;;  %v12021_v7 = vsub.f32 %v2168_v51, %v12007_v11 }
 0x2e1   : > { %v1925_v21 = vpop.f32.mrf.mxu1 }
 0x2e2   : > { %v1516_v30 = vadd.f32 %v1515_v9, %v1443_v31  ;;  %16243 = vst [vmem:[#allocation184_spill] sm:$0xff] %v12021_v7 }
 0x2e3   : > { %2033 = vmatmul.f32.gmra.mxu2 %v11677_v14  ;;  %v1845_v61 = vpop.f32.mrf.mxu0 }
 0x2e4   : > { %v12010_v44 = vadd.f32 %v1582_v3, %v1516_v30  ;;  %2096 = vmatmul.f32.gmra.mxu3 %v11649_v0  ;;  %2345 = vmatmul.f32.gmra.mxu1 %v11961_v18  ;;  %v2171_v3 = vsel %vm511_vm1, %v279_v2, 0  ;;  %v12024_v30 = vand.u32 4294901760, %v2248_v15  ;;  %v12027_v0 = vand.u32 4294901760, %v12021_v7 }
 0x2e5   : > { %v12029_v26 = vand.u32 4294901760, %v2171_v3 }
 0x2e6   : > { %16242 = vst [vmem:[#allocation183_spill] sm:$0xff] %v12010_v44  ;;  %v1656_v9 = vpop.f32.mrf.mxu2  ;;  %2242 = vmatmul.f32.gmra.mxu0 %v12002_v48  ;;  %v2256_v51 = vsub.f32 %v12021_v7, %v12027_v0 }
 0x2e7   : > { %v1448_v17 = vpop.f32.mrf.mxu3  ;;  %16244 = vst [vmem:[#allocation185_spill] sm:$0xff] %v12024_v30  ;;  %v12043_v2 = vsub.f32 %v2171_v3, %v12029_v26 }
 0x2e8   : > { %v1449_v59 = vadd.f32 %v1448_v17, %v1358_v54  ;;  %16245 = vst [vmem:[#allocation186_spill] sm:$0xff] %v12027_v0 }
 0x2e9   : > { %v1931_v56 = vpop.f32.mrf.mxu1  ;;  %16246 = vst [vmem:[#allocation187_spill] sm:$0xff] %v12029_v26  ;;  %v12049_v22 = vand.u32 4294901760, %v12043_v2 }
 0x2ea   : > { %v1520_v31 = vadd.f32 %v1519_v55, %v1449_v59  ;;  %v280_v55 = vld [vmem:[%s15569_s2 + $0x160] sm:$0xff]  ;;  %16248 = vst [vmem:[#allocation189_spill] sm:$0xff] %v12043_v2 }
 0x2eb   : > { %2037 = vmatmul.f32.gmra.mxu2 %v11700_v62  ;;  %v1850_v48 = vpop.f32.mrf.mxu0  ;;  %16250 = vst [vmem:[#allocation191_spill] sm:$0xff] %v12049_v22  ;;  %v2264_v3 = vsub.f32 %v12043_v2, %v12049_v22 }
 0x2ec   : > { %v12032_v37 = vadd.f32 %v1586_v8, %v1520_v31  ;;  %2100 = vmatmul.f32.gmra.mxu3 %v11677_v14  ;;  %2349 = vmatmul.f32.gmra.mxu1 %v11984_v10  ;;  %v2174_v8 = vsel %vm511_vm1, %v280_v55, 0  ;;  %v12046_v14 = vand.u32 4294901760, %v2256_v51 }
 0x2ed   : > { %v12051_v12 = vand.u32 4294901760, %v2174_v8 }
 0x2ee   : > { %16247 = vst [vmem:[#allocation188_spill] sm:$0xff] %v12032_v37  ;;  %v1664_v54 = vpop.f32.mrf.mxu2  ;;  %2250 = vmatmul.f32.gmra.mxu0 %v12024_v30 }
 0x2ef   : > { %v1775_v15 = vpop.f32.mrf.mxu3  ;;  %16249 = vst [vmem:[#allocation190_spill] sm:$0xff] %v12046_v14  ;;  %v12065_v55 = vsub.f32 %v2174_v8, %v12051_v12 }
 0x2f0   : > { %v1776_v17 = vadd.f32 %v1775_v15, %v1656_v9  ;;  %16251 = vst [vmem:[#allocation192_spill] sm:$0xff] %v12051_v12 }
 0x2f1   : > { %v1937_v59 = vpop.f32.mrf.mxu1  ;;  %16252 = vst [vmem:[#allocation193_spill] sm:$0xff] %v12065_v55  ;;  %v12071_v16 = vand.u32 4294901760, %v12065_v55 }
 0x2f2   : > { %v1846_v31 = vadd.f32 %v1845_v61, %v1776_v17  ;;  %v281_v61 = vld [vmem:[%s15569_s2 + $0x168] sm:$0xff] }
 0x2f3   : > { %2041 = vmatmul.f32.gmra.mxu2 %v11723_v45  ;;  %v1855_v30 = vpop.f32.mrf.mxu0  ;;  %16254 = vst [vmem:[#allocation195_spill] sm:$0xff] %v12071_v16  ;;  %v2272_v8 = vsub.f32 %v12065_v55, %v12071_v16 }
 0x2f4   : > { %v12054_v40 = vadd.f32 %v1925_v21, %v1846_v31  ;;  %2104 = vmatmul.f32.gmra.mxu3 %v11700_v62  ;;  %2353 = vmatmul.f32.gmra.mxu1 %v12007_v11  ;;  %v2177_v21 = vsel %vm511_vm1, %v281_v61, 0  ;;  %v12068_v62 = vand.u32 4294901760, %v2264_v3 }
 0x2f5   : > { %v12073_v37 = vand.u32 4294901760, %v2177_v21 }
 0x2f6   : > { %v1672_v9 = vpop.f32.mrf.mxu2  ;;  %2258 = vmatmul.f32.gmra.mxu0 %v12046_v14  ;;  %16253 = vst [vmem:[#allocation194_spill] sm:$0xff] %v12068_v62 }
 0x2f7   : > { %v1779_v51 = vpop.f32.mrf.mxu3  ;;  %16255 = vst [vmem:[#allocation196_spill] sm:$0xff] %v12073_v37  ;;  %v12087_v61 = vsub.f32 %v2177_v21, %v12073_v37 }
 0x2f8   : > { %v1780_v15 = vadd.f32 %v1779_v51, %v1664_v54 }
 0x2f9   : > { %v1943_v17 = vpop.f32.mrf.mxu1  ;;  %16256 = vst [vmem:[#allocation197_spill] sm:$0xff] %v12087_v61  ;;  %v12093_v28 = vand.u32 4294901760, %v12087_v61 }
 0x2fa   : > { %v1851_v31 = vadd.f32 %v1850_v48, %v1780_v15  ;;  %v282_v48 = vld [vmem:[%s15569_s2 + $0x170] sm:$0xff] }
 0x2fb   : > { %2045 = vmatmul.f32.gmra.mxu2 %v11746_v53  ;;  %v1860_v14 = vpop.f32.mrf.mxu0  ;;  %16258 = vst [vmem:[#allocation199_spill] sm:$0xff] %v12093_v28  ;;  %v2280_v21 = vsub.f32 %v12087_v61, %v12093_v28 }
 0x2fc   : > { %v12076_v44 = vadd.f32 %v1931_v56, %v1851_v31  ;;  %2108 = vmatmul.f32.gmra.mxu3 %v11723_v45  ;;  %2357 = vmatmul.f32.gmra.mxu1 %v12029_v26  ;;  %v2180_v56 = vsel %vm511_vm1, %v282_v48, 0  ;;  %v12090_v45 = vand.u32 4294901760, %v2272_v8 }
 0x2fd   : > { %v12095_v49 = vand.u32 4294901760, %v2180_v56 }
 0x2fe   : > { %v1680_v54 = vpop.f32.mrf.mxu2  ;;  %2266 = vmatmul.f32.gmra.mxu0 %v12068_v62  ;;  %16257 = vst [vmem:[#allocation198_spill] sm:$0xff] %v12090_v45 }
 0x2ff   : > { %v1783_v3 = vpop.f32.mrf.mxu3  ;;  %16259 = vst [vmem:[#allocation200_spill] sm:$0xff] %v12095_v49  ;;  %v12109_v48 = vsub.f32 %v2180_v56, %v12095_v49 }
 0x300   : > { %v1784_v51 = vadd.f32 %v1783_v3, %v1672_v9 }
 0x301   : > { %v1949_v15 = vpop.f32.mrf.mxu1  ;;  %16260 = vst [vmem:[#allocation201_spill] sm:$0xff] %v12109_v48  ;;  %v12115_v47 = vand.u32 4294901760, %v12109_v48 }
 0x302   : > { %v1856_v31 = vadd.f32 %v1855_v30, %v1784_v51  ;;  %v283_v30 = vld [vmem:[%s15569_s2 + $0x178] sm:$0xff] }
 0x303   : > { %2049 = vmatmul.f32.gmra.mxu2 %v11769_v41  ;;  %v1865_v62 = vpop.f32.mrf.mxu0  ;;  %16262 = vst [vmem:[#allocation203_spill] sm:$0xff] %v12115_v47 }
 0x304   : > { %v12098_v50 = vadd.f32 %v1937_v59, %v1856_v31  ;;  %2112 = vmatmul.f32.gmra.mxu3 %v11746_v53  ;;  %2361 = vmatmul.f32.gmra.mxu1 %v12051_v12  ;;  %v2183_v59 = vsel %vm511_vm1, %v283_v30, 0  ;;  %v12112_v53 = vand.u32 4294901760, %v2280_v21 }
 0x305   : > { %v12117_v24 = vand.u32 4294901760, %v2183_v59 }
 0x306   : > { %v1688_v9 = vpop.f32.mrf.mxu2  ;;  %2274 = vmatmul.f32.gmra.mxu0 %v12090_v45  ;;  %16261 = vst [vmem:[#allocation202_spill] sm:$0xff] %v12112_v53 }
 0x307   : > { %v1787_v8 = vpop.f32.mrf.mxu3  ;;  %16263 = vst [vmem:[#allocation204_spill] sm:$0xff] %v12117_v24 }
 0x308   : > { %v1788_v3 = vadd.f32 %v1787_v8, %v1680_v54  ;;  %v12128_v54 = vsub.f32 %v2183_v59, %v12117_v24 }
 0x309   : > { %v1955_v51 = vpop.f32.mrf.mxu1 }
 0x30a   : > { %v1861_v31 = vadd.f32 %v1860_v14, %v1788_v3  ;;  %v2288_v14 = vsub.f32 %v12109_v48, %v12115_v47  ;;  %16264 = vst [vmem:[#allocation205_spill] sm:$0xff] %v12128_v54 }
 0x30b   : > { %2053 = vmatmul.f32.gmra.mxu2 %v11792_v58  ;;  %v1870_v45 = vpop.f32.mrf.mxu0 }
 0x30c   : > { %v12120_v28 = vadd.f32 %v1943_v17, %v1861_v31  ;;  %2116 = vmatmul.f32.gmra.mxu3 %v11769_v41  ;;  %2365 = vmatmul.f32.gmra.mxu1 %v12073_v37  ;;  %v12130_v5 = vand.u32 4294901760, %v2288_v14  ;;  %v12133_v17 = vand.u32 4294901760, %v12128_v54 }
 0x30e   : > { %v1696_v56 = vpop.f32.mrf.mxu2  ;;  %2282 = vmatmul.f32.gmra.mxu0 %v12112_v53  ;;  %16265 = vst [vmem:[#allocation206_spill] sm:$0xff] %v12130_v5 }
 0x30f   : > { %v1791_v30 = vpop.f32.mrf.mxu3  ;;  %16266 = vst [vmem:[#allocation207_spill] sm:$0xff] %v12133_v17 }
 0x310   : > { %v1792_v21 = vadd.f32 %v1791_v30, %v1688_v9 }
 0x311   : > { %v1961_v8 = vpop.f32.mrf.mxu1 }
 0x312   : > { %v1866_v3 = vadd.f32 %v1865_v62, %v1792_v21  ;;  %v2296_v62 = vsub.f32 %v12128_v54, %v12133_v17 }
 0x313   : > { %2057 = vmatmul.f32.gmra.mxu2 %v11815_v46  ;;  %v1875_v31 = vpop.f32.mrf.mxu0 }
 0x314   : > { %v12136_v41 = vadd.f32 %v1949_v15, %v1866_v3  ;;  %2120 = vmatmul.f32.gmra.mxu3 %v11792_v58  ;;  %2369 = vmatmul.f32.gmra.mxu1 %v12095_v49  ;;  %v12143_v53 = vand.u32 4294901760, %v2296_v62 }
 0x316   : > { %v1704_v59 = vpop.f32.mrf.mxu2  ;;  %2290 = vmatmul.f32.gmra.mxu0 %v12130_v5  ;;  %16267 = vst [vmem:[#allocation208_spill] sm:$0xff] %v12143_v53 }
 0x317   : > { %v1795_v9 = vpop.f32.mrf.mxu3 }
 0x318   : > { %v1796_v14 = vadd.f32 %v1795_v9, %v1696_v56 }
 0x319   : > { %v1967_v30 = vpop.f32.mrf.mxu1 }
 0x31a   : > { %v1871_v21 = vadd.f32 %v1870_v45, %v1796_v14 }
 0x31b   : > { %2061 = vmatmul.f32.gmra.mxu2 %v11838_v19  ;;  %v1880_v15 = vpop.f32.mrf.mxu0 }
 0x31c   : > { %v12146_v3 = vadd.f32 %v1955_v51, %v1871_v21  ;;  %2124 = vmatmul.f32.gmra.mxu3 %v11815_v46  ;;  %2373 = vmatmul.f32.gmra.mxu1 %v12117_v24  ;;  %v16268_v51 = vld [vmem:[#allocation6_spill] sm:$0xff]  ;;  %v16269_v21 = vld [vmem:[#allocation7_spill] sm:$0xff] }
 0x31e   : > { %v1712_v58 = vpop.f32.mrf.mxu2  ;;  %2298 = vmatmul.f32.gmra.mxu0 %v12143_v53 }
 0x31f   : > { %v1799_v5 = vpop.f32.mrf.mxu3 }
 0x320   : > { %v1800_v17 = vadd.f32 %v1799_v5, %v1704_v59 }
 0x321   : > { %v1973_v47 = vpop.f32.mrf.mxu1 }
 0x322   : > { %v1876_v56 = vadd.f32 %v1875_v31, %v1800_v17 }
 0x323   : > { %2399 = vmatmul.f32.vlgmr.msra.gmra.mxu2 %v11875_v39  ;;  %v1885_v45 = vpop.f32.mrf.mxu0 }
 0x324   : > { %v12152_v62 = vadd.f32 %v1961_v8, %v1876_v56  ;;  %2128 = vmatmul.f32.gmra.mxu3 %v11838_v19  ;;  %2639 = vmatmul.f32.vlgmr.msrb.gmra.mxu1 %v11861_v29 }
 0x325   : > { %3215 = vmatpush.msra.mxu2 %v16268_v51 }
 0x326   : > { %v1720_v9 = vpop.f32.mrf.mxu2  ;;  %2572 = vmatmul.f32.vlgmr.msrb.gmra.mxu0 %v11861_v29 }
 0x327   : > { %v1803_v14 = vpop.f32.mrf.mxu3  ;;  %3219 = vmatpush.msra.mxu2 %v16269_v21 }
 0x328   : > { %v1804_v5 = vadd.f32 %v1803_v14, %v1712_v58 }
 0x329   : > { %v1979_v59 = vpop.f32.mrf.mxu1 }
 0x32a   : > { %v1881_v17 = vadd.f32 %v1880_v15, %v1804_v5 }
 0x32b   : > { %2404 = vmatmul.f32.gmra.mxu2 %v11898_v63  ;;  %v1890_v31 = vpop.f32.mrf.mxu0 }
 0x32c   : > { %v12160_v8 = vadd.f32 %v1967_v30, %v1881_v17  ;;  %2479 = vmatmul.f32.vlgmr.msra.gmra.mxu3 %v11882_v23  ;;  %2643 = vmatmul.f32.gmra.mxu1 %v11884_v33 }
 0x32d   : > { %3244 = vmatpush.msra.mxu3 %v16217_v35 }
 0x32e   : > { %v1728_v56 = vpop.f32.mrf.mxu2  ;;  %2576 = vmatmul.f32.gmra.mxu0 %v11884_v33 }
 0x32f   : > { %v1807_v51 = vpop.f32.mrf.mxu3  ;;  %3246 = vmatpush.msra.mxu3 %v16220_v43 }
 0x330   : > { %v1808_v58 = vadd.f32 %v1807_v51, %v1720_v9 }
 0x331   : > { %v1985_v14 = vpop.f32.mrf.mxu1 }
 0x332   : > { %v1886_v15 = vadd.f32 %v1885_v45, %v1808_v58 }
 0x333   : > { %2409 = vmatmul.f32.gmra.mxu2 %v11923_v1  ;;  %v1895_v5 = vpop.f32.mrf.mxu0 }
 0x334   : > { %v12168_v30 = vadd.f32 %v1973_v47, %v1886_v15  ;;  %2485 = vmatmul.f32.gmra.mxu3 %v11905_v13  ;;  %2647 = vmatmul.f32.gmra.mxu1 %v11907_v52 }
 0x336   : > { %v1736_v17 = vpop.f32.mrf.mxu2  ;;  %2580 = vmatmul.f32.gmra.mxu0 %v11907_v52 }
 0x337   : > { %v1811_v23 = vpop.f32.mrf.mxu3 }
 0x338   : > { %v1812_v63 = vadd.f32 %v1811_v23, %v1728_v56 }
 0x339   : > { %v1991_v21 = vpop.f32.mrf.mxu1 }
 0x33a   : > { %v1891_v39 = vadd.f32 %v1890_v31, %v1812_v63 }
 0x33b   : > { %2414 = vmatmul.f32.gmra.mxu2 %v11951_v25  ;;  %v1900_v51 = vpop.f32.mrf.mxu0 }
 0x33c   : > { %v12174_v45 = vadd.f32 %v1979_v59, %v1891_v39  ;;  %2491 = vmatmul.f32.gmra.mxu3 %v11934_v20  ;;  %2651 = vmatmul.f32.gmra.mxu1 %v11936_v27 }
 0x33e   : > { %v1744_v47 = vpop.f32.mrf.mxu2  ;;  %2584 = vmatmul.f32.gmra.mxu0 %v11936_v27 }
 0x33f   : > { %v1815_v9 = vpop.f32.mrf.mxu3 }
 0x340   : > { %v1816_v58 = vadd.f32 %v1815_v9, %v1736_v17 }
 0x341   : > { %v12179_v15 = vpop.f32.mrf.mxu1 }
 0x342   : > { %v1896_v13 = vadd.f32 %v1895_v5, %v1816_v58 }
 0x343   : > { %2419 = vmatmul.f32.gmra.mxu2 %v11975_v32  ;;  %v12182_v23 = vpop.f32.mrf.mxu0 }
 0x344   : > { %v12184_v63 = vadd.f32 %v1985_v14, %v1896_v13  ;;  %2497 = vmatmul.f32.gmra.mxu3 %v11959_v38  ;;  %2655 = vmatmul.f32.gmra.mxu1 %v11961_v18 }
 0x346   : > { %v2018_v39 = vpop.f32.mrf.mxu2  ;;  %2588 = vmatmul.f32.gmra.mxu0 %v11961_v18 }
 0x347   : > { %v1819_v59 = vpop.f32.mrf.mxu3  ;;  %v2019_v31 = vadd.f32 %v2018_v39, %v12054_v40 }
 0x348   : > { %v1820_v56 = vadd.f32 %v1819_v59, %v1744_v47 }
 0x349   : > { %v12190_v17 = vpop.f32.mrf.mxu1 }
 0x34a   : > { %v1901_v5 = vadd.f32 %v1900_v51, %v1820_v56 }
 0x34b   : > { %2424 = vmatmul.f32.gmra.mxu2 %v11998_v34  ;;  %v12193_v9 = vpop.f32.mrf.mxu0 }
 0x34c   : > { %v12195_v13 = vadd.f32 %v1991_v21, %v1901_v5  ;;  %2503 = vmatmul.f32.gmra.mxu3 %v11982_v4  ;;  %2659 = vmatmul.f32.gmra.mxu1 %v11984_v10 }
 0x34e   : > { %v2022_v14 = vpop.f32.mrf.mxu2  ;;  %2592 = vmatmul.f32.gmra.mxu0 %v11984_v10 }
 0x34f   : > { %v2023_v58 = vadd.f32 %v2022_v14, %v12076_v44  ;;  %v2085_v40 = vpop.f32.mrf.mxu3 }
 0x350   : > { %v2086_v47 = vadd.f32 %v2085_v40, %v2019_v31 }
 0x351   : > { %v12201_v39 = vpop.f32.mrf.mxu1 }
 0x352   : > { %16270 = vst [vmem:[#allocation209_spill] sm:$0xff] %v12201_v39  ;;  %v12204_v51 = vadd.f32 %v2086_v47, %v11780_v36 }
 0x353   : > { %2429 = vmatmul.f32.gmra.mxu2 %v12021_v7  ;;  %v12207_v21 = vpop.f32.mrf.mxu0 }
 0x354   : > { %16271 = vst [vmem:[#allocation210_spill] sm:$0xff] %v12207_v21  ;;  %2509 = vmatmul.f32.gmra.mxu3 %v12005_v57  ;;  %2663 = vmatmul.f32.gmra.mxu1 %v12007_v11 }
 0x356   : > { %v2026_v59 = vpop.f32.mrf.mxu2  ;;  %2596 = vmatmul.f32.gmra.mxu0 %v12007_v11 }
 0x357   : > { %v2027_v44 = vadd.f32 %v2026_v59, %v12098_v50  ;;  %v2089_v56 = vpop.f32.mrf.mxu3 }
 0x358   : > { %v2090_v31 = vadd.f32 %v2089_v56, %v2023_v58 }
 0x359   : > { %v12213_v5 = vpop.f32.mrf.mxu1 }
 0x35a   : > { %16272 = vst [vmem:[#allocation211_spill] sm:$0xff] %v12213_v5  ;;  %v12216_v36 = vadd.f32 %v2090_v31, %v11803_v42  ;;  %v3060_v31 = vld.sshfl [vmem:[#allocation1] sm:$0xff pattern:$0x75316420]  ;;  %v10776_v5 = vld [vmem:[%s10920_s26 + $0x8] sm:$0xf] }
 0x35b   : > { %2434 = vmatmul.f32.gmra.mxu2 %v12043_v2  ;;  %v12219_v14 = vpop.f32.mrf.mxu0  ;;  %5600 = vst [vmem:[#allocation1] ss:$2 sm:$0xff] %v10776_v5  ;;  %v3062_v5 = vsel %vm309_vm0, %v3060_v31, 0  ;;  %v16284_v31 = vld [vmem:[#allocation199_spill] sm:$0xff] }
 0x35c   : > { %16273 = vst [vmem:[#allocation212_spill] sm:$0xff] %v12219_v14  ;;  %2515 = vmatmul.f32.gmra.mxu3 %v12027_v0  ;;  %2667 = vmatmul.f32.gmra.mxu1 %v12029_v26  ;;  %v10777_v14 = vld [vmem:[%s10920_s26 + $0x18] sm:$0xf] }
 0x35d   : > { %5602 = vst [vmem:[#allocation1 + $0x1] ss:$2 sm:$0xff] %v10777_v14 }
 0x35e   : > { %v2030_v40 = vpop.f32.mrf.mxu2  ;;  %2600 = vmatmul.f32.gmra.mxu0 %v12029_v26 }
 0x35f   : > { %v2031_v50 = vadd.f32 %v2030_v40, %v12120_v28  ;;  %v2093_v58 = vpop.f32.mrf.mxu3 }
 0x360   : > { %v2094_v47 = vadd.f32 %v2093_v58, %v2027_v44 }
 0x361   : > { %v12225_v59 = vpop.f32.mrf.mxu1 }
 0x362   : > { %16274 = vst [vmem:[#allocation213_spill] sm:$0xff] %v12225_v59  ;;  %v12228_v42 = vadd.f32 %v2094_v47, %v11826_v6  ;;  %v3061_v59 = vld.sshfl [vmem:[#allocation1 + $0x10] sm:$0xff pattern:$0x75316420] }
 0x363   : > { %2439 = vmatmul.f32.gmra.mxu2 %v12065_v55  ;;  %v12231_v56 = vpop.f32.mrf.mxu0 }
 0x364   : > { %16275 = vst [vmem:[#allocation214_spill] sm:$0xff] %v12228_v42  ;;  %2521 = vmatmul.f32.gmra.mxu3 %v12049_v22  ;;  %2671 = vmatmul.f32.gmra.mxu1 %v12051_v12 }
 0x365   : > { %16276 = vst [vmem:[#allocation215_spill] sm:$0xff] %v12231_v56  ;;  %v10778_v56 = vld [vmem:[%s10920_s26 + $0x28] sm:$0xf] }
 0x366   : > { %v2034_v28 = vpop.f32.mrf.mxu2  ;;  %2604 = vmatmul.f32.gmra.mxu0 %v12051_v12  ;;  %5604 = vst [vmem:[#allocation1 + $0x10] ss:$2 sm:$0xff] %v10778_v56 }
 0x367   : > { %v2097_v44 = vpop.f32.mrf.mxu3  ;;  %v2035_v14 = vadd.f32 %v2034_v28, %v12136_v41  ;;  %v3064_v41 = vsel %vm309_vm0, %v3061_v59, 0 }
 0x368   : > { %v2098_v6 = vadd.f32 %v2097_v44, %v2031_v50  ;;  %v12252_v44 = vand.u32 4294901760, %v3062_v5 }
 0x369   : > { %v12238_v40 = vpop.f32.mrf.mxu1 }
 0x36a   : > { %16277 = vst [vmem:[#allocation216_spill] sm:$0xff] %v12238_v40  ;;  %v12241_v58 = vadd.f32 %v2098_v6, %v11846_v60  ;;  %v3085_v56 = vsub.f32 %v3062_v5, %v12252_v44 }
 0x36b   : > { %2444 = vmatmul.f32.gmra.mxu2 %v12087_v61  ;;  %v12244_v47 = vpop.f32.mrf.mxu0 }
 0x36c   : > { %16278 = vst [vmem:[#allocation217_spill] sm:$0xff] %v12241_v58  ;;  %2527 = vmatmul.f32.gmra.mxu3 %v12071_v16  ;;  %2675 = vmatmul.f32.gmra.mxu1 %v12073_v37 }
 0x36d   : > { %16279 = vst [vmem:[#allocation218_spill] sm:$0xff] %v12244_v47  ;;  %v16281_v47 = vld [vmem:[#allocation154_spill] sm:$0xff] }
 0x36e   : > { %v2038_v50 = vpop.f32.mrf.mxu2  ;;  %2608 = vmatmul.f32.gmra.mxu0 %v12073_v37 }
 0x36f   : > { %v2101_v60 = vpop.f32.mrf.mxu3  ;;  %v2039_v28 = vadd.f32 %v2038_v50, %v12146_v3 }
 0x370   : > { %v2102_v6 = vadd.f32 %v2101_v60, %v2035_v14 }
 0x371   : > { %v12254_v40 = vpop.f32.mrf.mxu1 }
 0x372   : > { %16280 = vst [vmem:[#allocation219_spill] sm:$0xff] %v12254_v40  ;;  %v12257_v58 = vadd.f32 %v2102_v6, %v16281_v47  ;;  %v3086_v47 = vand.u32 4294901760, %v3085_v56  ;;  %v3092_v6 = vand.u32 4294901760, %v3064_v41 }
 0x373   : > { %2449 = vmatmul.f32.gmra.mxu2 %v12109_v48  ;;  %v12260_v42 = vpop.f32.mrf.mxu0 }
 0x374   : > { %16282 = vst [vmem:[#allocation154_spill] sm:$0xff] %v12257_v58  ;;  %2533 = vmatmul.f32.gmra.mxu3 %v16284_v31  ;;  %2679 = vmatmul.f32.gmra.mxu1 %v12095_v49  ;;  %v3087_v5 = vsub.f32 %v3085_v56, %v3086_v47  ;;  %v3093_v59 = vsub.f32 %v3064_v41, %v3092_v6  ;;  %v16289_v31 = vld [vmem:[#allocation203_spill] sm:$0xff] }
 0x375   : > { %16283 = vst [vmem:[#allocation220_spill] sm:$0xff] %v12260_v42  ;;  %v16286_v42 = vld [vmem:[#allocation159_spill] sm:$0xff] }
 0x376   : > { %v2042_v14 = vpop.f32.mrf.mxu2  ;;  %2612 = vmatmul.f32.gmra.mxu0 %v12095_v49 }
 0x377   : > { %v2105_v60 = vpop.f32.mrf.mxu3  ;;  %v2043_v3 = vadd.f32 %v2042_v14, %v12152_v62 }
 0x378   : > { %v2106_v40 = vadd.f32 %v2105_v60, %v2039_v28  ;;  %v3088_v60 = vand.u32 4294901760, %v3087_v5 }
 0x379   : > { %v12268_v58 = vpop.f32.mrf.mxu1 }
 0x37a   : > { %16285 = vst [vmem:[#allocation221_spill] sm:$0xff] %v12268_v58  ;;  %v12271_v39 = vadd.f32 %v2106_v40, %v16286_v42  ;;  %v3094_v58 = vand.u32 4294901760, %v3093_v59 }
 0x37b   : > { %2454 = vmatmul.f32.gmra.mxu2 %v12128_v54  ;;  %v12274_v21 = vpop.f32.mrf.mxu0 }
 0x37c   : > { %16287 = vst [vmem:[#allocation159_spill] sm:$0xff] %v12271_v39  ;;  %2539 = vmatmul.f32.gmra.mxu3 %v16289_v31  ;;  %2683 = vmatmul.f32.gmra.mxu1 %v12117_v24  ;;  %v16291_v39 = vld [vmem:[#allocation164_spill] sm:$0xff]  ;;  %v3095_v41 = vsub.f32 %v3093_v59, %v3094_v58  ;;  %v16294_v31 = vld [vmem:[#allocation207_spill] sm:$0xff] }
 0x37d   : > { %16288 = vst [vmem:[#allocation222_spill] sm:$0xff] %v12274_v21 }
 0x37e   : > { %v2046_v50 = vpop.f32.mrf.mxu2  ;;  %2616 = vmatmul.f32.gmra.mxu0 %v12117_v24  ;;  %v3096_v5 = vand.u32 4294901760, %v3095_v41 }
 0x37f   : > { %v2109_v28 = vpop.f32.mrf.mxu3  ;;  %v2047_v62 = vadd.f32 %v2046_v50, %v12160_v8 }
 0x380   : > { %v2110_v42 = vadd.f32 %v2109_v28, %v2043_v3  ;;  %v16296_v28 = vld [vmem:[#allocation168_spill] sm:$0xff] }
 0x381   : > { %v12280_v40 = vpop.f32.mrf.mxu1 }
 0x382   : > { %16290 = vst [vmem:[#allocation223_spill] sm:$0xff] %v12280_v40  ;;  %v12283_v54 = vadd.f32 %v2110_v42, %v16291_v39 }
 0x383   : > { %3089 = vmatmul.f32.vlgmr.msrb.gmra.mxu2 %v3088_v60  ;;  %v12285_v21 = vpop.f32.mrf.mxu0 }
 0x384   : > { %16292 = vst [vmem:[#allocation164_spill] sm:$0xff] %v12283_v54  ;;  %2545 = vmatmul.f32.gmra.mxu3 %v16294_v31  ;;  %3188 = vmatmul.f32.vlgmr.msra.gmra.mxu1 %v3086_v47 }
 0x385   : > { %16293 = vst [vmem:[#allocation224_spill] sm:$0xff] %v12285_v21 }
 0x386   : > { %v2050_v14 = vpop.f32.mrf.mxu2  ;;  %3158 = vmatmul.f32.vlgmr.msra.gmra.mxu0 %v3085_v56 }
 0x387   : > { %v2113_v48 = vpop.f32.mrf.mxu3  ;;  %v2051_v47 = vadd.f32 %v2050_v14, %v12168_v30 }
 0x388   : > { %v2114_v16 = vadd.f32 %v2113_v48, %v2047_v62  ;;  %v16300_v48 = vld [vmem:[#allocation173_spill] sm:$0xff] }
 0x389   : > { %v12289_v3 = vpop.f32.mrf.mxu1 }
 0x38a   : > { %16295 = vst [vmem:[#allocation225_spill] sm:$0xff] %v12289_v3  ;;  %v12292_v40 = vadd.f32 %v2114_v16, %v16296_v28 }
 0x38b   : > { %3097 = vmatmul.f32.gmra.mxu2 %v3096_v5  ;;  %v12294_v39 = vpop.f32.mrf.mxu0 }
 0x38c   : > { %16297 = vst [vmem:[#allocation168_spill] sm:$0xff] %v12292_v40  ;;  %3128 = vmatmul.f32.vlgmr.msrb.gmra.mxu3 %v12252_v44  ;;  %3194 = vmatmul.f32.gmra.mxu1 %v3094_v58 }
 0x38d   : > { %16298 = vst [vmem:[#allocation226_spill] sm:$0xff] %v12294_v39 }
 0x38e   : > { %v2054_v60 = vpop.f32.mrf.mxu2  ;;  %3163 = vmatmul.f32.gmra.mxu0 %v3093_v59  ;;  %v16304_v59 = vld [vmem:[#allocation178_spill] sm:$0xff] }
 0x38f   : > { %v2117_v8 = vpop.f32.mrf.mxu3  ;;  %v2055_v41 = vadd.f32 %v2054_v60, %v12174_v45  ;;  %v16307_v45 = vld [vmem:[#allocation183_spill] sm:$0xff] }
 0x390   : > { %v2118_v56 = vadd.f32 %v2117_v8, %v2051_v47 }
 0x391   : > { %v12298_v50 = vpop.f32.mrf.mxu1 }
 0x392   : > { %16299 = vst [vmem:[#allocation227_spill] sm:$0xff] %v12298_v50  ;;  %v12301_v42 = vadd.f32 %v2118_v56, %v16300_v48 }
 0x393   : > { %3221 = vmatmul.f32.vlgmr.msra.gmra.mxu2 %v12252_v44  ;;  %v12304_v16 = vpop.f32.mrf.mxu0 }
 0x394   : > { %16301 = vst [vmem:[#allocation173_spill] sm:$0xff] %v12301_v42  ;;  %3132 = vmatmul.f32.gmra.mxu3 %v3092_v6 }
 0x395   : > { %16302 = vst [vmem:[#allocation228_spill] sm:$0xff] %v12304_v16 }
 0x396   : > { %v2058_v62 = vpop.f32.mrf.mxu2 }
 0x397   : > { %v2121_v58 = vpop.f32.mrf.mxu3  ;;  %v2059_v47 = vadd.f32 %v2058_v62, %v12184_v63  ;;  %v2331_v63 = vadd.f32 %v12179_v15, %v12182_v23 }
 0x398   : > { %v2122_v5 = vadd.f32 %v2121_v58, %v2055_v41 }
 0x399   : > { %v12307_v30 = vpop.f32.mrf.mxu1 }
 0x39a   : > { %16303 = vst [vmem:[#allocation229_spill] sm:$0xff] %v12307_v30  ;;  %v12310_v14 = vadd.f32 %v2122_v5, %v16304_v59 }
 0x39b   : > { %3225 = vmatmul.f32.gmra.mxu2 %v3092_v6  ;;  %v12312_v28 = vpop.f32.mrf.mxu0 }
 0x39c   : > { %16305 = vst [vmem:[#allocation178_spill] sm:$0xff] %v12310_v14  ;;  %3248 = vmatmul.f32.vlgmr.msra.gmra.mxu3 %v12252_v44 }
 0x39d   : > { %16306 = vst [vmem:[#allocation230_spill] sm:$0xff] %v12312_v28  ;;  %v16309_v28 = vld [vmem:[#allocation188_spill] sm:$0xff] }
 0x39e   : > { %v2062_v8 = vpop.f32.mrf.mxu2 }
 0x39f   : > { %v2125_v56 = vpop.f32.mrf.mxu3  ;;  %v2063_v58 = vadd.f32 %v2062_v8, %v12195_v13  ;;  %v2335_v13 = vadd.f32 %v12190_v17, %v12193_v9 }
 0x3a0   : > { %v2126_v48 = vadd.f32 %v2125_v56, %v2059_v47 }
 0x3a1   : > { %v2640_v3 = vpop.f32.mrf.mxu1 }
 0x3a2   : > { %v12317_v60 = vadd.f32 %v2126_v48, %v16307_v45 }
 0x3a3   : > { %v2573_v41 = vpop.f32.mrf.mxu0 }
 0x3a4   : > { %16308 = vst [vmem:[#allocation183_spill] sm:$0xff] %v12317_v60  ;;  %3252 = vmatmul.f32.gmra.mxu3 %v3092_v6 }
 0x3a6   : > { %v2400_v5 = vpop.f32.mrf.mxu2 }
 0x3a7   : > { %v2129_v59 = vpop.f32.mrf.mxu3  ;;  %v2401_v62 = vadd.f32 %v2400_v5, %v2331_v63 }
 0x3a8   : > { %v2130_v30 = vadd.f32 %v2129_v59, %v2063_v58 }
 0x3a9   : > { %v2644_v14 = vpop.f32.mrf.mxu1 }
 0x3aa   : > { %v12321_v39 = vadd.f32 %v2130_v30, %v16309_v28 }
 0x3ab   : > { %v2577_v44 = vpop.f32.mrf.mxu0 }
 0x3ac   : > { %16310 = vst [vmem:[#allocation188_spill] sm:$0xff] %v12321_v39 }
 0x3ae   : > { %v2405_v47 = vpop.f32.mrf.mxu2 }
 0x3af   : > { %v2480_v56 = vpop.f32.mrf.mxu3  ;;  %v2406_v58 = vadd.f32 %v2405_v47, %v2335_v13 }
 0x3b0   : > { %v2481_v48 = vadd.f32 %v2480_v56, %v2401_v62 }
 0x3b1   : > { %v12327_v6 = vpop.f32.mrf.mxu1 }
 0x3b2   : > { %v2574_v45 = vadd.f32 %v2573_v41, %v2481_v48  ;;  %16312 = vst [vmem:[#allocation232_spill] sm:$0xff] %v12327_v6  ;;  %v16381_v6 = vld [vmem:[#allocation33_spill] sm:$0xff] }
 0x3b3   : > { %v12325_v42 = vpop.f32.mrf.mxu0 }
 0x3b4   : > { %16311 = vst [vmem:[#allocation231_spill] sm:$0xff] %v12325_v42  ;;  %v2641_v8 = vadd.f32 %v2640_v3, %v2574_v45  ;;  %v16382_v42 = vld [vmem:[#allocation40_spill] sm:$0xff] }
 0x3b6   : > { %v12332_v30 = vadd.f32 %v2641_v8, %v12204_v51  ;;  %v12334_v28 = vpop.f32.mrf.mxu2 }
 0x3b7   : > { %16314 = vst [vmem:[#allocation234_spill] sm:$0xff] %v12334_v28  ;;  %v2486_v15 = vpop.f32.mrf.mxu3  ;;  %v16384_v28 = vld [vmem:[#allocation47_spill] sm:$0xff] }
 0x3b8   : > { %16313 = vst [vmem:[#allocation233_spill] sm:$0xff] %v12332_v30  ;;  %v2487_v23 = vadd.f32 %v2486_v15, %v2406_v58 }
 0x3b9   : > { %v12338_v63 = vpop.f32.mrf.mxu1 }
 0x3ba   : > { %v2578_v5 = vadd.f32 %v2577_v44, %v2487_v23  ;;  %16316 = vst [vmem:[#allocation236_spill] sm:$0xff] %v12338_v63 }
 0x3bb   : > { %v12336_v59 = vpop.f32.mrf.mxu0 }
 0x3bc   : > { %16315 = vst [vmem:[#allocation235_spill] sm:$0xff] %v12336_v59  ;;  %v2645_v41 = vadd.f32 %v2644_v14, %v2578_v5 }
 0x3be   : > { %v12341_v62 = vadd.f32 %v2645_v41, %v12216_v36  ;;  %v12343_v56 = vpop.f32.mrf.mxu2 }
 0x3bf   : > { %16318 = vst [vmem:[#allocation238_spill] sm:$0xff] %v12343_v56  ;;  %v12345_v17 = vpop.f32.mrf.mxu3 }
 0x3c0   : > { %16317 = vst [vmem:[#allocation237_spill] sm:$0xff] %v12341_v62 }
 0x3c1   : > { %16319 = vst [vmem:[#allocation239_spill] sm:$0xff] %v12345_v17  ;;  %v12353_v47 = vpop.f32.mrf.mxu1  ;;  %v16383_v17 = vld [vmem:[#allocation38_spill] sm:$0xff] }
 0x3c2   : > { %16323 = vst [vmem:[#allocation243_spill] sm:$0xff] %v12353_v47  ;;  %v16377_v47 = vld [vmem:[#allocation29_spill] sm:$0xff] }
 0x3c3   : > { %v12347_v9 = vpop.f32.mrf.mxu0 }
 0x3c4   : > { %16320 = vst [vmem:[#allocation240_spill] sm:$0xff] %v12347_v9  ;;  %v16378_v9 = vld [vmem:[#allocation36_spill] sm:$0xff] }
 0x3c6   : > { %v12349_v51 = vpop.f32.mrf.mxu2 }
 0x3c7   : > { %16321 = vst [vmem:[#allocation241_spill] sm:$0xff] %v12349_v51  ;;  %v12351_v3 = vpop.f32.mrf.mxu3  ;;  %v16380_v51 = vld [vmem:[#allocation43_spill] sm:$0xff] }
 0x3c8   : > { %16322 = vst [vmem:[#allocation242_spill] sm:$0xff] %v12351_v3 }
 0x3c9   : > { %v12361_v36 = vpop.f32.mrf.mxu1 }
 0x3ca   : > { %16327 = vst [vmem:[#allocation247_spill] sm:$0xff] %v12361_v36 }
 0x3cb   : > { %v12355_v44 = vpop.f32.mrf.mxu0 }
 0x3cc   : > { %16324 = vst [vmem:[#allocation244_spill] sm:$0xff] %v12355_v44 }
 0x3ce   : > { %v12357_v14 = vpop.f32.mrf.mxu2 }
 0x3cf   : > { %16325 = vst [vmem:[#allocation245_spill] sm:$0xff] %v12357_v14  ;;  %v12359_v48 = vpop.f32.mrf.mxu3 }
 0x3d0   : > { %16326 = vst [vmem:[#allocation246_spill] sm:$0xff] %v12359_v48  ;;  %v16379_v48 = vld [vmem:[#allocation34_spill] sm:$0xff] }
 0x3d1   : > { %v12369_v58 = vpop.f32.mrf.mxu1 }
 0x3d2   : > { %16331 = vst [vmem:[#allocation251_spill] sm:$0xff] %v12369_v58 }
 0x3d3   : > { %v12367_v8 = vpop.f32.mrf.mxu0 }
 0x3d4   : > { %16330 = vst [vmem:[#allocation250_spill] sm:$0xff] %v12367_v8 }
 0x3d6   : > { %v12363_v45 = vpop.f32.mrf.mxu2 }
 0x3d7   : > { %16328 = vst [vmem:[#allocation248_spill] sm:$0xff] %v12363_v45  ;;  %v12365_v13 = vpop.f32.mrf.mxu3 }
 0x3d8   : > { %16329 = vst [vmem:[#allocation249_spill] sm:$0xff] %v12365_v13 }
 0x3d9   : > { %v12377_v41 = vpop.f32.mrf.mxu1 }
 0x3da   : > { %16335 = vst [vmem:[#allocation255_spill] sm:$0xff] %v12377_v41 }
 0x3db   : > { %v12375_v5 = vpop.f32.mrf.mxu0 }
 0x3dc   : > { %16334 = vst [vmem:[#allocation254_spill] sm:$0xff] %v12375_v5 }
 0x3de   : > { %v12371_v15 = vpop.f32.mrf.mxu2 }
 0x3df   : > { %16332 = vst [vmem:[#allocation252_spill] sm:$0xff] %v12371_v15  ;;  %v12373_v23 = vpop.f32.mrf.mxu3  ;;  %v16376_v15 = vld [vmem:[#allocation39_spill] sm:$0xff] }
 0x3e0   : > { %16333 = vst [vmem:[#allocation253_spill] sm:$0xff] %v12373_v23 }
 0x3e1   : > { %v12389_v8 = vpop.f32.mrf.mxu1 }
 0x3e2   : > { %16341 = vst [vmem:[#allocation261_spill] sm:$0xff] %v12389_v8 }
 0x3e3   : > { %v12383_v54 = vpop.f32.mrf.mxu0 }
 0x3e4   : > { %16338 = vst [vmem:[#allocation258_spill] sm:$0xff] %v12383_v54 }
 0x3e6   : > { %v12379_v39 = vpop.f32.mrf.mxu2 }
 0x3e7   : > { %16336 = vst [vmem:[#allocation256_spill] sm:$0xff] %v12379_v39  ;;  %v12381_v21 = vpop.f32.mrf.mxu3 }
 0x3e8   : > { %16337 = vst [vmem:[#allocation257_spill] sm:$0xff] %v12381_v21  ;;  %v16375_v21 = vld [vmem:[#allocation30_spill] sm:$0xff] }
 0x3e9   : > { %v12397_v13 = vpop.f32.mrf.mxu1 }
 0x3ea   : > { %16345 = vst [vmem:[#allocation265_spill] sm:$0xff] %v12397_v13 }
 0x3eb   : > { %v12391_v58 = vpop.f32.mrf.mxu0 }
 0x3ec   : > { %16342 = vst [vmem:[#allocation262_spill] sm:$0xff] %v12391_v58 }
 0x3ee   : > { %v12385_v45 = vpop.f32.mrf.mxu2 }
 0x3ef   : > { %16339 = vst [vmem:[#allocation259_spill] sm:$0xff] %v12385_v45  ;;  %v12387_v36 = vpop.f32.mrf.mxu3 }
 0x3f0   : > { %16340 = vst [vmem:[#allocation260_spill] sm:$0xff] %v12387_v36 }
 0x3f1   : > { %v12405_v54 = vpop.f32.mrf.mxu1 }
 0x3f2   : > { %16349 = vst [vmem:[#allocation269_spill] sm:$0xff] %v12405_v54 }
 0x3f3   : > { %v12403_v63 = vpop.f32.mrf.mxu0 }
 0x3f4   : > { %16348 = vst [vmem:[#allocation268_spill] sm:$0xff] %v12403_v63 }
 0x3f6   : > { %v12393_v44 = vpop.f32.mrf.mxu2 }
 0x3f7   : > { %16343 = vst [vmem:[#allocation263_spill] sm:$0xff] %v12393_v44  ;;  %v12395_v23 = vpop.f32.mrf.mxu3 }
 0x3f8   : > { %16344 = vst [vmem:[#allocation264_spill] sm:$0xff] %v12395_v23 }
 0x3f9   : > { %v12411_v58 = vpop.f32.mrf.mxu1 }
 0x3fa   : > { %16352 = vst [vmem:[#allocation272_spill] sm:$0xff] %v12411_v58 }
 0x3fb   : > { %v12409_v8 = vpop.f32.mrf.mxu0 }
 0x3fc   : > { %16351 = vst [vmem:[#allocation271_spill] sm:$0xff] %v12409_v8 }
 0x3fe   : > { %v12399_v14 = vpop.f32.mrf.mxu2 }
 0x3ff   : > { %16346 = vst [vmem:[#allocation266_spill] sm:$0xff] %v12399_v14  ;;  %v12401_v39 = vpop.f32.mrf.mxu3 }
 0x400   : > { %16347 = vst [vmem:[#allocation267_spill] sm:$0xff] %v12401_v39 }
 0x401   : > { %v3189_v13 = vpop.f32.mrf.mxu1 }
 0x403   : > { %v3159_v23 = vpop.f32.mrf.mxu0 }
 0x406   : > { %v3090_v45 = vpop.f32.mrf.mxu2 }
 0x407   : > { %v12407_v36 = vpop.f32.mrf.mxu3 }
 0x408   : > { %16350 = vst [vmem:[#allocation270_spill] sm:$0xff] %v12407_v36 }
 0x409   : > { %v3195_v36 = vpop.f32.mrf.mxu1 }
 0x40b   : > { %v3164_v63 = vpop.f32.mrf.mxu0 }
 0x40e   : > { %v3098_v59 = vpop.f32.mrf.mxu2 }
 0x40f   : > { %v3129_v3 = vpop.f32.mrf.mxu3 }
 0x410   : > { %v3130_v56 = vadd.f32 %v3129_v3, %v3090_v45 }
 0x412   : > { %v3160_v14 = vadd.f32 %v3159_v23, %v3130_v56  ;;  %v16353_v23 = vld [vmem:[#allocation15_spill] sm:$0xff] }
 0x414   : > { %v3190_v39 = vadd.f32 %v3189_v13, %v3160_v14 }
 0x416   : > { %v3222_v60 = vpop.f32.mrf.mxu2 }
 0x417   : > { %v3133_v30 = vpop.f32.mrf.mxu3  ;;  %v3223_v50 = vadd.f32 %v3222_v60, %v3190_v39 }
 0x418   : > { %v3134_v44 = vadd.f32 %v3133_v30, %v3098_v59 }
 0x41a   : > { %v3165_v16 = vadd.f32 %v3164_v63, %v3134_v44 }
 0x41c   : > { %v3196_v58 = vadd.f32 %v3195_v36, %v3165_v16 }
 0x41e   : > { %v3226_v8 = vpop.f32.mrf.mxu2 }
 0x41f   : > { %v3249_v54 = vpop.f32.mrf.mxu3  ;;  %v3227_v40 = vadd.f32 %v3226_v8, %v3196_v58 }
 0x420   : > { %v3250_v62 = vadd.f32 %v3249_v54, %v3223_v50 }
 0x422   : > { %3258 = vrot.lane.b32.xlu1 %v3250_v62, %s10843_s29  ;;  %v3783_v50 = vand.u32 4294901760, %v3250_v62 }
 0x424   : > { %v3903_v16 = vsub.f32 %v3250_v62, %v3783_v50 }
 0x426   : > { %v3904_v3 = vand.u32 4294901760, %v3903_v16 }
 0x427   : > { %v3253_v41 = vpop.f32.mrf.mxu3 }
 0x428   : > { %v3254_v5 = vadd.f32 %v3253_v41, %v3227_v40  ;;  %v3905_v13 = vsub.f32 %v3903_v16, %v3904_v3  ;;  %v16354_v41 = vld [vmem:[#allocation12_spill] sm:$0xff] }
 0x42a   : > { %4269 = vrot.lane.b32.xlu2 %v3254_v5, %s10842_s28  ;;  %3260 = vrot.lane.b32.xlu0 %v3254_v5, %s10843_s29  ;;  %v3765_v54 = vsel %vm548_vm2, %v3254_v5, 0 }
 0x42b   : > { %4788 = vrot.lane.b32.xlu1 %v3254_v5, %s10841_s27  ;;  %v3781_v39 = vand.u32 4294901760, %v3765_v54 }
 0x42d   : > { %v3897_v60 = vsub.f32 %v3765_v54, %v3781_v39  ;;  %v3906_v54 = vand.u32 4294901760, %v3905_v13  ;;  %v16357_v13 = vld [vmem:[#allocation10_spill] sm:$0xff] }
 0x42f   : > { %v3898_v63 = vand.u32 4294901760, %v3897_v60 }
 0x431   : > { %v3899_v36 = vsub.f32 %v3897_v60, %v3898_v63 }
 0x432   : > { %4786 = vrot.lane.b32.xlu2 %v3250_v62, %s10841_s27  ;;  %4267 = vrot.lane.b32.xlu0 %v3250_v62, %s10842_s28 }
 0x433   : > { %v3900_v62 = vand.u32 4294901760, %v3899_v36 }
 0x494   : > { %v3259_v30 = vpop.permute.xlu1 %3258 }
 0x495   : > { %v3281_v59 = vand.u32 4294901760, %v3259_v30 }
 0x497   : > { %v3401_v44 = vsub.f32 %v3259_v30, %v3281_v59 }
 0x499   : > { %v3402_v58 = vand.u32 4294901760, %v3401_v44 }
 0x49c   : > { %v3261_v40 = vpop.permute.xlu0 %3260 }
 0x49d   : > { %v3263_v56 = vsel %vm548_vm2, %v3261_v40, 0  ;;  %v16355_v40 = vld [vmem:[#allocation11_spill] sm:$0xff] }
 0x49e   : > { %v3279_v14 = vand.u32 4294901760, %v3263_v56 }
 0x4a0   : > { %v3395_v45 = vsub.f32 %v3263_v56, %v3279_v14  ;;  %3280 = vmatpush.msrb.mxu0 %v3279_v14  ;;  %3551 = vmatpush.msrb.mxu3 %v3279_v14  ;;  %v3403_v56 = vsub.f32 %v3401_v44, %v3402_v58 }
 0x4a2   : > { %v3396_v8 = vand.u32 4294901760, %v3395_v45  ;;  %3282 = vmatpush.msrb.mxu0 %v3281_v59  ;;  %3471 = vmatpush.msrb.mxu2 %v3395_v45  ;;  %v3404_v36 = vand.u32 4294901760, %v3403_v56  ;;  %v16373_v56 = vld [vmem:[#allocation25_spill] sm:$0xff] }
 0x4a3   : > { %3553 = vmatpush.msrb.mxu3 %v3281_v59  ;;  %3288 = vmatmul.f32.vlgmr.msrb.gmra.mxu0 %v16353_v23 }
 0x4a4   : > { %v3397_v5 = vsub.f32 %v3395_v45, %v3396_v8  ;;  %3557 = vmatmul.f32.vlgmr.msrb.gmra.mxu3 %v16354_v41  ;;  %3474 = vmatpush.msrb.mxu2 %v3401_v44  ;;  %v16356_v45 = vld [vmem:[#allocation19_spill] sm:$0xff]  ;;  %v16359_v44 = vld [vmem:[#allocation14_spill] sm:$0xff] }
 0x4a5   : > { %3901 = vmatpush.msra.mxu3 %v3900_v62  ;;  %3644 = vmatpush.msra.mxu0 %v3396_v8  ;;  %v16358_v8 = vld [vmem:[#allocation16_spill] sm:$0xff]  ;;  %v16365_v62 = vld [vmem:[#allocation17_spill] sm:$0xff] }
 0x4a6   : > { %v3398_v30 = vand.u32 4294901760, %v3397_v5  ;;  %3477 = vmatmul.f32.vlgmr.msrb.gmra.mxu2 %v16355_v40  ;;  %v16366_v5 = vld [vmem:[#allocation24_spill] sm:$0xff] }
 0x4a7   : > { %3782 = vmatpush.msra.mxu2 %v3781_v39  ;;  %3907 = vmatpush.msra.mxu3 %v3906_v54  ;;  %v16368_v54 = vld [vmem:[#allocation31_spill] sm:$0xff] }
 0x4a8   : > { %3648 = vmatpush.msra.mxu0 %v3402_v58  ;;  %3399 = vmatpush.msrb.mxu1 %v3398_v30  ;;  %v16362_v58 = vld [vmem:[#allocation20_spill] sm:$0xff]  ;;  %v16372_v30 = vld [vmem:[#allocation35_spill] sm:$0xff] }
 0x4a9   : > { %4215 = vmatpush.msrb.mxu3 %v3781_v39  ;;  %3784 = vmatpush.msra.mxu2 %v3783_v50 }
 0x4aa   : > { %3973 = vmatpush.msrb.mxu0 %v3897_v60  ;;  %3405 = vmatpush.msrb.mxu1 %v3404_v36  ;;  %v16360_v60 = vld [vmem:[#allocation23_spill] sm:$0xff]  ;;  %v16374_v36 = vld [vmem:[#allocation32_spill] sm:$0xff] }
 0x4ab   : > { %4146 = vmatpush.msrb.mxu2 %v3898_v63  ;;  %4217 = vmatpush.msrb.mxu3 %v3783_v50  ;;  %v16361_v63 = vld [vmem:[#allocation13_spill] sm:$0xff] }
 0x4ac   : > { %3976 = vmatpush.msrb.mxu0 %v3903_v16  ;;  %3407 = vmatmul.f32.vlgmr.msrb.gmra.mxu1 %v16357_v13  ;;  %v16363_v16 = vld [vmem:[#allocation18_spill] sm:$0xff] }
 0x4ad   : > { %4150 = vmatpush.msrb.mxu2 %v3904_v3  ;;  %3296 = vmatmul.f32.gmra.mxu0 %v16356_v45  ;;  %v16364_v3 = vld [vmem:[#allocation27_spill] sm:$0xff] }
 0x4ae   : > { %3563 = vmatmul.f32.gmra.mxu3 %v16358_v8  ;;  %3713 = vmatpush.msra.mxu1 %v3279_v14  ;;  %v16367_v14 = vld [vmem:[#allocation22_spill] sm:$0xff]  ;;  %v16412_v45 = vld [vmem:[#allocation83_spill] sm:$0xff] }
 0x4af   : > { %3482 = vmatmul.f32.gmra.mxu2 %v16359_v44 }
 0x4b0   : > { %3715 = vmatpush.msra.mxu1 %v3281_v59  ;;  %v16371_v59 = vld [vmem:[#allocation26_spill] sm:$0xff] }
 0x4b2   : > { %4053 = vmatpush.msrb.mxu1 %v3781_v39  ;;  %v16369_v39 = vld [vmem:[#allocation21_spill] sm:$0xff] }
 0x4b4   : > { %4055 = vmatpush.msrb.mxu1 %v3783_v50  ;;  %v16370_v50 = vld [vmem:[#allocation28_spill] sm:$0xff] }
 0x4b5   : > { %3304 = vmatmul.f32.gmra.mxu0 %v16360_v60  ;;  %3411 = vmatmul.f32.gmra.mxu1 %v16361_v63  ;;  %v16406_v60 = vld [vmem:[#allocation71_spill] sm:$0xff] }
 0x4b6   : > { %3569 = vmatmul.f32.gmra.mxu3 %v16362_v58  ;;  %v16405_v58 = vld [vmem:[#allocation65_spill] sm:$0xff] }
 0x4b7   : > { %3487 = vmatmul.f32.gmra.mxu2 %v16363_v16  ;;  %v16404_v16 = vld [vmem:[#allocation67_spill] sm:$0xff] }
 0x4bd   : > { %3312 = vmatmul.f32.gmra.mxu0 %v16364_v3  ;;  %3415 = vmatmul.f32.gmra.mxu1 %v16365_v62  ;;  %v16401_v3 = vld [vmem:[#allocation57_spill] sm:$0xff] }
 0x4be   : > { %3575 = vmatmul.f32.gmra.mxu3 %v16366_v5 }
 0x4bf   : > { %3492 = vmatmul.f32.gmra.mxu2 %v16367_v14  ;;  %v16397_v14 = vld [vmem:[#allocation49_spill] sm:$0xff] }
 0x4c5   : > { %3320 = vmatmul.f32.gmra.mxu0 %v16368_v54  ;;  %3419 = vmatmul.f32.gmra.mxu1 %v16369_v39 }
 0x4c6   : > { %3581 = vmatmul.f32.gmra.mxu3 %v16370_v50  ;;  %v16395_v50 = vld [vmem:[#allocation50_spill] sm:$0xff] }
 0x4c7   : > { %3497 = vmatmul.f32.gmra.mxu2 %v16371_v59  ;;  %v16392_v59 = vld [vmem:[#allocation55_spill] sm:$0xff] }
 0x4cd   : > { %3328 = vmatmul.f32.gmra.mxu0 %v16372_v30  ;;  %3423 = vmatmul.f32.gmra.mxu1 %v16373_v56  ;;  %v16388_v30 = vld [vmem:[#allocation51_spill] sm:$0xff] }
 0x4ce   : > { %3587 = vmatmul.f32.gmra.mxu3 %v16374_v36  ;;  %v16385_v36 = vld [vmem:[#allocation37_spill] sm:$0xff] }
 0x4cf   : > { %3502 = vmatmul.f32.gmra.mxu2 %v16375_v21  ;;  %v16386_v21 = vld [vmem:[#allocation44_spill] sm:$0xff] }
 0x4d5   : > { %3336 = vmatmul.f32.gmra.mxu0 %v16376_v15  ;;  %3427 = vmatmul.f32.gmra.mxu1 %v16377_v47  ;;  %v16387_v15 = vld [vmem:[#allocation42_spill] sm:$0xff] }
 0x4d6   : > { %3593 = vmatmul.f32.gmra.mxu3 %v16378_v9  ;;  %v16389_v9 = vld [vmem:[#allocation41_spill] sm:$0xff] }
 0x4d7   : > { %3507 = vmatmul.f32.gmra.mxu2 %v16379_v48  ;;  %v16390_v48 = vld [vmem:[#allocation48_spill] sm:$0xff] }
 0x4dd   : > { %3344 = vmatmul.f32.gmra.mxu0 %v16380_v51  ;;  %3431 = vmatmul.f32.gmra.mxu1 %v16381_v6  ;;  %v16391_v51 = vld [vmem:[#allocation46_spill] sm:$0xff] }
 0x4de   : > { %3599 = vmatmul.f32.gmra.mxu3 %v16382_v42  ;;  %v16393_v42 = vld [vmem:[#allocation45_spill] sm:$0xff] }
 0x4df   : > { %3512 = vmatmul.f32.gmra.mxu2 %v16383_v17  ;;  %v4270_v17 = vpop.permute.xlu2 %4269 }
 0x4e5   : > { %3352 = vmatmul.f32.gmra.mxu0 %v16384_v28  ;;  %3435 = vmatmul.f32.gmra.mxu1 %v16385_v36  ;;  %v16394_v28 = vld [vmem:[#allocation52_spill] sm:$0xff] }
 0x4e6   : > { %3605 = vmatmul.f32.gmra.mxu3 %v16386_v21  ;;  %v4272_v21 = vsel %vm548_vm2, %v4270_v17, 0 }
 0x4e7   : > { %3517 = vmatmul.f32.gmra.mxu2 %v16387_v15  ;;  %v4268_v15 = vpop.permute.xlu0 %4267  ;;  %v12465_v54 = vand.u32 4294901760, %v4272_v21 }
 0x4e9   : > { %v12474_v5 = vsub.f32 %v4272_v21, %v12465_v54 }
 0x4eb   : > { %v15918_v17 = vand.u32 4294901760, %v12474_v5 }
 0x4ed   : > { %3360 = vmatmul.f32.gmra.mxu0 %v16388_v30  ;;  %3439 = vmatmul.f32.gmra.mxu1 %v16389_v9  ;;  %v16396_v30 = vld [vmem:[#allocation59_spill] sm:$0xff]  ;;  %v4406_v21 = vsub.f32 %v12474_v5, %v15918_v17 }
 0x4ee   : > { %3611 = vmatmul.f32.gmra.mxu3 %v16390_v48  ;;  %v12469_v48 = vand.u32 4294901760, %v4268_v15 }
 0x4ef   : > { %3522 = vmatmul.f32.gmra.mxu2 %v16391_v51  ;;  %v16398_v51 = vld [vmem:[#allocation56_spill] sm:$0xff] }
 0x4f5   : > { %3368 = vmatmul.f32.gmra.mxu0 %v16392_v59  ;;  %3443 = vmatmul.f32.gmra.mxu1 %v16393_v42  ;;  %v16399_v59 = vld [vmem:[#allocation54_spill] sm:$0xff] }
 0x4f6   : > { %3617 = vmatmul.f32.gmra.mxu3 %v16394_v28  ;;  %v16400_v28 = vld [vmem:[#allocation53_spill] sm:$0xff] }
 0x4f7   : > { %3527 = vmatmul.f32.gmra.mxu2 %v16395_v50  ;;  %v12477_v50 = vsub.f32 %v4268_v15, %v12469_v48 }
 0x4fd   : > { %3376 = vmatmul.f32.gmra.mxu0 %v16396_v30  ;;  %3447 = vmatmul.f32.gmra.mxu1 %v16397_v14  ;;  %v15919_v30 = vand.u32 4294901760, %v12477_v50 }
 0x4fe   : > { %3623 = vmatmul.f32.gmra.mxu3 %v16398_v51  ;;  %v4407_v51 = vand.u32 4294901760, %v4406_v21  ;;  %v16407_v21 = vld [vmem:[#allocation69_spill] sm:$0xff] }
 0x4ff   : > { %3532 = vmatmul.f32.gmra.mxu2 %v16399_v59  ;;  %v16402_v59 = vld [vmem:[#allocation63_spill] sm:$0xff]  ;;  %v4412_v15 = vsub.f32 %v12477_v50, %v15919_v30 }
 0x500   : > { %v16408_v30 = vld [vmem:[#allocation75_spill] sm:$0xff] }
 0x501   : > { %v4413_v17 = vand.u32 4294901760, %v4412_v15  ;;  %v16410_v15 = vld [vmem:[#allocation79_spill] sm:$0xff] }
 0x505   : > { %3451 = vmatmul.f32.gmra.mxu1 %v16400_v28  ;;  %3650 = vmatmul.f32.vlgmr.msra.gmra.mxu0 %v16357_v13 }
 0x506   : > { %3909 = vmatmul.f32.vlgmr.msra.gmra.mxu3 %v16401_v3  ;;  %4289 = vmatpush.msra.mxu0 %v12465_v54 }
 0x507   : > { %4560 = vmatpush.msra.mxu3 %v12465_v54  ;;  %3790 = vmatmul.f32.vlgmr.msra.gmra.mxu2 %v16402_v59  ;;  %v16403_v59 = vld [vmem:[#allocation61_spill] sm:$0xff] }
 0x508   : > { %4291 = vmatpush.msra.mxu0 %v12469_v48  ;;  %4480 = vmatpush.msra.mxu2 %v12474_v5 }
 0x509   : > { %4562 = vmatpush.msra.mxu3 %v12469_v48 }
 0x50a   : > { %4483 = vmatpush.msra.mxu2 %v12477_v50 }
 0x50d   : > { %3654 = vmatmul.f32.gmra.mxu0 %v16361_v63  ;;  %3717 = vmatmul.f32.vlgmr.msra.gmra.mxu1 %v16357_v13 }
 0x50e   : > { %3913 = vmatmul.f32.gmra.mxu3 %v16403_v59  ;;  %4408 = vmatpush.msra.mxu1 %v4407_v51 }
 0x50f   : > { %3798 = vmatmul.f32.gmra.mxu2 %v16404_v16 }
 0x510   : > { %4414 = vmatpush.msra.mxu1 %v4413_v17  ;;  %v16409_v17 = vld [vmem:[#allocation73_spill] sm:$0xff] }
 0x515   : > { %3658 = vmatmul.f32.gmra.mxu0 %v16365_v62  ;;  %3721 = vmatmul.f32.gmra.mxu1 %v16361_v63 }
 0x516   : > { %3917 = vmatmul.f32.gmra.mxu3 %v16405_v58 }
 0x517   : > { %3806 = vmatmul.f32.gmra.mxu2 %v16406_v60 }
 0x51d   : > { %3662 = vmatmul.f32.gmra.mxu0 %v16369_v39  ;;  %3725 = vmatmul.f32.gmra.mxu1 %v16365_v62 }
 0x51e   : > { %3921 = vmatmul.f32.gmra.mxu3 %v16407_v21 }
 0x51f   : > { %3814 = vmatmul.f32.gmra.mxu2 %v16408_v30  ;;  %v16411_v30 = vld [vmem:[#allocation77_spill] sm:$0xff] }
 0x520   : > { %v3289_v51 = vpop.f32.mrf.mxu0 }
 0x525   : > { %3666 = vmatmul.f32.gmra.mxu0 %v16373_v56  ;;  %3729 = vmatmul.f32.gmra.mxu1 %v16369_v39 }
 0x526   : > { %3925 = vmatmul.f32.gmra.mxu3 %v16409_v17 }
 0x527   : > { %3822 = vmatmul.f32.gmra.mxu2 %v16410_v15  ;;  %v3558_v16 = vpop.f32.mrf.mxu3 }
 0x529   : > { %v3478_v63 = vpop.f32.mrf.mxu2  ;;  %v3408_v44 = vpop.f32.mrf.mxu1 }
 0x52a   : > { %v3297_v60 = vpop.f32.mrf.mxu0  ;;  %v3409_v8 = vadd.f32 %v3408_v44, %v3289_v51 }
 0x52c   : > { %v3479_v13 = vadd.f32 %v3478_v63, %v3409_v8  ;;  %v16413_v8 = vld [vmem:[#allocation81_spill] sm:$0xff]  ;;  %v16414_v63 = vld [vmem:[#allocation87_spill] sm:$0xff] }
 0x52d   : > { %3670 = vmatmul.f32.gmra.mxu0 %v16377_v47  ;;  %3733 = vmatmul.f32.gmra.mxu1 %v16373_v56 }
 0x52e   : > { %3929 = vmatmul.f32.gmra.mxu3 %v16411_v30  ;;  %v12516_v62 = vadd.f32 %v3558_v16, %v3479_v13 }
 0x52f   : > { %3830 = vmatmul.f32.gmra.mxu2 %v16412_v45 }
 0x531   : > { %v3564_v39 = vpop.f32.mrf.mxu3 }
 0x532   : > { %v3305_v40 = vpop.f32.mrf.mxu0  ;;  %v3412_v41 = vpop.f32.mrf.mxu1 }
 0x533   : > { %v3413_v15 = vadd.f32 %v3412_v41, %v3297_v60  ;;  %v3483_v23 = vpop.f32.mrf.mxu2  ;;  %v16416_v60 = vld [vmem:[#allocation91_spill] sm:$0xff] }
 0x535   : > { %v3484_v31 = vadd.f32 %v3483_v23, %v3413_v15  ;;  %3674 = vmatmul.f32.gmra.mxu0 %v16381_v6  ;;  %3737 = vmatmul.f32.gmra.mxu1 %v16377_v47  ;;  %v16415_v23 = vld [vmem:[#allocation85_spill] sm:$0xff] }
 0x536   : > { %3933 = vmatmul.f32.gmra.mxu3 %v16413_v8 }
 0x537   : > { %v12522_v44 = vadd.f32 %v3564_v39, %v3484_v31  ;;  %3838 = vmatmul.f32.gmra.mxu2 %v16414_v63 }
 0x539   : > { %v3570_v13 = vpop.f32.mrf.mxu3 }
 0x53a   : > { %v3313_v16 = vpop.f32.mrf.mxu0  ;;  %v3416_v51 = vpop.f32.mrf.mxu1 }
 0x53b   : > { %v3417_v45 = vadd.f32 %v3416_v51, %v3305_v40  ;;  %v3488_v56 = vpop.f32.mrf.mxu2  ;;  %v16417_v40 = vld [vmem:[#allocation89_spill] sm:$0xff] }
 0x53d   : > { %v3489_v61 = vadd.f32 %v3488_v56, %v3417_v45  ;;  %3678 = vmatmul.f32.gmra.mxu0 %v16385_v36  ;;  %3741 = vmatmul.f32.gmra.mxu1 %v16381_v6  ;;  %v16418_v56 = vld [vmem:[#allocation95_spill] sm:$0xff] }
 0x53e   : > { %3937 = vmatmul.f32.gmra.mxu3 %v16415_v23 }
 0x53f   : > { %v12528_v41 = vadd.f32 %v3570_v13, %v3489_v61  ;;  %3846 = vmatmul.f32.gmra.mxu2 %v16416_v60 }
 0x541   : > { %v3576_v31 = vpop.f32.mrf.mxu3 }
 0x542   : > { %v3321_v39 = vpop.f32.mrf.mxu0  ;;  %v3420_v15 = vpop.f32.mrf.mxu1 }
 0x543   : > { %v3421_v63 = vadd.f32 %v3420_v15, %v3313_v16  ;;  %v3493_v47 = vpop.f32.mrf.mxu2  ;;  %v16420_v15 = vld [vmem:[#allocation99_spill] sm:$0xff] }
 0x545   : > { %v3494_v22 = vadd.f32 %v3493_v47, %v3421_v63  ;;  %3682 = vmatmul.f32.gmra.mxu0 %v16389_v9  ;;  %3745 = vmatmul.f32.gmra.mxu1 %v16385_v36  ;;  %v16419_v47 = vld [vmem:[#allocation93_spill] sm:$0xff]  ;;  %v4789_v63 = vpop.permute.xlu1 %4788 }
 0x546   : > { %3941 = vmatmul.f32.gmra.mxu3 %v16417_v40 }
 0x547   : > { %v12534_v45 = vadd.f32 %v3576_v31, %v3494_v22  ;;  %3854 = vmatmul.f32.gmra.mxu2 %v16418_v56  ;;  %v4791_v31 = vsel %vm548_vm2, %v4789_v63, 0 }
 0x549   : > { %v3582_v61 = vpop.f32.mrf.mxu3 }
 0x54a   : > { %v3329_v13 = vpop.f32.mrf.mxu0  ;;  %v3424_v51 = vpop.f32.mrf.mxu1 }
 0x54b   : > { %v3425_v60 = vadd.f32 %v3424_v51, %v3321_v39  ;;  %v3498_v6 = vpop.f32.mrf.mxu2  ;;  %v4787_v51 = vpop.permute.xlu2 %4786 }
 0x54d   : > { %v3499_v55 = vadd.f32 %v3498_v6, %v3425_v60  ;;  %3686 = vmatmul.f32.gmra.mxu0 %v16393_v42  ;;  %3749 = vmatmul.f32.gmra.mxu1 %v16389_v9  ;;  %v12544_v6 = vand.u32 4294901760, %v4791_v31  ;;  %v16421_v9 = vld [vmem:[#allocation97_spill] sm:$0xff] }
 0x54e   : > { %3945 = vmatmul.f32.gmra.mxu3 %v16419_v47 }
 0x54f   : > { %v12540_v16 = vadd.f32 %v3582_v61, %v3499_v55  ;;  %3862 = vmatmul.f32.gmra.mxu2 %v16420_v15  ;;  %v12549_v55 = vand.u32 4294901760, %v4787_v51  ;;  %v16422_v15 = vld [vmem:[#allocation103_spill] sm:$0xff]  ;;  %v12555_v63 = vsub.f32 %v4791_v31, %v12544_v6 }
 0x551   : > { %v3588_v22 = vpop.f32.mrf.mxu3 }
 0x552   : > { %v3337_v56 = vpop.f32.mrf.mxu0  ;;  %v3428_v36 = vpop.f32.mrf.mxu1 }
 0x553   : > { %v3429_v0 = vadd.f32 %v3428_v36, %v3329_v13  ;;  %v3503_v39 = vpop.f32.mrf.mxu2 }
 0x555   : > { %v3504_v60 = vadd.f32 %v3503_v39, %v3429_v0  ;;  %3690 = vmatmul.f32.gmra.mxu0 %v16397_v14  ;;  %3753 = vmatmul.f32.gmra.mxu1 %v16393_v42  ;;  %v12558_v0 = vsub.f32 %v4787_v51, %v12549_v55  ;;  %v15951_v42 = vand.u32 4294901760, %v12555_v63 }
 0x556   : > { %3949 = vmatmul.f32.gmra.mxu3 %v16421_v9 }
 0x557   : > { %v12551_v61 = vadd.f32 %v3588_v22, %v3504_v60  ;;  %3870 = vmatmul.f32.gmra.mxu2 %v16422_v15  ;;  %v16423_v22 = vld [vmem:[#allocation101_spill] sm:$0xff]  ;;  %v15952_v31 = vand.u32 4294901760, %v12558_v0 }
 0x558   : > { %v16424_v15 = vld [vmem:[#allocation105_spill] sm:$0xff] }
 0x559   : > { %v3594_v36 = vpop.f32.mrf.mxu3 }
 0x55a   : > { %v3345_v13 = vpop.f32.mrf.mxu0  ;;  %v3432_v2 = vpop.f32.mrf.mxu1 }
 0x55b   : > { %v3433_v39 = vadd.f32 %v3432_v2, %v3337_v56  ;;  %v3508_v57 = vpop.f32.mrf.mxu2  ;;  %v4925_v2 = vsub.f32 %v12555_v63, %v15951_v42 }
 0x55d   : > { %v3509_v7 = vadd.f32 %v3508_v57, %v3433_v39  ;;  %3694 = vmatmul.f32.gmra.mxu0 %v16400_v28  ;;  %3757 = vmatmul.f32.gmra.mxu1 %v16397_v14  ;;  %v4931_v14 = vsub.f32 %v12558_v0, %v15952_v31  ;;  %v4926_v34 = vand.u32 4294901760, %v4925_v2 }
 0x55e   : > { %3953 = vmatmul.f32.gmra.mxu3 %v16423_v22 }
 0x55f   : > { %v12565_v60 = vadd.f32 %v3594_v36, %v3509_v7  ;;  %3878 = vmatmul.f32.gmra.mxu2 %v16424_v15  ;;  %v16425_v7 = vld [vmem:[#allocation58_spill] sm:$0xff]  ;;  %v16426_v36 = vand.u32 4294901760, %v12474_v5 }
 0x560   : > { %v16432_v15 = vld [vmem:[#allocation70_spill] sm:$0xff] }
 0x561   : > { %v3600_v56 = vpop.f32.mrf.mxu3 }
 0x562   : > { %v3353_v51 = vpop.f32.mrf.mxu0  ;;  %v3436_v4 = vpop.f32.mrf.mxu1 }
 0x563   : > { %v3437_v57 = vadd.f32 %v3436_v4, %v3345_v13  ;;  %v3513_v39 = vpop.f32.mrf.mxu2  ;;  %v4932_v4 = vand.u32 4294901760, %v4931_v14  ;;  %v16427_v13 = vand.u32 4294901760, %v12477_v50 }
 0x565   : > { %v3514_v38 = vadd.f32 %v3513_v39, %v3437_v57  ;;  %3761 = vmatmul.f32.gmra.mxu1 %v16400_v28  ;;  %3979 = vmatmul.f32.vlgmr.msrb.gmra.mxu0 %v16425_v7 }
 0x566   : > { %4219 = vmatmul.f32.vlgmr.msrb.gmra.mxu3 %v16401_v3  ;;  %4653 = vmatpush.msrb.mxu0 %v16426_v36 }
 0x567   : > { %4927 = vmatpush.msrb.mxu3 %v4926_v34  ;;  %v12579_v42 = vadd.f32 %v3600_v56, %v3514_v38  ;;  %4152 = vmatmul.f32.vlgmr.msrb.gmra.mxu2 %v16401_v3  ;;  %v16428_v34 = vld [vmem:[#allocation62_spill] sm:$0xff]  ;;  %v16429_v38 = vld [vmem:[#allocation60_spill] sm:$0xff] }
 0x568   : > { %4657 = vmatpush.msrb.mxu0 %v16427_v13  ;;  %4808 = vmatpush.msrb.mxu2 %v12544_v6 }
 0x569   : > { %4933 = vmatpush.msrb.mxu3 %v4932_v4  ;;  %v3606_v2 = vpop.f32.mrf.mxu3 }
 0x56a   : > { %4810 = vmatpush.msrb.mxu2 %v12549_v55  ;;  %v3361_v57 = vpop.f32.mrf.mxu0  ;;  %v3440_v39 = vpop.f32.mrf.mxu1 }
 0x56b   : > { %v3441_v31 = vadd.f32 %v3440_v39, %v3353_v51  ;;  %v3518_v5 = vpop.f32.mrf.mxu2  ;;  %v16430_v39 = vld [vmem:[#allocation66_spill] sm:$0xff] }
 0x56d   : > { %v3519_v36 = vadd.f32 %v3518_v5, %v3441_v31  ;;  %3984 = vmatmul.f32.gmra.mxu0 %v16428_v34  ;;  %4059 = vmatmul.f32.vlgmr.msrb.gmra.mxu1 %v16429_v38  ;;  %v16431_v5 = vld [vmem:[#allocation64_spill] sm:$0xff] }
 0x56e   : > { %4223 = vmatmul.f32.gmra.mxu3 %v16403_v59  ;;  %4722 = vmatpush.msrb.mxu1 %v12465_v54 }
 0x56f   : > { %v12590_v14 = vadd.f32 %v3606_v2, %v3519_v36  ;;  %4156 = vmatmul.f32.gmra.mxu2 %v16403_v59 }
 0x570   : > { %4724 = vmatpush.msrb.mxu1 %v12469_v48 }
 0x571   : > { %v3612_v50 = vpop.f32.mrf.mxu3 }
 0x572   : > { %v3369_v56 = vpop.f32.mrf.mxu0  ;;  %v3444_v4 = vpop.f32.mrf.mxu1 }
 0x573   : > { %v3445_v51 = vadd.f32 %v3444_v4, %v3361_v57  ;;  %v3523_v13 = vpop.f32.mrf.mxu2  ;;  %v16433_v57 = vld [vmem:[#allocation68_spill] sm:$0xff] }
 0x575   : > { %v3524_v31 = vadd.f32 %v3523_v13, %v3445_v51  ;;  %3989 = vmatmul.f32.gmra.mxu0 %v16430_v39  ;;  %4065 = vmatmul.f32.gmra.mxu1 %v16431_v5 }
 0x576   : > { %4227 = vmatmul.f32.gmra.mxu3 %v16405_v58 }
 0x577   : > { %v12597_v38 = vadd.f32 %v3612_v50, %v3524_v31  ;;  %4160 = vmatmul.f32.gmra.mxu2 %v16405_v58  ;;  %v16434_v58 = vld [vmem:[#allocation74_spill] sm:$0xff] }
 0x579   : > { %v3618_v54 = vpop.f32.mrf.mxu3 }
 0x57a   : > { %v3377_v2 = vpop.f32.mrf.mxu0  ;;  %v3448_v36 = vpop.f32.mrf.mxu1 }
 0x57b   : > { %v3449_v48 = vadd.f32 %v3448_v36, %v3369_v56  ;;  %v3528_v34 = vpop.f32.mrf.mxu2  ;;  %v16435_v56 = vld [vmem:[#allocation72_spill] sm:$0xff] }
 0x57d   : > { %v3529_v7 = vadd.f32 %v3528_v34, %v3449_v48  ;;  %3994 = vmatmul.f32.gmra.mxu0 %v16432_v15  ;;  %4071 = vmatmul.f32.gmra.mxu1 %v16433_v57 }
 0x57e   : > { %4231 = vmatmul.f32.gmra.mxu3 %v16407_v21 }
 0x57f   : > { %v12603_v4 = vadd.f32 %v3618_v54, %v3529_v7  ;;  %4164 = vmatmul.f32.gmra.mxu2 %v16407_v21 }
 0x581   : > { %v3624_v50 = vpop.f32.mrf.mxu3 }
 0x582   : > { %v3452_v51 = vpop.f32.mrf.mxu1  ;;  %v3651_v13 = vpop.f32.mrf.mxu0 }
 0x583   : > { %v3453_v31 = vadd.f32 %v3452_v51, %v3377_v2  ;;  %v3533_v5 = vpop.f32.mrf.mxu2  ;;  %v3652_v7 = vadd.f32 %v3651_v13, %v12516_v62  ;;  %v16436_v51 = vld [vmem:[#allocation78_spill] sm:$0xff] }
 0x585   : > { %v3534_v39 = vadd.f32 %v3533_v5, %v3453_v31  ;;  %3999 = vmatmul.f32.gmra.mxu0 %v16434_v58  ;;  %4077 = vmatmul.f32.gmra.mxu1 %v16435_v56  ;;  %v16437_v5 = vld [vmem:[#allocation76_spill] sm:$0xff] }
 0x586   : > { %4235 = vmatmul.f32.gmra.mxu3 %v16409_v17 }
 0x587   : > { %v12609_v34 = vadd.f32 %v3624_v50, %v3534_v39  ;;  %4168 = vmatmul.f32.gmra.mxu2 %v16409_v17 }
 0x589   : > { %v3910_v54 = vpop.f32.mrf.mxu3 }
 0x58a   : > { %v3655_v36 = vpop.f32.mrf.mxu0  ;;  %v3718_v48 = vpop.f32.mrf.mxu1 }
 0x58b   : > { %v3719_v57 = vadd.f32 %v3718_v48, %v3652_v7  ;;  %v3791_v15 = vpop.f32.mrf.mxu2  ;;  %v3656_v39 = vadd.f32 %v3655_v36, %v12522_v44  ;;  %v16438_v48 = vld [vmem:[#allocation82_spill] sm:$0xff] }
 0x58d   : > { %v3792_v2 = vadd.f32 %v3791_v15, %v3719_v57  ;;  %4004 = vmatmul.f32.gmra.mxu0 %v16436_v51  ;;  %4083 = vmatmul.f32.gmra.mxu1 %v16437_v5  ;;  %v16439_v15 = vld [vmem:[#allocation80_spill] sm:$0xff] }
 0x58e   : > { %4239 = vmatmul.f32.gmra.mxu3 %v16411_v30 }
 0x58f   : > { %v12616_v31 = vadd.f32 %v3910_v54, %v3792_v2  ;;  %4172 = vmatmul.f32.gmra.mxu2 %v16411_v30 }
 0x591   : > { %v3914_v50 = vpop.f32.mrf.mxu3 }
 0x592   : > { %v3659_v62 = vpop.f32.mrf.mxu0  ;;  %v3722_v13 = vpop.f32.mrf.mxu1 }
 0x593   : > { %v3723_v56 = vadd.f32 %v3722_v13, %v3656_v39  ;;  %v3799_v58 = vpop.f32.mrf.mxu2  ;;  %v3660_v54 = vadd.f32 %v3659_v62, %v12528_v41  ;;  %v16440_v13 = vld [vmem:[#allocation86_spill] sm:$0xff] }
 0x595   : > { %v3800_v7 = vadd.f32 %v3799_v58, %v3723_v56  ;;  %4009 = vmatmul.f32.gmra.mxu0 %v16438_v48  ;;  %4089 = vmatmul.f32.gmra.mxu1 %v16439_v15  ;;  %v16441_v58 = vld [vmem:[#allocation84_spill] sm:$0xff] }
 0x596   : > { %4243 = vmatmul.f32.gmra.mxu3 %v16413_v8 }
 0x597   : > { %v12623_v57 = vadd.f32 %v3914_v50, %v3800_v7  ;;  %4176 = vmatmul.f32.gmra.mxu2 %v16413_v8 }
 0x599   : > { %v3918_v2 = vpop.f32.mrf.mxu3 }
 0x59a   : > { %v3663_v44 = vpop.f32.mrf.mxu0  ;;  %v3726_v36 = vpop.f32.mrf.mxu1 }
 0x59b   : > { %v3727_v5 = vadd.f32 %v3726_v36, %v3660_v54  ;;  %v3807_v51 = vpop.f32.mrf.mxu2  ;;  %v3664_v50 = vadd.f32 %v3663_v44, %v12534_v45  ;;  %v16442_v36 = vld [vmem:[#allocation90_spill] sm:$0xff] }
 0x59d   : > { %v3808_v39 = vadd.f32 %v3807_v51, %v3727_v5  ;;  %4014 = vmatmul.f32.gmra.mxu0 %v16440_v13  ;;  %4095 = vmatmul.f32.gmra.mxu1 %v16441_v58  ;;  %v16443_v51 = vld [vmem:[#allocation88_spill] sm:$0xff] }
 0x59e   : > { %4247 = vmatmul.f32.gmra.mxu3 %v16415_v23 }
 0x59f   : > { %v12630_v56 = vadd.f32 %v3918_v2, %v3808_v39  ;;  %4180 = vmatmul.f32.gmra.mxu2 %v16415_v23 }
 0x5a1   : > { %v3922_v7 = vpop.f32.mrf.mxu3 }
 0x5a2   : > { %v3667_v41 = vpop.f32.mrf.mxu0  ;;  %v3730_v62 = vpop.f32.mrf.mxu1 }
 0x5a3   : > { %v3731_v15 = vadd.f32 %v3730_v62, %v3664_v50  ;;  %v3815_v48 = vpop.f32.mrf.mxu2  ;;  %v3668_v2 = vadd.f32 %v3667_v41, %v12540_v16  ;;  %v16444_v62 = vld [vmem:[#allocation94_spill] sm:$0xff] }
 0x5a5   : > { %v3816_v54 = vadd.f32 %v3815_v48, %v3731_v15  ;;  %4019 = vmatmul.f32.gmra.mxu0 %v16442_v36  ;;  %4101 = vmatmul.f32.gmra.mxu1 %v16443_v51  ;;  %v16445_v48 = vld [vmem:[#allocation92_spill] sm:$0xff] }
 0x5a6   : > { %4251 = vmatmul.f32.gmra.mxu3 %v16417_v40 }
 0x5a7   : > { %v12637_v5 = vadd.f32 %v3922_v7, %v3816_v54  ;;  %4184 = vmatmul.f32.gmra.mxu2 %v16417_v40 }
 0x5a9   : > { %v3926_v39 = vpop.f32.mrf.mxu3 }
 0x5aa   : > { %v3671_v45 = vpop.f32.mrf.mxu0  ;;  %v3734_v44 = vpop.f32.mrf.mxu1 }
 0x5ab   : > { %v3735_v58 = vadd.f32 %v3734_v44, %v3668_v2  ;;  %v3823_v13 = vpop.f32.mrf.mxu2  ;;  %v3672_v7 = vadd.f32 %v3671_v45, %v12551_v61  ;;  %v16446_v44 = vld [vmem:[#allocation98_spill] sm:$0xff] }
 0x5ad   : > { %v3824_v50 = vadd.f32 %v3823_v13, %v3735_v58  ;;  %4024 = vmatmul.f32.gmra.mxu0 %v16444_v62  ;;  %4107 = vmatmul.f32.gmra.mxu1 %v16445_v48  ;;  %v16447_v13 = vld [vmem:[#allocation96_spill] sm:$0xff] }
 0x5ae   : > { %4255 = vmatmul.f32.gmra.mxu3 %v16419_v47 }
 0x5af   : > { %v12644_v15 = vadd.f32 %v3926_v39, %v3824_v50  ;;  %4188 = vmatmul.f32.gmra.mxu2 %v16419_v47 }
 0x5b1   : > { %v3930_v54 = vpop.f32.mrf.mxu3 }
 0x5b2   : > { %v3675_v16 = vpop.f32.mrf.mxu0  ;;  %v3738_v41 = vpop.f32.mrf.mxu1 }
 0x5b3   : > { %v3739_v51 = vadd.f32 %v3738_v41, %v3672_v7  ;;  %v3831_v36 = vpop.f32.mrf.mxu2  ;;  %v3676_v39 = vadd.f32 %v3675_v16, %v12565_v60  ;;  %v16448_v41 = vld [vmem:[#allocation102_spill] sm:$0xff] }
 0x5b5   : > { %v3832_v2 = vadd.f32 %v3831_v36, %v3739_v51  ;;  %4029 = vmatmul.f32.gmra.mxu0 %v16446_v44  ;;  %4113 = vmatmul.f32.gmra.mxu1 %v16447_v13  ;;  %v16449_v36 = vld [vmem:[#allocation100_spill] sm:$0xff] }
 0x5b6   : > { %4259 = vmatmul.f32.gmra.mxu3 %v16421_v9 }
 0x5b7   : > { %v12651_v58 = vadd.f32 %v3930_v54, %v3832_v2  ;;  %4192 = vmatmul.f32.gmra.mxu2 %v16421_v9 }
 0x5b9   : > { %v3934_v50 = vpop.f32.mrf.mxu3 }
 0x5ba   : > { %v3679_v61 = vpop.f32.mrf.mxu0  ;;  %v3742_v45 = vpop.f32.mrf.mxu1 }
 0x5bb   : > { %v3743_v48 = vadd.f32 %v3742_v45, %v3676_v39  ;;  %v3839_v62 = vpop.f32.mrf.mxu2  ;;  %v3680_v54 = vadd.f32 %v3679_v61, %v12579_v42  ;;  %v16450_v45 = vld [vmem:[#allocation104_spill] sm:$0xff]  ;;  %v16454_v42 = vand.u32 4294901760, %v12555_v63  ;;  %v16455_v61 = vand.u32 4294901760, %v12558_v0 }
 0x5bd   : > { %v3840_v7 = vadd.f32 %v3839_v62, %v3743_v48  ;;  %4034 = vmatmul.f32.gmra.mxu0 %v16448_v41  ;;  %4119 = vmatmul.f32.gmra.mxu1 %v16449_v36  ;;  %v16451_v62 = vld [vmem:[#allocation111_spill] sm:$0xff]  ;;  %v16452_v48 = vld [vmem:[#allocation108_spill] sm:$0xff] }
 0x5be   : > { %4263 = vmatmul.f32.gmra.mxu3 %v16423_v22 }
 0x5bf   : > { %v12658_v51 = vadd.f32 %v3934_v50, %v3840_v7  ;;  %4196 = vmatmul.f32.gmra.mxu2 %v16423_v22  ;;  %v16453_v7 = vld [vmem:[#allocation107_spill] sm:$0xff] }
 0x5c1   : > { %v3938_v2 = vpop.f32.mrf.mxu3 }
 0x5c2   : > { %v3683_v60 = vpop.f32.mrf.mxu0  ;;  %v3746_v16 = vpop.f32.mrf.mxu1 }
 0x5c3   : > { %v3747_v13 = vadd.f32 %v3746_v16, %v3680_v54  ;;  %v3847_v44 = vpop.f32.mrf.mxu2 }
 0x5c5   : > { %v3848_v39 = vadd.f32 %v3847_v44, %v3747_v13  ;;  %4125 = vmatmul.f32.gmra.mxu1 %v16450_v45  ;;  %4297 = vmatmul.f32.vlgmr.msra.gmra.mxu0 %v16451_v62  ;;  %v3684_v44 = vadd.f32 %v3683_v60, %v12590_v14  ;;  %v16456_v62 = vld [vmem:[#allocation115_spill] sm:$0xff]  ;;  %v16459_v60 = vld [vmem:[#allocation110_spill] sm:$0xff]  ;;  %v16461_v45 = vld [vmem:[#allocation109_spill] sm:$0xff] }
 0x5c6   : > { %4566 = vmatmul.f32.vlgmr.msra.gmra.mxu3 %v16452_v48  ;;  %4999 = vmatpush.msra.mxu0 %v12555_v63  ;;  %v16458_v63 = vld [vmem:[#allocation112_spill] sm:$0xff] }
 0x5c7   : > { %5241 = vmatpush.msra.mxu3 %v12544_v6  ;;  %v12667_v50 = vadd.f32 %v3938_v2, %v3848_v39  ;;  %4486 = vmatmul.f32.vlgmr.msra.gmra.mxu2 %v16453_v7  ;;  %v16457_v7 = vld [vmem:[#allocation106_spill] sm:$0xff] }
 0x5c8   : > { %5002 = vmatpush.msra.mxu0 %v12558_v0  ;;  %5172 = vmatpush.msra.mxu2 %v16454_v42 }
 0x5c9   : > { %5243 = vmatpush.msra.mxu3 %v12549_v55  ;;  %v3942_v13 = vpop.f32.mrf.mxu3 }
 0x5ca   : > { %5176 = vmatpush.msra.mxu2 %v16455_v61  ;;  %v3687_v54 = vpop.f32.mrf.mxu0  ;;  %v3750_v16 = vpop.f32.mrf.mxu1 }
 0x5cb   : > { %v3751_v48 = vadd.f32 %v3750_v16, %v3684_v44  ;;  %v3855_v2 = vpop.f32.mrf.mxu2  ;;  %v3688_v0 = vadd.f32 %v3687_v54, %v12597_v38 }
 0x5cd   : > { %v3856_v39 = vadd.f32 %v3855_v2, %v3751_v48  ;;  %4305 = vmatmul.f32.gmra.mxu0 %v16456_v62  ;;  %4416 = vmatmul.f32.vlgmr.msra.gmra.mxu1 %v16457_v7  ;;  %v16460_v62 = vld [vmem:[#allocation119_spill] sm:$0xff] }
 0x5ce   : > { %5079 = vmatpush.msra.mxu1 %v12544_v6  ;;  %4572 = vmatmul.f32.gmra.mxu3 %v16458_v63  ;;  %v16462_v6 = vld [vmem:[#allocation116_spill] sm:$0xff] }
 0x5cf   : > { %v12681_v14 = vadd.f32 %v3942_v13, %v3856_v39  ;;  %4491 = vmatmul.f32.gmra.mxu2 %v16459_v60  ;;  %v16463_v39 = vld [vmem:[#allocation114_spill] sm:$0xff] }
 0x5d0   : > { %5081 = vmatpush.msra.mxu1 %v12549_v55 }
 0x5d1   : > { %v3946_v42 = vpop.f32.mrf.mxu3 }
 0x5d2   : > { %v3691_v44 = vpop.f32.mrf.mxu0  ;;  %v3754_v61 = vpop.f32.mrf.mxu1 }
 0x5d3   : > { %v3755_v48 = vadd.f32 %v3754_v61, %v3688_v0  ;;  %v3863_v16 = vpop.f32.mrf.mxu2  ;;  %v3692_v55 = vadd.f32 %v3691_v44, %v12603_v4  ;;  %v16464_v61 = vld [vmem:[#allocation123_spill] sm:$0xff] }
 0x5d5   : > { %v3864_v2 = vadd.f32 %v3863_v16, %v3755_v48  ;;  %4313 = vmatmul.f32.gmra.mxu0 %v16460_v62  ;;  %4420 = vmatmul.f32.gmra.mxu1 %v16461_v45  ;;  %v16465_v48 = vld [vmem:[#allocation113_spill] sm:$0xff]  ;;  %v16466_v16 = vld [vmem:[#allocation120_spill] sm:$0xff] }
 0x5d6   : > { %4578 = vmatmul.f32.gmra.mxu3 %v16462_v6 }
 0x5d7   : > { %v12689_v13 = vadd.f32 %v3946_v42, %v3864_v2  ;;  %4496 = vmatmul.f32.gmra.mxu2 %v16463_v39  ;;  %v16467_v42 = vld [vmem:[#allocation118_spill] sm:$0xff] }
 0x5d9   : > { %v3950_v60 = vpop.f32.mrf.mxu3 }
 0x5da   : > { %v3695_v38 = vpop.f32.mrf.mxu0  ;;  %v3758_v54 = vpop.f32.mrf.mxu1 }
 0x5db   : > { %v3759_v63 = vadd.f32 %v3758_v54, %v3692_v55  ;;  %v3871_v36 = vpop.f32.mrf.mxu2  ;;  %v3696_v2 = vadd.f32 %v3695_v38, %v12609_v34  ;;  %v16468_v54 = vld [vmem:[#allocation127_spill] sm:$0xff] }
 0x5dd   : > { %v3872_v0 = vadd.f32 %v3871_v36, %v3759_v63  ;;  %4321 = vmatmul.f32.gmra.mxu0 %v16464_v61  ;;  %4424 = vmatmul.f32.gmra.mxu1 %v16465_v48  ;;  %v16469_v36 = vld [vmem:[#allocation117_spill] sm:$0xff]  ;;  %v16470_v63 = vld [vmem:[#allocation124_spill] sm:$0xff] }
 0x5de   : > { %4584 = vmatmul.f32.gmra.mxu3 %v16466_v16 }
 0x5df   : > { %v12696_v62 = vadd.f32 %v3950_v60, %v3872_v0  ;;  %4501 = vmatmul.f32.gmra.mxu2 %v16467_v42  ;;  %v16471_v60 = vld [vmem:[#allocation122_spill] sm:$0xff] }
 0x5e1   : > { %v3954_v39 = vpop.f32.mrf.mxu3 }
 0x5e2   : > { %v3762_v4 = vpop.f32.mrf.mxu1  ;;  %v3980_v44 = vpop.f32.mrf.mxu0 }
 0x5e3   : > { %v3763_v6 = vadd.f32 %v3762_v4, %v3696_v2  ;;  %v3879_v41 = vpop.f32.mrf.mxu2  ;;  %v3981_v0 = vadd.f32 %v3980_v44, %v12616_v31  ;;  %v16472_v4 = vld [vmem:[#allocation131_spill] sm:$0xff] }
 0x5e5   : > { %v3880_v55 = vadd.f32 %v3879_v41, %v3763_v6  ;;  %4329 = vmatmul.f32.gmra.mxu0 %v16468_v54  ;;  %4428 = vmatmul.f32.gmra.mxu1 %v16469_v36  ;;  %v16473_v41 = vld [vmem:[#allocation121_spill] sm:$0xff]  ;;  %v16474_v6 = vld [vmem:[#allocation128_spill] sm:$0xff] }
 0x5e6   : > { %4590 = vmatmul.f32.gmra.mxu3 %v16470_v63 }
 0x5e7   : > { %v12703_v61 = vadd.f32 %v3954_v39, %v3880_v55  ;;  %4506 = vmatmul.f32.gmra.mxu2 %v16471_v60  ;;  %v16475_v39 = vld [vmem:[#allocation126_spill] sm:$0xff] }
 0x5e9   : > { %v4220_v42 = vpop.f32.mrf.mxu3 }
 0x5ea   : > { %v3985_v34 = vpop.f32.mrf.mxu0  ;;  %v4060_v38 = vpop.f32.mrf.mxu1 }
 0x5eb   : > { %v4061_v16 = vadd.f32 %v4060_v38, %v3981_v0  ;;  %v4153_v22 = vpop.f32.mrf.mxu2  ;;  %v3986_v55 = vadd.f32 %v3985_v34, %v12623_v57  ;;  %v16476_v38 = vld [vmem:[#allocation135_spill] sm:$0xff] }
 0x5ed   : > { %v4154_v2 = vadd.f32 %v4153_v22, %v4061_v16  ;;  %4337 = vmatmul.f32.gmra.mxu0 %v16472_v4  ;;  %4432 = vmatmul.f32.gmra.mxu1 %v16473_v41  ;;  %v16477_v22 = vld [vmem:[#allocation125_spill] sm:$0xff]  ;;  %v16478_v16 = vld [vmem:[#allocation132_spill] sm:$0xff] }
 0x5ee   : > { %4596 = vmatmul.f32.gmra.mxu3 %v16474_v6 }
 0x5ef   : > { %v12710_v54 = vadd.f32 %v4220_v42, %v4154_v2  ;;  %4511 = vmatmul.f32.gmra.mxu2 %v16475_v39  ;;  %v16479_v42 = vld [vmem:[#allocation130_spill] sm:$0xff] }
 0x5f1   : > { %v4224_v60 = vpop.f32.mrf.mxu3 }
 0x5f2   : > { %v3990_v31 = vpop.f32.mrf.mxu0  ;;  %v4066_v44 = vpop.f32.mrf.mxu1 }
 0x5f3   : > { %v4067_v63 = vadd.f32 %v4066_v44, %v3986_v55  ;;  %v4157_v9 = vpop.f32.mrf.mxu2  ;;  %v3991_v2 = vadd.f32 %v3990_v31, %v12630_v56  ;;  %v16480_v44 = vld [vmem:[#allocation139_spill] sm:$0xff] }
 0x5f5   : > { %v4158_v0 = vadd.f32 %v4157_v9, %v4067_v63  ;;  %4345 = vmatmul.f32.gmra.mxu0 %v16476_v38  ;;  %4436 = vmatmul.f32.gmra.mxu1 %v16477_v22  ;;  %v16481_v9 = vld [vmem:[#allocation129_spill] sm:$0xff]  ;;  %v16482_v63 = vld [vmem:[#allocation136_spill] sm:$0xff] }
 0x5f6   : > { %4602 = vmatmul.f32.gmra.mxu3 %v16478_v16 }
 0x5f7   : > { %v12717_v4 = vadd.f32 %v4224_v60, %v4158_v0  ;;  %4516 = vmatmul.f32.gmra.mxu2 %v16479_v42  ;;  %v16483_v60 = vld [vmem:[#allocation134_spill] sm:$0xff] }
 0x5f9   : > { %v4228_v39 = vpop.f32.mrf.mxu3 }
 0x5fa   : > { %v3995_v57 = vpop.f32.mrf.mxu0  ;;  %v4072_v34 = vpop.f32.mrf.mxu1 }
 0x5fb   : > { %v4073_v6 = vadd.f32 %v4072_v34, %v3991_v2  ;;  %v4161_v47 = vpop.f32.mrf.mxu2  ;;  %v3996_v0 = vadd.f32 %v3995_v57, %v12637_v5  ;;  %v16484_v34 = vld [vmem:[#allocation143_spill] sm:$0xff] }
 0x5fd   : > { %v4162_v55 = vadd.f32 %v4161_v47, %v4073_v6  ;;  %4353 = vmatmul.f32.gmra.mxu0 %v16480_v44  ;;  %4440 = vmatmul.f32.gmra.mxu1 %v16481_v9  ;;  %v16485_v47 = vld [vmem:[#allocation133_spill] sm:$0xff]  ;;  %v16486_v6 = vld [vmem:[#allocation140_spill] sm:$0xff] }
 0x5fe   : > { %4608 = vmatmul.f32.gmra.mxu3 %v16482_v63 }
 0x5ff   : > { %v12724_v38 = vadd.f32 %v4228_v39, %v4162_v55  ;;  %4521 = vmatmul.f32.gmra.mxu2 %v16483_v60  ;;  %v16487_v39 = vld [vmem:[#allocation138_spill] sm:$0xff] }
 0x601   : > { %v4232_v42 = vpop.f32.mrf.mxu3 }
 0x602   : > { %v4000_v56 = vpop.f32.mrf.mxu0  ;;  %v4078_v31 = vpop.f32.mrf.mxu1 }
 0x603   : > { %v4079_v16 = vadd.f32 %v4078_v31, %v3996_v0  ;;  %v4165_v40 = vpop.f32.mrf.mxu2  ;;  %v4001_v55 = vadd.f32 %v4000_v56, %v12644_v15  ;;  %v16488_v31 = vld [vmem:[#allocation147_spill] sm:$0xff] }
 0x605   : > { %v4166_v2 = vadd.f32 %v4165_v40, %v4079_v16  ;;  %4361 = vmatmul.f32.gmra.mxu0 %v16484_v34  ;;  %4444 = vmatmul.f32.gmra.mxu1 %v16485_v47  ;;  %v16489_v40 = vld [vmem:[#allocation137_spill] sm:$0xff]  ;;  %v16490_v16 = vld [vmem:[#allocation144_spill] sm:$0xff] }
 0x606   : > { %4614 = vmatmul.f32.gmra.mxu3 %v16486_v6 }
 0x607   : > { %v12731_v44 = vadd.f32 %v4232_v42, %v4166_v2  ;;  %4526 = vmatmul.f32.gmra.mxu2 %v16487_v39  ;;  %v16491_v42 = vld [vmem:[#allocation142_spill] sm:$0xff] }
 0x609   : > { %v4236_v60 = vpop.f32.mrf.mxu3 }
 0x60a   : > { %v4005_v5 = vpop.f32.mrf.mxu0  ;;  %v4084_v57 = vpop.f32.mrf.mxu1 }
 0x60b   : > { %v4085_v63 = vadd.f32 %v4084_v57, %v4001_v55  ;;  %v4169_v23 = vpop.f32.mrf.mxu2  ;;  %v4006_v2 = vadd.f32 %v4005_v5, %v12651_v58  ;;  %v16492_v57 = vld [vmem:[#allocation151_spill] sm:$0xff] }
 0x60d   : > { %v4170_v0 = vadd.f32 %v4169_v23, %v4085_v63  ;;  %4369 = vmatmul.f32.gmra.mxu0 %v16488_v31  ;;  %4448 = vmatmul.f32.gmra.mxu1 %v16489_v40  ;;  %v16493_v23 = vld [vmem:[#allocation141_spill] sm:$0xff]  ;;  %v16494_v63 = vld [vmem:[#allocation148_spill] sm:$0xff] }
 0x60e   : > { %4620 = vmatmul.f32.gmra.mxu3 %v16490_v16 }
 0x60f   : > { %v12738_v34 = vadd.f32 %v4236_v60, %v4170_v0  ;;  %4531 = vmatmul.f32.gmra.mxu2 %v16491_v42  ;;  %v16495_v60 = vld [vmem:[#allocation146_spill] sm:$0xff] }
 0x611   : > { %v4240_v39 = vpop.f32.mrf.mxu3 }
 0x612   : > { %v4010_v15 = vpop.f32.mrf.mxu0  ;;  %v4090_v56 = vpop.f32.mrf.mxu1 }
 0x613   : > { %v4091_v6 = vadd.f32 %v4090_v56, %v4006_v2  ;;  %v4173_v8 = vpop.f32.mrf.mxu2  ;;  %v4011_v0 = vadd.f32 %v4010_v15, %v12658_v51  ;;  %v16496_v56 = vld [vmem:[#allocation156_spill] sm:$0xff] }
 0x615   : > { %v4174_v55 = vadd.f32 %v4173_v8, %v4091_v6  ;;  %4377 = vmatmul.f32.gmra.mxu0 %v16492_v57  ;;  %4452 = vmatmul.f32.gmra.mxu1 %v16493_v23  ;;  %v16497_v8 = vld [vmem:[#allocation152_spill] sm:$0xff] }
 0x616   : > { %4626 = vmatmul.f32.gmra.mxu3 %v16494_v63 }
 0x617   : > { %v12745_v31 = vadd.f32 %v4240_v39, %v4174_v55  ;;  %4536 = vmatmul.f32.gmra.mxu2 %v16495_v60  ;;  %v16498_v39 = vld [vmem:[#allocation150_spill] sm:$0xff] }
 0x619   : > { %v4244_v42 = vpop.f32.mrf.mxu3 }
 0x61a   : > { %v4015_v58 = vpop.f32.mrf.mxu0  ;;  %v4096_v5 = vpop.f32.mrf.mxu1 }
 0x61b   : > { %v4097_v16 = vadd.f32 %v4096_v5, %v4011_v0  ;;  %v4177_v30 = vpop.f32.mrf.mxu2  ;;  %v4016_v55 = vadd.f32 %v4015_v58, %v12667_v50  ;;  %v16500_v50 = vld [vmem:[#allocation4_spill] sm:$0xff]  ;;  %v16501_v5 = vld [vmem:[#allocation5_spill] sm:$0xff] }
 0x61d   : > { %v4178_v2 = vadd.f32 %v4177_v30, %v4097_v16  ;;  %4385 = vmatmul.f32.gmra.mxu0 %v16496_v56  ;;  %4456 = vmatmul.f32.gmra.mxu1 %v11815_v46  ;;  %v16499_v16 = vld [vmem:[#allocation161_spill] sm:$0xff] }
 0x61e   : > { %4632 = vmatmul.f32.gmra.mxu3 %v16497_v8 }
 0x61f   : > { %v12752_v6 = vadd.f32 %v4244_v42, %v4178_v2  ;;  %4541 = vmatmul.f32.gmra.mxu2 %v16498_v39 }
 0x621   : > { %v4248_v60 = vpop.f32.mrf.mxu3 }
 0x622   : > { %v4020_v51 = vpop.f32.mrf.mxu0  ;;  %v4102_v15 = vpop.f32.mrf.mxu1 }
 0x623   : > { %v4103_v63 = vadd.f32 %v4102_v15, %v4016_v55  ;;  %v4181_v57 = vpop.f32.mrf.mxu2  ;;  %v4021_v42 = vadd.f32 %v4020_v51, %v12681_v14  ;;  %v16502_v15 = vld [vmem:[#allocation8_spill] sm:$0xff]  ;;  %v16503_v14 = vld [vmem:[#allocation165_spill] sm:$0xff] }
 0x624   : > { %v16504_v51 = vld [vmem:[#allocation9_spill] sm:$0xff] }
 0x625   : > { %v4182_v0 = vadd.f32 %v4181_v57, %v4103_v63  ;;  %4460 = vmatmul.f32.gmra.mxu1 %v11838_v19  ;;  %4659 = vmatmul.f32.vlgmr.msrb.gmra.mxu0 %v16457_v7 }
 0x626   : > { %4935 = vmatmul.f32.vlgmr.msrb.gmra.mxu3 %v11861_v29  ;;  %5626 = vmatpush.msrb.mxu0 %v16217_v35 }
 0x627   : > { %v12760_v30 = vadd.f32 %v4248_v60, %v4182_v0  ;;  %4816 = vmatmul.f32.vlgmr.msrb.gmra.mxu2 %v16499_v16  ;;  %5727 = vmatpush.msrb.mxu3 %v16217_v35 }
 0x628   : > { %5697 = vmatpush.msrb.mxu2 %v16500_v50  ;;  %5628 = vmatpush.msrb.mxu0 %v16220_v43 }
 0x629   : > { %v4252_v57 = vpop.f32.mrf.mxu3  ;;  %5729 = vmatpush.msrb.mxu3 %v16220_v43 }
 0x62a   : > { %v4025_v63 = vpop.f32.mrf.mxu0  ;;  %v4108_v58 = vpop.f32.mrf.mxu1  ;;  %5700 = vmatpush.msrb.mxu2 %v16501_v5 }
 0x62b   : > { %v4109_v2 = vadd.f32 %v4108_v58, %v4021_v42  ;;  %v4185_v60 = vpop.f32.mrf.mxu2  ;;  %v4026_v50 = vadd.f32 %v4025_v63, %v12689_v13 }
 0x62d   : > { %v4186_v55 = vadd.f32 %v4185_v60, %v4109_v2  ;;  %4663 = vmatmul.f32.gmra.mxu0 %v16461_v45  ;;  %4726 = vmatmul.f32.vlgmr.msrb.gmra.mxu1 %v16457_v7 }
 0x62e   : > { %4939 = vmatmul.f32.gmra.mxu3 %v11884_v33  ;;  %5665 = vmatpush.msrb.mxu1 %v16502_v15 }
 0x62f   : > { %v12773_v0 = vadd.f32 %v4252_v57, %v4186_v55  ;;  %4824 = vmatmul.f32.gmra.mxu2 %v16503_v14  ;;  %v16505_v55 = vld [vmem:[#allocation170_spill] sm:$0xff] }
 0x630   : > { %5671 = vmatpush.msrb.mxu1 %v16504_v51 }
 0x631   : > { %v4256_v5 = vpop.f32.mrf.mxu3 }
 0x632   : > { %v4030_v42 = vpop.f32.mrf.mxu0  ;;  %v4114_v58 = vpop.f32.mrf.mxu1 }
 0x633   : > { %v4115_v2 = vadd.f32 %v4114_v58, %v4026_v50  ;;  %v4189_v60 = vpop.f32.mrf.mxu2  ;;  %v4031_v51 = vadd.f32 %v4030_v42, %v12696_v62 }
 0x635   : > { %v4190_v16 = vadd.f32 %v4189_v60, %v4115_v2  ;;  %4667 = vmatmul.f32.gmra.mxu0 %v16465_v48  ;;  %4730 = vmatmul.f32.gmra.mxu1 %v16461_v45 }
 0x636   : > { %4943 = vmatmul.f32.gmra.mxu3 %v11907_v52 }
 0x637   : > { %v12781_v57 = vadd.f32 %v4256_v5, %v4190_v16  ;;  %4832 = vmatmul.f32.gmra.mxu2 %v16505_v55  ;;  %v16506_v16 = vld [vmem:[#allocation175_spill] sm:$0xff] }
 0x639   : > { %v4260_v14 = vpop.f32.mrf.mxu3 }
 0x63a   : > { %v4035_v13 = vpop.f32.mrf.mxu0  ;;  %v4120_v63 = vpop.f32.mrf.mxu1 }
 0x63b   : > { %v4121_v15 = vadd.f32 %v4120_v63, %v4031_v51  ;;  %v4193_v39 = vpop.f32.mrf.mxu2  ;;  %v4036_v5 = vadd.f32 %v4035_v13, %v12703_v61 }
 0x63d   : > { %v4194_v50 = vadd.f32 %v4193_v39, %v4121_v15  ;;  %4671 = vmatmul.f32.gmra.mxu0 %v16469_v36  ;;  %4734 = vmatmul.f32.gmra.mxu1 %v16465_v48  ;;  %v16507_v15 = vld [vmem:[#allocation180_spill] sm:$0xff] }
 0x63e   : > { %4947 = vmatmul.f32.gmra.mxu3 %v11936_v27 }
 0x63f   : > { %v12788_v58 = vadd.f32 %v4260_v14, %v4194_v50  ;;  %4840 = vmatmul.f32.gmra.mxu2 %v16506_v16 }
 0x641   : > { %v4264_v2 = vpop.f32.mrf.mxu3 }
 0x642   : > { %v4126_v62 = vpop.f32.mrf.mxu1  ;;  %v4298_v42 = vpop.f32.mrf.mxu0 }
 0x643   : > { %v4127_v60 = vadd.f32 %v4126_v62, %v4036_v5  ;;  %v4197_v55 = vpop.f32.mrf.mxu2  ;;  %v16508_v5 = vld [vmem:[#allocation185_spill] sm:$0xff] }
 0x645   : > { %v4198_v51 = vadd.f32 %v4197_v55, %v4127_v60  ;;  %4675 = vmatmul.f32.gmra.mxu0 %v16473_v41  ;;  %4738 = vmatmul.f32.gmra.mxu1 %v16469_v36 }
 0x646   : > { %4951 = vmatmul.f32.gmra.mxu3 %v11961_v18 }
 0x647   : > { %v12795_v39 = vadd.f32 %v4264_v2, %v4198_v51  ;;  %4848 = vmatmul.f32.gmra.mxu2 %v16507_v15 }
 0x649   : > { %v4567_v14 = vpop.f32.mrf.mxu3 }
 0x64a   : > { %v4306_v63 = vpop.f32.mrf.mxu0  ;;  %v4417_v50 = vpop.f32.mrf.mxu1 }
 0x64b   : > { %v4418_v61 = vadd.f32 %v4417_v50, %v4298_v42  ;;  %v4487_v13 = vpop.f32.mrf.mxu2  ;;  %v16509_v50 = vld [vmem:[#allocation190_spill] sm:$0xff] }
 0x64d   : > { %v4488_v16 = vadd.f32 %v4487_v13, %v4418_v61  ;;  %4679 = vmatmul.f32.gmra.mxu0 %v16477_v22  ;;  %4742 = vmatmul.f32.gmra.mxu1 %v16473_v41 }
 0x64e   : > { %4955 = vmatmul.f32.gmra.mxu3 %v11984_v10 }
 0x64f   : > { %v12801_v55 = vadd.f32 %v4567_v14, %v4488_v16  ;;  %4856 = vmatmul.f32.gmra.mxu2 %v16508_v5 }
 0x651   : > { %v4573_v2 = vpop.f32.mrf.mxu3 }
 0x652   : > { %v4314_v62 = vpop.f32.mrf.mxu0  ;;  %v4421_v60 = vpop.f32.mrf.mxu1 }
 0x653   : > { %v4422_v51 = vadd.f32 %v4421_v60, %v4306_v63  ;;  %v4492_v15 = vpop.f32.mrf.mxu2  ;;  %v16510_v63 = vld [vmem:[#allocation194_spill] sm:$0xff] }
 0x655   : > { %v4493_v8 = vadd.f32 %v4492_v15, %v4422_v51  ;;  %4683 = vmatmul.f32.gmra.mxu0 %v16481_v9  ;;  %4746 = vmatmul.f32.gmra.mxu1 %v16477_v22 }
 0x656   : > { %4959 = vmatmul.f32.gmra.mxu3 %v12007_v11 }
 0x657   : > { %v12807_v42 = vadd.f32 %v4573_v2, %v4493_v8  ;;  %4864 = vmatmul.f32.gmra.mxu2 %v16509_v50 }
 0x659   : > { %v4579_v16 = vpop.f32.mrf.mxu3 }
 0x65a   : > { %v4322_v14 = vpop.f32.mrf.mxu0  ;;  %v4425_v61 = vpop.f32.mrf.mxu1 }
 0x65b   : > { %v4426_v13 = vadd.f32 %v4425_v61, %v4314_v62  ;;  %v4497_v5 = vpop.f32.mrf.mxu2  ;;  %v16511_v62 = vld [vmem:[#allocation198_spill] sm:$0xff] }
 0x65d   : > { %v4498_v56 = vadd.f32 %v4497_v5, %v4426_v13  ;;  %4687 = vmatmul.f32.gmra.mxu0 %v16485_v47  ;;  %4750 = vmatmul.f32.gmra.mxu1 %v16481_v9 }
 0x65e   : > { %4963 = vmatmul.f32.gmra.mxu3 %v12029_v26 }
 0x65f   : > { %v12813_v15 = vadd.f32 %v4579_v16, %v4498_v56  ;;  %4872 = vmatmul.f32.gmra.mxu2 %v16510_v63 }
 0x661   : > { %v4585_v8 = vpop.f32.mrf.mxu3 }
 0x662   : > { %v4330_v2 = vpop.f32.mrf.mxu0  ;;  %v4429_v60 = vpop.f32.mrf.mxu1 }
 0x663   : > { %v4430_v51 = vadd.f32 %v4429_v60, %v4322_v14  ;;  %v4502_v50 = vpop.f32.mrf.mxu2  ;;  %v16512_v14 = vld [vmem:[#allocation202_spill] sm:$0xff] }
 0x665   : > { %v4503_v22 = vadd.f32 %v4502_v50, %v4430_v51  ;;  %4691 = vmatmul.f32.gmra.mxu0 %v16489_v40  ;;  %4754 = vmatmul.f32.gmra.mxu1 %v16485_v47 }
 0x666   : > { %4967 = vmatmul.f32.gmra.mxu3 %v12051_v12 }
 0x667   : > { %v12819_v5 = vadd.f32 %v4585_v8, %v4503_v22  ;;  %4880 = vmatmul.f32.gmra.mxu2 %v16511_v62 }
 0x669   : > { %v4591_v56 = vpop.f32.mrf.mxu3 }
 0x66a   : > { %v4338_v16 = vpop.f32.mrf.mxu0  ;;  %v4433_v61 = vpop.f32.mrf.mxu1 }
 0x66b   : > { %v4434_v13 = vadd.f32 %v4433_v61, %v4330_v2  ;;  %v4507_v63 = vpop.f32.mrf.mxu2  ;;  %v16513_v2 = vld [vmem:[#allocation206_spill] sm:$0xff] }
 0x66d   : > { %v4508_v9 = vadd.f32 %v4507_v63, %v4434_v13  ;;  %4695 = vmatmul.f32.gmra.mxu0 %v16493_v23  ;;  %4758 = vmatmul.f32.gmra.mxu1 %v16489_v40 }
 0x66e   : > { %4971 = vmatmul.f32.gmra.mxu3 %v12073_v37 }
 0x66f   : > { %v12825_v50 = vadd.f32 %v4591_v56, %v4508_v9  ;;  %4888 = vmatmul.f32.gmra.mxu2 %v16512_v14 }
 0x671   : > { %v4597_v22 = vpop.f32.mrf.mxu3 }
 0x672   : > { %v4346_v8 = vpop.f32.mrf.mxu0  ;;  %v4437_v60 = vpop.f32.mrf.mxu1 }
 0x673   : > { %v4438_v51 = vadd.f32 %v4437_v60, %v4338_v16  ;;  %v4512_v62 = vpop.f32.mrf.mxu2 }
 0x675   : > { %v4513_v47 = vadd.f32 %v4512_v62, %v4438_v51  ;;  %4699 = vmatmul.f32.gmra.mxu0 %v11815_v46  ;;  %4762 = vmatmul.f32.gmra.mxu1 %v16493_v23 }
 0x676   : > { %4975 = vmatmul.f32.gmra.mxu3 %v12095_v49 }
 0x677   : > { %v12831_v63 = vadd.f32 %v4597_v22, %v4513_v47  ;;  %4896 = vmatmul.f32.gmra.mxu2 %v16513_v2 }
 0x679   : > { %v4603_v9 = vpop.f32.mrf.mxu3 }
 0x67a   : > { %v4354_v56 = vpop.f32.mrf.mxu0  ;;  %v4441_v61 = vpop.f32.mrf.mxu1 }
 0x67b   : > { %v4442_v13 = vadd.f32 %v4441_v61, %v4346_v8  ;;  %v4517_v14 = vpop.f32.mrf.mxu2  ;;  %v16514_v8 = vld [vmem:[#allocation155_spill] sm:$0xff] }
 0x67d   : > { %v4518_v40 = vadd.f32 %v4517_v14, %v4442_v13  ;;  %4703 = vmatmul.f32.gmra.mxu0 %v11838_v19  ;;  %4766 = vmatmul.f32.gmra.mxu1 %v11815_v46  ;;  %v16515_v14 = vld [vmem:[#allocation6_spill] sm:$0xff] }
 0x67e   : > { %4979 = vmatmul.f32.gmra.mxu3 %v12117_v24 }
 0x67f   : > { %v12837_v62 = vadd.f32 %v4603_v9, %v4518_v40  ;;  %4904 = vmatmul.f32.gmra.mxu2 %v12143_v53  ;;  %v16516_v40 = vld [vmem:[#allocation7_spill] sm:$0xff] }
 0x681   : > { %v4609_v47 = vpop.f32.mrf.mxu3 }
 0x682   : > { %v4362_v16 = vpop.f32.mrf.mxu0  ;;  %v4445_v22 = vpop.f32.mrf.mxu1 }
 0x683   : > { %v4446_v60 = vadd.f32 %v4445_v22, %v4354_v56  ;;  %v4522_v51 = vpop.f32.mrf.mxu2 }
 0x685   : > { %v4523_v2 = vadd.f32 %v4522_v51, %v4446_v60  ;;  %4770 = vmatmul.f32.gmra.mxu1 %v11838_v19  ;;  %5005 = vmatmul.f32.vlgmr.msra.gmra.mxu0 %v16514_v8  ;;  %v16517_v51 = vld [vmem:[#allocation160_spill] sm:$0xff]  ;;  %v16518_v19 = vld [vmem:[#allocation157_spill] sm:$0xff] }
 0x686   : > { %5245 = vmatmul.f32.vlgmr.msra.gmra.mxu3 %v11861_v29  ;;  %5760 = vmatpush.msra.mxu0 %v16515_v14 }
 0x687   : > { %v12844_v61 = vadd.f32 %v4609_v47, %v4523_v2  ;;  %5178 = vmatmul.f32.vlgmr.msra.gmra.mxu2 %v11861_v29 }
 0x688   : > { %5764 = vmatpush.msra.mxu0 %v16516_v40 }
 0x689   : > { %v4615_v9 = vpop.f32.mrf.mxu3 }
 0x68a   : > { %v4370_v13 = vpop.f32.mrf.mxu0  ;;  %v4449_v53 = vpop.f32.mrf.mxu1 }
 0x68b   : > { %v4450_v56 = vadd.f32 %v4449_v53, %v4362_v16  ;;  %v4527_v22 = vpop.f32.mrf.mxu2 }
 0x68d   : > { %v4528_v60 = vadd.f32 %v4527_v22, %v4450_v56  ;;  %5010 = vmatmul.f32.gmra.mxu0 %v16517_v51  ;;  %5085 = vmatmul.f32.vlgmr.msra.gmra.mxu1 %v16518_v19  ;;  %v16519_v22 = vld [vmem:[#allocation162_spill] sm:$0xff] }
 0x68e   : > { %5249 = vmatmul.f32.gmra.mxu3 %v11884_v33  ;;  %5789 = vmatpush.msra.mxu1 %v16217_v35 }
 0x68f   : > { %v12852_v2 = vadd.f32 %v4615_v9, %v4528_v60  ;;  %5182 = vmatmul.f32.gmra.mxu2 %v11884_v33 }
 0x690   : > { %5791 = vmatpush.msra.mxu1 %v16220_v43 }
 0x691   : > { %v4621_v47 = vpop.f32.mrf.mxu3 }
 0x692   : > { %v4378_v40 = vpop.f32.mrf.mxu0  ;;  %v4453_v14 = vpop.f32.mrf.mxu1 }
 0x693   : > { %v4454_v53 = vadd.f32 %v4453_v14, %v4370_v13  ;;  %v4532_v16 = vpop.f32.mrf.mxu2 }
 0x695   : > { %v4533_v56 = vadd.f32 %v4532_v16, %v4454_v53  ;;  %5015 = vmatmul.f32.gmra.mxu0 %v11923_v1  ;;  %5091 = vmatmul.f32.gmra.mxu1 %v16519_v22 }
 0x696   : > { %5253 = vmatmul.f32.gmra.mxu3 %v11907_v52 }
 0x697   : > { %v12859_v19 = vadd.f32 %v4621_v47, %v4533_v56  ;;  %5186 = vmatmul.f32.gmra.mxu2 %v11907_v52 }
 0x699   : > { %v4627_v9 = vpop.f32.mrf.mxu3 }
 0x69a   : > { %v4386_v60 = vpop.f32.mrf.mxu0  ;;  %v4457_v51 = vpop.f32.mrf.mxu1 }
 0x69b   : > { %v4458_v8 = vadd.f32 %v4457_v51, %v4378_v40  ;;  %v4537_v33 = vpop.f32.mrf.mxu2  ;;  %v16520_v40 = vld [vmem:[#allocation171_spill] sm:$0xff] }
 0x69d   : > { %v4538_v43 = vadd.f32 %v4537_v33, %v4458_v8  ;;  %5020 = vmatmul.f32.gmra.mxu0 %v11951_v25  ;;  %5097 = vmatmul.f32.gmra.mxu1 %v11934_v20 }
 0x69e   : > { %5257 = vmatmul.f32.gmra.mxu3 %v11936_v27 }
 0x69f   : > { %v12865_v14 = vadd.f32 %v4627_v9, %v4538_v43  ;;  %5190 = vmatmul.f32.gmra.mxu2 %v11936_v27 }
 0x6a1   : > { %v4633_v13 = vpop.f32.mrf.mxu3 }
 0x6a2   : > { %v4461_v47 = vpop.f32.mrf.mxu1  ;;  %v4660_v53 = vpop.f32.mrf.mxu0 }
 0x6a3   : > { %v4462_v16 = vadd.f32 %v4461_v47, %v4386_v60  ;;  %v4542_v56 = vpop.f32.mrf.mxu2  ;;  %v4661_v43 = vadd.f32 %v4660_v53, %v12801_v55 }
 0x6a5   : > { %v4543_v22 = vadd.f32 %v4542_v56, %v4462_v16  ;;  %5025 = vmatmul.f32.gmra.mxu0 %v11975_v32  ;;  %5103 = vmatmul.f32.gmra.mxu1 %v16520_v40  ;;  %v16521_v16 = vld [vmem:[#allocation179_spill] sm:$0xff]  ;;  %v16522_v56 = vld [vmem:[#allocation176_spill] sm:$0xff]  ;;  %v16674_v40 = vld [vmem:[#allocation105_spill] sm:$0xff] }
 0x6a6   : > { %5261 = vmatmul.f32.gmra.mxu3 %v11961_v18 }
 0x6a7   : > { %v12871_v33 = vadd.f32 %v4633_v13, %v4543_v22  ;;  %5194 = vmatmul.f32.gmra.mxu2 %v11961_v18 }
 0x6a9   : > { %v4936_v8 = vpop.f32.mrf.mxu3 }
 0x6aa   : > { %v4664_v51 = vpop.f32.mrf.mxu0  ;;  %v4727_v9 = vpop.f32.mrf.mxu1 }
 0x6ab   : > { %v4728_v20 = vadd.f32 %v4727_v9, %v4661_v43  ;;  %v4817_v25 = vpop.f32.mrf.mxu2  ;;  %v4665_v55 = vadd.f32 %v4664_v51, %v12807_v42 }
 0x6ac   : > { %v12875_v60 = vadd.f32 %v4936_v8, %v4817_v25  ;;  %v16524_v8 = vld [vmem:[#allocation181_spill] sm:$0xff] }
 0x6ad   : > { %v12878_v47 = vadd.f32 %v4728_v20, %v12710_v54  ;;  %5030 = vmatmul.f32.gmra.mxu0 %v16521_v16  ;;  %5109 = vmatmul.f32.gmra.mxu1 %v16522_v56  ;;  %v16523_v54 = vld [vmem:[#allocation184_spill] sm:$0xff] }
 0x6ae   : > { %5265 = vmatmul.f32.gmra.mxu3 %v11984_v10 }
 0x6af   : > { %5198 = vmatmul.f32.gmra.mxu2 %v11984_v10 }
 0x6b1   : > { %v4940_v22 = vpop.f32.mrf.mxu3 }
 0x6b2   : > { %v4668_v13 = vpop.f32.mrf.mxu0  ;;  %v4731_v53 = vpop.f32.mrf.mxu1 }
 0x6b3   : > { %v4732_v43 = vadd.f32 %v4731_v53, %v4665_v55  ;;  %v4825_v9 = vpop.f32.mrf.mxu2  ;;  %v4669_v42 = vadd.f32 %v4668_v13, %v12813_v15 }
 0x6b4   : > { %v12885_v25 = vadd.f32 %v4940_v22, %v4825_v9  ;;  %v16529_v9 = vld [vmem:[#allocation186_spill] sm:$0xff] }
 0x6b5   : > { %v12888_v20 = vadd.f32 %v4732_v43, %v12717_v4  ;;  %5035 = vmatmul.f32.gmra.mxu0 %v16523_v54  ;;  %5115 = vmatmul.f32.gmra.mxu1 %v16524_v8  ;;  %v16528_v43 = vld [vmem:[#allocation189_spill] sm:$0xff]  ;;  %v10780_v8 = vld [vmem:[%s10920_s26 + $0x1c] sm:$0xf] }
 0x6b6   : > { %5269 = vmatmul.f32.gmra.mxu3 %v12007_v11 }
 0x6b7   : > { %5202 = vmatmul.f32.gmra.mxu2 %v12007_v11 }
 0x6b9   : > { %v12895_v51 = vpop.f32.mrf.mxu3 }
 0x6ba   : > { %16525 = vst [vmem:[#allocation57_spill] sm:$0xff] %v12895_v51  ;;  %v4672_v56 = vpop.f32.mrf.mxu0  ;;  %v4735_v55 = vpop.f32.mrf.mxu1 }
 0x6bb   : > { %v4736_v53 = vadd.f32 %v4735_v55, %v4669_v42  ;;  %v12897_v22 = vpop.f32.mrf.mxu2  ;;  %v4673_v15 = vadd.f32 %v4672_v56, %v12819_v5 }
 0x6bc   : > { %16526 = vst [vmem:[#allocation61_spill] sm:$0xff] %v12897_v22 }
 0x6bd   : > { %v12900_v4 = vadd.f32 %v4736_v53, %v12724_v38  ;;  %5040 = vmatmul.f32.gmra.mxu0 %v16528_v43  ;;  %5121 = vmatmul.f32.gmra.mxu1 %v16529_v9  ;;  %v5605_v38 = vld.sshfl [vmem:[#allocation1] sm:$0xff pattern:$0x75316420]  ;;  %v16534_v9 = vld [vmem:[#allocation191_spill] sm:$0xff]  ;;  %v10779_v43 = vld [vmem:[%s10920_s26 + $0xc] sm:$0xf] }
 0x6be   : > { %5273 = vmatmul.f32.gmra.mxu3 %v12029_v26  ;;  %8145 = vst [vmem:[#allocation1] ss:$2 sm:$0xff] %v10779_v43  ;;  %v5606_v43 = vld.sshfl [vmem:[#allocation1 + $0x10] sm:$0xff pattern:$0x75316420] }
 0x6bf   : > { %16527 = vst [vmem:[#allocation273_spill] sm:$0xff] %v12900_v4  ;;  %5206 = vmatmul.f32.gmra.mxu2 %v12029_v26  ;;  %v16533_v4 = vld [vmem:[#allocation193_spill] sm:$0xff] }
 0x6c0   : > { %8147 = vst [vmem:[#allocation1 + $0x1] ss:$2 sm:$0xff] %v10780_v8 }
 0x6c1   : > { %v12907_v13 = vpop.f32.mrf.mxu3 }
 0x6c2   : > { %16530 = vst [vmem:[#allocation274_spill] sm:$0xff] %v12907_v13  ;;  %v4676_v42 = vpop.f32.mrf.mxu0  ;;  %v4739_v55 = vpop.f32.mrf.mxu1  ;;  %v16538_v13 = vld [vmem:[#allocation197_spill] sm:$0xff] }
 0x6c3   : > { %v4740_v51 = vadd.f32 %v4739_v55, %v4673_v15  ;;  %v12909_v22 = vpop.f32.mrf.mxu2  ;;  %v4677_v5 = vadd.f32 %v4676_v42, %v12825_v50  ;;  %v5607_v50 = vsel %vm309_vm0, %v5605_v38, 0  ;;  %v16544_v38 = vld [vmem:[#allocation199_spill] sm:$0xff] }
 0x6c4   : > { %16531 = vst [vmem:[#allocation275_spill] sm:$0xff] %v12909_v22  ;;  %v16539_v22 = vld [vmem:[#allocation195_spill] sm:$0xff] }
 0x6c5   : > { %v12912_v53 = vadd.f32 %v4740_v51, %v12731_v44  ;;  %5045 = vmatmul.f32.gmra.mxu0 %v16533_v4  ;;  %5127 = vmatmul.f32.gmra.mxu1 %v16534_v9  ;;  %v10781_v9 = vld [vmem:[%s10920_s26 + $0x2c] sm:$0xf]  ;;  %v16672_v4 = vld [vmem:[#allocation103_spill] sm:$0xff] }
 0x6c6   : > { %5277 = vmatmul.f32.gmra.mxu3 %v12051_v12  ;;  %8149 = vst [vmem:[#allocation1 + $0x10] ss:$2 sm:$0xff] %v10781_v9 }
 0x6c7   : > { %16532 = vst [vmem:[#allocation276_spill] sm:$0xff] %v12912_v53  ;;  %5210 = vmatmul.f32.gmra.mxu2 %v12051_v12 }
 0x6c9   : > { %v12921_v56 = vpop.f32.mrf.mxu3 }
 0x6ca   : > { %16535 = vst [vmem:[#allocation277_spill] sm:$0xff] %v12921_v56  ;;  %v4680_v15 = vpop.f32.mrf.mxu0  ;;  %v4743_v44 = vpop.f32.mrf.mxu1 }
 0x6cb   : > { %v4744_v51 = vadd.f32 %v4743_v44, %v4677_v5  ;;  %v12923_v55 = vpop.f32.mrf.mxu2  ;;  %v4681_v8 = vadd.f32 %v4680_v15, %v12831_v63  ;;  %v12937_v5 = vand.u32 4294901760, %v5607_v50  ;;  %v5609_v63 = vsel %vm309_vm0, %v5606_v43, 0  ;;  %v16549_v43 = vld [vmem:[#allocation203_spill] sm:$0xff] }
 0x6cc   : > { %16536 = vst [vmem:[#allocation278_spill] sm:$0xff] %v12923_v55  ;;  %v16543_v55 = vld [vmem:[#allocation201_spill] sm:$0xff] }
 0x6cd   : > { %v12926_v53 = vadd.f32 %v4744_v51, %v12738_v34  ;;  %5050 = vmatmul.f32.gmra.mxu0 %v16538_v13  ;;  %5133 = vmatmul.f32.gmra.mxu1 %v16539_v22  ;;  %v5630_v9 = vsub.f32 %v5607_v50, %v12937_v5 }
 0x6ce   : > { %5281 = vmatmul.f32.gmra.mxu3 %v12073_v37 }
 0x6cf   : > { %16537 = vst [vmem:[#allocation279_spill] sm:$0xff] %v12926_v53  ;;  %5214 = vmatmul.f32.gmra.mxu2 %v12073_v37 }
 0x6d1   : > { %v12935_v42 = vpop.f32.mrf.mxu3 }
 0x6d2   : > { %16540 = vst [vmem:[#allocation280_spill] sm:$0xff] %v12935_v42  ;;  %v4684_v34 = vpop.f32.mrf.mxu0  ;;  %v4747_v44 = vpop.f32.mrf.mxu1  ;;  %v12953_v42 = vand.u32 4294901760, %v5609_v63 }
 0x6d3   : > { %v4748_v51 = vadd.f32 %v4747_v44, %v4681_v8  ;;  %v12939_v53 = vpop.f32.mrf.mxu2  ;;  %v4685_v15 = vadd.f32 %v4684_v34, %v12837_v62  ;;  %v5631_v44 = vand.u32 4294901760, %v5630_v9 }
 0x6d4   : > { %16541 = vst [vmem:[#allocation281_spill] sm:$0xff] %v12939_v53  ;;  %v5638_v62 = vsub.f32 %v5609_v63, %v12953_v42 }
 0x6d5   : > { %v12942_v56 = vadd.f32 %v4748_v51, %v12745_v31  ;;  %5055 = vmatmul.f32.gmra.mxu0 %v16543_v55  ;;  %5139 = vmatmul.f32.gmra.mxu1 %v16544_v38  ;;  %v16548_v38 = vld [vmem:[#allocation205_spill] sm:$0xff]  ;;  %v5632_v55 = vsub.f32 %v5630_v9, %v5631_v44 }
 0x6d6   : > { %5285 = vmatmul.f32.gmra.mxu3 %v12095_v49 }
 0x6d7   : > { %16542 = vst [vmem:[#allocation282_spill] sm:$0xff] %v12942_v56  ;;  %5218 = vmatmul.f32.gmra.mxu2 %v12095_v49 }
 0x6d9   : > { %v12951_v8 = vpop.f32.mrf.mxu3 }
 0x6da   : > { %16545 = vst [vmem:[#allocation283_spill] sm:$0xff] %v12951_v8  ;;  %v4688_v31 = vpop.f32.mrf.mxu0  ;;  %v4751_v51 = vpop.f32.mrf.mxu1  ;;  %v5633_v8 = vand.u32 4294901760, %v5632_v55 }
 0x6db   : > { %v4752_v56 = vadd.f32 %v4751_v51, %v4685_v15  ;;  %v12955_v53 = vpop.f32.mrf.mxu2  ;;  %v4689_v34 = vadd.f32 %v4688_v31, %v12844_v61  ;;  %v5639_v51 = vand.u32 4294901760, %v5638_v62 }
 0x6dc   : > { %16546 = vst [vmem:[#allocation284_spill] sm:$0xff] %v12955_v53 }
 0x6dd   : > { %v12958_v50 = vadd.f32 %v4752_v56, %v12752_v6  ;;  %5060 = vmatmul.f32.gmra.mxu0 %v16548_v38  ;;  %5145 = vmatmul.f32.gmra.mxu1 %v16549_v43  ;;  %v16553_v38 = vld [vmem:[#allocation207_spill] sm:$0xff]  ;;  %v5640_v63 = vsub.f32 %v5638_v62, %v5639_v51 }
 0x6de   : > { %5289 = vmatmul.f32.gmra.mxu3 %v12117_v24 }
 0x6df   : > { %16547 = vst [vmem:[#allocation285_spill] sm:$0xff] %v12958_v50  ;;  %5222 = vmatmul.f32.gmra.mxu2 %v12117_v24  ;;  %v5641_v55 = vand.u32 4294901760, %v5640_v63 }
 0x6e1   : > { %v12966_v15 = vpop.f32.mrf.mxu3 }
 0x6e2   : > { %16550 = vst [vmem:[#allocation286_spill] sm:$0xff] %v12966_v15  ;;  %v4692_v53 = vpop.f32.mrf.mxu0  ;;  %v4755_v6 = vpop.f32.mrf.mxu1 }
 0x6e3   : > { %v4756_v56 = vadd.f32 %v4755_v6, %v4689_v34  ;;  %v12968_v50 = vpop.f32.mrf.mxu2  ;;  %v4693_v61 = vadd.f32 %v4692_v53, %v12852_v2 }
 0x6e4   : > { %16551 = vst [vmem:[#allocation287_spill] sm:$0xff] %v12968_v50  ;;  %v16643_v50 = vld [vmem:[#allocation51_spill] sm:$0xff] }
 0x6e5   : > { %v12971_v43 = vadd.f32 %v4756_v56, %v12760_v30  ;;  %5151 = vmatmul.f32.gmra.mxu1 %v16553_v38  ;;  %5634 = vmatmul.f32.vlgmr.msrb.gmra.mxu0 %v5633_v8 }
 0x6e6   : > { %5733 = vmatmul.f32.vlgmr.msrb.gmra.mxu3 %v5631_v44 }
 0x6e7   : > { %16552 = vst [vmem:[#allocation288_spill] sm:$0xff] %v12971_v43  ;;  %5703 = vmatmul.f32.vlgmr.msrb.gmra.mxu2 %v5630_v9 }
 0x6e9   : > { %v12975_v31 = vpop.f32.mrf.mxu3 }
 0x6ea   : > { %16554 = vst [vmem:[#allocation289_spill] sm:$0xff] %v12975_v31  ;;  %v4696_v15 = vpop.f32.mrf.mxu0  ;;  %v4759_v22 = vpop.f32.mrf.mxu1 }
 0x6eb   : > { %v4760_v13 = vadd.f32 %v4759_v22, %v4693_v61  ;;  %v12977_v34 = vpop.f32.mrf.mxu2  ;;  %v4697_v30 = vadd.f32 %v4696_v15, %v12859_v19 }
 0x6ec   : > { %16555 = vst [vmem:[#allocation290_spill] sm:$0xff] %v12977_v34 }
 0x6ed   : > { %v12980_v6 = vadd.f32 %v4760_v13, %v12773_v0  ;;  %5642 = vmatmul.f32.gmra.mxu0 %v5641_v55  ;;  %5673 = vmatmul.f32.vlgmr.msrb.gmra.mxu1 %v12937_v5 }
 0x6ee   : > { %5739 = vmatmul.f32.gmra.mxu3 %v5639_v51 }
 0x6ef   : > { %16556 = vst [vmem:[#allocation291_spill] sm:$0xff] %v12980_v6  ;;  %5708 = vmatmul.f32.gmra.mxu2 %v5638_v62 }
 0x6f1   : > { %v12984_v9 = vpop.f32.mrf.mxu3 }
 0x6f2   : > { %16557 = vst [vmem:[#allocation292_spill] sm:$0xff] %v12984_v9  ;;  %v4700_v2 = vpop.f32.mrf.mxu0  ;;  %v4763_v53 = vpop.f32.mrf.mxu1 }
 0x6f3   : > { %v4764_v8 = vadd.f32 %v4763_v53, %v4697_v30  ;;  %v12986_v44 = vpop.f32.mrf.mxu2  ;;  %v4701_v0 = vadd.f32 %v4700_v2, %v12865_v14 }
 0x6f4   : > { %16558 = vst [vmem:[#allocation293_spill] sm:$0xff] %v12986_v44 }
 0x6f5   : > { %v12989_v22 = vadd.f32 %v4764_v8, %v12781_v57  ;;  %5677 = vmatmul.f32.gmra.mxu1 %v12953_v42  ;;  %5766 = vmatmul.f32.vlgmr.msra.gmra.mxu0 %v12937_v5 }
 0x6f7   : > { %16559 = vst [vmem:[#allocation294_spill] sm:$0xff] %v12989_v22 }
 0x6f9   : > { %v12994_v13 = vpop.f32.mrf.mxu3 }
 0x6fa   : > { %16560 = vst [vmem:[#allocation295_spill] sm:$0xff] %v12994_v13  ;;  %v4704_v62 = vpop.f32.mrf.mxu0  ;;  %v4767_v19 = vpop.f32.mrf.mxu1 }
 0x6fb   : > { %v4768_v15 = vadd.f32 %v4767_v19, %v4701_v0  ;;  %v12996_v51 = vpop.f32.mrf.mxu2  ;;  %v4705_v57 = vadd.f32 %v4704_v62, %v12871_v33 }
 0x6fc   : > { %16561 = vst [vmem:[#allocation296_spill] sm:$0xff] %v12996_v51 }
 0x6fd   : > { %v12999_v56 = vadd.f32 %v4768_v15, %v12788_v58  ;;  %5770 = vmatmul.f32.gmra.mxu0 %v12953_v42  ;;  %5793 = vmatmul.f32.vlgmr.msra.gmra.mxu1 %v12937_v5 }
 0x6ff   : > { %16562 = vst [vmem:[#allocation297_spill] sm:$0xff] %v12999_v56 }
 0x701   : > { %v13004_v63 = vpop.f32.mrf.mxu3 }
 0x702   : > { %16563 = vst [vmem:[#allocation298_spill] sm:$0xff] %v13004_v63  ;;  %v4771_v61 = vpop.f32.mrf.mxu1  ;;  %v5006_v14 = vpop.f32.mrf.mxu0 }
 0x703   : > { %v4772_v55 = vadd.f32 %v4771_v61, %v4705_v57  ;;  %v13006_v30 = vpop.f32.mrf.mxu2  ;;  %v5007_v58 = vadd.f32 %v5006_v14, %v12875_v60 }
 0x704   : > { %16564 = vst [vmem:[#allocation299_spill] sm:$0xff] %v13006_v30 }
 0x705   : > { %v13009_v2 = vadd.f32 %v4772_v55, %v12795_v39  ;;  %5797 = vmatmul.f32.gmra.mxu1 %v12953_v42 }
 0x707   : > { %16565 = vst [vmem:[#allocation300_spill] sm:$0xff] %v13009_v2 }
 0x709   : > { %v5246_v53 = vpop.f32.mrf.mxu3 }
 0x70a   : > { %v5011_v8 = vpop.f32.mrf.mxu0  ;;  %v5086_v0 = vpop.f32.mrf.mxu1 }
 0x70b   : > { %v5087_v5 = vadd.f32 %v5086_v0, %v5007_v58  ;;  %v5179_v19 = vpop.f32.mrf.mxu2  ;;  %v5012_v15 = vadd.f32 %v5011_v8, %v12885_v25 }
 0x70d   : > { %v5180_v33 = vadd.f32 %v5179_v19, %v5087_v5 }
 0x70f   : > { %v5247_v62 = vadd.f32 %v5246_v53, %v5180_v33 }
 0x711   : > { %v13015_v57 = vadd.f32 %v5247_v62, %v12878_v47  ;;  %v5250_v61 = vpop.f32.mrf.mxu3 }
 0x712   : > { %v13017_v63 = vpop.f32.mrf.mxu0  ;;  %v5092_v39 = vpop.f32.mrf.mxu1 }
 0x713   : > { %16566 = vst [vmem:[#allocation301_spill] sm:$0xff] %v13015_v57  ;;  %v5093_v55 = vadd.f32 %v5092_v39, %v5012_v15  ;;  %v5183_v42 = vpop.f32.mrf.mxu2 }
 0x714   : > { %16567 = vst [vmem:[#allocation302_spill] sm:$0xff] %v13017_v63 }
 0x715   : > { %v5184_v2 = vadd.f32 %v5183_v42, %v5093_v55 }
 0x717   : > { %v5251_v60 = vadd.f32 %v5250_v61, %v5184_v2 }
 0x719   : > { %v13020_v14 = vadd.f32 %v5251_v60, %v12888_v20  ;;  %v13022_v58 = vpop.f32.mrf.mxu3 }
 0x71a   : > { %16569 = vst [vmem:[#allocation304_spill] sm:$0xff] %v13022_v58  ;;  %v13024_v0 = vpop.f32.mrf.mxu0  ;;  %v13026_v53 = vpop.f32.mrf.mxu1 }
 0x71b   : > { %16568 = vst [vmem:[#allocation303_spill] sm:$0xff] %v13020_v14  ;;  %v13028_v25 = vpop.f32.mrf.mxu2 }
 0x71c   : > { %16570 = vst [vmem:[#allocation305_spill] sm:$0xff] %v13024_v0 }
 0x71d   : > { %16571 = vst [vmem:[#allocation306_spill] sm:$0xff] %v13026_v53 }
 0x71e   : > { %16572 = vst [vmem:[#allocation307_spill] sm:$0xff] %v13028_v25 }
 0x721   : > { %v13030_v47 = vpop.f32.mrf.mxu3 }
 0x722   : > { %16573 = vst [vmem:[#allocation308_spill] sm:$0xff] %v13030_v47  ;;  %v13032_v8 = vpop.f32.mrf.mxu0  ;;  %v13034_v5 = vpop.f32.mrf.mxu1 }
 0x723   : > { %16574 = vst [vmem:[#allocation309_spill] sm:$0xff] %v13032_v8  ;;  %v13036_v19 = vpop.f32.mrf.mxu2 }
 0x724   : > { %16575 = vst [vmem:[#allocation310_spill] sm:$0xff] %v13034_v5 }
 0x725   : > { %16576 = vst [vmem:[#allocation311_spill] sm:$0xff] %v13036_v19 }
 0x729   : > { %v13038_v2 = vpop.f32.mrf.mxu3 }
 0x72a   : > { %16577 = vst [vmem:[#allocation312_spill] sm:$0xff] %v13038_v2  ;;  %v13040_v20 = vpop.f32.mrf.mxu0  ;;  %v13042_v33 = vpop.f32.mrf.mxu1  ;;  %v16658_v2 = vld [vmem:[#allocation71_spill] sm:$0xff] }
 0x72b   : > { %16578 = vst [vmem:[#allocation313_spill] sm:$0xff] %v13040_v20  ;;  %v13044_v62 = vpop.f32.mrf.mxu2 }
 0x72c   : > { %16579 = vst [vmem:[#allocation314_spill] sm:$0xff] %v13042_v33  ;;  %v16664_v33 = vld [vmem:[#allocation87_spill] sm:$0xff] }
 0x72d   : > { %16580 = vst [vmem:[#allocation315_spill] sm:$0xff] %v13044_v62 }
 0x731   : > { %v13046_v15 = vpop.f32.mrf.mxu3 }
 0x732   : > { %16581 = vst [vmem:[#allocation316_spill] sm:$0xff] %v13046_v15  ;;  %v13048_v61 = vpop.f32.mrf.mxu0  ;;  %v13050_v39 = vpop.f32.mrf.mxu1 }
 0x733   : > { %16582 = vst [vmem:[#allocation317_spill] sm:$0xff] %v13048_v61  ;;  %v13052_v55 = vpop.f32.mrf.mxu2 }
 0x734   : > { %16583 = vst [vmem:[#allocation318_spill] sm:$0xff] %v13050_v39 }
 0x735   : > { %16584 = vst [vmem:[#allocation319_spill] sm:$0xff] %v13052_v55 }
 0x739   : > { %v13054_v42 = vpop.f32.mrf.mxu3 }
 0x73a   : > { %16585 = vst [vmem:[#allocation320_spill] sm:$0xff] %v13054_v42  ;;  %v13056_v60 = vpop.f32.mrf.mxu0  ;;  %v13058_v30 = vpop.f32.mrf.mxu1 }
 0x73b   : > { %16586 = vst [vmem:[#allocation321_spill] sm:$0xff] %v13056_v60  ;;  %v13060_v22 = vpop.f32.mrf.mxu2  ;;  %v16635_v60 = vld [vmem:[#allocation43_spill] sm:$0xff] }
 0x73c   : > { %16587 = vst [vmem:[#allocation322_spill] sm:$0xff] %v13058_v30 }
 0x73d   : > { %16588 = vst [vmem:[#allocation323_spill] sm:$0xff] %v13060_v22 }
 0x741   : > { %v13062_v9 = vpop.f32.mrf.mxu3 }
 0x742   : > { %16589 = vst [vmem:[#allocation324_spill] sm:$0xff] %v13062_v9  ;;  %v13064_v44 = vpop.f32.mrf.mxu0  ;;  %v13066_v6 = vpop.f32.mrf.mxu1 }
 0x743   : > { %16590 = vst [vmem:[#allocation325_spill] sm:$0xff] %v13064_v44  ;;  %v13068_v31 = vpop.f32.mrf.mxu2 }
 0x744   : > { %16591 = vst [vmem:[#allocation326_spill] sm:$0xff] %v13066_v6  ;;  %v16631_v6 = vld [vmem:[#allocation39_spill] sm:$0xff] }
 0x745   : > { %16592 = vst [vmem:[#allocation327_spill] sm:$0xff] %v13068_v31 }
 0x749   : > { %v13070_v34 = vpop.f32.mrf.mxu3 }
 0x74a   : > { %16593 = vst [vmem:[#allocation328_spill] sm:$0xff] %v13070_v34  ;;  %v13072_v61 = vpop.f32.mrf.mxu0  ;;  %v13074_v15 = vpop.f32.mrf.mxu1 }
 0x74b   : > { %16594 = vst [vmem:[#allocation329_spill] sm:$0xff] %v13072_v61  ;;  %v13076_v42 = vpop.f32.mrf.mxu2 }
 0x74c   : > { %16595 = vst [vmem:[#allocation330_spill] sm:$0xff] %v13074_v15 }
 0x74d   : > { %16596 = vst [vmem:[#allocation331_spill] sm:$0xff] %v13076_v42 }
 0x751   : > { %v13084_v39 = vpop.f32.mrf.mxu3 }
 0x752   : > { %v13078_v55 = vpop.f32.mrf.mxu0  ;;  %v13080_v30 = vpop.f32.mrf.mxu1  ;;  %16600 = vst [vmem:[#allocation335_spill] sm:$0xff] %v13084_v39 }
 0x753   : > { %16597 = vst [vmem:[#allocation332_spill] sm:$0xff] %v13078_v55  ;;  %v13082_v22 = vpop.f32.mrf.mxu2 }
 0x754   : > { %16598 = vst [vmem:[#allocation333_spill] sm:$0xff] %v13080_v30 }
 0x755   : > { %16599 = vst [vmem:[#allocation334_spill] sm:$0xff] %v13082_v22 }
 0x759   : > { %v13092_v34 = vpop.f32.mrf.mxu3 }
 0x75a   : > { %v13086_v44 = vpop.f32.mrf.mxu0  ;;  %v13088_v20 = vpop.f32.mrf.mxu1  ;;  %16604 = vst [vmem:[#allocation339_spill] sm:$0xff] %v13092_v34 }
 0x75b   : > { %16601 = vst [vmem:[#allocation336_spill] sm:$0xff] %v13086_v44  ;;  %v13090_v47 = vpop.f32.mrf.mxu2 }
 0x75c   : > { %16602 = vst [vmem:[#allocation337_spill] sm:$0xff] %v13088_v20 }
 0x75d   : > { %16603 = vst [vmem:[#allocation338_spill] sm:$0xff] %v13090_v47 }
 0x761   : > { %v13098_v19 = vpop.f32.mrf.mxu3 }
 0x762   : > { %v13094_v61 = vpop.f32.mrf.mxu1  ;;  %v5635_v15 = vpop.f32.mrf.mxu0  ;;  %16607 = vst [vmem:[#allocation342_spill] sm:$0xff] %v13098_v19 }
 0x763   : > { %16605 = vst [vmem:[#allocation340_spill] sm:$0xff] %v13094_v61  ;;  %v13096_v42 = vpop.f32.mrf.mxu2 }
 0x764   : > { %16606 = vst [vmem:[#allocation341_spill] sm:$0xff] %v13096_v42 }
 0x769   : > { %v5734_v39 = vpop.f32.mrf.mxu3 }
 0x76a   : > { %v5643_v30 = vpop.f32.mrf.mxu0  ;;  %v5674_v5 = vpop.f32.mrf.mxu1 }
 0x76b   : > { %v5704_v22 = vpop.f32.mrf.mxu2  ;;  %v5675_v0 = vadd.f32 %v5674_v5, %v5635_v15 }
 0x76d   : > { %v5705_v44 = vadd.f32 %v5704_v22, %v5675_v0 }
 0x76f   : > { %v5735_v20 = vadd.f32 %v5734_v39, %v5705_v44  ;;  %v16608_v39 = vld [vmem:[#allocation15_spill] sm:$0xff] }
 0x771   : > { %v5740_v14 = vpop.f32.mrf.mxu3 }
 0x772   : > { %v5678_v57 = vpop.f32.mrf.mxu1  ;;  %v5767_v56 = vpop.f32.mrf.mxu0 }
 0x773   : > { %v5679_v55 = vadd.f32 %v5678_v57, %v5643_v30  ;;  %v5709_v47 = vpop.f32.mrf.mxu2  ;;  %v5768_v13 = vadd.f32 %v5767_v56, %v5735_v20 }
 0x775   : > { %v5710_v51 = vadd.f32 %v5709_v47, %v5679_v55 }
 0x777   : > { %v5741_v19 = vadd.f32 %v5740_v14, %v5710_v51 }
 0x77a   : > { %v5794_v34 = vpop.f32.mrf.mxu1  ;;  %v5771_v42 = vpop.f32.mrf.mxu0 }
 0x77b   : > { %v5795_v61 = vadd.f32 %v5794_v34, %v5768_v13  ;;  %v5772_v43 = vadd.f32 %v5771_v42, %v5741_v19  ;;  %v16609_v42 = vld [vmem:[#allocation12_spill] sm:$0xff] }
 0x77d   : > { %5803 = vrot.lane.b32.xlu1 %v5795_v61, %s10843_s29  ;;  %v6328_v22 = vand.u32 4294901760, %v5795_v61 }
 0x77f   : > { %v6448_v51 = vsub.f32 %v5795_v61, %v6328_v22 }
 0x781   : > { %v6449_v14 = vand.u32 4294901760, %v6448_v51 }
 0x782   : > { %v5798_v9 = vpop.f32.mrf.mxu1 }
 0x783   : > { %v5799_v31 = vadd.f32 %v5798_v9, %v5772_v43  ;;  %v6450_v20 = vsub.f32 %v6448_v51, %v6449_v14 }
 0x785   : > { %6814 = vrot.lane.b32.xlu2 %v5799_v31, %s10842_s28  ;;  %5805 = vrot.lane.b32.xlu0 %v5799_v31, %s10843_s29  ;;  %v6310_v34 = vsel %vm548_vm2, %v5799_v31, 0 }
 0x786   : > { %7333 = vrot.lane.b32.xlu1 %v5799_v31, %s10841_s27  ;;  %v6326_v44 = vand.u32 4294901760, %v6310_v34 }
 0x788   : > { %v6442_v13 = vsub.f32 %v6310_v34, %v6326_v44  ;;  %v6451_v34 = vand.u32 4294901760, %v6450_v20  ;;  %v16612_v20 = vld [vmem:[#allocation10_spill] sm:$0xff] }
 0x78a   : > { %v6443_v57 = vand.u32 4294901760, %v6442_v13 }
 0x78c   : > { %v6444_v5 = vsub.f32 %v6442_v13, %v6443_v57 }
 0x78d   : > { %7331 = vrot.lane.b32.xlu2 %v5795_v61, %s10841_s27  ;;  %6812 = vrot.lane.b32.xlu0 %v5795_v61, %s10842_s28 }
 0x78e   : > { %v6445_v61 = vand.u32 4294901760, %v6444_v5 }
 0x7ef   : > { %v5804_v56 = vpop.permute.xlu1 %5803 }
 0x7f0   : > { %v5826_v30 = vand.u32 4294901760, %v5804_v56 }
 0x7f2   : > { %v5946_v0 = vsub.f32 %v5804_v56, %v5826_v30 }
 0x7f4   : > { %v5947_v31 = vand.u32 4294901760, %v5946_v0 }
 0x7f7   : > { %v5806_v43 = vpop.permute.xlu0 %5805 }
 0x7f8   : > { %v5808_v9 = vsel %vm548_vm2, %v5806_v43, 0  ;;  %v16610_v43 = vld [vmem:[#allocation11_spill] sm:$0xff] }
 0x7f9   : > { %v5824_v47 = vand.u32 4294901760, %v5808_v9 }
 0x7fb   : > { %v5940_v19 = vsub.f32 %v5808_v9, %v5824_v47  ;;  %5825 = vmatpush.msra.mxu2 %v5824_v47  ;;  %6096 = vmatpush.msrb.mxu1 %v5824_v47  ;;  %v5948_v9 = vsub.f32 %v5946_v0, %v5947_v31 }
 0x7fd   : > { %v5941_v15 = vand.u32 4294901760, %v5940_v19  ;;  %5827 = vmatpush.msra.mxu2 %v5826_v30  ;;  %6016 = vmatpush.msrb.mxu0 %v5940_v19  ;;  %v5949_v5 = vand.u32 4294901760, %v5948_v9  ;;  %v16628_v9 = vld [vmem:[#allocation25_spill] sm:$0xff] }
 0x7fe   : > { %6098 = vmatpush.msrb.mxu1 %v5826_v30  ;;  %5833 = vmatmul.f32.vlgmr.msra.gmra.mxu2 %v16608_v39 }
 0x7ff   : > { %v5942_v55 = vsub.f32 %v5940_v19, %v5941_v15  ;;  %6102 = vmatmul.f32.vlgmr.msrb.gmra.mxu1 %v16609_v42  ;;  %6019 = vmatpush.msrb.mxu0 %v5946_v0  ;;  %v16611_v19 = vld [vmem:[#allocation19_spill] sm:$0xff]  ;;  %v16614_v0 = vld [vmem:[#allocation14_spill] sm:$0xff] }
 0x800   : > { %6446 = vmatpush.msra.mxu1 %v6445_v61  ;;  %6189 = vmatpush.msrb.mxu2 %v5941_v15  ;;  %v16613_v15 = vld [vmem:[#allocation16_spill] sm:$0xff]  ;;  %v16620_v61 = vld [vmem:[#allocation17_spill] sm:$0xff] }
 0x801   : > { %v5943_v56 = vand.u32 4294901760, %v5942_v55  ;;  %6022 = vmatmul.f32.vlgmr.msrb.gmra.mxu0 %v16610_v43  ;;  %v16621_v55 = vld [vmem:[#allocation24_spill] sm:$0xff] }
 0x802   : > { %6327 = vmatpush.msra.mxu0 %v6326_v44  ;;  %6452 = vmatpush.msra.mxu1 %v6451_v34  ;;  %v16623_v34 = vld [vmem:[#allocation31_spill] sm:$0xff] }
 0x803   : > { %6193 = vmatpush.msrb.mxu2 %v5947_v31  ;;  %5944 = vmatpush.msra.mxu3 %v5943_v56  ;;  %v16617_v31 = vld [vmem:[#allocation20_spill] sm:$0xff]  ;;  %v16627_v56 = vld [vmem:[#allocation35_spill] sm:$0xff] }
 0x804   : > { %6760 = vmatpush.msrb.mxu1 %v6326_v44  ;;  %6329 = vmatpush.msra.mxu0 %v6328_v22 }
 0x805   : > { %6518 = vmatpush.msra.mxu2 %v6442_v13  ;;  %5950 = vmatpush.msra.mxu3 %v5949_v5  ;;  %v16615_v13 = vld [vmem:[#allocation23_spill] sm:$0xff]  ;;  %v16629_v5 = vld [vmem:[#allocation32_spill] sm:$0xff] }
 0x806   : > { %6691 = vmatpush.msrb.mxu0 %v6443_v57  ;;  %6762 = vmatpush.msrb.mxu1 %v6328_v22  ;;  %v16616_v57 = vld [vmem:[#allocation13_spill] sm:$0xff] }
 0x807   : > { %6521 = vmatpush.msra.mxu2 %v6448_v51  ;;  %5952 = vmatmul.f32.vlgmr.msra.gmra.mxu3 %v16612_v20  ;;  %v16618_v51 = vld [vmem:[#allocation18_spill] sm:$0xff] }
 0x808   : > { %6695 = vmatpush.msrb.mxu0 %v6449_v14  ;;  %5841 = vmatmul.f32.gmra.mxu2 %v16611_v19  ;;  %v16619_v14 = vld [vmem:[#allocation27_spill] sm:$0xff] }
 0x809   : > { %6108 = vmatmul.f32.gmra.mxu1 %v16613_v15  ;;  %6258 = vmatpush.msrb.mxu3 %v5824_v47  ;;  %v16622_v47 = vld [vmem:[#allocation22_spill] sm:$0xff]  ;;  %v16652_v15 = vld [vmem:[#allocation49_spill] sm:$0xff] }
 0x80a   : > { %6027 = vmatmul.f32.gmra.mxu0 %v16614_v0 }
 0x80b   : > { %6260 = vmatpush.msrb.mxu3 %v5826_v30  ;;  %v16626_v30 = vld [vmem:[#allocation26_spill] sm:$0xff] }
 0x80d   : > { %6598 = vmatpush.msra.mxu3 %v6326_v44  ;;  %v16624_v44 = vld [vmem:[#allocation21_spill] sm:$0xff] }
 0x80f   : > { %6600 = vmatpush.msra.mxu3 %v6328_v22  ;;  %v16625_v22 = vld [vmem:[#allocation28_spill] sm:$0xff] }
 0x810   : > { %5849 = vmatmul.f32.gmra.mxu2 %v16615_v13  ;;  %5956 = vmatmul.f32.gmra.mxu3 %v16616_v57  ;;  %v16650_v13 = vld [vmem:[#allocation50_spill] sm:$0xff] }
 0x811   : > { %6114 = vmatmul.f32.gmra.mxu1 %v16617_v31  ;;  %v16647_v31 = vld [vmem:[#allocation55_spill] sm:$0xff] }
 0x812   : > { %6032 = vmatmul.f32.gmra.mxu0 %v16618_v51  ;;  %v16639_v51 = vld [vmem:[#allocation47_spill] sm:$0xff] }
 0x818   : > { %5857 = vmatmul.f32.gmra.mxu2 %v16619_v14  ;;  %5960 = vmatmul.f32.gmra.mxu3 %v16620_v61  ;;  %v16630_v14 = vld [vmem:[#allocation30_spill] sm:$0xff] }
 0x819   : > { %6120 = vmatmul.f32.gmra.mxu1 %v16621_v55  ;;  %v16632_v55 = vld [vmem:[#allocation29_spill] sm:$0xff] }
 0x81a   : > { %6037 = vmatmul.f32.gmra.mxu0 %v16622_v47  ;;  %v16633_v47 = vld [vmem:[#allocation36_spill] sm:$0xff] }
 0x820   : > { %5865 = vmatmul.f32.gmra.mxu2 %v16623_v34  ;;  %5964 = vmatmul.f32.gmra.mxu3 %v16624_v44  ;;  %v16634_v34 = vld [vmem:[#allocation34_spill] sm:$0xff] }
 0x821   : > { %6126 = vmatmul.f32.gmra.mxu1 %v16625_v22  ;;  %v16636_v22 = vld [vmem:[#allocation33_spill] sm:$0xff] }
 0x822   : > { %6042 = vmatmul.f32.gmra.mxu0 %v16626_v30  ;;  %v16637_v30 = vld [vmem:[#allocation40_spill] sm:$0xff] }
 0x828   : > { %5873 = vmatmul.f32.gmra.mxu2 %v16627_v56  ;;  %5968 = vmatmul.f32.gmra.mxu3 %v16628_v9  ;;  %v16638_v56 = vld [vmem:[#allocation38_spill] sm:$0xff] }
 0x829   : > { %6132 = vmatmul.f32.gmra.mxu1 %v16629_v5  ;;  %v16640_v5 = vld [vmem:[#allocation37_spill] sm:$0xff] }
 0x82a   : > { %6047 = vmatmul.f32.gmra.mxu0 %v16630_v14  ;;  %v16641_v14 = vld [vmem:[#allocation44_spill] sm:$0xff] }
 0x830   : > { %5881 = vmatmul.f32.gmra.mxu2 %v16631_v6  ;;  %5972 = vmatmul.f32.gmra.mxu3 %v16632_v55  ;;  %v16642_v6 = vld [vmem:[#allocation42_spill] sm:$0xff] }
 0x831   : > { %6138 = vmatmul.f32.gmra.mxu1 %v16633_v47  ;;  %v16644_v47 = vld [vmem:[#allocation41_spill] sm:$0xff] }
 0x832   : > { %6052 = vmatmul.f32.gmra.mxu0 %v16634_v34  ;;  %v16645_v34 = vld [vmem:[#allocation48_spill] sm:$0xff] }
 0x838   : > { %5889 = vmatmul.f32.gmra.mxu2 %v16635_v60  ;;  %5976 = vmatmul.f32.gmra.mxu3 %v16636_v22  ;;  %v16646_v60 = vld [vmem:[#allocation46_spill] sm:$0xff] }
 0x839   : > { %6144 = vmatmul.f32.gmra.mxu1 %v16637_v30  ;;  %v16648_v30 = vld [vmem:[#allocation45_spill] sm:$0xff] }
 0x83a   : > { %6057 = vmatmul.f32.gmra.mxu0 %v16638_v56  ;;  %v6815_v56 = vpop.permute.xlu2 %6814 }
 0x840   : > { %5897 = vmatmul.f32.gmra.mxu2 %v16639_v51  ;;  %5980 = vmatmul.f32.gmra.mxu3 %v16640_v5  ;;  %v16649_v51 = vld [vmem:[#allocation52_spill] sm:$0xff] }
 0x841   : > { %6150 = vmatmul.f32.gmra.mxu1 %v16641_v14  ;;  %v6817_v14 = vsel %vm548_vm2, %v6815_v56, 0 }
 0x842   : > { %6062 = vmatmul.f32.gmra.mxu0 %v16642_v6  ;;  %v6813_v6 = vpop.permute.xlu0 %6812  ;;  %v13152_v0 = vand.u32 4294901760, %v6817_v14 }
 0x844   : > { %v13161_v19 = vsub.f32 %v6817_v14, %v13152_v0 }
 0x846   : > { %v15976_v56 = vand.u32 4294901760, %v13161_v19  ;;  %v16676_v24 = vand.u32 4294901760, %v13161_v19 }
 0x848   : > { %5905 = vmatmul.f32.gmra.mxu2 %v16643_v50  ;;  %5984 = vmatmul.f32.gmra.mxu3 %v16644_v47  ;;  %v16651_v50 = vld [vmem:[#allocation59_spill] sm:$0xff] }
 0x849   : > { %6156 = vmatmul.f32.gmra.mxu1 %v16645_v34  ;;  %v13156_v34 = vand.u32 4294901760, %v6813_v6 }
 0x84a   : > { %6067 = vmatmul.f32.gmra.mxu0 %v16646_v60  ;;  %v16653_v60 = vld [vmem:[#allocation56_spill] sm:$0xff] }
 0x850   : > { %5913 = vmatmul.f32.gmra.mxu2 %v16647_v31  ;;  %5988 = vmatmul.f32.gmra.mxu3 %v16648_v30  ;;  %v16654_v31 = vld [vmem:[#allocation54_spill] sm:$0xff] }
 0x851   : > { %6162 = vmatmul.f32.gmra.mxu1 %v16649_v51  ;;  %v16657_v51 = vld [vmem:[#allocation65_spill] sm:$0xff] }
 0x852   : > { %6072 = vmatmul.f32.gmra.mxu0 %v16650_v13  ;;  %v13164_v13 = vsub.f32 %v6813_v6, %v13156_v34  ;;  %v6951_v6 = vsub.f32 %v13161_v19, %v15976_v56 }
 0x858   : > { %5921 = vmatmul.f32.gmra.mxu2 %v16651_v50  ;;  %5992 = vmatmul.f32.gmra.mxu3 %v16652_v15  ;;  %v15977_v50 = vand.u32 4294901760, %v13164_v13 }
 0x859   : > { %6168 = vmatmul.f32.gmra.mxu1 %v16653_v60  ;;  %v6952_v60 = vand.u32 4294901760, %v6951_v6  ;;  %v16659_v6 = vld [vmem:[#allocation75_spill] sm:$0xff] }
 0x85a   : > { %6077 = vmatmul.f32.gmra.mxu0 %v16654_v31  ;;  %v16655_v31 = vld [vmem:[#allocation63_spill] sm:$0xff]  ;;  %v6957_v14 = vsub.f32 %v13164_v13, %v15977_v50 }
 0x85b   : > { %v16660_v50 = vld [vmem:[#allocation79_spill] sm:$0xff] }
 0x85c   : > { %v6958_v56 = vand.u32 4294901760, %v6957_v14 }
 0x860   : > { %5996 = vmatmul.f32.gmra.mxu3 %v16400_v28  ;;  %6195 = vmatmul.f32.vlgmr.msrb.gmra.mxu2 %v16612_v20 }
 0x861   : > { %6454 = vmatmul.f32.vlgmr.msra.gmra.mxu1 %v16401_v3  ;;  %6834 = vmatpush.msrb.mxu2 %v13152_v0 }
 0x862   : > { %7105 = vmatpush.msra.mxu1 %v13152_v0  ;;  %6335 = vmatmul.f32.vlgmr.msra.gmra.mxu0 %v16655_v31  ;;  %v16656_v31 = vld [vmem:[#allocation67_spill] sm:$0xff] }
 0x863   : > { %6836 = vmatpush.msrb.mxu2 %v13156_v34  ;;  %7025 = vmatpush.msra.mxu0 %v13161_v19 }
 0x864   : > { %7107 = vmatpush.msra.mxu1 %v13156_v34 }
 0x865   : > { %7028 = vmatpush.msra.mxu0 %v13164_v13 }
 0x868   : > { %6199 = vmatmul.f32.gmra.mxu2 %v16616_v57  ;;  %6262 = vmatmul.f32.vlgmr.msrb.gmra.mxu3 %v16612_v20 }
 0x869   : > { %6458 = vmatmul.f32.gmra.mxu1 %v16403_v59  ;;  %6953 = vmatpush.msrb.mxu3 %v6952_v60 }
 0x86a   : > { %6343 = vmatmul.f32.gmra.mxu0 %v16656_v31 }
 0x86b   : > { %6959 = vmatpush.msrb.mxu3 %v6958_v56 }
 0x870   : > { %6203 = vmatmul.f32.gmra.mxu2 %v16620_v61  ;;  %6266 = vmatmul.f32.gmra.mxu3 %v16616_v57 }
 0x871   : > { %6462 = vmatmul.f32.gmra.mxu1 %v16657_v51 }
 0x872   : > { %6351 = vmatmul.f32.gmra.mxu0 %v16658_v2 }
 0x878   : > { %6207 = vmatmul.f32.gmra.mxu2 %v16624_v44  ;;  %6270 = vmatmul.f32.gmra.mxu3 %v16620_v61  ;;  %v16661_v61 = vld [vmem:[#allocation77_spill] sm:$0xff] }
 0x879   : > { %6466 = vmatmul.f32.gmra.mxu1 %v16407_v21 }
 0x87a   : > { %6359 = vmatmul.f32.gmra.mxu0 %v16659_v6  ;;  %v16662_v6 = vld [vmem:[#allocation83_spill] sm:$0xff] }
 0x87c   : > { %v6103_v60 = vpop.f32.mrf.mxu1 }
 0x87e   : > { %v6023_v14 = vpop.f32.mrf.mxu0 }
 0x880   : > { %6211 = vmatmul.f32.gmra.mxu2 %v16628_v9  ;;  %6274 = vmatmul.f32.gmra.mxu3 %v16624_v44 }
 0x881   : > { %6470 = vmatmul.f32.gmra.mxu1 %v16409_v17  ;;  %v5834_v56 = vpop.f32.mrf.mxu2 }
 0x882   : > { %6367 = vmatmul.f32.gmra.mxu0 %v16660_v50  ;;  %v16663_v50 = vld [vmem:[#allocation81_spill] sm:$0xff] }
 0x886   : > { %v6109_v2 = vpop.f32.mrf.mxu1 }
 0x887   : > { %v6028_v31 = vpop.f32.mrf.mxu0 }
 0x888   : > { %6215 = vmatmul.f32.gmra.mxu2 %v16632_v55  ;;  %6278 = vmatmul.f32.gmra.mxu3 %v16628_v9 }
 0x889   : > { %6474 = vmatmul.f32.gmra.mxu1 %v16661_v61 }
 0x88a   : > { %6375 = vmatmul.f32.gmra.mxu0 %v16662_v6  ;;  %v5953_v20 = vpop.f32.mrf.mxu3 }
 0x88b   : > { %v5842_v57 = vpop.f32.mrf.mxu2  ;;  %v5954_v43 = vadd.f32 %v5953_v20, %v5834_v56 }
 0x88d   : > { %v6024_v62 = vadd.f32 %v6023_v14, %v5954_v43  ;;  %v16666_v43 = vld [vmem:[#allocation91_spill] sm:$0xff] }
 0x88e   : > { %v6115_v44 = vpop.f32.mrf.mxu1 }
 0x88f   : > { %v6033_v42 = vpop.f32.mrf.mxu0  ;;  %v13204_v39 = vadd.f32 %v6103_v60, %v6024_v62  ;;  %v16665_v62 = vld [vmem:[#allocation85_spill] sm:$0xff] }
 0x890   : > { %6219 = vmatmul.f32.gmra.mxu2 %v16636_v22  ;;  %6282 = vmatmul.f32.gmra.mxu3 %v16632_v55 }
 0x891   : > { %6478 = vmatmul.f32.gmra.mxu1 %v16663_v50 }
 0x892   : > { %6383 = vmatmul.f32.gmra.mxu0 %v16664_v33 }
 0x893   : > { %v5850_v9 = vpop.f32.mrf.mxu2  ;;  %v5957_v8 = vpop.f32.mrf.mxu3 }
 0x894   : > { %v5958_v58 = vadd.f32 %v5957_v8, %v5842_v57 }
 0x896   : > { %v6029_v6 = vadd.f32 %v6028_v31, %v5958_v58  ;;  %v6121_v25 = vpop.f32.mrf.mxu1  ;;  %v16667_v58 = vld [vmem:[#allocation89_spill] sm:$0xff] }
 0x897   : > { %v6038_v53 = vpop.f32.mrf.mxu0 }
 0x898   : > { %v13210_v20 = vadd.f32 %v6109_v2, %v6029_v6  ;;  %6223 = vmatmul.f32.gmra.mxu2 %v16640_v5  ;;  %6286 = vmatmul.f32.gmra.mxu3 %v16636_v22  ;;  %v16668_v2 = vld [vmem:[#allocation95_spill] sm:$0xff] }
 0x899   : > { %6482 = vmatmul.f32.gmra.mxu1 %v16665_v62 }
 0x89a   : > { %6391 = vmatmul.f32.gmra.mxu0 %v16666_v43 }
 0x89b   : > { %v5858_v60 = vpop.f32.mrf.mxu2  ;;  %v5961_v14 = vpop.f32.mrf.mxu3 }
 0x89c   : > { %v5962_v56 = vadd.f32 %v5961_v14, %v5850_v9 }
 0x89e   : > { %v6034_v33 = vadd.f32 %v6033_v42, %v5962_v56  ;;  %v6127_v55 = vpop.f32.mrf.mxu1  ;;  %v7334_v42 = vpop.permute.xlu1 %7333 }
 0x89f   : > { %v6043_v63 = vpop.f32.mrf.mxu0 }
 0x8a0   : > { %v13216_v8 = vadd.f32 %v6115_v44, %v6034_v33  ;;  %6227 = vmatmul.f32.gmra.mxu2 %v16644_v47  ;;  %6290 = vmatmul.f32.gmra.mxu3 %v16640_v5  ;;  %v16669_v33 = vld [vmem:[#allocation93_spill] sm:$0xff]  ;;  %v16670_v44 = vld [vmem:[#allocation99_spill] sm:$0xff]  ;;  %v7336_v5 = vsel %vm548_vm2, %v7334_v42, 0 }
 0x8a1   : > { %6486 = vmatmul.f32.gmra.mxu1 %v16667_v58 }
 0x8a2   : > { %6399 = vmatmul.f32.gmra.mxu0 %v16668_v2 }
 0x8a3   : > { %v5866_v57 = vpop.f32.mrf.mxu2  ;;  %v5965_v31 = vpop.f32.mrf.mxu3 }
 0x8a4   : > { %v5966_v6 = vadd.f32 %v5965_v31, %v5858_v60  ;;  %v7332_v31 = vpop.permute.xlu2 %7331 }
 0x8a6   : > { %v6039_v43 = vadd.f32 %v6038_v53, %v5966_v6  ;;  %v6133_v22 = vpop.f32.mrf.mxu1 }
 0x8a7   : > { %v6048_v38 = vpop.f32.mrf.mxu0 }
 0x8a8   : > { %v13222_v9 = vadd.f32 %v6121_v25, %v6039_v43  ;;  %6231 = vmatmul.f32.gmra.mxu2 %v16648_v30  ;;  %6294 = vmatmul.f32.gmra.mxu3 %v16644_v47  ;;  %v13229_v25 = vand.u32 4294901760, %v7336_v5  ;;  %v16671_v47 = vld [vmem:[#allocation97_spill] sm:$0xff] }
 0x8a9   : > { %6490 = vmatmul.f32.gmra.mxu1 %v16669_v33 }
 0x8aa   : > { %6407 = vmatmul.f32.gmra.mxu0 %v16670_v44  ;;  %v13236_v44 = vand.u32 4294901760, %v7332_v31 }
 0x8ab   : > { %v5874_v14 = vpop.f32.mrf.mxu2  ;;  %v5969_v56 = vpop.f32.mrf.mxu3 }
 0x8ac   : > { %v5970_v2 = vadd.f32 %v5969_v56, %v5866_v57  ;;  %v13243_v56 = vsub.f32 %v7332_v31, %v13236_v44 }
 0x8ae   : > { %v6044_v60 = vadd.f32 %v6043_v63, %v5970_v2  ;;  %v6139_v53 = vpop.f32.mrf.mxu1  ;;  %v13240_v63 = vsub.f32 %v7336_v5, %v13229_v25  ;;  %v15995_v5 = vand.u32 4294901760, %v13243_v56 }
 0x8af   : > { %v6053_v6 = vpop.f32.mrf.mxu0 }
 0x8b0   : > { %v13231_v43 = vadd.f32 %v6127_v55, %v6044_v60  ;;  %6235 = vmatmul.f32.gmra.mxu2 %v16652_v15  ;;  %6298 = vmatmul.f32.gmra.mxu3 %v16648_v30  ;;  %v15996_v30 = vand.u32 4294901760, %v13240_v63 }
 0x8b1   : > { %6494 = vmatmul.f32.gmra.mxu1 %v16671_v47 }
 0x8b2   : > { %6415 = vmatmul.f32.gmra.mxu0 %v16672_v4  ;;  %v16673_v4 = vld [vmem:[#allocation101_spill] sm:$0xff] }
 0x8b3   : > { %v5882_v57 = vpop.f32.mrf.mxu2  ;;  %v5973_v42 = vpop.f32.mrf.mxu3 }
 0x8b4   : > { %v5974_v2 = vadd.f32 %v5973_v42, %v5874_v14 }
 0x8b6   : > { %v6049_v55 = vadd.f32 %v6048_v38, %v5974_v2  ;;  %v6145_v60 = vpop.f32.mrf.mxu1  ;;  %v7470_v38 = vsub.f32 %v13240_v63, %v15996_v30 }
 0x8b7   : > { %v6058_v54 = vpop.f32.mrf.mxu0 }
 0x8b8   : > { %v13246_v16 = vadd.f32 %v6133_v22, %v6049_v55  ;;  %6239 = vmatmul.f32.gmra.mxu2 %v16400_v28  ;;  %6302 = vmatmul.f32.gmra.mxu3 %v16652_v15  ;;  %v7476_v22 = vsub.f32 %v13243_v56, %v15995_v5  ;;  %v7471_v32 = vand.u32 4294901760, %v7470_v38 }
 0x8b9   : > { %6498 = vmatmul.f32.gmra.mxu1 %v16673_v4 }
 0x8ba   : > { %6423 = vmatmul.f32.gmra.mxu0 %v16674_v40  ;;  %v16675_v40 = vld [vmem:[#allocation58_spill] sm:$0xff] }
 0x8bb   : > { %v5890_v14 = vpop.f32.mrf.mxu2  ;;  %v5977_v31 = vpop.f32.mrf.mxu3 }
 0x8bc   : > { %v5978_v42 = vadd.f32 %v5977_v31, %v5882_v57  ;;  %v16677_v57 = vand.u32 4294901760, %v13164_v13 }
 0x8be   : > { %v6054_v2 = vadd.f32 %v6053_v6, %v5978_v42  ;;  %v6151_v55 = vpop.f32.mrf.mxu1  ;;  %v7477_v6 = vand.u32 4294901760, %v7476_v22 }
 0x8bf   : > { %v6063_v15 = vpop.f32.mrf.mxu0 }
 0x8c0   : > { %v13259_v1 = vadd.f32 %v6139_v53, %v6054_v2  ;;  %6306 = vmatmul.f32.gmra.mxu3 %v16400_v28  ;;  %6524 = vmatmul.f32.vlgmr.msra.gmra.mxu2 %v16675_v40 }
 0x8c1   : > { %6764 = vmatmul.f32.vlgmr.msrb.gmra.mxu1 %v16401_v3  ;;  %7198 = vmatpush.msra.mxu2 %v16676_v24  ;;  %v16678_v24 = vld [vmem:[#allocation62_spill] sm:$0xff] }
 0x8c2   : > { %7472 = vmatpush.msrb.mxu1 %v7471_v32  ;;  %6697 = vmatmul.f32.vlgmr.msrb.gmra.mxu0 %v16401_v3  ;;  %v16679_v32 = vld [vmem:[#allocation60_spill] sm:$0xff] }
 0x8c3   : > { %7202 = vmatpush.msra.mxu2 %v16677_v57  ;;  %7353 = vmatpush.msrb.mxu0 %v13229_v25  ;;  %v5898_v53 = vpop.f32.mrf.mxu2  ;;  %v5981_v31 = vpop.f32.mrf.mxu3 }
 0x8c4   : > { %7478 = vmatpush.msrb.mxu1 %v7477_v6  ;;  %v5982_v38 = vadd.f32 %v5981_v31, %v5890_v14  ;;  %v16680_v31 = vld [vmem:[#allocation66_spill] sm:$0xff] }
 0x8c5   : > { %7355 = vmatpush.msrb.mxu0 %v13236_v44 }
 0x8c6   : > { %v6059_v42 = vadd.f32 %v6058_v54, %v5982_v38  ;;  %v6157_v2 = vpop.f32.mrf.mxu1  ;;  %v16681_v38 = vld [vmem:[#allocation64_spill] sm:$0xff] }
 0x8c7   : > { %v6068_v5 = vpop.f32.mrf.mxu0 }
 0x8c8   : > { %v13271_v19 = vadd.f32 %v6145_v60, %v6059_v42  ;;  %6529 = vmatmul.f32.gmra.mxu2 %v16678_v24  ;;  %6604 = vmatmul.f32.vlgmr.msra.gmra.mxu3 %v16679_v32 }
 0x8c9   : > { %6768 = vmatmul.f32.gmra.mxu1 %v16403_v59  ;;  %7267 = vmatpush.msra.mxu3 %v13152_v0 }
 0x8ca   : > { %6701 = vmatmul.f32.gmra.mxu0 %v16403_v59 }
 0x8cb   : > { %7269 = vmatpush.msra.mxu3 %v13156_v34  ;;  %v5906_v13 = vpop.f32.mrf.mxu2  ;;  %v5985_v14 = vpop.f32.mrf.mxu3 }
 0x8cc   : > { %v5986_v22 = vadd.f32 %v5985_v14, %v5898_v53 }
 0x8ce   : > { %v6064_v54 = vadd.f32 %v6063_v15, %v5986_v22  ;;  %v6163_v6 = vpop.f32.mrf.mxu1  ;;  %v16682_v15 = vld [vmem:[#allocation70_spill] sm:$0xff] }
 0x8cf   : > { %v6073_v57 = vpop.f32.mrf.mxu0 }
 0x8d0   : > { %v13279_v60 = vadd.f32 %v6151_v55, %v6064_v54  ;;  %6534 = vmatmul.f32.gmra.mxu2 %v16680_v31  ;;  %6610 = vmatmul.f32.gmra.mxu3 %v16681_v38  ;;  %v16683_v55 = vld [vmem:[#allocation68_spill] sm:$0xff] }
 0x8d1   : > { %6772 = vmatmul.f32.gmra.mxu1 %v16657_v51 }
 0x8d2   : > { %6705 = vmatmul.f32.gmra.mxu0 %v16657_v51 }
 0x8d3   : > { %v5914_v0 = vpop.f32.mrf.mxu2  ;;  %v5989_v42 = vpop.f32.mrf.mxu3 }
 0x8d4   : > { %v5990_v30 = vadd.f32 %v5989_v42, %v5906_v13 }
 0x8d6   : > { %v6069_v34 = vadd.f32 %v6068_v5, %v5990_v30  ;;  %v6169_v24 = vpop.f32.mrf.mxu1  ;;  %v16684_v30 = vld [vmem:[#allocation74_spill] sm:$0xff]  ;;  %v16685_v5 = vld [vmem:[#allocation72_spill] sm:$0xff] }
 0x8d7   : > { %v6078_v32 = vpop.f32.mrf.mxu0 }
 0x8d8   : > { %v13285_v53 = vadd.f32 %v6157_v2, %v6069_v34  ;;  %6539 = vmatmul.f32.gmra.mxu2 %v16682_v15  ;;  %6616 = vmatmul.f32.gmra.mxu3 %v16683_v55 }
 0x8d9   : > { %6776 = vmatmul.f32.gmra.mxu1 %v16407_v21 }
 0x8da   : > { %6709 = vmatmul.f32.gmra.mxu0 %v16407_v21 }
 0x8db   : > { %v5922_v14 = vpop.f32.mrf.mxu2  ;;  %v5993_v22 = vpop.f32.mrf.mxu3 }
 0x8dc   : > { %v5994_v54 = vadd.f32 %v5993_v22, %v5914_v0 }
 0x8de   : > { %v6074_v31 = vadd.f32 %v6073_v57, %v5994_v54  ;;  %v6455_v38 = vpop.f32.mrf.mxu1 }
 0x8df   : > { %v6336_v40 = vpop.f32.mrf.mxu0 }
 0x8e0   : > { %v13291_v13 = vadd.f32 %v6163_v6, %v6074_v31  ;;  %6544 = vmatmul.f32.gmra.mxu2 %v16684_v30  ;;  %6622 = vmatmul.f32.gmra.mxu3 %v16685_v5  ;;  %v16686_v6 = vld [vmem:[#allocation78_spill] sm:$0xff]  ;;  %v16687_v31 = vld [vmem:[#allocation76_spill] sm:$0xff] }
 0x8e1   : > { %6780 = vmatmul.f32.gmra.mxu1 %v16409_v17 }
 0x8e2   : > { %6713 = vmatmul.f32.gmra.mxu0 %v16409_v17 }
 0x8e3   : > { %v5997_v2 = vpop.f32.mrf.mxu3  ;;  %v6196_v42 = vpop.f32.mrf.mxu2 }
 0x8e4   : > { %v5998_v34 = vadd.f32 %v5997_v2, %v5922_v14  ;;  %v6197_v15 = vadd.f32 %v6196_v42, %v13204_v39 }
 0x8e6   : > { %v6079_v55 = vadd.f32 %v6078_v32, %v5998_v34  ;;  %v6459_v0 = vpop.f32.mrf.mxu1 }
 0x8e7   : > { %v6344_v57 = vpop.f32.mrf.mxu0 }
 0x8e8   : > { %v13298_v22 = vadd.f32 %v6169_v24, %v6079_v55  ;;  %6549 = vmatmul.f32.gmra.mxu2 %v16686_v6  ;;  %6628 = vmatmul.f32.gmra.mxu3 %v16687_v31  ;;  %v16688_v24 = vld [vmem:[#allocation82_spill] sm:$0xff]  ;;  %v16689_v55 = vld [vmem:[#allocation80_spill] sm:$0xff] }
 0x8e9   : > { %6784 = vmatmul.f32.gmra.mxu1 %v16661_v61 }
 0x8ea   : > { %6717 = vmatmul.f32.gmra.mxu0 %v16661_v61 }
 0x8eb   : > { %v6200_v54 = vpop.f32.mrf.mxu2  ;;  %v6263_v30 = vpop.f32.mrf.mxu3 }
 0x8ec   : > { %v6201_v5 = vadd.f32 %v6200_v54, %v13210_v20  ;;  %v6264_v14 = vadd.f32 %v6263_v30, %v6197_v15  ;;  %v16691_v54 = vld [vmem:[#allocation84_spill] sm:$0xff] }
 0x8ee   : > { %v6337_v2 = vadd.f32 %v6336_v40, %v6264_v14  ;;  %v6463_v39 = vpop.f32.mrf.mxu1 }
 0x8ef   : > { %v6352_v32 = vpop.f32.mrf.mxu0 }
 0x8f0   : > { %v13305_v42 = vadd.f32 %v6455_v38, %v6337_v2  ;;  %6554 = vmatmul.f32.gmra.mxu2 %v16688_v24  ;;  %6634 = vmatmul.f32.gmra.mxu3 %v16689_v55  ;;  %v16690_v38 = vld [vmem:[#allocation86_spill] sm:$0xff] }
 0x8f1   : > { %6788 = vmatmul.f32.gmra.mxu1 %v16663_v50 }
 0x8f2   : > { %6721 = vmatmul.f32.gmra.mxu0 %v16663_v50 }
 0x8f3   : > { %v6204_v34 = vpop.f32.mrf.mxu2  ;;  %v6267_v6 = vpop.f32.mrf.mxu3 }
 0x8f4   : > { %v6205_v31 = vadd.f32 %v6204_v34, %v13216_v8  ;;  %v6268_v61 = vadd.f32 %v6267_v6, %v6201_v5  ;;  %v16693_v6 = vld [vmem:[#allocation88_spill] sm:$0xff] }
 0x8f6   : > { %v6345_v20 = vadd.f32 %v6344_v57, %v6268_v61  ;;  %v6467_v15 = vpop.f32.mrf.mxu1 }
 0x8f7   : > { %v6360_v40 = vpop.f32.mrf.mxu0 }
 0x8f8   : > { %v13312_v30 = vadd.f32 %v6459_v0, %v6345_v20  ;;  %6559 = vmatmul.f32.gmra.mxu2 %v16690_v38  ;;  %6640 = vmatmul.f32.gmra.mxu3 %v16691_v54  ;;  %v16692_v0 = vld [vmem:[#allocation90_spill] sm:$0xff] }
 0x8f9   : > { %6792 = vmatmul.f32.gmra.mxu1 %v16665_v62 }
 0x8fa   : > { %6725 = vmatmul.f32.gmra.mxu0 %v16665_v62 }
 0x8fb   : > { %v6208_v14 = vpop.f32.mrf.mxu2  ;;  %v6271_v2 = vpop.f32.mrf.mxu3 }
 0x8fc   : > { %v6209_v24 = vadd.f32 %v6208_v14, %v13222_v9  ;;  %v6272_v55 = vadd.f32 %v6271_v2, %v6205_v31  ;;  %v16695_v14 = vld [vmem:[#allocation92_spill] sm:$0xff] }
 0x8fe   : > { %v6353_v8 = vadd.f32 %v6352_v32, %v6272_v55  ;;  %v6471_v5 = vpop.f32.mrf.mxu1 }
 0x8ff   : > { %v6368_v61 = vpop.f32.mrf.mxu0 }
 0x900   : > { %v13319_v57 = vadd.f32 %v6463_v39, %v6353_v8  ;;  %6564 = vmatmul.f32.gmra.mxu2 %v16692_v0  ;;  %6646 = vmatmul.f32.gmra.mxu3 %v16693_v6  ;;  %v16694_v39 = vld [vmem:[#allocation94_spill] sm:$0xff] }
 0x901   : > { %6796 = vmatmul.f32.gmra.mxu1 %v16667_v58 }
 0x902   : > { %6729 = vmatmul.f32.gmra.mxu0 %v16667_v58 }
 0x903   : > { %v6212_v34 = vpop.f32.mrf.mxu2  ;;  %v6275_v20 = vpop.f32.mrf.mxu3 }
 0x904   : > { %v6213_v38 = vadd.f32 %v6212_v34, %v13231_v43  ;;  %v6276_v54 = vadd.f32 %v6275_v20, %v6209_v24  ;;  %v16697_v34 = vld [vmem:[#allocation96_spill] sm:$0xff] }
 0x906   : > { %v6361_v9 = vadd.f32 %v6360_v40, %v6276_v54  ;;  %v6475_v31 = vpop.f32.mrf.mxu1 }
 0x907   : > { %v6376_v32 = vpop.f32.mrf.mxu0 }
 0x908   : > { %v13326_v55 = vadd.f32 %v6467_v15, %v6361_v9  ;;  %6569 = vmatmul.f32.gmra.mxu2 %v16694_v39  ;;  %6652 = vmatmul.f32.gmra.mxu3 %v16695_v14  ;;  %v16696_v15 = vld [vmem:[#allocation98_spill] sm:$0xff] }
 0x909   : > { %6800 = vmatmul.f32.gmra.mxu1 %v16669_v33 }
 0x90a   : > { %6733 = vmatmul.f32.gmra.mxu0 %v16669_v33 }
 0x90b   : > { %v6216_v2 = vpop.f32.mrf.mxu2  ;;  %v6279_v8 = vpop.f32.mrf.mxu3 }
 0x90c   : > { %v6217_v0 = vadd.f32 %v6216_v2, %v13246_v16  ;;  %v6280_v6 = vadd.f32 %v6279_v8, %v6213_v38  ;;  %v16699_v2 = vld [vmem:[#allocation100_spill] sm:$0xff] }
 0x90e   : > { %v6369_v43 = vadd.f32 %v6368_v61, %v6280_v6  ;;  %v6479_v24 = vpop.f32.mrf.mxu1 }
 0x90f   : > { %v6384_v40 = vpop.f32.mrf.mxu0 }
 0x910   : > { %v13333_v54 = vadd.f32 %v6471_v5, %v6369_v43  ;;  %6574 = vmatmul.f32.gmra.mxu2 %v16696_v15  ;;  %6658 = vmatmul.f32.gmra.mxu3 %v16697_v34  ;;  %v16698_v5 = vld [vmem:[#allocation102_spill] sm:$0xff] }
 0x911   : > { %6804 = vmatmul.f32.gmra.mxu1 %v16671_v47 }
 0x912   : > { %6737 = vmatmul.f32.gmra.mxu0 %v16671_v47 }
 0x913   : > { %v6220_v20 = vpop.f32.mrf.mxu2  ;;  %v6283_v9 = vpop.f32.mrf.mxu3 }
 0x914   : > { %v6221_v39 = vadd.f32 %v6220_v20, %v13259_v1  ;;  %v6284_v14 = vadd.f32 %v6283_v9, %v6217_v0  ;;  %v16701_v20 = vld [vmem:[#allocation111_spill] sm:$0xff]  ;;  %v16702_v9 = vld [vmem:[#allocation108_spill] sm:$0xff] }
 0x916   : > { %v6377_v16 = vadd.f32 %v6376_v32, %v6284_v14  ;;  %v6483_v38 = vpop.f32.mrf.mxu1 }
 0x917   : > { %v6392_v61 = vpop.f32.mrf.mxu0 }
 0x918   : > { %v13340_v6 = vadd.f32 %v6475_v31, %v6377_v16  ;;  %6579 = vmatmul.f32.gmra.mxu2 %v16698_v5  ;;  %6664 = vmatmul.f32.gmra.mxu3 %v16699_v2  ;;  %v16700_v31 = vld [vmem:[#allocation104_spill] sm:$0xff]  ;;  %v16703_v16 = vld [vmem:[#allocation107_spill] sm:$0xff] }
 0x919   : > { %6808 = vmatmul.f32.gmra.mxu1 %v16673_v4 }
 0x91a   : > { %6741 = vmatmul.f32.gmra.mxu0 %v16673_v4 }
 0x91b   : > { %v6224_v8 = vpop.f32.mrf.mxu2  ;;  %v6287_v43 = vpop.f32.mrf.mxu3 }
 0x91c   : > { %v6225_v15 = vadd.f32 %v6224_v8, %v13271_v19  ;;  %v6288_v34 = vadd.f32 %v6287_v43, %v6221_v39  ;;  %v16704_v19 = vand.u32 4294901760, %v13240_v63  ;;  %v16705_v8 = vand.u32 4294901760, %v13243_v56 }
 0x91e   : > { %v6385_v1 = vadd.f32 %v6384_v40, %v6288_v34  ;;  %v6487_v0 = vpop.f32.mrf.mxu1 }
 0x91f   : > { %v6400_v32 = vpop.f32.mrf.mxu0 }
 0x920   : > { %v13347_v14 = vadd.f32 %v6479_v24, %v6385_v1  ;;  %6670 = vmatmul.f32.gmra.mxu3 %v16700_v31  ;;  %6842 = vmatmul.f32.vlgmr.msrb.gmra.mxu2 %v16701_v20 }
 0x921   : > { %7111 = vmatmul.f32.vlgmr.msra.gmra.mxu1 %v16702_v9  ;;  %7544 = vmatpush.msrb.mxu2 %v13240_v63  ;;  %v16707_v63 = vld [vmem:[#allocation112_spill] sm:$0xff] }
 0x922   : > { %7786 = vmatpush.msra.mxu1 %v13229_v25  ;;  %7031 = vmatmul.f32.vlgmr.msra.gmra.mxu0 %v16703_v16  ;;  %v16706_v16 = vld [vmem:[#allocation115_spill] sm:$0xff] }
 0x923   : > { %7547 = vmatpush.msrb.mxu2 %v13243_v56  ;;  %7717 = vmatpush.msra.mxu0 %v16704_v19  ;;  %v6228_v39 = vpop.f32.mrf.mxu2  ;;  %v6291_v24 = vpop.f32.mrf.mxu3  ;;  %v16708_v19 = vld [vmem:[#allocation110_spill] sm:$0xff] }
 0x924   : > { %7788 = vmatpush.msra.mxu1 %v13236_v44  ;;  %v6229_v40 = vadd.f32 %v6228_v39, %v13279_v60  ;;  %v6292_v34 = vadd.f32 %v6291_v24, %v6225_v15 }
 0x925   : > { %7721 = vmatpush.msra.mxu0 %v16705_v8  ;;  %v16709_v8 = vld [vmem:[#allocation119_spill] sm:$0xff] }
 0x926   : > { %v6393_v43 = vadd.f32 %v6392_v61, %v6292_v34  ;;  %v6491_v1 = vpop.f32.mrf.mxu1 }
 0x927   : > { %v6408_v9 = vpop.f32.mrf.mxu0 }
 0x928   : > { %v13362_v20 = vadd.f32 %v6483_v38, %v6393_v43  ;;  %6850 = vmatmul.f32.gmra.mxu2 %v16706_v16  ;;  %6961 = vmatmul.f32.vlgmr.msrb.gmra.mxu3 %v16457_v7  ;;  %v16711_v43 = vld [vmem:[#allocation114_spill] sm:$0xff] }
 0x929   : > { %7624 = vmatpush.msrb.mxu3 %v13229_v25  ;;  %7117 = vmatmul.f32.gmra.mxu1 %v16707_v63  ;;  %v16710_v25 = vld [vmem:[#allocation116_spill] sm:$0xff] }
 0x92a   : > { %7036 = vmatmul.f32.gmra.mxu0 %v16708_v19 }
 0x92b   : > { %7626 = vmatpush.msrb.mxu3 %v13236_v44  ;;  %v6232_v60 = vpop.f32.mrf.mxu2  ;;  %v6295_v56 = vpop.f32.mrf.mxu3 }
 0x92c   : > { %v6233_v15 = vadd.f32 %v6232_v60, %v13285_v53  ;;  %v6296_v61 = vadd.f32 %v6295_v56, %v6229_v40  ;;  %v16713_v56 = vld [vmem:[#allocation120_spill] sm:$0xff] }
 0x92e   : > { %v6401_v39 = vadd.f32 %v6400_v32, %v6296_v61  ;;  %v6495_v38 = vpop.f32.mrf.mxu1  ;;  %v16714_v61 = vld [vmem:[#allocation118_spill] sm:$0xff] }
 0x92f   : > { %v6416_v24 = vpop.f32.mrf.mxu0 }
 0x930   : > { %v13371_v34 = vadd.f32 %v6487_v0, %v6401_v39  ;;  %6858 = vmatmul.f32.gmra.mxu2 %v16709_v8  ;;  %6965 = vmatmul.f32.gmra.mxu3 %v16461_v45  ;;  %v16712_v0 = vld [vmem:[#allocation123_spill] sm:$0xff] }
 0x931   : > { %7123 = vmatmul.f32.gmra.mxu1 %v16710_v25 }
 0x932   : > { %7041 = vmatmul.f32.gmra.mxu0 %v16711_v43 }
 0x933   : > { %v6236_v19 = vpop.f32.mrf.mxu2  ;;  %v6299_v44 = vpop.f32.mrf.mxu3 }
 0x934   : > { %v6237_v63 = vadd.f32 %v6236_v19, %v13291_v13  ;;  %v6300_v16 = vadd.f32 %v6299_v44, %v6233_v15  ;;  %v16716_v15 = vld [vmem:[#allocation124_spill] sm:$0xff]  ;;  %v16717_v44 = vld [vmem:[#allocation122_spill] sm:$0xff] }
 0x936   : > { %v6409_v53 = vadd.f32 %v6408_v9, %v6300_v16  ;;  %v6499_v40 = vpop.f32.mrf.mxu1 }
 0x937   : > { %v6424_v32 = vpop.f32.mrf.mxu0 }
 0x938   : > { %v13378_v60 = vadd.f32 %v6491_v1, %v6409_v53  ;;  %6866 = vmatmul.f32.gmra.mxu2 %v16712_v0  ;;  %6969 = vmatmul.f32.gmra.mxu3 %v16465_v48  ;;  %v16715_v1 = vld [vmem:[#allocation127_spill] sm:$0xff] }
 0x939   : > { %7129 = vmatmul.f32.gmra.mxu1 %v16713_v56 }
 0x93a   : > { %7046 = vmatmul.f32.gmra.mxu0 %v16714_v61 }
 0x93b   : > { %v6240_v39 = vpop.f32.mrf.mxu2  ;;  %v6303_v43 = vpop.f32.mrf.mxu3 }
 0x93c   : > { %v6241_v25 = vadd.f32 %v6240_v39, %v13298_v22  ;;  %v6304_v8 = vadd.f32 %v6303_v43, %v6237_v63  ;;  %v16719_v43 = vld [vmem:[#allocation128_spill] sm:$0xff]  ;;  %v16720_v39 = vld [vmem:[#allocation126_spill] sm:$0xff] }
 0x93e   : > { %v6417_v13 = vadd.f32 %v6416_v24, %v6304_v8  ;;  %v6765_v19 = vpop.f32.mrf.mxu1 }
 0x93f   : > { %v6698_v9 = vpop.f32.mrf.mxu0 }
 0x940   : > { %v13385_v16 = vadd.f32 %v6495_v38, %v6417_v13  ;;  %6874 = vmatmul.f32.gmra.mxu2 %v16715_v1  ;;  %6973 = vmatmul.f32.gmra.mxu3 %v16469_v36  ;;  %v16718_v38 = vld [vmem:[#allocation131_spill] sm:$0xff] }
 0x941   : > { %7135 = vmatmul.f32.gmra.mxu1 %v16716_v15 }
 0x942   : > { %7051 = vmatmul.f32.gmra.mxu0 %v16717_v44 }
 0x943   : > { %v6307_v53 = vpop.f32.mrf.mxu3  ;;  %v6525_v61 = vpop.f32.mrf.mxu2 }
 0x944   : > { %v6308_v56 = vadd.f32 %v6307_v53, %v6241_v25  ;;  %v6526_v0 = vadd.f32 %v6525_v61, %v13305_v42  ;;  %v16722_v61 = vld [vmem:[#allocation125_spill] sm:$0xff] }
 0x946   : > { %v6425_v22 = vadd.f32 %v6424_v32, %v6308_v56  ;;  %v6769_v63 = vpop.f32.mrf.mxu1 }
 0x947   : > { %v6702_v24 = vpop.f32.mrf.mxu0 }
 0x948   : > { %v13392_v8 = vadd.f32 %v6499_v40, %v6425_v22  ;;  %6882 = vmatmul.f32.gmra.mxu2 %v16718_v38  ;;  %6977 = vmatmul.f32.gmra.mxu3 %v16473_v41  ;;  %v16721_v40 = vld [vmem:[#allocation135_spill] sm:$0xff]  ;;  %v16723_v22 = vld [vmem:[#allocation132_spill] sm:$0xff]  ;;  %v16724_v38 = vld [vmem:[#allocation130_spill] sm:$0xff] }
 0x949   : > { %7141 = vmatmul.f32.gmra.mxu1 %v16719_v43 }
 0x94a   : > { %7056 = vmatmul.f32.gmra.mxu0 %v16720_v39 }
 0x94b   : > { %v6530_v13 = vpop.f32.mrf.mxu2  ;;  %v6605_v44 = vpop.f32.mrf.mxu3 }
 0x94c   : > { %v6531_v15 = vadd.f32 %v6530_v13, %v13312_v30  ;;  %v6606_v25 = vadd.f32 %v6605_v44, %v6526_v0  ;;  %v16726_v13 = vld [vmem:[#allocation129_spill] sm:$0xff] }
 0x94e   : > { %v6699_v53 = vadd.f32 %v6698_v9, %v6606_v25  ;;  %v6773_v42 = vpop.f32.mrf.mxu1  ;;  %v16727_v25 = vld [vmem:[#allocation136_spill] sm:$0xff] }
 0x94f   : > { %v6706_v32 = vpop.f32.mrf.mxu0 }
 0x950   : > { %v13399_v56 = vadd.f32 %v6765_v19, %v6699_v53  ;;  %6890 = vmatmul.f32.gmra.mxu2 %v16721_v40  ;;  %6981 = vmatmul.f32.gmra.mxu3 %v16722_v61  ;;  %v16725_v19 = vld [vmem:[#allocation139_spill] sm:$0xff]  ;;  %v16728_v53 = vld [vmem:[#allocation134_spill] sm:$0xff] }
 0x951   : > { %7147 = vmatmul.f32.gmra.mxu1 %v16723_v22 }
 0x952   : > { %7061 = vmatmul.f32.gmra.mxu0 %v16724_v38 }
 0x953   : > { %v6535_v43 = vpop.f32.mrf.mxu2  ;;  %v6611_v39 = vpop.f32.mrf.mxu3 }
 0x954   : > { %v6536_v1 = vadd.f32 %v6535_v43, %v13319_v57  ;;  %v6612_v31 = vadd.f32 %v6611_v39, %v6531_v15  ;;  %v16730_v43 = vld [vmem:[#allocation133_spill] sm:$0xff]  ;;  %v16731_v39 = vld [vmem:[#allocation140_spill] sm:$0xff] }
 0x956   : > { %v6703_v30 = vadd.f32 %v6702_v24, %v6612_v31  ;;  %v6777_v0 = vpop.f32.mrf.mxu1 }
 0x957   : > { %v6710_v9 = vpop.f32.mrf.mxu0 }
 0x958   : > { %v13406_v44 = vadd.f32 %v6769_v63, %v6703_v30  ;;  %6898 = vmatmul.f32.gmra.mxu2 %v16725_v19  ;;  %6985 = vmatmul.f32.gmra.mxu3 %v16726_v13  ;;  %v16729_v63 = vld [vmem:[#allocation143_spill] sm:$0xff]  ;;  %v16732_v30 = vld [vmem:[#allocation138_spill] sm:$0xff] }
 0x959   : > { %7153 = vmatmul.f32.gmra.mxu1 %v16727_v25 }
 0x95a   : > { %7066 = vmatmul.f32.gmra.mxu0 %v16728_v53 }
 0x95b   : > { %v6540_v22 = vpop.f32.mrf.mxu2  ;;  %v6617_v38 = vpop.f32.mrf.mxu3 }
 0x95c   : > { %v6541_v40 = vadd.f32 %v6540_v22, %v13326_v55  ;;  %v6618_v5 = vadd.f32 %v6617_v38, %v6536_v1  ;;  %v16735_v22 = vld [vmem:[#allocation144_spill] sm:$0xff] }
 0x95e   : > { %v6707_v57 = vadd.f32 %v6706_v32, %v6618_v5  ;;  %v6781_v15 = vpop.f32.mrf.mxu1  ;;  %v16734_v32 = vld [vmem:[#allocation137_spill] sm:$0xff] }
 0x95f   : > { %v6714_v31 = vpop.f32.mrf.mxu0 }
 0x960   : > { %v13413_v24 = vadd.f32 %v6773_v42, %v6707_v57  ;;  %6906 = vmatmul.f32.gmra.mxu2 %v16729_v63  ;;  %6989 = vmatmul.f32.gmra.mxu3 %v16730_v43  ;;  %v16733_v42 = vld [vmem:[#allocation147_spill] sm:$0xff]  ;;  %v16736_v57 = vld [vmem:[#allocation142_spill] sm:$0xff] }
 0x961   : > { %7159 = vmatmul.f32.gmra.mxu1 %v16731_v39 }
 0x962   : > { %7071 = vmatmul.f32.gmra.mxu0 %v16732_v30 }
 0x963   : > { %v6545_v25 = vpop.f32.mrf.mxu2  ;;  %v6623_v53 = vpop.f32.mrf.mxu3 }
 0x964   : > { %v6546_v19 = vadd.f32 %v6545_v25, %v13333_v54  ;;  %v6624_v2 = vadd.f32 %v6623_v53, %v6541_v40  ;;  %v16738_v25 = vld [vmem:[#allocation148_spill] sm:$0xff]  ;;  %v16739_v53 = vld [vmem:[#allocation146_spill] sm:$0xff] }
 0x966   : > { %v6711_v55 = vadd.f32 %v6710_v9, %v6624_v2  ;;  %v6785_v1 = vpop.f32.mrf.mxu1 }
 0x967   : > { %v6718_v5 = vpop.f32.mrf.mxu0 }
 0x968   : > { %v13420_v38 = vadd.f32 %v6777_v0, %v6711_v55  ;;  %6914 = vmatmul.f32.gmra.mxu2 %v16733_v42  ;;  %6993 = vmatmul.f32.gmra.mxu3 %v16734_v32  ;;  %v16737_v0 = vld [vmem:[#allocation151_spill] sm:$0xff] }
 0x969   : > { %7165 = vmatmul.f32.gmra.mxu1 %v16735_v22 }
 0x96a   : > { %7076 = vmatmul.f32.gmra.mxu0 %v16736_v57 }
 0x96b   : > { %v6550_v39 = vpop.f32.mrf.mxu2  ;;  %v6629_v30 = vpop.f32.mrf.mxu3 }
 0x96c   : > { %v6551_v63 = vadd.f32 %v6550_v39, %v13340_v6  ;;  %v6630_v4 = vadd.f32 %v6629_v30, %v6546_v19  ;;  %v16741_v39 = vld [vmem:[#allocation152_spill] sm:$0xff]  ;;  %v16742_v30 = vld [vmem:[#allocation150_spill] sm:$0xff] }
 0x96e   : > { %v6715_v54 = vadd.f32 %v6714_v31, %v6630_v4  ;;  %v6789_v40 = vpop.f32.mrf.mxu1 }
 0x96f   : > { %v6722_v2 = vpop.f32.mrf.mxu0 }
 0x970   : > { %v13427_v9 = vadd.f32 %v6781_v15, %v6715_v54  ;;  %6922 = vmatmul.f32.gmra.mxu2 %v16737_v0  ;;  %6997 = vmatmul.f32.gmra.mxu3 %v16493_v23  ;;  %v16740_v15 = vld [vmem:[#allocation156_spill] sm:$0xff] }
 0x971   : > { %7171 = vmatmul.f32.gmra.mxu1 %v16738_v25 }
 0x972   : > { %7081 = vmatmul.f32.gmra.mxu0 %v16739_v53 }
 0x973   : > { %v6555_v55 = vpop.f32.mrf.mxu2  ;;  %v6635_v57 = vpop.f32.mrf.mxu3 }
 0x974   : > { %v6556_v22 = vadd.f32 %v6555_v55, %v13347_v14  ;;  %v6636_v42 = vadd.f32 %v6635_v57, %v6551_v63  ;;  %v16744_v57 = vld [vmem:[#allocation161_spill] sm:$0xff] }
 0x976   : > { %v6719_v6 = vadd.f32 %v6718_v5, %v6636_v42  ;;  %v6793_v19 = vpop.f32.mrf.mxu1 }
 0x977   : > { %v6726_v4 = vpop.f32.mrf.mxu0 }
 0x978   : > { %v13434_v31 = vadd.f32 %v6785_v1, %v6719_v6  ;;  %6930 = vmatmul.f32.gmra.mxu2 %v16740_v15  ;;  %7001 = vmatmul.f32.gmra.mxu3 %v11815_v46  ;;  %v16743_v1 = vld [vmem:[#allocation149_spill] sm:$0xff] }
 0x979   : > { %7177 = vmatmul.f32.gmra.mxu1 %v16741_v39  ;;  %v16750_v39 = vld [vmem:[#allocation165_spill] sm:$0xff] }
 0x97a   : > { %7086 = vmatmul.f32.gmra.mxu0 %v16742_v30 }
 0x97b   : > { %v6560_v54 = vpop.f32.mrf.mxu2  ;;  %v6641_v53 = vpop.f32.mrf.mxu3 }
 0x97c   : > { %v6561_v25 = vadd.f32 %v6560_v54, %v13362_v20  ;;  %v6642_v0 = vadd.f32 %v6641_v53, %v6556_v22  ;;  %v16745_v22 = vld [vmem:[#allocation4_spill] sm:$0xff]  ;;  %v16747_v53 = vld [vmem:[#allocation5_spill] sm:$0xff] }
 0x97e   : > { %v6723_v14 = vadd.f32 %v6722_v2, %v6642_v0  ;;  %v6797_v63 = vpop.f32.mrf.mxu1  ;;  %v16746_v2 = vld [vmem:[#allocation3_spill] sm:$0xff] }
 0x97f   : > { %v6730_v5 = vpop.f32.mrf.mxu0 }
 0x980   : > { %v13441_v42 = vadd.f32 %v6789_v40, %v6723_v14  ;;  %7005 = vmatmul.f32.gmra.mxu3 %v16743_v1  ;;  %7204 = vmatmul.f32.vlgmr.msra.gmra.mxu2 %v16457_v7 }
 0x981   : > { %7480 = vmatmul.f32.vlgmr.msrb.gmra.mxu1 %v11861_v29  ;;  %8171 = vmatpush.msra.mxu2 %v16217_v35 }
 0x982   : > { %7361 = vmatmul.f32.vlgmr.msrb.gmra.mxu0 %v16744_v57  ;;  %8272 = vmatpush.msrb.mxu1 %v16217_v35  ;;  %v16748_v57 = vld [vmem:[#allocation158_spill] sm:$0xff] }
 0x983   : > { %v6565_v55 = vpop.f32.mrf.mxu2  ;;  %v6647_v20 = vpop.f32.mrf.mxu3  ;;  %8242 = vmatpush.msrb.mxu0 %v16745_v22  ;;  %8173 = vmatpush.msra.mxu2 %v16746_v2  ;;  %v16749_v22 = vld [vmem:[#allocation8_spill] sm:$0xff] }
 0x984   : > { %v6566_v40 = vadd.f32 %v6565_v55, %v13371_v34  ;;  %v6648_v0 = vadd.f32 %v6647_v20, %v6561_v25  ;;  %8274 = vmatpush.msrb.mxu1 %v16746_v2  ;;  %v16751_v55 = vld [vmem:[#allocation9_spill] sm:$0xff] }
 0x985   : > { %8245 = vmatpush.msrb.mxu0 %v16747_v53 }
 0x986   : > { %v6727_v6 = vadd.f32 %v6726_v4, %v6648_v0  ;;  %v6801_v54 = vpop.f32.mrf.mxu1 }
 0x987   : > { %v6734_v14 = vpop.f32.mrf.mxu0 }
 0x988   : > { %v13454_v30 = vadd.f32 %v6793_v19, %v6727_v6  ;;  %7208 = vmatmul.f32.gmra.mxu2 %v16461_v45  ;;  %7271 = vmatmul.f32.vlgmr.msra.gmra.mxu3 %v16457_v7 }
 0x989   : > { %7484 = vmatmul.f32.gmra.mxu1 %v16748_v57  ;;  %8210 = vmatpush.msra.mxu3 %v16749_v22  ;;  %v16752_v22 = vld [vmem:[#allocation170_spill] sm:$0xff] }
 0x98a   : > { %7369 = vmatmul.f32.gmra.mxu0 %v16750_v39 }
 0x98b   : > { %v6570_v34 = vpop.f32.mrf.mxu2  ;;  %v6653_v25 = vpop.f32.mrf.mxu3  ;;  %8216 = vmatpush.msra.mxu3 %v16751_v55 }
 0x98c   : > { %v6571_v4 = vadd.f32 %v6570_v34, %v13378_v60  ;;  %v6654_v20 = vadd.f32 %v6653_v25, %v6566_v40 }
 0x98e   : > { %v6731_v0 = vadd.f32 %v6730_v5, %v6654_v20  ;;  %v6805_v19 = vpop.f32.mrf.mxu1 }
 0x98f   : > { %v6738_v53 = vpop.f32.mrf.mxu0 }
 0x990   : > { %v13463_v6 = vadd.f32 %v6797_v63, %v6731_v0  ;;  %7212 = vmatmul.f32.gmra.mxu2 %v16465_v48  ;;  %7275 = vmatmul.f32.gmra.mxu3 %v16461_v45  ;;  %v16753_v63 = vld [vmem:[#allocation175_spill] sm:$0xff] }
 0x991   : > { %7488 = vmatmul.f32.gmra.mxu1 %v11907_v52 }
 0x992   : > { %7377 = vmatmul.f32.gmra.mxu0 %v16752_v22 }
 0x993   : > { %v6575_v39 = vpop.f32.mrf.mxu2  ;;  %v6659_v15 = vpop.f32.mrf.mxu3 }
 0x994   : > { %v6576_v55 = vadd.f32 %v6575_v39, %v13385_v16  ;;  %v6660_v7 = vadd.f32 %v6659_v15, %v6571_v4 }
 0x996   : > { %v6735_v60 = vadd.f32 %v6734_v14, %v6660_v7  ;;  %v6809_v40 = vpop.f32.mrf.mxu1 }
 0x997   : > { %v6742_v5 = vpop.f32.mrf.mxu0 }
 0x998   : > { %v13470_v34 = vadd.f32 %v6801_v54, %v6735_v60  ;;  %7216 = vmatmul.f32.gmra.mxu2 %v16469_v36  ;;  %7279 = vmatmul.f32.gmra.mxu3 %v16465_v48  ;;  %v16754_v54 = vld [vmem:[#allocation180_spill] sm:$0xff] }
 0x999   : > { %7492 = vmatmul.f32.gmra.mxu1 %v11936_v27 }
 0x99a   : > { %7385 = vmatmul.f32.gmra.mxu0 %v16753_v63 }
 0x99b   : > { %v6580_v25 = vpop.f32.mrf.mxu2  ;;  %v6665_v20 = vpop.f32.mrf.mxu3 }
 0x99c   : > { %v6581_v0 = vadd.f32 %v6580_v25, %v13392_v8  ;;  %v6666_v22 = vadd.f32 %v6665_v20, %v6576_v55 }
 0x99e   : > { %v6739_v16 = vadd.f32 %v6738_v53, %v6666_v22  ;;  %v7112_v15 = vpop.f32.mrf.mxu1 }
 0x99f   : > { %v7032_v7 = vpop.f32.mrf.mxu0 }
 0x9a0   : > { %v13477_v39 = vadd.f32 %v6805_v19, %v6739_v16  ;;  %7220 = vmatmul.f32.gmra.mxu2 %v16473_v41  ;;  %7283 = vmatmul.f32.gmra.mxu3 %v16469_v36  ;;  %v16755_v19 = vld [vmem:[#allocation185_spill] sm:$0xff] }
 0x9a1   : > { %7496 = vmatmul.f32.gmra.mxu1 %v11961_v18 }
 0x9a2   : > { %7393 = vmatmul.f32.gmra.mxu0 %v16754_v54 }
 0x9a3   : > { %v6671_v14 = vpop.f32.mrf.mxu3  ;;  %v6843_v4 = vpop.f32.mrf.mxu2 }
 0x9a4   : > { %v6672_v60 = vadd.f32 %v6671_v14, %v6581_v0 }
 0x9a6   : > { %v6743_v63 = vadd.f32 %v6742_v5, %v6672_v60  ;;  %v7118_v48 = vpop.f32.mrf.mxu1 }
 0x9a7   : > { %v7037_v8 = vpop.f32.mrf.mxu0 }
 0x9a8   : > { %v13483_v55 = vadd.f32 %v6809_v40, %v6743_v63  ;;  %7224 = vmatmul.f32.gmra.mxu2 %v16722_v61  ;;  %7287 = vmatmul.f32.gmra.mxu3 %v16473_v41  ;;  %v16756_v40 = vld [vmem:[#allocation190_spill] sm:$0xff] }
 0x9a9   : > { %7500 = vmatmul.f32.gmra.mxu1 %v11984_v10 }
 0x9aa   : > { %7401 = vmatmul.f32.gmra.mxu0 %v16755_v19 }
 0x9ab   : > { %v6851_v53 = vpop.f32.mrf.mxu2  ;;  %v6962_v22 = vpop.f32.mrf.mxu3 }
 0x9ac   : > { %v6963_v25 = vadd.f32 %v6962_v22, %v6843_v4 }
 0x9ae   : > { %v7033_v20 = vadd.f32 %v7032_v7, %v6963_v25  ;;  %v7124_v16 = vpop.f32.mrf.mxu1 }
 0x9af   : > { %v7042_v54 = vpop.f32.mrf.mxu0 }
 0x9b0   : > { %v13489_v0 = vadd.f32 %v7112_v15, %v7033_v20  ;;  %7228 = vmatmul.f32.gmra.mxu2 %v16726_v13  ;;  %7291 = vmatmul.f32.gmra.mxu3 %v16722_v61  ;;  %v16757_v15 = vld [vmem:[#allocation194_spill] sm:$0xff] }
 0x9b1   : > { %7504 = vmatmul.f32.gmra.mxu1 %v12007_v11 }
 0x9b2   : > { %7409 = vmatmul.f32.gmra.mxu0 %v16756_v40 }
 0x9b3   : > { %v6859_v5 = vpop.f32.mrf.mxu2  ;;  %v6966_v63 = vpop.f32.mrf.mxu3 }
 0x9b4   : > { %v6967_v14 = vadd.f32 %v6966_v63, %v6851_v53 }
 0x9b6   : > { %v7038_v60 = vadd.f32 %v7037_v8, %v6967_v14  ;;  %v7130_v19 = vpop.f32.mrf.mxu1 }
 0x9b7   : > { %v7047_v41 = vpop.f32.mrf.mxu0 }
 0x9b8   : > { %v13495_v4 = vadd.f32 %v7118_v48, %v7038_v60  ;;  %7232 = vmatmul.f32.gmra.mxu2 %v16730_v43  ;;  %7295 = vmatmul.f32.gmra.mxu3 %v16726_v13  ;;  %v16758_v48 = vld [vmem:[#allocation198_spill] sm:$0xff] }
 0x9b9   : > { %7508 = vmatmul.f32.gmra.mxu1 %v12029_v26 }
 0x9ba   : > { %7417 = vmatmul.f32.gmra.mxu0 %v16757_v15 }
 0x9bb   : > { %v6867_v7 = vpop.f32.mrf.mxu2  ;;  %v6970_v22 = vpop.f32.mrf.mxu3 }
 0x9bc   : > { %v6971_v25 = vadd.f32 %v6970_v22, %v6859_v5 }
 0x9be   : > { %v7043_v20 = vadd.f32 %v7042_v54, %v6971_v25  ;;  %v7136_v40 = vpop.f32.mrf.mxu1  ;;  %v16759_v54 = vld [vmem:[#allocation202_spill] sm:$0xff] }
 0x9bf   : > { %v7052_v61 = vpop.f32.mrf.mxu0 }
 0x9c0   : > { %v13501_v53 = vadd.f32 %v7124_v16, %v7043_v20  ;;  %7236 = vmatmul.f32.gmra.mxu2 %v16734_v32  ;;  %7299 = vmatmul.f32.gmra.mxu3 %v16730_v43 }
 0x9c1   : > { %7512 = vmatmul.f32.gmra.mxu1 %v12051_v12 }
 0x9c2   : > { %7425 = vmatmul.f32.gmra.mxu0 %v16758_v48 }
 0x9c3   : > { %v6875_v8 = vpop.f32.mrf.mxu2  ;;  %v6974_v63 = vpop.f32.mrf.mxu3 }
 0x9c4   : > { %v6975_v14 = vadd.f32 %v6974_v63, %v6867_v7 }
 0x9c6   : > { %v7048_v60 = vadd.f32 %v7047_v41, %v6975_v14  ;;  %v7142_v15 = vpop.f32.mrf.mxu1  ;;  %v16760_v41 = vld [vmem:[#allocation206_spill] sm:$0xff] }
 0x9c7   : > { %v7057_v13 = vpop.f32.mrf.mxu0 }
 0x9c8   : > { %v13507_v5 = vadd.f32 %v7130_v19, %v7048_v60  ;;  %7240 = vmatmul.f32.gmra.mxu2 %v16493_v23  ;;  %7303 = vmatmul.f32.gmra.mxu3 %v16734_v32 }
 0x9c9   : > { %7516 = vmatmul.f32.gmra.mxu1 %v12073_v37 }
 0x9ca   : > { %7433 = vmatmul.f32.gmra.mxu0 %v16759_v54 }
 0x9cb   : > { %v6883_v16 = vpop.f32.mrf.mxu2  ;;  %v6978_v22 = vpop.f32.mrf.mxu3 }
 0x9cc   : > { %v6979_v25 = vadd.f32 %v6978_v22, %v6875_v8 }
 0x9ce   : > { %v7053_v20 = vadd.f32 %v7052_v61, %v6979_v25  ;;  %v7148_v48 = vpop.f32.mrf.mxu1  ;;  %v16761_v61 = vld [vmem:[#allocation204_spill] sm:$0xff] }
 0x9cf   : > { %v7062_v43 = vpop.f32.mrf.mxu0 }
 0x9d0   : > { %v13513_v7 = vadd.f32 %v7136_v40, %v7053_v20  ;;  %7244 = vmatmul.f32.gmra.mxu2 %v11815_v46  ;;  %7307 = vmatmul.f32.gmra.mxu3 %v16493_v23  ;;  %v16762_v40 = vld [vmem:[#allocation208_spill] sm:$0xff] }
 0x9d1   : > { %7520 = vmatmul.f32.gmra.mxu1 %v12095_v49 }
 0x9d2   : > { %7441 = vmatmul.f32.gmra.mxu0 %v16760_v41 }
 0x9d3   : > { %v6891_v19 = vpop.f32.mrf.mxu2  ;;  %v6982_v63 = vpop.f32.mrf.mxu3 }
 0x9d4   : > { %v6983_v14 = vadd.f32 %v6982_v63, %v6883_v16 }
 0x9d6   : > { %v7058_v60 = vadd.f32 %v7057_v13, %v6983_v14  ;;  %v7154_v54 = vpop.f32.mrf.mxu1  ;;  %v16763_v13 = vld [vmem:[#allocation155_spill] sm:$0xff] }
 0x9d7   : > { %v7067_v32 = vpop.f32.mrf.mxu0 }
 0x9d8   : > { %v13519_v8 = vadd.f32 %v7142_v15, %v7058_v60  ;;  %7248 = vmatmul.f32.gmra.mxu2 %v16743_v1  ;;  %7311 = vmatmul.f32.gmra.mxu3 %v11815_v46  ;;  %v16764_v15 = vld [vmem:[#allocation6_spill] sm:$0xff]  ;;  %v16765_v60 = vld [vmem:[#allocation7_spill] sm:$0xff] }
 0x9d9   : > { %7524 = vmatmul.f32.gmra.mxu1 %v16761_v61 }
 0x9da   : > { %7449 = vmatmul.f32.gmra.mxu0 %v16762_v40  ;;  %v16767_v40 = vld [vmem:[#allocation157_spill] sm:$0xff] }
 0x9db   : > { %v6899_v22 = vpop.f32.mrf.mxu2  ;;  %v6986_v25 = vpop.f32.mrf.mxu3 }
 0x9dc   : > { %v6987_v20 = vadd.f32 %v6986_v25, %v6891_v19 }
 0x9de   : > { %v7063_v41 = vadd.f32 %v7062_v43, %v6987_v20  ;;  %v7160_v23 = vpop.f32.mrf.mxu1 }
 0x9df   : > { %v7072_v36 = vpop.f32.mrf.mxu0 }
 0x9e0   : > { %v13525_v16 = vadd.f32 %v7148_v48, %v7063_v41  ;;  %7315 = vmatmul.f32.gmra.mxu3 %v16743_v1  ;;  %7550 = vmatmul.f32.vlgmr.msrb.gmra.mxu2 %v16763_v13  ;;  %v16766_v41 = vld [vmem:[#allocation160_spill] sm:$0xff]  ;;  %v16796_v1 = vld [vmem:[#allocation203_spill] sm:$0xff] }
 0x9e1   : > { %7790 = vmatmul.f32.vlgmr.msra.gmra.mxu1 %v11861_v29  ;;  %8305 = vmatpush.msrb.mxu2 %v16764_v15 }
 0x9e2   : > { %7723 = vmatmul.f32.vlgmr.msra.gmra.mxu0 %v11861_v29 }
 0x9e3   : > { %v6907_v63 = vpop.f32.mrf.mxu2  ;;  %v6990_v14 = vpop.f32.mrf.mxu3  ;;  %8309 = vmatpush.msrb.mxu2 %v16765_v60 }
 0x9e4   : > { %v6991_v19 = vadd.f32 %v6990_v14, %v6899_v22 }
 0x9e6   : > { %v7068_v43 = vadd.f32 %v7067_v32, %v6991_v19  ;;  %v7166_v25 = vpop.f32.mrf.mxu1  ;;  %v16768_v19 = vld [vmem:[#allocation2_spill] sm:$0xff] }
 0x9e7   : > { %v7077_v20 = vpop.f32.mrf.mxu0 }
 0x9e8   : > { %v13533_v48 = vadd.f32 %v7154_v54, %v7068_v43  ;;  %7555 = vmatmul.f32.gmra.mxu2 %v16766_v41  ;;  %7630 = vmatmul.f32.vlgmr.msrb.gmra.mxu3 %v16767_v40  ;;  %v16769_v43 = vld [vmem:[#allocation162_spill] sm:$0xff] }
 0x9e9   : > { %7794 = vmatmul.f32.gmra.mxu1 %v16748_v57  ;;  %8334 = vmatpush.msrb.mxu3 %v16217_v35 }
 0x9ea   : > { %7727 = vmatmul.f32.gmra.mxu0 %v16748_v57 }
 0x9eb   : > { %v6915_v15 = vpop.f32.mrf.mxu2  ;;  %v6994_v13 = vpop.f32.mrf.mxu3  ;;  %8336 = vmatpush.msrb.mxu3 %v16746_v2 }
 0x9ec   : > { %v6995_v22 = vadd.f32 %v6994_v13, %v6907_v63 }
 0x9ee   : > { %v7073_v32 = vadd.f32 %v7072_v36, %v6995_v22  ;;  %v7172_v14 = vpop.f32.mrf.mxu1  ;;  %v16770_v36 = vld [vmem:[#allocation169_spill] sm:$0xff] }
 0x9ef   : > { %v7082_v60 = vpop.f32.mrf.mxu0 }
 0x9f0   : > { %v13541_v54 = vadd.f32 %v7160_v23, %v7073_v32  ;;  %7560 = vmatmul.f32.gmra.mxu2 %v16768_v19  ;;  %7636 = vmatmul.f32.gmra.mxu3 %v16769_v43  ;;  %v16771_v23 = vld [vmem:[#allocation166_spill] sm:$0xff] }
 0x9f1   : > { %7798 = vmatmul.f32.gmra.mxu1 %v11907_v52 }
 0x9f2   : > { %7731 = vmatmul.f32.gmra.mxu0 %v11907_v52 }
 0x9f3   : > { %v6923_v35 = vpop.f32.mrf.mxu2  ;;  %v6998_v41 = vpop.f32.mrf.mxu3 }
 0x9f4   : > { %v6999_v40 = vadd.f32 %v6998_v41, %v6915_v15 }
 0x9f6   : > { %v7078_v57 = vadd.f32 %v7077_v20, %v6999_v40  ;;  %v7178_v29 = vpop.f32.mrf.mxu1 }
 0x9f7   : > { %v7087_v2 = vpop.f32.mrf.mxu0 }
 0x9f8   : > { %v13547_v13 = vadd.f32 %v7166_v25, %v7078_v57  ;;  %7565 = vmatmul.f32.gmra.mxu2 %v16770_v36  ;;  %7642 = vmatmul.f32.gmra.mxu3 %v16771_v23  ;;  %v16772_v57 = vld [vmem:[#allocation174_spill] sm:$0xff]  ;;  %v16773_v25 = vld [vmem:[#allocation171_spill] sm:$0xff] }
 0x9f9   : > { %7802 = vmatmul.f32.gmra.mxu1 %v11936_v27 }
 0x9fa   : > { %7735 = vmatmul.f32.gmra.mxu0 %v11936_v27 }
 0x9fb   : > { %v6931_v63 = vpop.f32.mrf.mxu2  ;;  %v7002_v22 = vpop.f32.mrf.mxu3 }
 0x9fc   : > { %v7003_v32 = vadd.f32 %v7002_v22, %v6923_v35 }
 0x9fe   : > { %v7083_v19 = vadd.f32 %v7082_v60, %v7003_v32  ;;  %v13553_v43 = vpop.f32.mrf.mxu1 }
 0x9ff   : > { %v13555_v41 = vpop.f32.mrf.mxu0 }
 0xa00   : > { %v13557_v40 = vadd.f32 %v7172_v14, %v7083_v19  ;;  %7570 = vmatmul.f32.gmra.mxu2 %v16772_v57  ;;  %7648 = vmatmul.f32.gmra.mxu3 %v16773_v25  ;;  %v16774_v19 = vld [vmem:[#allocation179_spill] sm:$0xff]  ;;  %v16775_v57 = vld [vmem:[#allocation176_spill] sm:$0xff] }
 0xa01   : > { %7806 = vmatmul.f32.gmra.mxu1 %v11961_v18 }
 0xa02   : > { %7739 = vmatmul.f32.gmra.mxu0 %v11961_v18  ;;  %v16792_v18 = vld [vmem:[#allocation201_spill] sm:$0xff] }
 0xa03   : > { %v7006_v20 = vpop.f32.mrf.mxu3  ;;  %v7205_v15 = vpop.f32.mrf.mxu2 }
 0xa04   : > { %v7007_v36 = vadd.f32 %v7006_v20, %v6931_v63  ;;  %v7206_v35 = vadd.f32 %v7205_v15, %v13489_v0  ;;  %v16777_v20 = vld [vmem:[#allocation184_spill] sm:$0xff]  ;;  %v16778_v15 = vld [vmem:[#allocation181_spill] sm:$0xff] }
 0xa06   : > { %v7088_v60 = vadd.f32 %v7087_v2, %v7007_v36  ;;  %v13564_v22 = vpop.f32.mrf.mxu1 }
 0xa07   : > { %v13566_v32 = vpop.f32.mrf.mxu0 }
 0xa08   : > { %v13568_v14 = vadd.f32 %v7178_v29, %v7088_v60  ;;  %7575 = vmatmul.f32.gmra.mxu2 %v16774_v19  ;;  %7654 = vmatmul.f32.gmra.mxu3 %v16775_v57 }
 0xa09   : > { %7810 = vmatmul.f32.gmra.mxu1 %v11984_v10 }
 0xa0a   : > { %7743 = vmatmul.f32.gmra.mxu0 %v11984_v10 }
 0xa0b   : > { %v7209_v25 = vpop.f32.mrf.mxu2  ;;  %v7272_v23 = vpop.f32.mrf.mxu3 }
 0xa0c   : > { %v7210_v63 = vadd.f32 %v7209_v25, %v13495_v4  ;;  %v7273_v0 = vadd.f32 %v7272_v23, %v7206_v35 }
 0xa0e   : > { %v13576_v2 = vadd.f32 %v7273_v0, %v13399_v56  ;;  %v13578_v36 = vpop.f32.mrf.mxu1  ;;  %v16781_v0 = vld [vmem:[#allocation189_spill] sm:$0xff] }
 0xa0f   : > { %v13580_v29 = vpop.f32.mrf.mxu0 }
 0xa10   : > { %16776 = vst [vmem:[#allocation4_spill] sm:$0xff] %v13576_v2  ;;  %7580 = vmatmul.f32.gmra.mxu2 %v16777_v20  ;;  %7660 = vmatmul.f32.gmra.mxu3 %v16778_v15  ;;  %v16782_v20 = vld [vmem:[#allocation186_spill] sm:$0xff] }
 0xa11   : > { %7814 = vmatmul.f32.gmra.mxu1 %v12007_v11 }
 0xa12   : > { %7747 = vmatmul.f32.gmra.mxu0 %v12007_v11 }
 0xa13   : > { %v7213_v60 = vpop.f32.mrf.mxu2  ;;  %v7276_v19 = vpop.f32.mrf.mxu3 }
 0xa14   : > { %v7214_v4 = vadd.f32 %v7213_v60, %v13501_v53  ;;  %v7277_v23 = vadd.f32 %v7276_v19, %v7210_v63 }
 0xa16   : > { %v13588_v56 = vadd.f32 %v7277_v23, %v13406_v44  ;;  %v13590_v25 = vpop.f32.mrf.mxu1  ;;  %v16783_v23 = vld [vmem:[#allocation193_spill] sm:$0xff] }
 0xa17   : > { %16779 = vst [vmem:[#allocation3_spill] sm:$0xff] %v13590_v25  ;;  %v13592_v35 = vpop.f32.mrf.mxu0 }
 0xa18   : > { %16780 = vst [vmem:[#allocation5_spill] sm:$0xff] %v13592_v35  ;;  %7585 = vmatmul.f32.gmra.mxu2 %v16781_v0  ;;  %7666 = vmatmul.f32.gmra.mxu3 %v16782_v20  ;;  %v16784_v0 = vld [vmem:[#allocation191_spill] sm:$0xff] }
 0xa19   : > { %7818 = vmatmul.f32.gmra.mxu1 %v12029_v26 }
 0xa1a   : > { %7751 = vmatmul.f32.gmra.mxu0 %v12029_v26 }
 0xa1b   : > { %v7217_v15 = vpop.f32.mrf.mxu2  ;;  %v7280_v57 = vpop.f32.mrf.mxu3 }
 0xa1c   : > { %v7218_v53 = vadd.f32 %v7217_v15, %v13507_v5  ;;  %v7281_v19 = vadd.f32 %v7280_v57, %v7214_v4  ;;  %v8150_v57 = vld.sshfl [vmem:[#allocation1] sm:$0xff pattern:$0x75316420] }
 0xa1d   : > { %v16788_v4 = vld [vmem:[#allocation197_spill] sm:$0xff] }
 0xa1e   : > { %v13600_v44 = vadd.f32 %v7281_v19, %v13413_v24  ;;  %v13602_v63 = vpop.f32.mrf.mxu1  ;;  %v16789_v19 = vld [vmem:[#allocation195_spill] sm:$0xff] }
 0xa1f   : > { %v13604_v60 = vpop.f32.mrf.mxu0 }
 0xa20   : > { %7590 = vmatmul.f32.gmra.mxu2 %v16783_v23  ;;  %7672 = vmatmul.f32.gmra.mxu3 %v16784_v0  ;;  %v8152_v23 = vsel %vm309_vm0, %v8150_v57, 0  ;;  %v16793_v57 = vld [vmem:[#allocation199_spill] sm:$0xff] }
 0xa21   : > { %7822 = vmatmul.f32.gmra.mxu1 %v12051_v12 }
 0xa22   : > { %7755 = vmatmul.f32.gmra.mxu0 %v12051_v12 }
 0xa23   : > { %v7221_v20 = vpop.f32.mrf.mxu2  ;;  %v7284_v26 = vpop.f32.mrf.mxu3 }
 0xa24   : > { %v7285_v11 = vadd.f32 %v7284_v26, %v7218_v53  ;;  %v7222_v0 = vadd.f32 %v7221_v20, %v13513_v7  ;;  %v13623_v53 = vand.u32 4294901760, %v8152_v23 }
 0xa26   : > { %v13611_v5 = vadd.f32 %v7285_v11, %v13420_v38  ;;  %v13613_v24 = vpop.f32.mrf.mxu1  ;;  %v8175_v7 = vsub.f32 %v8152_v23, %v13623_v53  ;;  %v16795_v23 = vld [vmem:[#allocation205_spill] sm:$0xff] }
 0xa27   : > { %16786 = vst [vmem:[#allocation9_spill] sm:$0xff] %v13613_v24  ;;  %v13615_v15 = vpop.f32.mrf.mxu0 }
 0xa28   : > { %16785 = vst [vmem:[#allocation8_spill] sm:$0xff] %v13611_v5  ;;  %7595 = vmatmul.f32.gmra.mxu2 %v16788_v4  ;;  %7678 = vmatmul.f32.gmra.mxu3 %v16789_v19  ;;  %v8151_v4 = vld.sshfl [vmem:[#allocation1 + $0x10] sm:$0xff pattern:$0x75316420] }
 0xa29   : > { %16787 = vst [vmem:[#allocation6_spill] sm:$0xff] %v13615_v15  ;;  %7826 = vmatmul.f32.gmra.mxu1 %v12073_v37  ;;  %v8154_v20 = vsel %vm309_vm0, %v8151_v4, 0  ;;  %v10844_v15 = vmov 0  }
 0xa2a   : > { %7759 = vmatmul.f32.gmra.mxu0 %v12073_v37  ;;  %v8176_v37 = vand.u32 4294901760, %v8175_v7  ;;  %v8182_v27 = vand.u32 4294901760, %v8154_v20  ;;  %10815 = vset.pattern.permute.xlu1 %v10844_v15 }
 0xa2b   : > { %v7225_v26 = vpop.f32.mrf.mxu2  ;;  %v7288_v11 = vpop.f32.mrf.mxu3  ;;  %10816 = vset.pattern.permute.xlu2 %v10844_v15  ;;  %10814 = vset.pattern.permute.xlu0 %v10844_v15 }
 0xa2c   : > { %v7289_v38 = vadd.f32 %v7288_v11, %v7222_v0  ;;  %v7226_v0 = vadd.f32 %v7225_v26, %v13519_v8  ;;  %v8177_v4 = vsub.f32 %v8175_v7, %v8176_v37  ;;  %v8183_v8 = vsub.f32 %v8154_v20, %v8182_v27 }
 0xa2e   : > { %v13626_v12 = vadd.f32 %v7289_v38, %v13427_v9  ;;  %v13628_v10 = vpop.f32.mrf.mxu1 }
 0xa2f   : > { %16790 = vst [vmem:[#allocation7_spill] sm:$0xff] %v13628_v10  ;;  %v13630_v19 = vpop.f32.mrf.mxu0 }
 0xa30   : > { %16791 = vst [vmem:[#allocation343_spill] sm:$0xff] %v13630_v19  ;;  %7600 = vmatmul.f32.gmra.mxu2 %v16792_v18  ;;  %7684 = vmatmul.f32.gmra.mxu3 %v16793_v57 }
 0xa31   : > { %7830 = vmatmul.f32.gmra.mxu1 %v12095_v49 }
 0xa32   : > { %7763 = vmatmul.f32.gmra.mxu0 %v12095_v49  ;;  %v8184_v49 = vand.u32 4294901760, %v8183_v8 }
 0xa33   : > { %v7229_v9 = vpop.f32.mrf.mxu2  ;;  %v7292_v11 = vpop.f32.mrf.mxu3 }
 0xa34   : > { %v7293_v38 = vadd.f32 %v7292_v11, %v7226_v0  ;;  %v7230_v26 = vadd.f32 %v7229_v9, %v13525_v16  ;;  %v8185_v20 = vsub.f32 %v8183_v8, %v8184_v49 }
 0xa36   : > { %v13640_v52 = vadd.f32 %v7293_v38, %v13434_v31  ;;  %v13642_v18 = vpop.f32.mrf.mxu1  ;;  %v8178_v38 = vand.u32 4294901760, %v8177_v4  ;;  %v8186_v4 = vand.u32 4294901760, %v8185_v20 }
 0xa37   : > { %v13644_v57 = vpop.f32.mrf.mxu0 }
 0xa38   : > { %16794 = vst [vmem:[#allocation344_spill] sm:$0xff] %v13640_v52  ;;  %7605 = vmatmul.f32.gmra.mxu2 %v16795_v23  ;;  %7690 = vmatmul.f32.gmra.mxu3 %v16796_v1  ;;  %v16800_v1 = vld [vmem:[#allocation207_spill] sm:$0xff] }
 0xa39   : > { %7834 = vmatmul.f32.gmra.mxu1 %v16761_v61 }
 0xa3a   : > { %7767 = vmatmul.f32.gmra.mxu0 %v16761_v61 }
 0xa3b   : > { %v7233_v0 = vpop.f32.mrf.mxu2  ;;  %v7296_v11 = vpop.f32.mrf.mxu3 }
 0xa3c   : > { %v7297_v31 = vadd.f32 %v7296_v11, %v7230_v26  ;;  %v7234_v16 = vadd.f32 %v7233_v0, %v13533_v48 }
 0xa3e   : > { %v13652_v46 = vadd.f32 %v7297_v31, %v13441_v42  ;;  %v13654_v45 = vpop.f32.mrf.mxu1 }
 0xa3f   : > { %16798 = vst [vmem:[#allocation346_spill] sm:$0xff] %v13654_v45  ;;  %v13656_v23 = vpop.f32.mrf.mxu0 }
 0xa40   : > { %16797 = vst [vmem:[#allocation345_spill] sm:$0xff] %v13652_v46  ;;  %7696 = vmatmul.f32.gmra.mxu3 %v16800_v1  ;;  %8179 = vmatmul.f32.vlgmr.msra.gmra.mxu2 %v8178_v38 }
 0xa41   : > { %16799 = vst [vmem:[#allocation347_spill] sm:$0xff] %v13656_v23  ;;  %8278 = vmatmul.f32.vlgmr.msrb.gmra.mxu1 %v8176_v37 }
 0xa42   : > { %8248 = vmatmul.f32.vlgmr.msrb.gmra.mxu0 %v8175_v7 }
 0xa43   : > { %v7237_v9 = vpop.f32.mrf.mxu2  ;;  %v7300_v61 = vpop.f32.mrf.mxu3 }
 0xa44   : > { %v7301_v26 = vadd.f32 %v7300_v61, %v7234_v16  ;;  %v7238_v37 = vadd.f32 %v7237_v9, %v13541_v54 }
 0xa46   : > { %v13661_v11 = vadd.f32 %v7301_v26, %v13454_v30  ;;  %v13663_v42 = vpop.f32.mrf.mxu1 }
 0xa47   : > { %16801 = vst [vmem:[#allocation348_spill] sm:$0xff] %v13663_v42  ;;  %v13665_v31 = vpop.f32.mrf.mxu0 }
 0xa48   : > { %16802 = vst [vmem:[#allocation349_spill] sm:$0xff] %v13665_v31  ;;  %8187 = vmatmul.f32.gmra.mxu2 %v8186_v4  ;;  %8218 = vmatmul.f32.vlgmr.msra.gmra.mxu3 %v13623_v53 }
 0xa49   : > { %8284 = vmatmul.f32.gmra.mxu1 %v8184_v49 }
 0xa4a   : > { %8253 = vmatmul.f32.gmra.mxu0 %v8183_v8 }
 0xa4b   : > { %v7241_v48 = vpop.f32.mrf.mxu2  ;;  %v7304_v7 = vpop.f32.mrf.mxu3 }
 0xa4c   : > { %v7305_v0 = vadd.f32 %v7304_v7, %v7238_v37  ;;  %v7242_v20 = vadd.f32 %v7241_v48, %v13547_v13 }
 0xa4e   : > { %v13670_v61 = vadd.f32 %v7305_v0, %v13463_v6  ;;  %v13672_v38 = vpop.f32.mrf.mxu1 }
 0xa4f   : > { %v13674_v30 = vpop.f32.mrf.mxu0 }
 0xa50   : > { %16803 = vst [vmem:[#allocation350_spill] sm:$0xff] %v13670_v61  ;;  %8222 = vmatmul.f32.gmra.mxu3 %v8182_v27  ;;  %8311 = vmatmul.f32.vlgmr.msrb.gmra.mxu2 %v13623_v53 }
 0xa53   : > { %v7245_v16 = vpop.f32.mrf.mxu2  ;;  %v7308_v49 = vpop.f32.mrf.mxu3 }
 0xa54   : > { %v7309_v26 = vadd.f32 %v7308_v49, %v7242_v20  ;;  %v7246_v6 = vadd.f32 %v7245_v16, %v13557_v40 }
 0xa56   : > { %v13679_v54 = vadd.f32 %v7309_v26, %v13470_v34  ;;  %v13681_v8 = vpop.f32.mrf.mxu1 }
 0xa57   : > { %16805 = vst [vmem:[#allocation352_spill] sm:$0xff] %v13681_v8  ;;  %v13683_v9 = vpop.f32.mrf.mxu0 }
 0xa58   : > { %16804 = vst [vmem:[#allocation351_spill] sm:$0xff] %v13679_v54  ;;  %8315 = vmatmul.f32.gmra.mxu2 %v8182_v27  ;;  %8338 = vmatmul.f32.vlgmr.msrb.gmra.mxu3 %v13623_v53 }
 0xa59   : > { %16806 = vst [vmem:[#allocation353_spill] sm:$0xff] %v13683_v9 }
 0xa5b   : > { %v7249_v4 = vpop.f32.mrf.mxu2  ;;  %v7312_v37 = vpop.f32.mrf.mxu3 }
 0xa5c   : > { %v7313_v7 = vadd.f32 %v7312_v37, %v7246_v6  ;;  %v7250_v34 = vadd.f32 %v7249_v4, %v13568_v14 }
 0xa5e   : > { %v13688_v13 = vadd.f32 %v7313_v7, %v13477_v39  ;;  %v13690_v48 = vpop.f32.mrf.mxu1 }
 0xa5f   : > { %16807 = vst [vmem:[#allocation354_spill] sm:$0xff] %v13690_v48  ;;  %v13692_v0 = vpop.f32.mrf.mxu0 }
 0xa60   : > { %16808 = vst [vmem:[#allocation355_spill] sm:$0xff] %v13692_v0  ;;  %8342 = vmatmul.f32.gmra.mxu3 %v8182_v27 }
 0xa63   : > { %v7316_v20 = vpop.f32.mrf.mxu3  ;;  %v13695_v49 = vpop.f32.mrf.mxu2 }
 0xa64   : > { %v7317_v26 = vadd.f32 %v7316_v20, %v7250_v34 }
 0xa66   : > { %v13698_v53 = vadd.f32 %v7317_v26, %v13483_v55  ;;  %v13700_v40 = vpop.f32.mrf.mxu1 }
 0xa67   : > { %v13702_v16 = vpop.f32.mrf.mxu0 }
 0xa68   : > { %16809 = vst [vmem:[#allocation356_spill] sm:$0xff] %v13698_v53 }
 0xa6b   : > { %v13704_v39 = vpop.f32.mrf.mxu2  ;;  %v13706_v6 = vpop.f32.mrf.mxu3 }
 0xa6e   : > { %v13708_v37 = vpop.f32.mrf.mxu1 }
 0xa6f   : > { %v13710_v27 = vpop.f32.mrf.mxu0 }
 0xa73   : > { %v13712_v14 = vpop.f32.mrf.mxu2  ;;  %v13714_v4 = vpop.f32.mrf.mxu3 }
 0xa76   : > { %v13718_v55 = vpop.f32.mrf.mxu1 }
 0xa77   : > { %v13716_v7 = vpop.f32.mrf.mxu0  ;;  %16811 = vst [vmem:[#allocation358_spill] sm:$0xff] %v13718_v55 }
 0xa78   : > { %16810 = vst [vmem:[#allocation357_spill] sm:$0xff] %v13716_v7 }
 0xa7b   : > { %v13720_v34 = vpop.f32.mrf.mxu2  ;;  %v13722_v20 = vpop.f32.mrf.mxu3 }
 0xa7c   : > { %16812 = vst [vmem:[#allocation359_spill] sm:$0xff] %v13720_v34 }
 0xa7e   : > { %v13726_v1 = vpop.f32.mrf.mxu1 }
 0xa7f   : > { %v13724_v26 = vpop.f32.mrf.mxu0 }
 0xa83   : > { %v13728_v53 = vpop.f32.mrf.mxu2  ;;  %v13730_v8 = vpop.f32.mrf.mxu3 }
 0xa84   : > { %16813 = vst [vmem:[#allocation360_spill] sm:$0xff] %v13730_v8 }
 0xa86   : > { %v13738_v31 = vpop.f32.mrf.mxu1 }
 0xa87   : > { %v13732_v9 = vpop.f32.mrf.mxu0  ;;  %16816 = vst [vmem:[#allocation363_spill] sm:$0xff] %v13738_v31 }
 0xa88   : > { %16814 = vst [vmem:[#allocation361_spill] sm:$0xff] %v13732_v9 }
 0xa8b   : > { %v13734_v54 = vpop.f32.mrf.mxu2  ;;  %v13736_v42 = vpop.f32.mrf.mxu3 }
 0xa8c   : > { %16815 = vst [vmem:[#allocation362_spill] sm:$0xff] %v13734_v54 }
 0xa8e   : > { %v13746_v46 = vpop.f32.mrf.mxu1 }
 0xa8f   : > { %v13740_v61 = vpop.f32.mrf.mxu0  ;;  %16820 = vst [vmem:[#allocation367_spill] sm:$0xff] %v13746_v46 }
 0xa90   : > { %16817 = vst [vmem:[#allocation364_spill] sm:$0xff] %v13740_v61 }
 0xa93   : > { %v13742_v45 = vpop.f32.mrf.mxu2  ;;  %v13744_v23 = vpop.f32.mrf.mxu3 }
 0xa94   : > { %16818 = vst [vmem:[#allocation365_spill] sm:$0xff] %v13742_v45 }
 0xa95   : > { %16819 = vst [vmem:[#allocation366_spill] sm:$0xff] %v13744_v23 }
 0xa96   : > { %v13754_v33 = vpop.f32.mrf.mxu1 }
 0xa97   : > { %v13752_v19 = vpop.f32.mrf.mxu0 }
 0xa9b   : > { %v13748_v47 = vpop.f32.mrf.mxu2  ;;  %v13750_v10 = vpop.f32.mrf.mxu3 }
 0xa9c   : > { %16821 = vst [vmem:[#allocation368_spill] sm:$0xff] %v13750_v10 }
 0xa9e   : > { %v13762_v61 = vpop.f32.mrf.mxu1 }
 0xa9f   : > { %v13760_v31 = vpop.f32.mrf.mxu0  ;;  %16824 = vst [vmem:[#allocation371_spill] sm:$0xff] %v13762_v61 }
 0xaa0   : > { %16823 = vst [vmem:[#allocation370_spill] sm:$0xff] %v13760_v31 }
 0xaa3   : > { %v13756_v52 = vpop.f32.mrf.mxu2  ;;  %v13758_v58 = vpop.f32.mrf.mxu3 }
 0xaa4   : > { %16822 = vst [vmem:[#allocation369_spill] sm:$0xff] %v13756_v52 }
 0xaa6   : > { %v13774_v23 = vpop.f32.mrf.mxu1 }
 0xaa7   : > { %v13768_v46 = vpop.f32.mrf.mxu0  ;;  %16829 = vst [vmem:[#allocation376_spill] sm:$0xff] %v13774_v23 }
 0xaa8   : > { %16827 = vst [vmem:[#allocation374_spill] sm:$0xff] %v13768_v46 }
 0xaab   : > { %v13764_v45 = vpop.f32.mrf.mxu2  ;;  %v13766_v9 = vpop.f32.mrf.mxu3 }
 0xaac   : > { %16825 = vst [vmem:[#allocation372_spill] sm:$0xff] %v13764_v45 }
 0xaad   : > { %16826 = vst [vmem:[#allocation373_spill] sm:$0xff] %v13766_v9 }
 0xaae   : > { %v13782_v31 = vpop.f32.mrf.mxu1 }
 0xaaf   : > { %v13776_v54 = vpop.f32.mrf.mxu0 }
 0xab3   : > { %v13770_v62 = vpop.f32.mrf.mxu2  ;;  %v13772_v10 = vpop.f32.mrf.mxu3 }
 0xab4   : > { %16828 = vst [vmem:[#allocation375_spill] sm:$0xff] %v13772_v10 }
 0xab6   : > { %v13788_v46 = vpop.f32.mrf.mxu1 }
 0xab7   : > { %v13786_v9 = vpop.f32.mrf.mxu0  ;;  %16833 = vst [vmem:[#allocation380_spill] sm:$0xff] %v13788_v46 }
 0xab8   : > { %16832 = vst [vmem:[#allocation379_spill] sm:$0xff] %v13786_v9 }
 0xabb   : > { %v13778_v52 = vpop.f32.mrf.mxu2  ;;  %v13780_v24 = vpop.f32.mrf.mxu3 }
 0xabc   : > { %16830 = vst [vmem:[#allocation377_spill] sm:$0xff] %v13778_v52 }
 0xabe   : > { %v8279_v52 = vpop.f32.mrf.mxu1 }
 0xabf   : > { %v8249_v50 = vpop.f32.mrf.mxu0 }
 0xac3   : > { %v13784_v61 = vpop.f32.mrf.mxu3  ;;  %v8180_v45 = vpop.f32.mrf.mxu2 }
 0xac4   : > { %16831 = vst [vmem:[#allocation378_spill] sm:$0xff] %v13784_v61 }
 0xac6   : > { %v8285_v46 = vpop.f32.mrf.mxu1 }
 0xac7   : > { %v8254_v61 = vpop.f32.mrf.mxu0 }
 0xacb   : > { %v8188_v10 = vpop.f32.mrf.mxu2  ;;  %v8219_v23 = vpop.f32.mrf.mxu3 }
 0xacc   : > { %v8220_v5 = vadd.f32 %v8219_v23, %v8180_v45 }
 0xace   : > { %v8250_v7 = vadd.f32 %v8249_v50, %v8220_v5  ;;  %v290_v50 = vld [vmem:[%s15570_s3 + $0x30] sm:$0xff]  ;;  %v293_v5 = vld [vmem:[%s15570_s3 + $0x48] sm:$0xff] }
 0xad0   : > { %v8280_v28 = vadd.f32 %v8279_v52, %v8250_v7  ;;  %v285_v52 = vld [vmem:[%s15570_s3 + $0x8] sm:$0xff]  ;;  %v16835_v7 = vld [vmem:[#allocation209_spill] sm:$0xff] }
 0xad3   : > { %v8223_v55 = vpop.f32.mrf.mxu3  ;;  %v8312_v17 = vpop.f32.mrf.mxu2 }
 0xad4   : > { %v8224_v8 = vadd.f32 %v8223_v55, %v8188_v10  ;;  %v8313_v34 = vadd.f32 %v8312_v17, %v8280_v28  ;;  %v284_v10 = vld [vmem:[%s15570_s3] sm:$0xff]  ;;  %v287_v28 = vld [vmem:[%s15570_s3 + $0x18] sm:$0xff]  ;;  %v289_v17 = vld [vmem:[%s15570_s3 + $0x28] sm:$0xff] }
 0xad6   : > { %v8255_v9 = vadd.f32 %v8254_v61, %v8224_v8  ;;  %v294_v61 = vld [vmem:[%s15570_s3 + $0x50] sm:$0xff]  ;;  %v295_v8 = vld [vmem:[%s15570_s3 + $0x58] sm:$0xff] }
 0xad8   : > { %v8286_v15 = vadd.f32 %v8285_v46, %v8255_v9  ;;  %v286_v46 = vld [vmem:[%s15570_s3 + $0x10] sm:$0xff]  ;;  %v16834_v9 = vld [vmem:[#allocation210_spill] sm:$0xff] }
 0xad9   : > { %v2339_v55 = vadd.f32 %v16835_v7, %v16834_v9  ;;  %v7490_v9 = vadd.f32 %v13578_v36, %v13580_v29  ;;  %v16844_v7 = vld [vmem:[#allocation232_spill] sm:$0xff]  ;;  %v16849_v36 = vld [vmem:[#allocation213_spill] sm:$0xff] }
 0xadb   : > { %v8339_v25 = vpop.f32.mrf.mxu3  ;;  %v8316_v21 = vpop.f32.mrf.mxu2 }
 0xadc   : > { %v13790_v35 = vadd.f32 %v8339_v25, %v8313_v34  ;;  %v8317_v2 = vadd.f32 %v8316_v21, %v8286_v15  ;;  %v288_v21 = vld [vmem:[%s15570_s3 + $0x20] sm:$0xff] }
 0xadd   : > { %v292_v25 = vld [vmem:[%s15570_s3 + $0x40] sm:$0xff] }
 0xade   : > { %8348 = vrot.lane.b32.xlu1 %v13790_v35, %s10843_s29  ;;  %v16836_v34 = vld [vmem:[#allocation61_spill] sm:$0xff] }
 0xadf   : > { %v16837_v15 = vld [vmem:[#allocation57_spill] sm:$0xff] }
 0xae3   : > { %v8343_v45 = vpop.f32.mrf.mxu3 }
 0xae4   : > { %v8344_v23 = vadd.f32 %v8343_v45, %v8317_v2  ;;  %v291_v2 = vld [vmem:[%s15570_s3 + $0x38] sm:$0xff]  ;;  %v4945_v45 = vadd.f32 %v16837_v15, %v16836_v34 }
 0xae5   : > { %v16845_v15 = vld [vmem:[#allocation304_spill] sm:$0xff] }
 0xae6   : > { %9359 = vrot.lane.b32.xlu2 %v8344_v23, %s10842_s28  ;;  %8350 = vrot.lane.b32.xlu0 %v8344_v23, %s10843_s29 }
 0xae7   : > { %9878 = vrot.lane.b32.xlu1 %v8344_v23, %s10841_s27 }
 0xaee   : > { %9876 = vrot.lane.b32.xlu2 %v13790_v35, %s10841_s27  ;;  %9357 = vrot.lane.b32.xlu0 %v13790_v35, %s10842_s28 }
 0xaef   : > { %2706 = vperm.xlu1 %10815, %v285_v52  }
 0xaf6   : > { %2711 = vperm.xlu2 %10816, %v286_v46   ;;  %2701 = vperm.xlu0 %10814, %v284_v10   ;;  %v16838_v46 = vld [vmem:[#allocation234_spill] sm:$0xff] }
 0xaf7   : > { %2716 = vperm.xlu1 %10815, %v287_v28   ;;  %v2411_v10 = vadd.f32 %v16838_v46, %v2339_v55  ;;  %v16839_v28 = vld [vmem:[#allocation302_spill] sm:$0xff]  ;;  %v7562_v55 = vadd.f32 %v13712_v14, %v7490_v9 }
 0xaf9   : > { %v7644_v46 = vadd.f32 %v13722_v20, %v7562_v55  ;;  %v13873_v20 = vand.u32 4294901760, %v13790_v35 }
 0xafe   : > { %2721 = vperm.xlu2 %10816, %v288_v21   ;;  %2726 = vperm.xlu0 %10814, %v289_v17   ;;  %v5017_v21 = vadd.f32 %v16839_v28, %v4945_v45  ;;  %v16840_v17 = vld [vmem:[#allocation239_spill] sm:$0xff]  ;;  %v8855_v45 = vsel %vm548_vm2, %v8344_v23, 0 }
 0xaff   : > { %2731 = vperm.xlu1 %10815, %v290_v50   ;;  %v2493_v50 = vadd.f32 %v16840_v17, %v2411_v10  ;;  %v16846_v10 = vld [vmem:[#allocation214_spill] sm:$0xff] }
 0xb06   : > { %2736 = vperm.xlu2 %10816, %v291_v2   ;;  %2741 = vperm.xlu0 %10814, %v292_v25   ;;  %v16841_v2 = vld [vmem:[#allocation306_spill] sm:$0xff] }
 0xb07   : > { %2746 = vperm.xlu1 %10815, %v293_v5   ;;  %v5099_v25 = vadd.f32 %v16841_v2, %v5017_v21  ;;  %v16842_v5 = vld [vmem:[#allocation231_spill] sm:$0xff]  ;;  %v16847_v21 = vld [vmem:[#allocation273_spill] sm:$0xff] }
 0xb08   : > { %v2582_v51 = vadd.f32 %v16842_v5, %v2493_v50  ;;  %v13861_v50 = vand.u32 4294901760, %v8855_v45  ;;  %v16850_v2 = vld [vmem:[#allocation241_spill] sm:$0xff]  ;;  %v7733_v5 = vadd.f32 %v13710_v27, %v7644_v46  ;;  %v13894_v27 = vsub.f32 %v13790_v35, %v13873_v20 }
 0xb0a   : > { %v2649_v34 = vadd.f32 %v16844_v7, %v2582_v51  ;;  %v16848_v51 = vld [vmem:[#allocation215_spill] sm:$0xff] }
 0xb0b   : > { %v2347_v29 = vadd.f32 %v16849_v36, %v16848_v51  ;;  %v16852_v51 = vld [vmem:[#allocation240_spill] sm:$0xff] }
 0xb0c   : > { %v2689_v28 = vadd.f32 %v2649_v34, %v16846_v10  ;;  %v16851_v34 = vld [vmem:[#allocation246_spill] sm:$0xff] }
 0xb0e   : > { %2751 = vperm.xlu2 %10816, %v294_v61   ;;  %2756 = vperm.xlu0 %10814, %v295_v8   ;;  %v16843_v61 = vld [vmem:[#allocation307_spill] sm:$0xff] }
 0xb0f   : > { %v5188_v8 = vadd.f32 %v16843_v61, %v5099_v25  ;;  %v2421_v25 = vadd.f32 %v16850_v2, %v2347_v29  ;;  %v13882_v61 = vsub.f32 %v8855_v45, %v13861_v50  ;;  %v7800_v45 = vadd.f32 %v13708_v37, %v7733_v5  ;;  %v16853_v2 = vld [vmem:[#allocation278_spill] sm:$0xff]  ;;  %v16854_v37 = vld [vmem:[#allocation277_spill] sm:$0xff] }
 0xb11   : > { %v5255_v0 = vadd.f32 %v16845_v15, %v5188_v8  ;;  %v2505_v15 = vadd.f32 %v16851_v34, %v2421_v25  ;;  %v4953_v25 = vadd.f32 %v16854_v37, %v16853_v2 }
 0xb13   : > { %v5295_v17 = vadd.f32 %v5255_v0, %v16847_v21  ;;  %v2590_v36 = vadd.f32 %v16852_v51, %v2505_v15 }
 0xb40   : > { %v13841_v52 = vpop.permute.xlu2 %9359 }
 0xb48   : > { %v13849_v48 = vpop.permute.xlu2 %9876 }
 0xb50   : > { %v13870_v14 = vpop.permute.xlu2 %2711  ;;  %v8349_v21 = vpop.permute.xlu1 %8348 }
 0xb51   : > { %v2761_v0 = vadd.f32 %v13870_v14, %v2689_v28  ;;  %v13877_v23 = vadd.f32 %v5295_v17, %v13870_v14  ;;  %v16043_v17 = vand.u32 4294901760, %v13882_v61  ;;  %v13917_v34 = vand.u32 4294901760, %v8349_v21 }
 0xb53   : > { %v2797_v8 = vrot.slane %v2761_v0, 1  ;;  %v2798_v9 = vrot.slane %v2761_v0, 2  ;;  %v2799_v7 = vrot.slane %v2761_v0, 3  ;;  %2968 = vst.msk [vmem:[%s13866_s14 + $0x40] sm:$0x1] %vm2951_vm3, %v2761_v0  ;;  %v2800_v55 = vrot.slane %v2761_v0, 4 }
 0xb54   : > { %5513 = vst.msk [vmem:[%s13866_s14 + $0x41] sm:$0x1] %vm2951_vm3, %v13877_v23  ;;  %v2801_v10 = vrot.slane %v2761_v0, 5  ;;  %v2802_v46 = vrot.slane %v2761_v0, 6  ;;  %v2803_v28 = vrot.slane %v2761_v0, 7  ;;  %v5343_v35 = vrot.slane %v13877_v23, 1 }
 0xb55   : > { %2969 = vst.msk [vmem:[%s13866_s14 + $0x44] sm:$0x1] %vm2951_vm3, %v2797_v8  ;;  %v5344_v0 = vrot.slane %v13877_v23, 2  ;;  %v8994_v8 = vand.u32 4294901760, %v13894_v27  ;;  %v5348_v37 = vrot.slane %v13877_v23, 6 }
 0xb56   : > { %2970 = vst.msk [vmem:[%s13866_s14 + $0x48] sm:$0x1] %vm2951_vm3, %v2798_v9  ;;  %v7840_v9 = vadd.f32 %v7800_v45, %v13600_v44  ;;  %v8989_v44 = vsub.f32 %v13882_v61, %v16043_v17  ;;  %v5347_v45 = vrot.slane %v13877_v23, 5 }
 0xb57   : > { %2971 = vst.msk [vmem:[%s13866_s14 + $0x4c] sm:$0x1] %vm2951_vm3, %v2799_v7  ;;  %v5345_v7 = vrot.slane %v13877_v23, 3 }
 0xb58   : > { %2972 = vst.msk [vmem:[%s13866_s14 + $0x50] sm:$0x1] %vm2951_vm3, %v2800_v55  ;;  %v8351_v29 = vpop.permute.xlu0 %8350  ;;  %v16855_v55 = vld [vmem:[#allocation309_spill] sm:$0xff] }
 0xb59   : > { %2973 = vst.msk [vmem:[%s13866_s14 + $0x54] sm:$0x1] %vm2951_vm3, %v2801_v10  ;;  %v8353_v5 = vsel %vm548_vm2, %v8351_v29, 0  ;;  %v5027_v51 = vadd.f32 %v16855_v55, %v4953_v25  ;;  %v5346_v10 = vrot.slane %v13877_v23, 4  ;;  %v16857_v25 = vld [vmem:[#allocation314_spill] sm:$0xff]  ;;  %v5349_v55 = vrot.slane %v13877_v23, 7 }
 0xb5a   : > { %2974 = vst.msk [vmem:[%s13866_s14 + $0x58] sm:$0x1] %vm2951_vm3, %v2802_v46  ;;  %v13919_v15 = vand.u32 4294901760, %v8353_v5  ;;  %v13932_v46 = vadd.f32 %v7840_v9, %v13870_v14 }
 0xb5b   : > { %2975 = vst.msk [vmem:[%s13866_s14 + $0x5c] sm:$0x1] %vm2951_vm3, %v2803_v28  ;;  %v16856_v28 = vld [vmem:[#allocation243_spill] sm:$0xff]  ;;  %v5111_v9 = vadd.f32 %v16857_v25, %v5027_v51  ;;  %v16859_v51 = vld [vmem:[#allocation12_spill] sm:$0xff]  ;;  %v13965_v25 = vpop.permute.xlu2 %2721 }
 0xb5c   : > { %5514 = vst.msk [vmem:[%s13866_s14 + $0x45] sm:$0x1] %vm2951_vm3, %v5343_v35  ;;  %v8485_v29 = vsub.f32 %v8353_v5, %v13919_v15  ;;  %8370 = vmatpush.msra.mxu0 %v13919_v15  ;;  %8641 = vmatpush.msra.mxu3 %v13919_v15  ;;  %v2657_v2 = vadd.f32 %v16856_v28, %v2590_v36  ;;  %v16858_v36 = vld [vmem:[#allocation15_spill] sm:$0xff]  ;;  %v7888_v23 = vrot.slane %v13932_v46, 1 }
 0xb5d   : > { %5515 = vst.msk [vmem:[%s13866_s14 + $0x49] sm:$0x1] %vm2951_vm3, %v5344_v0  ;;  %v8995_v35 = vsub.f32 %v13894_v27, %v8994_v8  ;;  %v13949_v5 = vsub.f32 %v8349_v21, %v13917_v34  ;;  %v8990_v0 = vand.u32 4294901760, %v8989_v44  ;;  %v16860_v21 = vld [vmem:[#allocation154_spill] sm:$0xff] }
 0xb5e   : > { %5516 = vst.msk [vmem:[%s13866_s14 + $0x4d] sm:$0x1] %vm2951_vm3, %v5345_v7  ;;  %v8486_v17 = vand.u32 4294901760, %v8485_v29  ;;  %8372 = vmatpush.msra.mxu0 %v13917_v34  ;;  %8561 = vmatpush.msra.mxu2 %v8485_v29  ;;  %v2691_v28 = vadd.f32 %v2657_v2, %v16860_v21  ;;  %v7890_v2 = vrot.slane %v13932_v46, 3  ;;  %v7891_v21 = vrot.slane %v13932_v46, 4 }
 0xb5f   : > { %5517 = vst.msk [vmem:[%s13866_s14 + $0x51] sm:$0x1] %vm2951_vm3, %v5346_v10  ;;  %8643 = vmatpush.msra.mxu3 %v13917_v34  ;;  %8378 = vmatmul.f32.vlgmr.msra.gmra.mxu0 %v16858_v36  ;;  %v7889_v10 = vrot.slane %v13932_v46, 2  ;;  %v8996_v44 = vand.u32 4294901760, %v8995_v35  ;;  %v7893_v35 = vrot.slane %v13932_v46, 6 }
 0xb60   : > { %5518 = vst.msk [vmem:[%s13866_s14 + $0x55] sm:$0x1] %vm2951_vm3, %v5347_v45  ;;  %v8487_v7 = vsub.f32 %v8485_v29, %v8486_v17  ;;  %8647 = vmatmul.f32.vlgmr.msra.gmra.mxu3 %v16859_v51  ;;  %8564 = vmatpush.msra.mxu2 %v13949_v5  ;;  %v16861_v45 = vld [vmem:[#allocation315_spill] sm:$0xff]  ;;  %v7498_v29 = vadd.f32 %v13602_v63, %v13604_v60  ;;  %v7892_v60 = vrot.slane %v13932_v46, 5 }
 0xb61   : > { %5519 = vst.msk [vmem:[%s13866_s14 + $0x59] sm:$0x1] %vm2951_vm3, %v5348_v37  ;;  %8991 = vmatpush.msrb.mxu3 %v8990_v0  ;;  %8734 = vmatpush.msrb.mxu0 %v8486_v17  ;;  %v5196_v36 = vadd.f32 %v16861_v45, %v5111_v9  ;;  %v16862_v37 = vld [vmem:[#allocation11_spill] sm:$0xff]  ;;  %v2763_v17 = vadd.f32 %v13965_v25, %v2691_v28  ;;  %v16863_v9 = vld [vmem:[#allocation312_spill] sm:$0xff]  ;;  %v7894_v0 = vrot.slane %v13932_v46, 7 }
 0xb62   : > { %5520 = vst.msk [vmem:[%s13866_s14 + $0x5d] sm:$0x1] %vm2951_vm3, %v5349_v55  ;;  %v8488_v51 = vand.u32 4294901760, %v8487_v7  ;;  %8567 = vmatmul.f32.vlgmr.msra.gmra.mxu2 %v16862_v37  ;;  %v7572_v63 = vadd.f32 %v13728_v53, %v7498_v29  ;;  %v16865_v7 = vld [vmem:[#allocation19_spill] sm:$0xff]  ;;  %v16870_v37 = vld [vmem:[#allocation14_spill] sm:$0xff] }
 0xb63   : > { %8058 = vst.msk [vmem:[%s13866_s14 + $0x42] sm:$0x1] %vm2951_vm3, %v13932_v46  ;;  %8872 = vmatpush.msrb.mxu2 %v13861_v50  ;;  %8997 = vmatpush.msrb.mxu3 %v8996_v44  ;;  %v5263_v55 = vadd.f32 %v16863_v9, %v5196_v36  ;;  %v2811_v28 = vrot.slane %v2763_v17, 1  ;;  %v2812_v46 = vrot.slane %v2763_v17, 2  ;;  %v16868_v44 = vld [vmem:[#allocation221_spill] sm:$0xff]  ;;  %v16869_v36 = vld [vmem:[#allocation279_spill] sm:$0xff] }
 0xb64   : > { %8059 = vst.msk [vmem:[%s13866_s14 + $0x46] sm:$0x1] %vm2951_vm3, %v7888_v23  ;;  %8489 = vmatpush.msra.mxu1 %v8488_v51  ;;  %v7656_v53 = vadd.f32 %v13736_v42, %v7572_v63  ;;  %v16864_v23 = vand.u32 4294901760, %v13882_v61  ;;  %v16866_v42 = vld [vmem:[#allocation16_spill] sm:$0xff]  ;;  %v2813_v51 = vrot.slane %v2763_v17, 3  ;;  %v2816_v9 = vrot.slane %v2763_v17, 6 }
 0xb65   : > { %9305 = vmatpush.msra.mxu3 %v13861_v50  ;;  %8060 = vst.msk [vmem:[%s13866_s14 + $0x4a] sm:$0x1] %vm2951_vm3, %v7889_v10  ;;  %8874 = vmatpush.msrb.mxu2 %v13873_v20  ;;  %v16867_v10 = vld [vmem:[#allocation222_spill] sm:$0xff]  ;;  %v5297_v29 = vadd.f32 %v5263_v55, %v16869_v36 }
 0xb66   : > { %8061 = vst.msk [vmem:[%s13866_s14 + $0x4e] sm:$0x1] %vm2951_vm3, %v7890_v2  ;;  %v2359_v45 = vadd.f32 %v16868_v44, %v16867_v10  ;;  %v7741_v2 = vadd.f32 %v13724_v26, %v7656_v53  ;;  %v16872_v26 = vld [vmem:[#allocation257_spill] sm:$0xff]  ;;  %v16877_v10 = vld [vmem:[#allocation286_spill] sm:$0xff] }
 0xb67   : > { %9236 = vmatpush.msra.mxu2 %v16864_v23  ;;  %9307 = vmatpush.msra.mxu3 %v13873_v20  ;;  %8062 = vst.msk [vmem:[%s13866_s14 + $0x52] sm:$0x1] %vm2951_vm3, %v7891_v21  ;;  %v16871_v21 = vld [vmem:[#allocation252_spill] sm:$0xff]  ;;  %v16873_v23 = vld [vmem:[#allocation23_spill] sm:$0xff] }
 0xb68   : > { %8386 = vmatmul.f32.gmra.mxu0 %v16865_v7  ;;  %8063 = vst.msk [vmem:[%s13866_s14 + $0x56] sm:$0x1] %vm2951_vm3, %v7892_v60  ;;  %8653 = vmatmul.f32.gmra.mxu3 %v16866_v42  ;;  %v2436_v63 = vadd.f32 %v16871_v21, %v2359_v45  ;;  %v2815_v60 = vrot.slane %v2763_v17, 5  ;;  %v7808_v53 = vadd.f32 %v13726_v1, %v7741_v2 }
 0xb69   : > { %9240 = vmatpush.msra.mxu2 %v8994_v8  ;;  %8064 = vst.msk [vmem:[%s13866_s14 + $0x5a] sm:$0x1] %vm2951_vm3, %v7893_v35  ;;  %v2814_v8 = vrot.slane %v2763_v17, 4  ;;  %v5309_v35 = vadd.f32 %v5297_v29, %v13965_v25  ;;  %v16878_v29 = vld [vmem:[#allocation18_spill] sm:$0xff] }
 0xb6a   : > { %8065 = vst.msk [vmem:[%s13866_s14 + $0x5e] sm:$0x1] %vm2951_vm3, %v7894_v0  ;;  %8572 = vmatmul.f32.gmra.mxu2 %v16870_v37  ;;  %v2523_v55 = vadd.f32 %v16872_v26, %v2436_v63  ;;  %v2817_v0 = vrot.slane %v2763_v17, 7  ;;  %v7842_v45 = vadd.f32 %v7808_v53, %v13626_v12  ;;  %v16880_v12 = vld [vmem:[#allocation255_spill] sm:$0xff] }
 0xb6b   : > { %2984 = vst.msk [vmem:[%s13866_s14 + $0x80] sm:$0x1] %vm2951_vm3, %v2763_v17  ;;  %v5357_v7 = vrot.slane %v5309_v35, 1  ;;  %v5358_v42 = vrot.slane %v5309_v35, 2  ;;  %v16876_v17 = vld [vmem:[#allocation287_spill] sm:$0xff]  ;;  %v5359_v36 = vrot.slane %v5309_v35, 3 }
 0xb6c   : > { %2985 = vst.msk [vmem:[%s13866_s14 + $0x84] sm:$0x1] %vm2951_vm3, %v2811_v28  ;;  %v16874_v28 = vld [vmem:[#allocation20_spill] sm:$0xff]  ;;  %v4965_v44 = vadd.f32 %v16877_v10, %v16876_v17  ;;  %v5360_v2 = vrot.slane %v5309_v35, 4  ;;  %v7854_v21 = vadd.f32 %v7842_v45, %v13965_v25  ;;  %v5362_v63 = vrot.slane %v5309_v35, 6  ;;  %v16882_v53 = vld [vmem:[#allocation27_spill] sm:$0xff] }
 0xb6d   : > { %2986 = vst.msk [vmem:[%s13866_s14 + $0x88] sm:$0x1] %vm2951_vm3, %v2812_v46  ;;  %v16875_v46 = vld [vmem:[#allocation254_spill] sm:$0xff]  ;;  %v7510_v17 = vadd.f32 %v13642_v18, %v13644_v57  ;;  %v16887_v57 = vld [vmem:[#allocation324_spill] sm:$0xff] }
 0xb6e   : > { %2987 = vst.msk [vmem:[%s13866_s14 + $0x8c] sm:$0x1] %vm2951_vm3, %v2813_v51  ;;  %v2602_v1 = vadd.f32 %v16875_v46, %v2523_v55  ;;  %v16879_v51 = vld [vmem:[#allocation321_spill] sm:$0xff]  ;;  %v5363_v55 = vrot.slane %v5309_v35, 7  ;;  %v16885_v46 = vld [vmem:[#allocation327_spill] sm:$0xff]  ;;  %v7904_v10 = vrot.slane %v7854_v21, 3 }
 0xb6f   : > { %2988 = vst.msk [vmem:[%s13866_s14 + $0x90] sm:$0x1] %vm2951_vm3, %v2814_v8  ;;  %v5042_v37 = vadd.f32 %v16879_v51, %v4965_v44  ;;  %v5361_v8 = vrot.slane %v5309_v35, 5  ;;  %v16886_v44 = vld [vmem:[#allocation22_spill] sm:$0xff]  ;;  %v7905_v45 = vrot.slane %v7854_v21, 4  ;;  %v7907_v18 = vrot.slane %v7854_v21, 6 }
 0xb70   : > { %8394 = vmatmul.f32.gmra.mxu0 %v16873_v23  ;;  %2989 = vst.msk [vmem:[%s13866_s14 + $0x94] sm:$0x1] %vm2951_vm3, %v2815_v60  ;;  %8659 = vmatmul.f32.gmra.mxu3 %v16874_v28  ;;  %v2669_v60 = vadd.f32 %v16880_v12, %v2602_v1  ;;  %v16883_v23 = vld [vmem:[#allocation24_spill] sm:$0xff]  ;;  %v14061_v28 = vpop.permute.xlu2 %2736 }
 0xb71   : > { %2990 = vst.msk [vmem:[%s13866_s14 + $0x98] sm:$0x1] %vm2951_vm3, %v2816_v9  ;;  %v16881_v9 = vld [vmem:[#allocation326_spill] sm:$0xff]  ;;  %v16889_v12 = vld [vmem:[#allocation28_spill] sm:$0xff] }
 0xb72   : > { %2991 = vst.msk [vmem:[%s13866_s14 + $0x9c] sm:$0x1] %vm2951_vm3, %v2817_v0  ;;  %8577 = vmatmul.f32.gmra.mxu2 %v16878_v29  ;;  %v5129_v26 = vadd.f32 %v16881_v9, %v5042_v37  ;;  %v7902_v0 = vrot.slane %v7854_v21, 1  ;;  %v7906_v29 = vrot.slane %v7854_v21, 5  ;;  %v16890_v9 = vld [vmem:[#allocation288_spill] sm:$0xff] }
 0xb73   : > { %5529 = vst.msk [vmem:[%s13866_s14 + $0x81] sm:$0x1] %vm2951_vm3, %v5309_v35  ;;  %v16884_v35 = vld [vmem:[#allocation168_spill] sm:$0xff] }
 0xb74   : > { %5530 = vst.msk [vmem:[%s13866_s14 + $0x85] sm:$0x1] %vm2951_vm3, %v5357_v7  ;;  %v7903_v7 = vrot.slane %v7854_v21, 2  ;;  %v5208_v1 = vadd.f32 %v16885_v46, %v5129_v26 }
 0xb75   : > { %5531 = vst.msk [vmem:[%s13866_s14 + $0x89] sm:$0x1] %vm2951_vm3, %v5358_v42  ;;  %v2694_v42 = vadd.f32 %v2669_v60, %v16884_v35 }
 0xb76   : > { %5532 = vst.msk [vmem:[%s13866_s14 + $0x8d] sm:$0x1] %vm2951_vm3, %v5359_v36  ;;  %v7587_v36 = vadd.f32 %v13748_v47, %v7510_v17  ;;  %v5275_v51 = vadd.f32 %v16887_v57, %v5208_v1  ;;  %v16888_v47 = vld [vmem:[#allocation31_spill] sm:$0xff]  ;;  %v14108_v17 = vpop.permute.xlu1 %9878 }
 0xb77   : > { %5533 = vst.msk [vmem:[%s13866_s14 + $0x91] sm:$0x1] %vm2951_vm3, %v5360_v2  ;;  %v2766_v2 = vadd.f32 %v14061_v28, %v2694_v42 }
 0xb78   : > { %8402 = vmatmul.f32.gmra.mxu0 %v16882_v53  ;;  %5534 = vst.msk [vmem:[%s13866_s14 + $0x95] sm:$0x1] %vm2951_vm3, %v5361_v8  ;;  %8665 = vmatmul.f32.gmra.mxu3 %v16883_v23  ;;  %v7674_v37 = vadd.f32 %v13758_v58, %v7587_v36  ;;  %v7908_v8 = vrot.slane %v7854_v21, 7  ;;  %v5300_v58 = vadd.f32 %v5275_v51, %v16890_v9  ;;  %v16891_v53 = vld [vmem:[#allocation26_spill] sm:$0xff]  ;;  %v16896_v51 = vld [vmem:[#allocation39_spill] sm:$0xff] }
 0xb79   : > { %5535 = vst.msk [vmem:[%s13866_s14 + $0x99] sm:$0x1] %vm2951_vm3, %v5362_v63  ;;  %v2832_v63 = vrot.slane %v2766_v2, 1  ;;  %v2833_v60 = vrot.slane %v2766_v2, 2  ;;  %v2834_v26 = vrot.slane %v2766_v2, 3  ;;  %v2836_v23 = vrot.slane %v2766_v2, 5 }
 0xb7a   : > { %5536 = vst.msk [vmem:[%s13866_s14 + $0x9d] sm:$0x1] %vm2951_vm3, %v5363_v55  ;;  %8582 = vmatmul.f32.gmra.mxu2 %v16886_v44  ;;  %v8492_v55 = vand.u32 4294901760, %v13949_v5  ;;  %v2837_v35 = vrot.slane %v2766_v2, 6  ;;  %v2838_v46 = vrot.slane %v2766_v2, 7  ;;  %v16894_v44 = vld [vmem:[#allocation32_spill] sm:$0xff] }
 0xb7b   : > { %8074 = vst.msk [vmem:[%s13866_s14 + $0x82] sm:$0x1] %vm2951_vm3, %v7854_v21  ;;  %v7753_v21 = vadd.f32 %v13752_v19, %v7674_v37  ;;  %v16895_v36 = vld [vmem:[#allocation30_spill] sm:$0xff] }
 0xb7c   : > { %8075 = vst.msk [vmem:[%s13866_s14 + $0x86] sm:$0x1] %vm2951_vm3, %v7902_v0  ;;  %v2835_v0 = vrot.slane %v2766_v2, 4  ;;  %8738 = vmatpush.msrb.mxu0 %v8492_v55  ;;  %v8493_v19 = vsub.f32 %v13949_v5, %v8492_v55  ;;  %v16901_v55 = vld [vmem:[#allocation43_spill] sm:$0xff] }
 0xb7d   : > { %8076 = vst.msk [vmem:[%s13866_s14 + $0x8a] sm:$0x1] %vm2951_vm3, %v7903_v7  ;;  %v5312_v7 = vadd.f32 %v5300_v58, %v14061_v28  ;;  %v7820_v42 = vadd.f32 %v13754_v33, %v7753_v21  ;;  %v16900_v58 = vld [vmem:[#allocation237_spill] sm:$0xff] }
 0xb7e   : > { %8077 = vst.msk [vmem:[%s13866_s14 + $0x8e] sm:$0x1] %vm2951_vm3, %v7904_v10  ;;  %9063 = vmatpush.msra.mxu0 %v13882_v61  ;;  %v8494_v1 = vand.u32 4294901760, %v8493_v19  ;;  %v16892_v61 = vld [vmem:[#allocation35_spill] sm:$0xff]  ;;  %v16893_v10 = vld [vmem:[#allocation10_spill] sm:$0xff]  ;;  %v14144_v37 = vpop.permute.xlu1 %2706 }
 0xb7f   : > { %8078 = vst.msk [vmem:[%s13866_s14 + $0x92] sm:$0x1] %vm2951_vm3, %v7905_v45  ;;  %v5378_v5 = vrot.slane %v5312_v7, 1  ;;  %v5379_v33 = vrot.slane %v5312_v7, 2  ;;  %v7845_v45 = vadd.f32 %v7820_v42, %v13661_v11  ;;  %v5383_v11 = vrot.slane %v5312_v7, 6 }
 0xb80   : > { %8410 = vmatmul.f32.gmra.mxu0 %v16888_v47  ;;  %8079 = vst.msk [vmem:[%s13866_s14 + $0x96] sm:$0x1] %vm2951_vm3, %v7906_v29  ;;  %8671 = vmatmul.f32.gmra.mxu3 %v16889_v12  ;;  %v5381_v29 = vrot.slane %v5312_v7, 4  ;;  %v2760_v21 = vadd.f32 %v14144_v37, %v16900_v58  ;;  %v16917_v58 = vld [vmem:[#allocation332_spill] sm:$0xff] }
 0xb81   : > { %8080 = vst.msk [vmem:[%s13866_s14 + $0x9a] sm:$0x1] %vm2951_vm3, %v7907_v18  ;;  %9066 = vmatpush.msra.mxu0 %v13894_v27  ;;  %8495 = vmatpush.msra.mxu1 %v8494_v1  ;;  %v5380_v27 = vrot.slane %v5312_v7, 3  ;;  %v7857_v18 = vadd.f32 %v7845_v45, %v14061_v28 }
 0xb82   : > { %8081 = vst.msk [vmem:[%s13866_s14 + $0x9e] sm:$0x1] %vm2951_vm3, %v7908_v8  ;;  %8587 = vmatmul.f32.gmra.mxu2 %v16891_v53  ;;  %8497 = vmatmul.f32.vlgmr.msra.gmra.mxu1 %v16893_v10  ;;  %v16898_v8 = vld [vmem:[#allocation36_spill] sm:$0xff]  ;;  %v2791_v53 = vrot.slane %v2760_v21, 2  ;;  %v2792_v42 = vrot.slane %v2760_v21, 3  ;;  %v2793_v1 = vrot.slane %v2760_v21, 4 }
 0xb83   : > { %3008 = vst.msk [vmem:[%s13866_s14 + $0xe0] sm:$0x1] %vm2951_vm3, %v2766_v2  ;;  %8803 = vmatpush.msrb.mxu1 %v13919_v15  ;;  %v5382_v2 = vrot.slane %v5312_v7, 5  ;;  %v5384_v15 = vrot.slane %v5312_v7, 7  ;;  %v7923_v57 = vrot.slane %v7857_v18, 1  ;;  %v7925_v47 = vrot.slane %v7857_v18, 3 }
 0xb84   : > { %3009 = vst.msk [vmem:[%s13866_s14 + $0xe4] sm:$0x1] %vm2951_vm3, %v2832_v63  ;;  %v16899_v63 = vld [vmem:[#allocation34_spill] sm:$0xff]  ;;  %v7926_v12 = vrot.slane %v7857_v18, 4  ;;  %v7927_v9 = vrot.slane %v7857_v18, 5 }
 0xb85   : > { %3010 = vst.msk [vmem:[%s13866_s14 + $0xe8] sm:$0x1] %vm2951_vm3, %v2833_v60  ;;  %8805 = vmatpush.msrb.mxu1 %v13917_v34  ;;  %v7924_v34 = vrot.slane %v7857_v18, 2 }
 0xb86   : > { %3011 = vst.msk [vmem:[%s13866_s14 + $0xec] sm:$0x1] %vm2951_vm3, %v2834_v26  ;;  %v7929_v26 = vrot.slane %v7857_v18, 7 }
 0xb87   : > { %3012 = vst.msk [vmem:[%s13866_s14 + $0xf0] sm:$0x1] %vm2951_vm3, %v2835_v0  ;;  %9143 = vmatpush.msra.mxu1 %v13861_v50  ;;  %v16897_v50 = vld [vmem:[#allocation13_spill] sm:$0xff] }
 0xb88   : > { %3013 = vst.msk [vmem:[%s13866_s14 + $0xf4] sm:$0x1] %vm2951_vm3, %v2836_v23  ;;  %8418 = vmatmul.f32.gmra.mxu0 %v16892_v61  ;;  %8677 = vmatmul.f32.gmra.mxu3 %v16894_v44  ;;  %v16902_v0 = vld [vmem:[#allocation17_spill] sm:$0xff]  ;;  %v16903_v23 = vld [vmem:[#allocation40_spill] sm:$0xff]  ;;  %v16908_v44 = vld [vmem:[#allocation303_spill] sm:$0xff] }
 0xb89   : > { %3014 = vst.msk [vmem:[%s13866_s14 + $0xf8] sm:$0x1] %vm2951_vm3, %v2837_v35  ;;  %9145 = vmatpush.msra.mxu1 %v13873_v20  ;;  %v7486_v20 = vadd.f32 %v13564_v22, %v13566_v32  ;;  %v7928_v22 = vrot.slane %v7857_v18, 6  ;;  %v5306_v45 = vadd.f32 %v16908_v44, %v14144_v37  ;;  %v7522_v44 = vadd.f32 %v13672_v38, %v13674_v30  ;;  %v16926_v38 = vld [vmem:[#allocation339_spill] sm:$0xff] }
 0xb8a   : > { %3015 = vst.msk [vmem:[%s13866_s14 + $0xfc] sm:$0x1] %vm2951_vm3, %v2838_v46  ;;  %8592 = vmatmul.f32.gmra.mxu2 %v16895_v36  ;;  %8501 = vmatmul.f32.gmra.mxu1 %v16897_v50  ;;  %v16906_v46 = vld [vmem:[#allocation38_spill] sm:$0xff] }
 0xb8b   : > { %5553 = vst.msk [vmem:[%s13866_s14 + $0xe1] sm:$0x1] %vm2951_vm3, %v5312_v7  ;;  %v7557_v60 = vadd.f32 %v13704_v39, %v7486_v20  ;;  %v2790_v39 = vrot.slane %v2760_v21, 1  ;;  %v16905_v7 = vld [vmem:[#allocation227_spill] sm:$0xff] }
 0xb8c   : > { %5554 = vst.msk [vmem:[%s13866_s14 + $0xe5] sm:$0x1] %vm2951_vm3, %v5378_v5  ;;  %v16907_v5 = vld [vmem:[#allocation263_spill] sm:$0xff] }
 0xb8d   : > { %5555 = vst.msk [vmem:[%s13866_s14 + $0xe9] sm:$0x1] %vm2951_vm3, %v5379_v33  ;;  %v7638_v32 = vadd.f32 %v13714_v4, %v7557_v60  ;;  %v16904_v4 = vld [vmem:[#allocation228_spill] sm:$0xff]  ;;  %v2794_v33 = vrot.slane %v2760_v21, 5  ;;  %v16915_v20 = vld [vmem:[#allocation295_spill] sm:$0xff]  ;;  %v16916_v60 = vld [vmem:[#allocation42_spill] sm:$0xff] }
 0xb8e   : > { %5556 = vst.msk [vmem:[%s13866_s14 + $0xed] sm:$0x1] %vm2951_vm3, %v5380_v27  ;;  %v2371_v19 = vadd.f32 %v16905_v7, %v16904_v4  ;;  %v16909_v27 = vld [vmem:[#allocation267_spill] sm:$0xff] }
 0xb8f   : > { %5557 = vst.msk [vmem:[%s13866_s14 + $0xf1] sm:$0x1] %vm2951_vm3, %v5381_v29  ;;  %v7729_v35 = vadd.f32 %v13702_v16, %v7638_v32  ;;  %v2795_v16 = vrot.slane %v2760_v21, 6  ;;  %v16920_v7 = vld [vmem:[#allocation51_spill] sm:$0xff] }
 0xb90   : > { %5558 = vst.msk [vmem:[%s13866_s14 + $0xf5] sm:$0x1] %vm2951_vm3, %v5382_v2  ;;  %8426 = vmatmul.f32.gmra.mxu0 %v16896_v51  ;;  %8683 = vmatmul.f32.gmra.mxu3 %v16898_v8  ;;  %v2451_v61 = vadd.f32 %v16907_v5, %v2371_v19  ;;  %v2796_v2 = vrot.slane %v2760_v21, 7  ;;  %v16912_v51 = vld [vmem:[#allocation44_spill] sm:$0xff] }
 0xb91   : > { %5559 = vst.msk [vmem:[%s13866_s14 + $0xf9] sm:$0x1] %vm2951_vm3, %v5383_v11  ;;  %v7796_v29 = vadd.f32 %v13700_v40, %v7729_v35  ;;  %v16910_v11 = vld [vmem:[#allocation47_spill] sm:$0xff]  ;;  %v16913_v40 = vld [vmem:[#allocation268_spill] sm:$0xff]  ;;  %v14228_v35 = vpop.permute.xlu2 %2751 }
 0xb92   : > { %5560 = vst.msk [vmem:[%s13866_s14 + $0xfd] sm:$0x1] %vm2951_vm3, %v5384_v15  ;;  %8597 = vmatmul.f32.gmra.mxu2 %v16899_v63  ;;  %8505 = vmatmul.f32.gmra.mxu1 %v16902_v0  ;;  %v2541_v36 = vadd.f32 %v16909_v27, %v2451_v61  ;;  %v5337_v15 = vrot.slane %v5306_v45, 2  ;;  %v16914_v8 = vld [vmem:[#allocation296_spill] sm:$0xff]  ;;  %v16924_v61 = vld [vmem:[#allocation338_spill] sm:$0xff] }
 0xb93   : > { %8098 = vst.msk [vmem:[%s13866_s14 + $0xe2] sm:$0x1] %vm2951_vm3, %v7857_v18  ;;  %v5336_v18 = vrot.slane %v5306_v45, 1  ;;  %v7839_v63 = vadd.f32 %v7796_v29, %v13588_v56  ;;  %v16918_v56 = vld [vmem:[#allocation269_spill] sm:$0xff] }
 0xb94   : > { %8099 = vst.msk [vmem:[%s13866_s14 + $0xe6] sm:$0x1] %vm2951_vm3, %v7923_v57  ;;  %v16911_v57 = vld [vmem:[#allocation21_spill] sm:$0xff] }
 0xb95   : > { %8100 = vst.msk [vmem:[%s13866_s14 + $0xea] sm:$0x1] %vm2951_vm3, %v7924_v34  ;;  %v2614_v34 = vadd.f32 %v16913_v40, %v2541_v36  ;;  %v7851_v32 = vadd.f32 %v7839_v63, %v14144_v37  ;;  %v7602_v36 = vadd.f32 %v13770_v62, %v7522_v44  ;;  %v7482_v44 = vadd.f32 %v13553_v43, %v13555_v41 }
 0xb96   : > { %8101 = vst.msk [vmem:[%s13866_s14 + $0xee] sm:$0x1] %vm2951_vm3, %v7925_v47  ;;  %v4977_v47 = vadd.f32 %v16915_v20, %v16914_v8  ;;  %v16929_v8 = vld [vmem:[#allocation52_spill] sm:$0xff] }
 0xb97   : > { %8102 = vst.msk [vmem:[%s13866_s14 + $0xf2] sm:$0x1] %vm2951_vm3, %v7926_v12  ;;  %v5338_v12 = vrot.slane %v5306_v45, 3  ;;  %v7881_v4 = vrot.slane %v7851_v32, 1  ;;  %v7882_v19 = vrot.slane %v7851_v32, 2  ;;  %v7884_v27 = vrot.slane %v7851_v32, 4 }
 0xb98   : > { %8103 = vst.msk [vmem:[%s13866_s14 + $0xf6] sm:$0x1] %vm2951_vm3, %v7927_v9  ;;  %8434 = vmatmul.f32.gmra.mxu0 %v16901_v55  ;;  %8689 = vmatmul.f32.gmra.mxu3 %v16903_v23  ;;  %v5339_v9 = vrot.slane %v5306_v45, 4  ;;  %v16919_v55 = vld [vmem:[#allocation337_spill] sm:$0xff]  ;;  %v5342_v23 = vrot.slane %v5306_v45, 7  ;;  %v7885_v29 = vrot.slane %v7851_v32, 5  ;;  %v7552_v43 = vadd.f32 %v13695_v49, %v7482_v44 }
 0xb99   : > { %8104 = vst.msk [vmem:[%s13866_s14 + $0xfa] sm:$0x1] %vm2951_vm3, %v7928_v22  ;;  %v5340_v22 = vrot.slane %v5306_v45, 5 }
 0xb9a   : > { %8105 = vst.msk [vmem:[%s13866_s14 + $0xfe] sm:$0x1] %vm2951_vm3, %v7929_v26  ;;  %8602 = vmatmul.f32.gmra.mxu2 %v16906_v46  ;;  %8509 = vmatmul.f32.gmra.mxu1 %v16911_v57  ;;  %v5341_v26 = vrot.slane %v5306_v45, 6  ;;  %v16922_v46 = vld [vmem:[#allocation48_spill] sm:$0xff] }
 0xb9b   : > { %2960 = vst.msk [vmem:[%s13866_s14 + $0x20] sm:$0x1] %vm2951_vm3, %v2760_v21  ;;  %v5057_v21 = vadd.f32 %v16917_v58, %v4977_v47 }
 0xb9c   : > { %2961 = vst.msk [vmem:[%s13866_s14 + $0x24] sm:$0x1] %vm2951_vm3, %v2790_v39  ;;  %v2681_v39 = vadd.f32 %v16918_v56, %v2614_v34  ;;  %v16928_v34 = vld [vmem:[#allocation29_spill] sm:$0xff]  ;;  %v16932_v56 = vld [vmem:[#allocation59_spill] sm:$0xff] }
 0xb9d   : > { %2962 = vst.msk [vmem:[%s13866_s14 + $0x28] sm:$0x1] %vm2951_vm3, %v2791_v53  ;;  %v5147_v53 = vadd.f32 %v16919_v55, %v5057_v21  ;;  %v16933_v55 = vld [vmem:[#allocation33_spill] sm:$0xff] }
 0xb9e   : > { %2963 = vst.msk [vmem:[%s13866_s14 + $0x2c] sm:$0x1] %vm2951_vm3, %v2792_v42  ;;  %v16921_v42 = vld [vmem:[#allocation25_spill] sm:$0xff] }
 0xb9f   : > { %2964 = vst.msk [vmem:[%s13866_s14 + $0x30] sm:$0x1] %vm2951_vm3, %v2793_v1  ;;  %v16923_v1 = vld [vmem:[#allocation183_spill] sm:$0xff] }
 0xba0   : > { %2965 = vst.msk [vmem:[%s13866_s14 + $0x34] sm:$0x1] %vm2951_vm3, %v2794_v33  ;;  %8442 = vmatmul.f32.gmra.mxu0 %v16910_v11  ;;  %8695 = vmatmul.f32.gmra.mxu3 %v16912_v51  ;;  %v2697_v5 = vadd.f32 %v2681_v39, %v16923_v1  ;;  %v5220_v33 = vadd.f32 %v16924_v61, %v5147_v53  ;;  %v16927_v51 = vld [vmem:[#allocation55_spill] sm:$0xff] }
 0xba1   : > { %2966 = vst.msk [vmem:[%s13866_s14 + $0x38] sm:$0x1] %vm2951_vm3, %v2795_v16  ;;  %v16925_v16 = vld [vmem:[#allocation46_spill] sm:$0xff]  ;;  %v7692_v11 = vadd.f32 %v13780_v24, %v7602_v36  ;;  %v16930_v24 = vld [vmem:[#allocation297_spill] sm:$0xff] }
 0xba2   : > { %2967 = vst.msk [vmem:[%s13866_s14 + $0x3c] sm:$0x1] %vm2951_vm3, %v2796_v2  ;;  %8607 = vmatmul.f32.gmra.mxu2 %v16916_v60  ;;  %8513 = vmatmul.f32.gmra.mxu1 %v16921_v42  ;;  %v2769_v2 = vadd.f32 %v14228_v35, %v2697_v5  ;;  %v5287_v30 = vadd.f32 %v16926_v38, %v5220_v33 }
 0xba3   : > { %5505 = vst.msk [vmem:[%s13866_s14 + $0x21] sm:$0x1] %vm2951_vm3, %v5306_v45  ;;  %v7883_v45 = vrot.slane %v7851_v32, 3  ;;  %v7765_v47 = vadd.f32 %v13776_v54, %v7692_v11 }
 0xba4   : > { %5506 = vst.msk [vmem:[%s13866_s14 + $0x25] sm:$0x1] %vm2951_vm3, %v5336_v18  ;;  %v7886_v18 = vrot.slane %v7851_v32, 6  ;;  %v2853_v62 = vrot.slane %v2769_v2, 1  ;;  %v2854_v40 = vrot.slane %v2769_v2, 2  ;;  %v5303_v20 = vadd.f32 %v5287_v30, %v16930_v24  ;;  %v16938_v30 = vld [vmem:[#allocation233_spill] sm:$0xff] }
 0xba5   : > { %5507 = vst.msk [vmem:[%s13866_s14 + $0x29] sm:$0x1] %vm2951_vm3, %v5337_v15  ;;  %v7887_v15 = vrot.slane %v7851_v32, 7  ;;  %v2855_v63 = vrot.slane %v2769_v2, 3  ;;  %v2856_v60 = vrot.slane %v2769_v2, 4  ;;  %v2858_v21 = vrot.slane %v2769_v2, 6 }
 0xba6   : > { %5508 = vst.msk [vmem:[%s13866_s14 + $0x2d] sm:$0x1] %vm2951_vm3, %v5338_v12  ;;  %v16931_v12 = vld [vmem:[#allocation50_spill] sm:$0xff]  ;;  %v5315_v58 = vadd.f32 %v5303_v20, %v14228_v35  ;;  %v7832_v54 = vadd.f32 %v13782_v31, %v7765_v47  ;;  %v16934_v31 = vld [vmem:[#allocation56_spill] sm:$0xff]  ;;  %v16941_v24 = vld [vmem:[#allocation211_spill] sm:$0xff] }
 0xba7   : > { %5509 = vst.msk [vmem:[%s13866_s14 + $0x31] sm:$0x1] %vm2951_vm3, %v5339_v9  ;;  %v2857_v9 = vrot.slane %v2769_v2, 5  ;;  %v16942_v47 = vld [vmem:[#allocation355_spill] sm:$0xff] }
 0xba8   : > { %5510 = vst.msk [vmem:[%s13866_s14 + $0x35] sm:$0x1] %vm2951_vm3, %v5340_v22  ;;  %8450 = vmatmul.f32.gmra.mxu0 %v16920_v7  ;;  %8701 = vmatmul.f32.gmra.mxu3 %v16922_v46  ;;  %v2859_v22 = vrot.slane %v2769_v2, 7  ;;  %v5400_v39 = vrot.slane %v5315_v58, 2  ;;  %v7848_v53 = vadd.f32 %v7832_v54, %v13688_v13  ;;  %v9362_v7 = vsel %vm548_vm2, %v13841_v52, 0 }
 0xba9   : > { %5511 = vst.msk [vmem:[%s13866_s14 + $0x39] sm:$0x1] %vm2951_vm3, %v5341_v26  ;;  %v5399_v26 = vrot.slane %v5315_v58, 1  ;;  %v5403_v46 = vrot.slane %v5315_v58, 5  ;;  %v5404_v5 = vrot.slane %v5315_v58, 6  ;;  %v14297_v13 = vand.u32 4294901760, %v9362_v7 }
 0xbaa   : > { %5512 = vst.msk [vmem:[%s13866_s14 + $0x3d] sm:$0x1] %vm2951_vm3, %v5342_v23  ;;  %8612 = vmatmul.f32.gmra.mxu2 %v16925_v16  ;;  %8517 = vmatmul.f32.gmra.mxu1 %v16928_v34  ;;  %v5401_v23 = vrot.slane %v5315_v58, 3  ;;  %v7860_v1 = vadd.f32 %v7848_v53, %v14228_v35  ;;  %v5405_v61 = vrot.slane %v5315_v58, 7 }
 0xbab   : > { %8050 = vst.msk [vmem:[%s13866_s14 + $0x22] sm:$0x1] %vm2951_vm3, %v7851_v32  ;;  %v9358_v32 = vpop.permute.xlu0 %9357  ;;  %v14317_v36 = vsub.f32 %v9362_v7, %v14297_v13 }
 0xbac   : > { %8051 = vst.msk [vmem:[%s13866_s14 + $0x26] sm:$0x1] %vm2951_vm3, %v7881_v4  ;;  %v16935_v4 = vld [vmem:[#allocation54_spill] sm:$0xff]  ;;  %v14303_v52 = vand.u32 4294901760, %v9358_v32  ;;  %v7944_v33 = vrot.slane %v7860_v1, 1  ;;  %v7947_v41 = vrot.slane %v7860_v1, 4 }
 0xbad   : > { %8052 = vst.msk [vmem:[%s13866_s14 + $0x2a] sm:$0x1] %vm2951_vm3, %v7882_v19  ;;  %v5402_v19 = vrot.slane %v5315_v58, 4  ;;  %v7948_v38 = vrot.slane %v7860_v1, 5  ;;  %v7949_v49 = vrot.slane %v7860_v1, 6 }
 0xbae   : > { %8053 = vst.msk [vmem:[%s13866_s14 + $0x2e] sm:$0x1] %vm2951_vm3, %v7883_v45  ;;  %v7945_v45 = vrot.slane %v7860_v1, 2 }
 0xbaf   : > { %8054 = vst.msk [vmem:[%s13866_s14 + $0x32] sm:$0x1] %vm2951_vm3, %v7884_v27  ;;  %v16936_v27 = vld [vmem:[#allocation37_spill] sm:$0xff] }
 0xbb0   : > { %8055 = vst.msk [vmem:[%s13866_s14 + $0x36] sm:$0x1] %vm2951_vm3, %v7885_v29  ;;  %8458 = vmatmul.f32.gmra.mxu0 %v16927_v51  ;;  %8707 = vmatmul.f32.gmra.mxu3 %v16929_v8  ;;  %v7946_v29 = vrot.slane %v7860_v1, 3  ;;  %v16939_v8 = vld [vmem:[#allocation41_spill] sm:$0xff] }
 0xbb1   : > { %8056 = vst.msk [vmem:[%s13866_s14 + $0x3a] sm:$0x1] %vm2951_vm3, %v7886_v18  ;;  %v14328_v18 = vsub.f32 %v9358_v32, %v14303_v52 }
 0xbb2   : > { %8057 = vst.msk [vmem:[%s13866_s14 + $0x3e] sm:$0x1] %vm2951_vm3, %v7887_v15  ;;  %8617 = vmatmul.f32.gmra.mxu2 %v16931_v12  ;;  %8521 = vmatmul.f32.gmra.mxu1 %v16933_v55  ;;  %v7632_v15 = vadd.f32 %v13706_v6, %v7552_v43  ;;  %v16940_v6 = vld [vmem:[#allocation212_spill] sm:$0xff] }
 0xbb3   : > { %3032 = vst.msk [vmem:[%s13866_s14 + $0x140] sm:$0x1] %vm2951_vm3, %v2769_v2  ;;  %v14312_v16 = vpop.permute.xlu0 %2701  ;;  %v16937_v2 = vld [vmem:[#allocation63_spill] sm:$0xff]  ;;  %v2343_v20 = vadd.f32 %v16941_v24, %v16940_v6 }
 0xbb4   : > { %3033 = vst.msk [vmem:[%s13866_s14 + $0x144] sm:$0x1] %vm2951_vm3, %v2853_v62  ;;  %v2759_v11 = vadd.f32 %v14312_v16, %v16938_v30  ;;  %v7950_v62 = vrot.slane %v7860_v1, 7 }
 0xbb5   : > { %3034 = vst.msk [vmem:[%s13866_s14 + $0x148] sm:$0x1] %vm2951_vm3, %v2854_v40 }
 0xbb6   : > { %3035 = vst.msk [vmem:[%s13866_s14 + $0x14c] sm:$0x1] %vm2951_vm3, %v2855_v63  ;;  %v2783_v51 = vrot.slane %v2759_v11, 1  ;;  %v2784_v40 = vrot.slane %v2759_v11, 2  ;;  %v7725_v63 = vadd.f32 %v16942_v47, %v7632_v15  ;;  %v2785_v12 = vrot.slane %v2759_v11, 3 }
 0xbb7   : > { %3036 = vst.msk [vmem:[%s13866_s14 + $0x150] sm:$0x1] %vm2951_vm3, %v2856_v60  ;;  %v2786_v60 = vrot.slane %v2759_v11, 4  ;;  %v2787_v54 = vrot.slane %v2759_v11, 5 }
 0xbb8   : > { %3037 = vst.msk [vmem:[%s13866_s14 + $0x154] sm:$0x1] %vm2951_vm3, %v2857_v9  ;;  %8466 = vmatmul.f32.gmra.mxu0 %v16932_v56  ;;  %8713 = vmatmul.f32.gmra.mxu3 %v16934_v31  ;;  %v16943_v9 = vld [vmem:[#allocation67_spill] sm:$0xff]  ;;  %v16946_v56 = vld [vmem:[#allocation242_spill] sm:$0xff] }
 0xbb9   : > { %3038 = vst.msk [vmem:[%s13866_s14 + $0x158] sm:$0x1] %vm2951_vm3, %v2858_v21  ;;  %v16947_v31 = vld [vmem:[#allocation354_spill] sm:$0xff] }
 0xbba   : > { %3039 = vst.msk [vmem:[%s13866_s14 + $0x15c] sm:$0x1] %vm2951_vm3, %v2859_v22  ;;  %8622 = vmatmul.f32.gmra.mxu2 %v16935_v4  ;;  %8525 = vmatmul.f32.gmra.mxu1 %v16936_v27  ;;  %v16945_v22 = vld [vmem:[#allocation301_spill] sm:$0xff]  ;;  %v7792_v53 = vadd.f32 %v16947_v31, %v7725_v63  ;;  %v14406_v63 = vpop.permute.xlu1 %2716  ;;  %v16964_v31 = vld [vmem:[#allocation75_spill] sm:$0xff] }
 0xbbb   : > { %5577 = vst.msk [vmem:[%s13866_s14 + $0x141] sm:$0x1] %vm2951_vm3, %v5315_v58  ;;  %v16944_v58 = vld [vmem:[#allocation238_spill] sm:$0xff]  ;;  %v5305_v32 = vadd.f32 %v16945_v22, %v14312_v16  ;;  %v16962_v22 = vld [vmem:[#allocation5_spill] sm:$0xff] }
 0xbbc   : > { %5578 = vst.msk [vmem:[%s13866_s14 + $0x145] sm:$0x1] %vm2951_vm3, %v5399_v26  ;;  %v2416_v21 = vadd.f32 %v16944_v58, %v2343_v20  ;;  %v2788_v26 = vrot.slane %v2759_v11, 6 }
 0xbbd   : > { %5579 = vst.msk [vmem:[%s13866_s14 + $0x149] sm:$0x1] %vm2951_vm3, %v5400_v39  ;;  %v5329_v4 = vrot.slane %v5305_v32, 1  ;;  %v5330_v7 = vrot.slane %v5305_v32, 2  ;;  %v5331_v43 = vrot.slane %v5305_v32, 3  ;;  %v5334_v15 = vrot.slane %v5305_v32, 6 }
 0xbbe   : > { %5580 = vst.msk [vmem:[%s13866_s14 + $0x14d] sm:$0x1] %vm2951_vm3, %v5401_v23  ;;  %v2499_v39 = vadd.f32 %v16946_v56, %v2416_v21  ;;  %v2789_v23 = vrot.slane %v2759_v11, 7  ;;  %v5335_v24 = vrot.slane %v5305_v32, 7  ;;  %v16961_v21 = vld [vmem:[#allocation311_spill] sm:$0xff] }
 0xbbf   : > { %5581 = vst.msk [vmem:[%s13866_s14 + $0x151] sm:$0x1] %vm2951_vm3, %v5402_v19  ;;  %v16948_v19 = vld [vmem:[#allocation45_spill] sm:$0xff] }
 0xbc0   : > { %5582 = vst.msk [vmem:[%s13866_s14 + $0x155] sm:$0x1] %vm2951_vm3, %v5403_v46  ;;  %8740 = vmatmul.f32.vlgmr.msrb.gmra.mxu0 %v16893_v10  ;;  %8999 = vmatmul.f32.vlgmr.msrb.gmra.mxu3 %v16401_v3  ;;  %v16949_v46 = vld [vmem:[#allocation65_spill] sm:$0xff] }
 0xbc1   : > { %5583 = vst.msk [vmem:[%s13866_s14 + $0x159] sm:$0x1] %vm2951_vm3, %v5404_v5  ;;  %9379 = vmatpush.msrb.mxu0 %v14297_v13  ;;  %9650 = vmatpush.msrb.mxu3 %v14297_v13 }
 0xbc2   : > { %5584 = vst.msk [vmem:[%s13866_s14 + $0x15d] sm:$0x1] %vm2951_vm3, %v5405_v61  ;;  %8880 = vmatmul.f32.vlgmr.msrb.gmra.mxu2 %v16937_v2  ;;  %8529 = vmatmul.f32.gmra.mxu1 %v16939_v8  ;;  %v16951_v61 = vld [vmem:[#allocation275_spill] sm:$0xff] }
 0xbc3   : > { %8122 = vst.msk [vmem:[%s13866_s14 + $0x142] sm:$0x1] %vm2951_vm3, %v7860_v1  ;;  %9381 = vmatpush.msrb.mxu0 %v14303_v52  ;;  %9570 = vmatpush.msrb.mxu2 %v14317_v36  ;;  %v16950_v1 = vld [vmem:[#allocation235_spill] sm:$0xff] }
 0xbc4   : > { %8123 = vst.msk [vmem:[%s13866_s14 + $0x146] sm:$0x1] %vm2951_vm3, %v7944_v33  ;;  %9652 = vmatpush.msrb.mxu3 %v14303_v52  ;;  %v2586_v5 = vadd.f32 %v16950_v1, %v2499_v39  ;;  %v16952_v33 = vld [vmem:[#allocation274_spill] sm:$0xff]  ;;  %v16954_v2 = vld [vmem:[#allocation71_spill] sm:$0xff] }
 0xbc5   : > { %8124 = vst.msk [vmem:[%s13866_s14 + $0x14a] sm:$0x1] %vm2951_vm3, %v7945_v45  ;;  %9573 = vmatpush.msrb.mxu2 %v14328_v18  ;;  %v4949_v44 = vadd.f32 %v16952_v33, %v16951_v61  ;;  %v16953_v45 = vld [vmem:[#allocation4_spill] sm:$0xff] }
 0xbc6   : > { %8125 = vst.msk [vmem:[%s13866_s14 + $0x14e] sm:$0x1] %vm2951_vm3, %v7946_v29  ;;  %v7838_v29 = vadd.f32 %v7792_v53, %v16953_v45  ;;  %v16965_v53 = vld [vmem:[#allocation359_spill] sm:$0xff]  ;;  %v16967_v33 = vld [vmem:[#allocation360_spill] sm:$0xff] }
 0xbc7   : > { %8126 = vst.msk [vmem:[%s13866_s14 + $0x152] sm:$0x1] %vm2951_vm3, %v7947_v41  ;;  %v5332_v41 = vrot.slane %v5305_v32, 4 }
 0xbc8   : > { %8127 = vst.msk [vmem:[%s13866_s14 + $0x156] sm:$0x1] %vm2951_vm3, %v7948_v38  ;;  %8744 = vmatmul.f32.gmra.mxu0 %v16897_v50  ;;  %9003 = vmatmul.f32.gmra.mxu3 %v16403_v59  ;;  %v16955_v38 = vld [vmem:[#allocation305_spill] sm:$0xff] }
 0xbc9   : > { %8128 = vst.msk [vmem:[%s13866_s14 + $0x15a] sm:$0x1] %vm2951_vm3, %v7949_v49  ;;  %v5022_v30 = vadd.f32 %v16955_v38, %v4949_v44  ;;  %v7850_v49 = vadd.f32 %v7838_v29, %v14312_v16  ;;  %v9495_v29 = vand.u32 4294901760, %v14317_v36  ;;  %v16969_v38 = vld [vmem:[#allocation73_spill] sm:$0xff] }
 0xbca   : > { %8129 = vst.msk [vmem:[%s13866_s14 + $0x15e] sm:$0x1] %vm2951_vm3, %v7950_v62  ;;  %8888 = vmatmul.f32.gmra.mxu2 %v16943_v9  ;;  %8533 = vmatmul.f32.gmra.mxu1 %v16948_v19  ;;  %v16956_v62 = vld [vmem:[#allocation236_spill] sm:$0xff]  ;;  %v16960_v9 = vld [vmem:[#allocation217_spill] sm:$0xff] }
 0xbcb   : > { %2952 = vst.msk [vmem:[%s13866_s14] sm:$0x1] %vm2951_vm3, %v2759_v11  ;;  %v5333_v11 = vrot.slane %v5305_v32, 5  ;;  %v7874_v20 = vrot.slane %v7850_v49, 1  ;;  %v7875_v47 = vrot.slane %v7850_v49, 2  ;;  %v7876_v56 = vrot.slane %v7850_v49, 3 }
 0xbcc   : > { %2953 = vst.msk [vmem:[%s13866_s14 + $0x4] sm:$0x1] %vm2951_vm3, %v2783_v51  ;;  %v2653_v51 = vadd.f32 %v16956_v62, %v2586_v5  ;;  %v7877_v39 = vrot.slane %v7850_v49, 4  ;;  %v7879_v1 = vrot.slane %v7850_v49, 6  ;;  %v16966_v5 = vld [vmem:[#allocation308_spill] sm:$0xff]  ;;  %v7880_v45 = vrot.slane %v7850_v49, 7 }
 0xbcd   : > { %2954 = vst.msk [vmem:[%s13866_s14 + $0x8] sm:$0x1] %vm2951_vm3, %v2784_v40  ;;  %v16957_v40 = vld [vmem:[#allocation310_spill] sm:$0xff] }
 0xbce   : > { %2955 = vst.msk [vmem:[%s13866_s14 + $0xc] sm:$0x1] %vm2951_vm3, %v2785_v12  ;;  %v5105_v6 = vadd.f32 %v16957_v40, %v5022_v30  ;;  %v16958_v12 = vld [vmem:[#allocation49_spill] sm:$0xff]  ;;  %v2690_v58 = vadd.f32 %v2653_v51, %v16960_v9  ;;  %v16970_v30 = vld [vmem:[#allocation218_spill] sm:$0xff] }
 0xbcf   : > { %2956 = vst.msk [vmem:[%s13866_s14 + $0x10] sm:$0x1] %vm2951_vm3, %v2786_v60  ;;  %v16959_v60 = vld [vmem:[#allocation69_spill] sm:$0xff] }
 0xbd0   : > { %2957 = vst.msk [vmem:[%s13866_s14 + $0x14] sm:$0x1] %vm2951_vm3, %v2787_v54  ;;  %8748 = vmatmul.f32.gmra.mxu0 %v16902_v0  ;;  %9007 = vmatmul.f32.gmra.mxu3 %v16949_v46  ;;  %v5192_v54 = vadd.f32 %v16961_v21, %v5105_v6  ;;  %v16973_v51 = vld [vmem:[#allocation357_spill] sm:$0xff] }
 0xbd1   : > { %2958 = vst.msk [vmem:[%s13866_s14 + $0x18] sm:$0x1] %vm2951_vm3, %v2788_v26 }
 0xbd2   : > { %2959 = vst.msk [vmem:[%s13866_s14 + $0x1c] sm:$0x1] %vm2951_vm3, %v2789_v23  ;;  %8896 = vmatmul.f32.gmra.mxu2 %v16954_v2  ;;  %8537 = vmatmul.f32.gmra.mxu1 %v16958_v12  ;;  %v5259_v61 = vadd.f32 %v16966_v5, %v5192_v54  ;;  %v16968_v2 = vld [vmem:[#allocation53_spill] sm:$0xff] }
 0xbd3   : > { %5497 = vst.msk [vmem:[%s13866_s14 + $0x1] sm:$0x1] %vm2951_vm3, %v5305_v32  ;;  %v16963_v32 = vld [vmem:[#allocation3_spill] sm:$0xff] }
 0xbd4   : > { %5498 = vst.msk [vmem:[%s13866_s14 + $0x5] sm:$0x1] %vm2951_vm3, %v5329_v4  ;;  %v7494_v26 = vadd.f32 %v16963_v32, %v16962_v22  ;;  %v7878_v4 = vrot.slane %v7850_v49, 5  ;;  %v16976_v32 = vld [vmem:[#allocation249_spill] sm:$0xff] }
 0xbd5   : > { %5499 = vst.msk [vmem:[%s13866_s14 + $0x9] sm:$0x1] %vm2951_vm3, %v5330_v7  ;;  %v2762_v7 = vadd.f32 %v14406_v63, %v2690_v58  ;;  %v9496_v58 = vsub.f32 %v14317_v36, %v9495_v29 }
 0xbd6   : > { %5500 = vst.msk [vmem:[%s13866_s14 + $0xd] sm:$0x1] %vm2951_vm3, %v5331_v43  ;;  %v7567_v23 = vadd.f32 %v16965_v53, %v7494_v26 }
 0xbd7   : > { %5501 = vst.msk [vmem:[%s13866_s14 + $0x11] sm:$0x1] %vm2951_vm3, %v5332_v41  ;;  %v2804_v43 = vrot.slane %v2762_v7, 1  ;;  %v2805_v41 = vrot.slane %v2762_v7, 2  ;;  %v2806_v6 = vrot.slane %v2762_v7, 3  ;;  %v2808_v21 = vrot.slane %v2762_v7, 5 }
 0xbd8   : > { %5502 = vst.msk [vmem:[%s13866_s14 + $0x15] sm:$0x1] %vm2951_vm3, %v5333_v11  ;;  %8752 = vmatmul.f32.gmra.mxu0 %v16911_v57  ;;  %9011 = vmatmul.f32.gmra.mxu3 %v16959_v60  ;;  %v7650_v44 = vadd.f32 %v16967_v33, %v7567_v23  ;;  %v16971_v11 = vld [vmem:[#allocation216_spill] sm:$0xff]  ;;  %v2809_v22 = vrot.slane %v2762_v7, 6  ;;  %v9497_v53 = vand.u32 4294901760, %v9496_v58 }
 0xbd9   : > { %5503 = vst.msk [vmem:[%s13866_s14 + $0x19] sm:$0x1] %vm2951_vm3, %v5334_v15  ;;  %v16972_v15 = vld [vmem:[#allocation276_spill] sm:$0xff] }
 0xbda   : > { %5504 = vst.msk [vmem:[%s13866_s14 + $0x1d] sm:$0x1] %vm2951_vm3, %v5335_v24  ;;  %8904 = vmatmul.f32.gmra.mxu2 %v16964_v31  ;;  %8541 = vmatmul.f32.gmra.mxu1 %v16968_v2  ;;  %v5296_v62 = vadd.f32 %v5259_v61, %v16972_v15  ;;  %v7737_v40 = vadd.f32 %v16973_v51, %v7650_v44  ;;  %v2807_v24 = vrot.slane %v2762_v7, 4  ;;  %v2810_v31 = vrot.slane %v2762_v7, 7  ;;  %v16980_v61 = vld [vmem:[#allocation281_spill] sm:$0xff]  ;;  %v16981_v33 = vld [vmem:[#allocation280_spill] sm:$0xff] }
 0xbdb   : > { %8042 = vst.msk [vmem:[%s13866_s14 + $0x2] sm:$0x1] %vm2951_vm3, %v7850_v49  ;;  %v2351_v49 = vadd.f32 %v16971_v11, %v16970_v30  ;;  %v4957_v44 = vadd.f32 %v16981_v33, %v16980_v61  ;;  %v16984_v11 = vld [vmem:[#allocation313_spill] sm:$0xff] }
 0xbdc   : > { %8043 = vst.msk [vmem:[%s13866_s14 + $0x6] sm:$0x1] %vm2951_vm3, %v7874_v20  ;;  %v16974_v20 = vld [vmem:[#allocation79_spill] sm:$0xff]  ;;  %v5308_v54 = vadd.f32 %v5296_v62, %v14406_v63 }
 0xbdd   : > { %8044 = vst.msk [vmem:[%s13866_s14 + $0xa] sm:$0x1] %vm2951_vm3, %v7875_v47  ;;  %v16975_v47 = vld [vmem:[#allocation245_spill] sm:$0xff] }
 0xbde   : > { %8045 = vst.msk [vmem:[%s13866_s14 + $0xe] sm:$0x1] %vm2951_vm3, %v7876_v56  ;;  %v2426_v9 = vadd.f32 %v16975_v47, %v2351_v49  ;;  %v16977_v56 = vld [vmem:[#allocation358_spill] sm:$0xff]  ;;  %v5350_v23 = vrot.slane %v5308_v54, 1  ;;  %v5353_v30 = vrot.slane %v5308_v54, 4  ;;  %v5032_v49 = vadd.f32 %v16984_v11, %v4957_v44 }
 0xbdf   : > { %8046 = vst.msk [vmem:[%s13866_s14 + $0x12] sm:$0x1] %vm2951_vm3, %v7877_v39  ;;  %v7804_v39 = vadd.f32 %v16977_v56, %v7737_v40  ;;  %v5354_v15 = vrot.slane %v5308_v54, 5  ;;  %v5355_v51 = vrot.slane %v5308_v54, 6  ;;  %v16985_v40 = vld [vmem:[#allocation247_spill] sm:$0xff]  ;;  %v5356_v47 = vrot.slane %v5308_v54, 7 }
 0xbe0   : > { %8047 = vst.msk [vmem:[%s13866_s14 + $0x16] sm:$0x1] %vm2951_vm3, %v7878_v4  ;;  %8756 = vmatmul.f32.gmra.mxu0 %v16921_v42  ;;  %9015 = vmatmul.f32.gmra.mxu3 %v16969_v38  ;;  %v2511_v26 = vadd.f32 %v16976_v32, %v2426_v9  ;;  %v5351_v4 = vrot.slane %v5308_v54, 2 }
 0xbe1   : > { %8048 = vst.msk [vmem:[%s13866_s14 + $0x1a] sm:$0x1] %vm2951_vm3, %v7879_v1  ;;  %v16978_v1 = vld [vmem:[#allocation77_spill] sm:$0xff] }
 0xbe2   : > { %8049 = vst.msk [vmem:[%s13866_s14 + $0x1e] sm:$0x1] %vm2951_vm3, %v7880_v45  ;;  %8912 = vmatmul.f32.gmra.mxu2 %v16974_v20  ;;  %8807 = vmatmul.f32.vlgmr.msrb.gmra.mxu1 %v16893_v10  ;;  %v16982_v45 = vld [vmem:[#allocation8_spill] sm:$0xff]  ;;  %v16983_v10 = vld [vmem:[#allocation83_spill] sm:$0xff] }
 0xbe3   : > { %2976 = vst.msk [vmem:[%s13866_s14 + $0x60] sm:$0x1] %vm2951_vm3, %v2762_v7  ;;  %v16979_v7 = vld [vmem:[#allocation244_spill] sm:$0xff]  ;;  %9498 = vmatpush.msrb.mxu1 %v9497_v53 }
 0xbe4   : > { %2977 = vst.msk [vmem:[%s13866_s14 + $0x64] sm:$0x1] %vm2951_vm3, %v2804_v43  ;;  %v2594_v5 = vadd.f32 %v16979_v7, %v2511_v26  ;;  %v7841_v43 = vadd.f32 %v7804_v39, %v16982_v45  ;;  %v16989_v26 = vld [vmem:[#allocation319_spill] sm:$0xff]  ;;  %v16990_v39 = vld [vmem:[#allocation6_spill] sm:$0xff]  ;;  %v16994_v45 = vld [vmem:[#allocation316_spill] sm:$0xff] }
 0xbe5   : > { %2978 = vst.msk [vmem:[%s13866_s14 + $0x68] sm:$0x1] %vm2951_vm3, %v2805_v41  ;;  %v5352_v41 = vrot.slane %v5308_v54, 3  ;;  %v16992_v7 = vld [vmem:[#allocation87_spill] sm:$0xff] }
 0xbe6   : > { %2979 = vst.msk [vmem:[%s13866_s14 + $0x6c] sm:$0x1] %vm2951_vm3, %v2806_v6  ;;  %v7853_v62 = vadd.f32 %v7841_v43, %v14406_v63  ;;  %v2661_v6 = vadd.f32 %v16985_v40, %v2594_v5 }
 0xbe7   : > { %2980 = vst.msk [vmem:[%s13866_s14 + $0x70] sm:$0x1] %vm2951_vm3, %v2807_v24  ;;  %v16986_v24 = vld [vmem:[#allocation318_spill] sm:$0xff] }
 0xbe8   : > { %2981 = vst.msk [vmem:[%s13866_s14 + $0x74] sm:$0x1] %vm2951_vm3, %v2808_v21  ;;  %8760 = vmatmul.f32.gmra.mxu0 %v16928_v34  ;;  %9019 = vmatmul.f32.gmra.mxu3 %v16978_v1  ;;  %v5117_v20 = vadd.f32 %v16986_v24, %v5032_v49  ;;  %v7895_v9 = vrot.slane %v7853_v62, 1  ;;  %v7896_v58 = vrot.slane %v7853_v62, 2  ;;  %v14496_v21 = vpop.permute.xlu0 %2726  ;;  %v7899_v61 = vrot.slane %v7853_v62, 5 }
 0xbe9   : > { %2982 = vst.msk [vmem:[%s13866_s14 + $0x78] sm:$0x1] %vm2951_vm3, %v2809_v22  ;;  %v16988_v22 = vld [vmem:[#allocation159_spill] sm:$0xff]  ;;  %v7900_v44 = vrot.slane %v7853_v62, 6 }
 0xbea   : > { %2983 = vst.msk [vmem:[%s13866_s14 + $0x7c] sm:$0x1] %vm2951_vm3, %v2810_v31  ;;  %8920 = vmatmul.f32.gmra.mxu2 %v16983_v10  ;;  %8811 = vmatmul.f32.gmra.mxu1 %v16897_v50  ;;  %v2692_v32 = vadd.f32 %v2661_v6, %v16988_v22  ;;  %v5200_v56 = vadd.f32 %v16989_v26, %v5117_v20  ;;  %v16991_v31 = vld [vmem:[#allocation9_spill] sm:$0xff]  ;;  %v16993_v50 = vld [vmem:[#allocation362_spill] sm:$0xff]  ;;  %v7901_v10 = vrot.slane %v7853_v62, 7  ;;  %v17001_v22 = vld [vmem:[#allocation91_spill] sm:$0xff] }
 0xbeb   : > { %5521 = vst.msk [vmem:[%s13866_s14 + $0x61] sm:$0x1] %vm2951_vm3, %v5308_v54  ;;  %v16987_v54 = vld [vmem:[#allocation81_spill] sm:$0xff]  ;;  %v7502_v53 = vadd.f32 %v16991_v31, %v16990_v39  ;;  %v16999_v6 = vld [vmem:[#allocation282_spill] sm:$0xff] }
 0xbec   : > { %5522 = vst.msk [vmem:[%s13866_s14 + $0x65] sm:$0x1] %vm2951_vm3, %v5350_v23  ;;  %v7897_v23 = vrot.slane %v7853_v62, 3  ;;  %v2764_v33 = vadd.f32 %v14496_v21, %v2692_v32  ;;  %v5267_v43 = vadd.f32 %v16994_v45, %v5200_v56  ;;  %v17000_v20 = vld [vmem:[#allocation361_spill] sm:$0xff]  ;;  %v17007_v45 = vld [vmem:[#allocation284_spill] sm:$0xff] }
 0xbed   : > { %5523 = vst.msk [vmem:[%s13866_s14 + $0x69] sm:$0x1] %vm2951_vm3, %v5351_v4  ;;  %v7898_v4 = vrot.slane %v7853_v62, 4  ;;  %v7577_v5 = vadd.f32 %v16993_v50, %v7502_v53  ;;  %v17003_v31 = vld [vmem:[#allocation253_spill] sm:$0xff] }
 0xbee   : > { %5524 = vst.msk [vmem:[%s13866_s14 + $0x6d] sm:$0x1] %vm2951_vm3, %v5352_v41  ;;  %v16995_v41 = vld [vmem:[#allocation366_spill] sm:$0xff]  ;;  %v2818_v11 = vrot.slane %v2764_v33, 1  ;;  %v2819_v49 = vrot.slane %v2764_v33, 2  ;;  %v5298_v24 = vadd.f32 %v5267_v43, %v16999_v6  ;;  %v2822_v26 = vrot.slane %v2764_v33, 5 }
 0xbef   : > { %5525 = vst.msk [vmem:[%s13866_s14 + $0x71] sm:$0x1] %vm2951_vm3, %v5353_v30  ;;  %v7662_v30 = vadd.f32 %v16995_v41, %v7577_v5  ;;  %v2823_v39 = vrot.slane %v2764_v33, 6  ;;  %v17008_v43 = vld [vmem:[#allocation283_spill] sm:$0xff] }
 0xbf0   : > { %5526 = vst.msk [vmem:[%s13866_s14 + $0x75] sm:$0x1] %vm2951_vm3, %v5354_v15  ;;  %8764 = vmatmul.f32.gmra.mxu0 %v16933_v55  ;;  %9023 = vmatmul.f32.gmra.mxu3 %v16987_v54  ;;  %v16996_v15 = vld [vmem:[#allocation85_spill] sm:$0xff]  ;;  %v5310_v56 = vadd.f32 %v5298_v24, %v14496_v21  ;;  %v4961_v41 = vadd.f32 %v17008_v43, %v17007_v45 }
 0xbf1   : > { %5527 = vst.msk [vmem:[%s13866_s14 + $0x79] sm:$0x1] %vm2951_vm3, %v5355_v51  ;;  %v16998_v51 = vld [vmem:[#allocation219_spill] sm:$0xff] }
 0xbf2   : > { %5528 = vst.msk [vmem:[%s13866_s14 + $0x7d] sm:$0x1] %vm2951_vm3, %v5356_v47  ;;  %8928 = vmatmul.f32.gmra.mxu2 %v16992_v7  ;;  %8815 = vmatmul.f32.gmra.mxu1 %v16902_v0  ;;  %v7745_v47 = vadd.f32 %v17000_v20, %v7662_v30  ;;  %v17002_v0 = vld [vmem:[#allocation248_spill] sm:$0xff]  ;;  %v2824_v7 = vrot.slane %v2764_v33, 7  ;;  %v5364_v50 = vrot.slane %v5310_v56, 1  ;;  %v5365_v5 = vrot.slane %v5310_v56, 2 }
 0xbf3   : > { %8066 = vst.msk [vmem:[%s13866_s14 + $0x62] sm:$0x1] %vm2951_vm3, %v7853_v62  ;;  %v16997_v62 = vld [vmem:[#allocation220_spill] sm:$0xff]  ;;  %v5369_v24 = vrot.slane %v5310_v56, 6  ;;  %v17012_v20 = vld [vmem:[#allocation251_spill] sm:$0xff] }
 0xbf4   : > { %8067 = vst.msk [vmem:[%s13866_s14 + $0x66] sm:$0x1] %vm2951_vm3, %v7895_v9  ;;  %v2355_v40 = vadd.f32 %v16998_v51, %v16997_v62  ;;  %v2820_v9 = vrot.slane %v2764_v33, 3  ;;  %v17009_v30 = vld [vmem:[#allocation344_spill] sm:$0xff]  ;;  %v17010_v62 = vld [vmem:[#allocation95_spill] sm:$0xff] }
 0xbf5   : > { %8068 = vst.msk [vmem:[%s13866_s14 + $0x6a] sm:$0x1] %vm2951_vm3, %v7896_v58  ;;  %v2821_v58 = vrot.slane %v2764_v33, 4 }
 0xbf6   : > { %8069 = vst.msk [vmem:[%s13866_s14 + $0x6e] sm:$0x1] %vm2951_vm3, %v7897_v23  ;;  %v2431_v32 = vadd.f32 %v17002_v0, %v2355_v40  ;;  %v17004_v23 = vld [vmem:[#allocation363_spill] sm:$0xff]  ;;  %v5368_v40 = vrot.slane %v5310_v56, 5 }
 0xbf7   : > { %8070 = vst.msk [vmem:[%s13866_s14 + $0x72] sm:$0x1] %vm2951_vm3, %v7898_v4  ;;  %v7812_v4 = vadd.f32 %v17004_v23, %v7745_v47 }
 0xbf8   : > { %8071 = vst.msk [vmem:[%s13866_s14 + $0x76] sm:$0x1] %vm2951_vm3, %v7899_v61  ;;  %8768 = vmatmul.f32.gmra.mxu0 %v16936_v27  ;;  %9027 = vmatmul.f32.gmra.mxu3 %v16996_v15  ;;  %v2517_v53 = vadd.f32 %v17003_v31, %v2431_v32  ;;  %v17005_v61 = vld [vmem:[#allocation89_spill] sm:$0xff] }
 0xbf9   : > { %8072 = vst.msk [vmem:[%s13866_s14 + $0x7a] sm:$0x1] %vm2951_vm3, %v7900_v44 }
 0xbfa   : > { %8073 = vst.msk [vmem:[%s13866_s14 + $0x7e] sm:$0x1] %vm2951_vm3, %v7901_v10  ;;  %8936 = vmatmul.f32.gmra.mxu2 %v17001_v22  ;;  %8819 = vmatmul.f32.gmra.mxu1 %v16911_v57  ;;  %v7843_v10 = vadd.f32 %v7812_v4, %v17009_v30  ;;  %v17011_v57 = vld [vmem:[#allocation317_spill] sm:$0xff]  ;;  %v5370_v22 = vrot.slane %v5310_v56, 7  ;;  %v17017_v4 = vld [vmem:[#allocation343_spill] sm:$0xff] }
 0xbfb   : > { %2992 = vst.msk [vmem:[%s13866_s14 + $0xa0] sm:$0x1] %vm2951_vm3, %v2764_v33  ;;  %v17006_v33 = vld [vmem:[#allocation250_spill] sm:$0xff]  ;;  %v5037_v51 = vadd.f32 %v17011_v57, %v4961_v41 }
 0xbfc   : > { %2993 = vst.msk [vmem:[%s13866_s14 + $0xa4] sm:$0x1] %vm2951_vm3, %v2818_v11  ;;  %v2598_v44 = vadd.f32 %v17006_v33, %v2517_v53  ;;  %v5366_v11 = vrot.slane %v5310_v56, 3  ;;  %v7855_v6 = vadd.f32 %v7843_v10, %v14496_v21  ;;  %v17016_v53 = vld [vmem:[#allocation323_spill] sm:$0xff]  ;;  %v17021_v10 = vld [vmem:[#allocation320_spill] sm:$0xff] }
 0xbfd   : > { %2994 = vst.msk [vmem:[%s13866_s14 + $0xa8] sm:$0x1] %vm2951_vm3, %v2819_v49  ;;  %v5367_v49 = vrot.slane %v5310_v56, 4 }
 0xbfe   : > { %2995 = vst.msk [vmem:[%s13866_s14 + $0xac] sm:$0x1] %vm2951_vm3, %v2820_v9  ;;  %v2665_v47 = vadd.f32 %v17012_v20, %v2598_v44  ;;  %v17013_v9 = vld [vmem:[#allocation322_spill] sm:$0xff]  ;;  %v7909_v0 = vrot.slane %v7855_v6, 1  ;;  %v7910_v32 = vrot.slane %v7855_v6, 2  ;;  %v7912_v33 = vrot.slane %v7855_v6, 4 }
 0xbff   : > { %2996 = vst.msk [vmem:[%s13866_s14 + $0xb0] sm:$0x1] %vm2951_vm3, %v2821_v58  ;;  %v5123_v58 = vadd.f32 %v17013_v9, %v5037_v51  ;;  %v17019_v44 = vld [vmem:[#allocation99_spill] sm:$0xff]  ;;  %v7913_v43 = vrot.slane %v7855_v6, 5  ;;  %v7914_v30 = vrot.slane %v7855_v6, 6  ;;  %v7915_v57 = vrot.slane %v7855_v6, 7 }
 0xc00   : > { %2997 = vst.msk [vmem:[%s13866_s14 + $0xb4] sm:$0x1] %vm2951_vm3, %v2822_v26  ;;  %8772 = vmatmul.f32.gmra.mxu0 %v16939_v8  ;;  %9031 = vmatmul.f32.gmra.mxu3 %v17005_v61  ;;  %v14582_v26 = vpop.permute.xlu1 %2731  ;;  %v17025_v20 = vld [vmem:[#allocation223_spill] sm:$0xff]  ;;  %v17026_v9 = vld [vmem:[#allocation285_spill] sm:$0xff] }
 0xc01   : > { %2998 = vst.msk [vmem:[%s13866_s14 + $0xb8] sm:$0x1] %vm2951_vm3, %v2823_v39  ;;  %v17015_v39 = vld [vmem:[#allocation164_spill] sm:$0xff]  ;;  %v5204_v23 = vadd.f32 %v17016_v53, %v5123_v58 }
 0xc02   : > { %2999 = vst.msk [vmem:[%s13866_s14 + $0xbc] sm:$0x1] %vm2951_vm3, %v2824_v7  ;;  %8944 = vmatmul.f32.gmra.mxu2 %v17010_v62  ;;  %8823 = vmatmul.f32.gmra.mxu1 %v16921_v42  ;;  %v2693_v31 = vadd.f32 %v2665_v47, %v17015_v39  ;;  %v17018_v7 = vld [vmem:[#allocation7_spill] sm:$0xff]  ;;  %v17020_v42 = vld [vmem:[#allocation365_spill] sm:$0xff] }
 0xc03   : > { %5537 = vst.msk [vmem:[%s13866_s14 + $0xa1] sm:$0x1] %vm2951_vm3, %v5310_v56  ;;  %v17014_v56 = vld [vmem:[#allocation93_spill] sm:$0xff] }
 0xc04   : > { %5538 = vst.msk [vmem:[%s13866_s14 + $0xa5] sm:$0x1] %vm2951_vm3, %v5364_v50  ;;  %v7506_v50 = vadd.f32 %v17018_v7, %v17017_v4  ;;  %v2765_v41 = vadd.f32 %v14582_v26, %v2693_v31  ;;  %v17028_v31 = vld [vmem:[#allocation103_spill] sm:$0xff] }
 0xc05   : > { %5539 = vst.msk [vmem:[%s13866_s14 + $0xa9] sm:$0x1] %vm2951_vm3, %v5365_v5  ;;  %v7911_v5 = vrot.slane %v7855_v6, 3 }
 0xc06   : > { %5540 = vst.msk [vmem:[%s13866_s14 + $0xad] sm:$0x1] %vm2951_vm3, %v5366_v11  ;;  %v7582_v45 = vadd.f32 %v17020_v42, %v7506_v50  ;;  %v5271_v11 = vadd.f32 %v17021_v10, %v5204_v23  ;;  %v2825_v51 = vrot.slane %v2765_v41, 1  ;;  %v2828_v39 = vrot.slane %v2765_v41, 4  ;;  %v17030_v50 = vld [vmem:[#allocation260_spill] sm:$0xff] }
 0xc07   : > { %5541 = vst.msk [vmem:[%s13866_s14 + $0xb1] sm:$0x1] %vm2951_vm3, %v5367_v49  ;;  %v17022_v49 = vld [vmem:[#allocation368_spill] sm:$0xff]  ;;  %v2829_v23 = vrot.slane %v2765_v41, 5  ;;  %v2830_v7 = vrot.slane %v2765_v41, 6  ;;  %v2831_v42 = vrot.slane %v2765_v41, 7 }
 0xc08   : > { %5542 = vst.msk [vmem:[%s13866_s14 + $0xb5] sm:$0x1] %vm2951_vm3, %v5368_v40  ;;  %8776 = vmatmul.f32.gmra.mxu0 %v16948_v19  ;;  %9035 = vmatmul.f32.gmra.mxu3 %v17014_v56  ;;  %v7668_v62 = vadd.f32 %v17022_v49, %v7582_v45  ;;  %v2826_v40 = vrot.slane %v2765_v41, 2  ;;  %v5299_v58 = vadd.f32 %v5271_v11, %v17026_v9  ;;  %v17034_v11 = vld [vmem:[#allocation290_spill] sm:$0xff]  ;;  %v17035_v49 = vld [vmem:[#allocation289_spill] sm:$0xff] }
 0xc09   : > { %5543 = vst.msk [vmem:[%s13866_s14 + $0xb9] sm:$0x1] %vm2951_vm3, %v5369_v24  ;;  %v17023_v24 = vld [vmem:[#allocation97_spill] sm:$0xff] }
 0xc0a   : > { %5544 = vst.msk [vmem:[%s13866_s14 + $0xbd] sm:$0x1] %vm2951_vm3, %v5370_v22  ;;  %8952 = vmatmul.f32.gmra.mxu2 %v17019_v44  ;;  %8827 = vmatmul.f32.gmra.mxu1 %v16928_v34  ;;  %v17027_v22 = vld [vmem:[#allocation364_spill] sm:$0xff]  ;;  %v5311_v4 = vadd.f32 %v5299_v58, %v14582_v26 }
 0xc0b   : > { %8082 = vst.msk [vmem:[%s13866_s14 + $0xa2] sm:$0x1] %vm2951_vm3, %v7855_v6  ;;  %v17024_v6 = vld [vmem:[#allocation224_spill] sm:$0xff] }
 0xc0c   : > { %8083 = vst.msk [vmem:[%s13866_s14 + $0xa6] sm:$0x1] %vm2951_vm3, %v7909_v0  ;;  %v2363_v47 = vadd.f32 %v17025_v20, %v17024_v6  ;;  %v7749_v0 = vadd.f32 %v17027_v22, %v7668_v62  ;;  %v17029_v34 = vld [vmem:[#allocation256_spill] sm:$0xff]  ;;  %v5371_v45 = vrot.slane %v5311_v4, 1  ;;  %v4969_v62 = vadd.f32 %v17035_v49, %v17034_v11  ;;  %v17038_v20 = vld [vmem:[#allocation325_spill] sm:$0xff] }
 0xc0d   : > { %8084 = vst.msk [vmem:[%s13866_s14 + $0xaa] sm:$0x1] %vm2951_vm3, %v7910_v32  ;;  %v2827_v32 = vrot.slane %v2765_v41, 3  ;;  %v5374_v6 = vrot.slane %v5311_v4, 4  ;;  %v5375_v9 = vrot.slane %v5311_v4, 5  ;;  %v5376_v22 = vrot.slane %v5311_v4, 6 }
 0xc0e   : > { %8085 = vst.msk [vmem:[%s13866_s14 + $0xae] sm:$0x1] %vm2951_vm3, %v7911_v5  ;;  %v2441_v53 = vadd.f32 %v17029_v34, %v2363_v47  ;;  %v5047_v47 = vadd.f32 %v17038_v20, %v4969_v62  ;;  %v5377_v34 = vrot.slane %v5311_v4, 7 }
 0xc0f   : > { %8086 = vst.msk [vmem:[%s13866_s14 + $0xb2] sm:$0x1] %vm2951_vm3, %v7912_v33  ;;  %v17031_v33 = vld [vmem:[#allocation367_spill] sm:$0xff] }
 0xc10   : > { %8087 = vst.msk [vmem:[%s13866_s14 + $0xb6] sm:$0x1] %vm2951_vm3, %v7913_v43  ;;  %8780 = vmatmul.f32.gmra.mxu0 %v16958_v12  ;;  %9039 = vmatmul.f32.gmra.mxu3 %v17023_v24  ;;  %v2529_v5 = vadd.f32 %v17030_v50, %v2441_v53  ;;  %v7816_v44 = vadd.f32 %v17031_v33, %v7749_v0  ;;  %v5372_v43 = vrot.slane %v5311_v4, 2  ;;  %v17039_v0 = vld [vmem:[#allocation261_spill] sm:$0xff]  ;;  %v17042_v33 = vld [vmem:[#allocation331_spill] sm:$0xff] }
 0xc11   : > { %8088 = vst.msk [vmem:[%s13866_s14 + $0xba] sm:$0x1] %vm2951_vm3, %v7914_v30  ;;  %v17032_v30 = vld [vmem:[#allocation101_spill] sm:$0xff] }
 0xc12   : > { %8089 = vst.msk [vmem:[%s13866_s14 + $0xbe] sm:$0x1] %vm2951_vm3, %v7915_v57  ;;  %8960 = vmatmul.f32.gmra.mxu2 %v17028_v31  ;;  %8831 = vmatmul.f32.gmra.mxu1 %v16933_v55  ;;  %v17036_v57 = vld [vmem:[#allocation345_spill] sm:$0xff] }
 0xc13   : > { %3000 = vst.msk [vmem:[%s13866_s14 + $0xc0] sm:$0x1] %vm2951_vm3, %v2765_v41  ;;  %v17033_v41 = vld [vmem:[#allocation258_spill] sm:$0xff]  ;;  %v17037_v55 = vld [vmem:[#allocation105_spill] sm:$0xff] }
 0xc14   : > { %3001 = vst.msk [vmem:[%s13866_s14 + $0xc4] sm:$0x1] %vm2951_vm3, %v2825_v51  ;;  %v2606_v10 = vadd.f32 %v17033_v41, %v2529_v5  ;;  %v7844_v51 = vadd.f32 %v7816_v44, %v17036_v57  ;;  %v17041_v50 = vld [vmem:[#allocation173_spill] sm:$0xff]  ;;  %v17043_v44 = vld [vmem:[#allocation347_spill] sm:$0xff]  ;;  %v17046_v57 = vld [vmem:[#allocation328_spill] sm:$0xff] }
 0xc15   : > { %3002 = vst.msk [vmem:[%s13866_s14 + $0xc8] sm:$0x1] %vm2951_vm3, %v2826_v40  ;;  %v5373_v40 = vrot.slane %v5311_v4, 3 }
 0xc16   : > { %3003 = vst.msk [vmem:[%s13866_s14 + $0xcc] sm:$0x1] %vm2951_vm3, %v2827_v32  ;;  %v7856_v58 = vadd.f32 %v7844_v51, %v14582_v26  ;;  %v2673_v32 = vadd.f32 %v17039_v0, %v2606_v10  ;;  %v17045_v10 = vld [vmem:[#allocation369_spill] sm:$0xff] }
 0xc17   : > { %3004 = vst.msk [vmem:[%s13866_s14 + $0xd0] sm:$0x1] %vm2951_vm3, %v2828_v39  ;;  %v17040_v39 = vld [vmem:[#allocation330_spill] sm:$0xff] }
 0xc18   : > { %3005 = vst.msk [vmem:[%s13866_s14 + $0xd4] sm:$0x1] %vm2951_vm3, %v2829_v23  ;;  %8784 = vmatmul.f32.gmra.mxu0 %v16968_v2  ;;  %9043 = vmatmul.f32.gmra.mxu3 %v17032_v30  ;;  %v5135_v31 = vadd.f32 %v17040_v39, %v5047_v47  ;;  %v7916_v53 = vrot.slane %v7856_v58, 1  ;;  %v7917_v23 = vrot.slane %v7856_v58, 2  ;;  %v2695_v5 = vadd.f32 %v2673_v32, %v17041_v50  ;;  %v17050_v32 = vld [vmem:[#allocation291_spill] sm:$0xff]  ;;  %v17051_v39 = vld [vmem:[#allocation370_spill] sm:$0xff] }
 0xc19   : > { %3006 = vst.msk [vmem:[%s13866_s14 + $0xd8] sm:$0x1] %vm2951_vm3, %v2830_v7  ;;  %v14667_v7 = vpop.permute.xlu0 %2741  ;;  %v7919_v41 = vrot.slane %v7856_v58, 4  ;;  %v7921_v62 = vrot.slane %v7856_v58, 6 }
 0xc1a   : > { %3007 = vst.msk [vmem:[%s13866_s14 + $0xdc] sm:$0x1] %vm2951_vm3, %v2831_v42  ;;  %8968 = vmatmul.f32.gmra.mxu2 %v17037_v55  ;;  %8835 = vmatmul.f32.gmra.mxu1 %v16936_v27  ;;  %v17044_v42 = vld [vmem:[#allocation346_spill] sm:$0xff]  ;;  %v7920_v27 = vrot.slane %v7856_v58, 5  ;;  %v2767_v49 = vadd.f32 %v14667_v7, %v2695_v5  ;;  %v7922_v55 = vrot.slane %v7856_v58, 7 }
 0xc1b   : > { %5545 = vst.msk [vmem:[%s13866_s14 + $0xc1] sm:$0x1] %vm2951_vm3, %v5311_v4  ;;  %v5212_v4 = vadd.f32 %v17042_v33, %v5135_v31 }
 0xc1c   : > { %5546 = vst.msk [vmem:[%s13866_s14 + $0xc5] sm:$0x1] %vm2951_vm3, %v5371_v45  ;;  %v7514_v45 = vadd.f32 %v17044_v42, %v17043_v44  ;;  %v2839_v20 = vrot.slane %v2767_v49, 1  ;;  %v2840_v47 = vrot.slane %v2767_v49, 2  ;;  %v2844_v33 = vrot.slane %v2767_v49, 6  ;;  %v17054_v42 = vld [vmem:[#allocation371_spill] sm:$0xff] }
 0xc1d   : > { %5547 = vst.msk [vmem:[%s13866_s14 + $0xc9] sm:$0x1] %vm2951_vm3, %v5372_v43  ;;  %v7918_v43 = vrot.slane %v7856_v58, 3  ;;  %v5279_v51 = vadd.f32 %v17046_v57, %v5212_v4  ;;  %v17053_v4 = vld [vmem:[#allocation264_spill] sm:$0xff]  ;;  %v17056_v57 = vld [vmem:[#allocation293_spill] sm:$0xff] }
 0xc1e   : > { %5548 = vst.msk [vmem:[%s13866_s14 + $0xcd] sm:$0x1] %vm2951_vm3, %v5373_v40  ;;  %v7592_v11 = vadd.f32 %v17045_v10, %v7514_v45  ;;  %v17047_v40 = vld [vmem:[#allocation373_spill] sm:$0xff] }
 0xc1f   : > { %5549 = vst.msk [vmem:[%s13866_s14 + $0xd1] sm:$0x1] %vm2951_vm3, %v5374_v6 }
 0xc20   : > { %5550 = vst.msk [vmem:[%s13866_s14 + $0xd5] sm:$0x1] %vm2951_vm3, %v5375_v9  ;;  %v7680_v6 = vadd.f32 %v17047_v40, %v7592_v11  ;;  %v17048_v9 = vld [vmem:[#allocation226_spill] sm:$0xff] }
 0xc21   : > { %5551 = vst.msk [vmem:[%s13866_s14 + $0xd9] sm:$0x1] %vm2951_vm3, %v5376_v22  ;;  %v17049_v22 = vld [vmem:[#allocation225_spill] sm:$0xff]  ;;  %v17058_v40 = vld [vmem:[#allocation350_spill] sm:$0xff] }
 0xc22   : > { %5552 = vst.msk [vmem:[%s13866_s14 + $0xdd] sm:$0x1] %vm2951_vm3, %v5377_v34  ;;  %8839 = vmatmul.f32.gmra.mxu1 %v16939_v8  ;;  %v2367_v0 = vadd.f32 %v17049_v22, %v17048_v9  ;;  %v7757_v31 = vadd.f32 %v17051_v39, %v7680_v6  ;;  %v2841_v34 = vrot.slane %v2767_v49, 3  ;;  %v2843_v8 = vrot.slane %v2767_v49, 5 }
 0xc23   : > { %8090 = vst.msk [vmem:[%s13866_s14 + $0xc2] sm:$0x1] %vm2951_vm3, %v7856_v58  ;;  %v5301_v58 = vadd.f32 %v5279_v51, %v17050_v32 }
 0xc24   : > { %8091 = vst.msk [vmem:[%s13866_s14 + $0xc6] sm:$0x1] %vm2951_vm3, %v7916_v53  ;;  %v2842_v53 = vrot.slane %v2767_v49, 4  ;;  %v7824_v45 = vadd.f32 %v17054_v42, %v7757_v31  ;;  %v17061_v31 = vld [vmem:[#allocation333_spill] sm:$0xff] }
 0xc25   : > { %8092 = vst.msk [vmem:[%s13866_s14 + $0xca] sm:$0x1] %vm2951_vm3, %v7917_v23  ;;  %v17052_v23 = vld [vmem:[#allocation259_spill] sm:$0xff]  ;;  %v5313_v5 = vadd.f32 %v5301_v58, %v14667_v7  ;;  %v17060_v58 = vld [vmem:[#allocation265_spill] sm:$0xff] }
 0xc26   : > { %8093 = vst.msk [vmem:[%s13866_s14 + $0xce] sm:$0x1] %vm2951_vm3, %v7918_v43  ;;  %v2446_v50 = vadd.f32 %v17052_v23, %v2367_v0  ;;  %v2845_v43 = vrot.slane %v2767_v49, 7  ;;  %v7846_v6 = vadd.f32 %v7824_v45, %v17058_v40  ;;  %v17064_v45 = vld [vmem:[#allocation349_spill] sm:$0xff]  ;;  %v17067_v40 = vld [vmem:[#allocation335_spill] sm:$0xff] }
 0xc27   : > { %8094 = vst.msk [vmem:[%s13866_s14 + $0xd2] sm:$0x1] %vm2951_vm3, %v7919_v41  ;;  %v9501_v41 = vand.u32 4294901760, %v14328_v18  ;;  %v5385_v10 = vrot.slane %v5313_v5, 1  ;;  %v5386_v11 = vrot.slane %v5313_v5, 2  ;;  %v5390_v32 = vrot.slane %v5313_v5, 6 }
 0xc28   : > { %8095 = vst.msk [vmem:[%s13866_s14 + $0xd6] sm:$0x1] %vm2951_vm3, %v7920_v27  ;;  %v2535_v44 = vadd.f32 %v17053_v4, %v2446_v50  ;;  %v17055_v27 = vld [vmem:[#allocation262_spill] sm:$0xff]  ;;  %v7858_v22 = vadd.f32 %v7846_v6, %v14667_v7 }
 0xc29   : > { %8096 = vst.msk [vmem:[%s13866_s14 + $0xda] sm:$0x1] %vm2951_vm3, %v7921_v62  ;;  %v9502_v0 = vsub.f32 %v14328_v18, %v9501_v41 }
 0xc2a   : > { %8097 = vst.msk [vmem:[%s13866_s14 + $0xde] sm:$0x1] %vm2951_vm3, %v7922_v55  ;;  %8843 = vmatmul.f32.gmra.mxu1 %v16948_v19  ;;  %v2610_v62 = vadd.f32 %v17055_v27, %v2535_v44  ;;  %v5387_v55 = vrot.slane %v5313_v5, 3  ;;  %v5389_v19 = vrot.slane %v5313_v5, 5  ;;  %v7930_v50 = vrot.slane %v7858_v22, 1  ;;  %v17063_v44 = vld [vmem:[#allocation334_spill] sm:$0xff] }
 0xc2b   : > { %3016 = vst.msk [vmem:[%s13866_s14 + $0x100] sm:$0x1] %vm2951_vm3, %v2767_v49  ;;  %v17057_v49 = vld [vmem:[#allocation292_spill] sm:$0xff]  ;;  %v9503_v23 = vand.u32 4294901760, %v9502_v0  ;;  %v7933_v27 = vrot.slane %v7858_v22, 4  ;;  %v17069_v0 = vld [vmem:[#allocation230_spill] sm:$0xff] }
 0xc2c   : > { %3017 = vst.msk [vmem:[%s13866_s14 + $0x104] sm:$0x1] %vm2951_vm3, %v2839_v20  ;;  %v4973_v51 = vadd.f32 %v17057_v49, %v17056_v57  ;;  %v5388_v20 = vrot.slane %v5313_v5, 4  ;;  %v2677_v39 = vadd.f32 %v17060_v58, %v2610_v62  ;;  %v17066_v62 = vld [vmem:[#allocation372_spill] sm:$0xff] }
 0xc2d   : > { %3018 = vst.msk [vmem:[%s13866_s14 + $0x108] sm:$0x1] %vm2951_vm3, %v2840_v47  ;;  %v17059_v47 = vld [vmem:[#allocation329_spill] sm:$0xff]  ;;  %9504 = vmatpush.msrb.mxu1 %v9503_v23 }
 0xc2e   : > { %3019 = vst.msk [vmem:[%s13866_s14 + $0x10c] sm:$0x1] %vm2951_vm3, %v2841_v34  ;;  %v5052_v9 = vadd.f32 %v17059_v47, %v4973_v51  ;;  %v7935_v51 = vrot.slane %v7858_v22, 6  ;;  %v7936_v47 = vrot.slane %v7858_v22, 7 }
 0xc2f   : > { %3020 = vst.msk [vmem:[%s13866_s14 + $0x110] sm:$0x1] %vm2951_vm3, %v2842_v53  ;;  %v5391_v53 = vrot.slane %v5313_v5, 7 }
 0xc30   : > { %3021 = vst.msk [vmem:[%s13866_s14 + $0x114] sm:$0x1] %vm2951_vm3, %v2843_v8  ;;  %v5141_v34 = vadd.f32 %v17061_v31, %v5052_v9  ;;  %v7931_v8 = vrot.slane %v7858_v22, 2  ;;  %v9881_v9 = vsel %vm548_vm2, %v14108_v17, 0 }
 0xc31   : > { %3022 = vst.msk [vmem:[%s13866_s14 + $0x118] sm:$0x1] %vm2951_vm3, %v2844_v33  ;;  %v14748_v33 = vpop.permute.xlu1 %2746  ;;  %v14782_v17 = vand.u32 4294901760, %v9881_v9 }
 0xc32   : > { %3023 = vst.msk [vmem:[%s13866_s14 + $0x11c] sm:$0x1] %vm2951_vm3, %v2845_v43  ;;  %8847 = vmatmul.f32.gmra.mxu1 %v16958_v12  ;;  %v5216_v42 = vadd.f32 %v17063_v44, %v5141_v34  ;;  %v17065_v43 = vld [vmem:[#allocation348_spill] sm:$0xff]  ;;  %v7934_v12 = vrot.slane %v7858_v22, 5  ;;  %v17072_v34 = vld [vmem:[#allocation374_spill] sm:$0xff] }
 0xc33   : > { %5561 = vst.msk [vmem:[%s13866_s14 + $0x101] sm:$0x1] %vm2951_vm3, %v5313_v5  ;;  %v17062_v5 = vld [vmem:[#allocation178_spill] sm:$0xff] }
 0xc34   : > { %5562 = vst.msk [vmem:[%s13866_s14 + $0x105] sm:$0x1] %vm2951_vm3, %v5385_v10  ;;  %v2696_v4 = vadd.f32 %v2677_v39, %v17062_v5  ;;  %v7518_v10 = vadd.f32 %v17065_v43, %v17064_v45  ;;  %v5283_v6 = vadd.f32 %v17067_v40, %v5216_v42  ;;  %v17074_v42 = vld [vmem:[#allocation270_spill] sm:$0xff] }
 0xc35   : > { %5563 = vst.msk [vmem:[%s13866_s14 + $0x109] sm:$0x1] %vm2951_vm3, %v5386_v11  ;;  %v7932_v11 = vrot.slane %v7858_v22, 3 }
 0xc36   : > { %5564 = vst.msk [vmem:[%s13866_s14 + $0x10d] sm:$0x1] %vm2951_vm3, %v5387_v55  ;;  %v7597_v57 = vadd.f32 %v17066_v62, %v7518_v10  ;;  %v2768_v49 = vadd.f32 %v14748_v33, %v2696_v4  ;;  %v17068_v55 = vld [vmem:[#allocation375_spill] sm:$0xff]  ;;  %v14790_v4 = vand.u32 4294901760, %v13849_v48  ;;  %v17075_v10 = vld [vmem:[#allocation376_spill] sm:$0xff] }
 0xc37   : > { %5565 = vst.msk [vmem:[%s13866_s14 + $0x111] sm:$0x1] %vm2951_vm3, %v5388_v20 }
 0xc38   : > { %5566 = vst.msk [vmem:[%s13866_s14 + $0x115] sm:$0x1] %vm2951_vm3, %v5389_v19  ;;  %v7686_v20 = vadd.f32 %v17068_v55, %v7597_v57  ;;  %v2846_v19 = vrot.slane %v2768_v49, 1  ;;  %v2847_v39 = vrot.slane %v2768_v49, 2  ;;  %v2848_v23 = vrot.slane %v2768_v49, 3  ;;  %v17077_v55 = vld [vmem:[#allocation299_spill] sm:$0xff] }
 0xc39   : > { %5567 = vst.msk [vmem:[%s13866_s14 + $0x119] sm:$0x1] %vm2951_vm3, %v5390_v32  ;;  %v17070_v32 = vld [vmem:[#allocation229_spill] sm:$0xff]  ;;  %v2849_v5 = vrot.slane %v2768_v49, 4  ;;  %v2851_v43 = vrot.slane %v2768_v49, 6  ;;  %v2852_v62 = vrot.slane %v2768_v49, 7  ;;  %v14808_v57 = vsub.f32 %v13849_v48, %v14790_v4 }
 0xc3a   : > { %5568 = vst.msk [vmem:[%s13866_s14 + $0x11d] sm:$0x1] %vm2951_vm3, %v5391_v53  ;;  %v2375_v58 = vadd.f32 %v17070_v32, %v17069_v0  ;;  %8851 = vmatmul.f32.gmra.mxu1 %v16968_v2  ;;  %v7761_v53 = vadd.f32 %v17072_v34, %v7686_v20  ;;  %v2850_v2 = vrot.slane %v2768_v49, 5  ;;  %v17080_v32 = vld [vmem:[#allocation336_spill] sm:$0xff] }
 0xc3b   : > { %8106 = vst.msk [vmem:[%s13866_s14 + $0x102] sm:$0x1] %vm2951_vm3, %v7858_v22  ;;  %v17071_v22 = vld [vmem:[#allocation294_spill] sm:$0xff]  ;;  %v17081_v34 = vld [vmem:[#allocation272_spill] sm:$0xff] }
 0xc3c   : > { %8107 = vst.msk [vmem:[%s13866_s14 + $0x106] sm:$0x1] %vm2951_vm3, %v7930_v50  ;;  %v5302_v31 = vadd.f32 %v5283_v6, %v17071_v22  ;;  %v17073_v50 = vld [vmem:[#allocation266_spill] sm:$0xff] }
 0xc3d   : > { %8108 = vst.msk [vmem:[%s13866_s14 + $0x10a] sm:$0x1] %vm2951_vm3, %v7931_v8  ;;  %v2456_v8 = vadd.f32 %v17073_v50, %v2375_v58  ;;  %v17082_v50 = vld [vmem:[#allocation340_spill] sm:$0xff] }
 0xc3e   : > { %8109 = vst.msk [vmem:[%s13866_s14 + $0x10e] sm:$0x1] %vm2951_vm3, %v7932_v11  ;;  %v5314_v44 = vadd.f32 %v5302_v31, %v14748_v33  ;;  %v7828_v11 = vadd.f32 %v17075_v10, %v7761_v53 }
 0xc3f   : > { %8110 = vst.msk [vmem:[%s13866_s14 + $0x112] sm:$0x1] %vm2951_vm3, %v7933_v27  ;;  %v2547_v45 = vadd.f32 %v17074_v42, %v2456_v8  ;;  %v14800_v27 = vsub.f32 %v9881_v9, %v14782_v17 }
 0xc40   : > { %8111 = vst.msk [vmem:[%s13866_s14 + $0x116] sm:$0x1] %vm2951_vm3, %v7934_v12  ;;  %v5392_v12 = vrot.slane %v5314_v44, 1  ;;  %v5393_v6 = vrot.slane %v5314_v44, 2  ;;  %v5394_v48 = vrot.slane %v5314_v44, 3  ;;  %v5395_v0 = vrot.slane %v5314_v44, 4 }
 0xc41   : > { %8112 = vst.msk [vmem:[%s13866_s14 + $0x11a] sm:$0x1] %vm2951_vm3, %v7935_v51  ;;  %v17076_v51 = vld [vmem:[#allocation271_spill] sm:$0xff]  ;;  %v5396_v22 = vrot.slane %v5314_v44, 5 }
 0xc42   : > { %8113 = vst.msk [vmem:[%s13866_s14 + $0x11e] sm:$0x1] %vm2951_vm3, %v7936_v47  ;;  %v2618_v40 = vadd.f32 %v17076_v51, %v2547_v45  ;;  %v17079_v47 = vld [vmem:[#allocation351_spill] sm:$0xff]  ;;  %v17085_v51 = vld [vmem:[#allocation353_spill] sm:$0xff] }
 0xc43   : > { %3024 = vst.msk [vmem:[%s13866_s14 + $0x120] sm:$0x1] %vm2951_vm3, %v2768_v49  ;;  %v17078_v49 = vld [vmem:[#allocation298_spill] sm:$0xff]  ;;  %v7847_v9 = vadd.f32 %v7828_v11, %v17079_v47  ;;  %v8498_v47 = vpop.f32.mrf.mxu1 }
 0xc44   : > { %3025 = vst.msk [vmem:[%s13866_s14 + $0x124] sm:$0x1] %vm2951_vm3, %v2846_v19  ;;  %v4981_v20 = vadd.f32 %v17078_v49, %v17077_v55  ;;  %v10014_v19 = vand.u32 4294901760, %v14800_v27  ;;  %v2685_v53 = vadd.f32 %v17081_v34, %v2618_v40  ;;  %v17086_v40 = vld [vmem:[#allocation352_spill] sm:$0xff]  ;;  %v17089_v34 = vld [vmem:[#allocation377_spill] sm:$0xff] }
 0xc45   : > { %3026 = vst.msk [vmem:[%s13866_s14 + $0x128] sm:$0x1] %vm2951_vm3, %v2847_v39  ;;  %v10020_v39 = vand.u32 4294901760, %v14808_v57  ;;  %v7859_v31 = vadd.f32 %v7847_v9, %v14748_v33  ;;  %v17087_v9 = vld [vmem:[#allocation58_spill] sm:$0xff] }
 0xc46   : > { %3027 = vst.msk [vmem:[%s13866_s14 + $0x12c] sm:$0x1] %vm2951_vm3, %v2848_v23  ;;  %v5062_v58 = vadd.f32 %v17080_v32, %v4981_v20  ;;  %v5397_v23 = vrot.slane %v5314_v44, 6  ;;  %v8379_v20 = vpop.f32.mrf.mxu0  ;;  %9069 = vmatmul.f32.vlgmr.msra.gmra.mxu0 %v17087_v9 }
 0xc47   : > { %3028 = vst.msk [vmem:[%s13866_s14 + $0x130] sm:$0x1] %vm2951_vm3, %v2849_v5  ;;  %v10015_v5 = vsub.f32 %v14800_v27, %v10014_v19  ;;  %v7937_v42 = vrot.slane %v7859_v31, 1  ;;  %v10021_v45 = vsub.f32 %v14808_v57, %v10020_v39  ;;  %v7938_v11 = vrot.slane %v7859_v31, 2  ;;  %9743 = vmatpush.msra.mxu0 %v9495_v29  ;;  %v17090_v29 = vld [vmem:[#allocation342_spill] sm:$0xff] }
 0xc48   : > { %3029 = vst.msk [vmem:[%s13866_s14 + $0x134] sm:$0x1] %vm2951_vm3, %v2850_v2  ;;  %v5153_v8 = vadd.f32 %v17082_v50, %v5062_v58  ;;  %v5398_v2 = vrot.slane %v5314_v44, 7  ;;  %v7939_v49 = vrot.slane %v7859_v31, 3  ;;  %v8499_v32 = vadd.f32 %v8498_v47, %v8379_v20  ;;  %v8568_v58 = vpop.f32.mrf.mxu2  ;;  %9242 = vmatmul.f32.vlgmr.msra.gmra.mxu2 %v16401_v3 }
 0xc49   : > { %3030 = vst.msk [vmem:[%s13866_s14 + $0x138] sm:$0x1] %vm2951_vm3, %v2851_v43  ;;  %v17083_v43 = vld [vmem:[#allocation188_spill] sm:$0xff]  ;;  %v10016_v55 = vand.u32 4294901760, %v10015_v5  ;;  %v7942_v5 = vrot.slane %v7859_v31, 6  ;;  %9747 = vmatpush.msra.mxu0 %v9501_v41  ;;  %9898 = vmatpush.msra.mxu2 %v14782_v17 }
 0xc4a   : > { %3031 = vst.msk [vmem:[%s13866_s14 + $0x13c] sm:$0x1] %vm2951_vm3, %v2852_v62  ;;  %v2698_v10 = vadd.f32 %v2685_v53, %v17083_v43  ;;  %v14847_v62 = vpop.permute.xlu0 %2756  ;;  %v8569_v36 = vadd.f32 %v8568_v58, %v8499_v32  ;;  %v17096_v32 = vld [vmem:[#allocation380_spill] sm:$0xff] }
 0xc4b   : > { %5569 = vst.msk [vmem:[%s13866_s14 + $0x121] sm:$0x1] %vm2951_vm3, %v5314_v44  ;;  %v17084_v44 = vld [vmem:[#allocation341_spill] sm:$0xff]  ;;  %9900 = vmatpush.msra.mxu2 %v14790_v4 }
 0xc4c   : > { %5570 = vst.msk [vmem:[%s13866_s14 + $0x125] sm:$0x1] %vm2951_vm3, %v5392_v12  ;;  %v5224_v12 = vadd.f32 %v17084_v44, %v5153_v8  ;;  %v2770_v50 = vadd.f32 %v14847_v62, %v2698_v10  ;;  %v10022_v8 = vand.u32 4294901760, %v10021_v45  ;;  %v7943_v10 = vrot.slane %v7859_v31, 7 }
 0xc4d   : > { %5571 = vst.msk [vmem:[%s13866_s14 + $0x129] sm:$0x1] %vm2951_vm3, %v5393_v6  ;;  %v7526_v6 = vadd.f32 %v17086_v40, %v17085_v51  ;;  %v8502_v51 = vpop.f32.mrf.mxu1  ;;  %v17094_v40 = vld [vmem:[#allocation62_spill] sm:$0xff] }
 0xc4e   : > { %5572 = vst.msk [vmem:[%s13866_s14 + $0x12d] sm:$0x1] %vm2951_vm3, %v5394_v48  ;;  %v17088_v48 = vld [vmem:[#allocation60_spill] sm:$0xff]  ;;  %v2860_v18 = vrot.slane %v2770_v50, 1  ;;  %v2861_v41 = vrot.slane %v2770_v50, 2  ;;  %v2862_v44 = vrot.slane %v2770_v50, 3 }
 0xc4f   : > { %5573 = vst.msk [vmem:[%s13866_s14 + $0x131] sm:$0x1] %vm2951_vm3, %v5395_v0  ;;  %9149 = vmatmul.f32.vlgmr.msra.gmra.mxu1 %v17088_v48  ;;  %v7940_v0 = vrot.slane %v7859_v31, 4  ;;  %v7607_v53 = vadd.f32 %v17089_v34, %v7526_v6  ;;  %v17095_v6 = vld [vmem:[#allocation64_spill] sm:$0xff]  ;;  %v2864_v47 = vrot.slane %v2770_v50, 5  ;;  %v2865_v48 = vrot.slane %v2770_v50, 6 }
 0xc50   : > { %5574 = vst.msk [vmem:[%s13866_s14 + $0x135] sm:$0x1] %vm2951_vm3, %v5396_v22  ;;  %v8648_v22 = vpop.f32.mrf.mxu3  ;;  %9309 = vmatmul.f32.vlgmr.msra.gmra.mxu3 %v16401_v3  ;;  %9812 = vmatpush.msra.mxu1 %v14297_v13 }
 0xc51   : > { %5575 = vst.msk [vmem:[%s13866_s14 + $0x139] sm:$0x1] %vm2951_vm3, %v5397_v23  ;;  %v7941_v23 = vrot.slane %v7859_v31, 5  ;;  %10017 = vmatpush.msra.mxu3 %v10016_v55  ;;  %v14878_v3 = vadd.f32 %v8648_v22, %v8569_v36  ;;  %v2866_v22 = vrot.slane %v2770_v50, 7 }
 0xc52   : > { %5576 = vst.msk [vmem:[%s13866_s14 + $0x13d] sm:$0x1] %vm2951_vm3, %v5398_v2  ;;  %v5291_v2 = vadd.f32 %v17090_v29, %v5224_v12  ;;  %9814 = vmatpush.msra.mxu1 %v14303_v52  ;;  %v8387_v12 = vpop.f32.mrf.mxu0  ;;  %9074 = vmatmul.f32.gmra.mxu0 %v17094_v40  ;;  %v2863_v52 = vrot.slane %v2770_v50, 4  ;;  %v17098_v29 = vld [vmem:[#allocation66_spill] sm:$0xff] }
 0xc53   : > { %8114 = vst.msk [vmem:[%s13866_s14 + $0x122] sm:$0x1] %vm2951_vm3, %v7859_v31  ;;  %10023 = vmatpush.msra.mxu3 %v10022_v8  ;;  %v17092_v31 = vld [vmem:[#allocation300_spill] sm:$0xff]  ;;  %v8503_v55 = vadd.f32 %v8502_v51, %v8387_v12 }
 0xc54   : > { %8115 = vst.msk [vmem:[%s13866_s14 + $0x126] sm:$0x1] %vm2951_vm3, %v7937_v42  ;;  %v17091_v42 = vld [vmem:[#allocation378_spill] sm:$0xff]  ;;  %v5304_v45 = vadd.f32 %v5291_v2, %v17092_v31  ;;  %v17099_v2 = vld [vmem:[#allocation68_spill] sm:$0xff] }
 0xc55   : > { %8116 = vst.msk [vmem:[%s13866_s14 + $0x12a] sm:$0x1] %vm2951_vm3, %v7938_v11  ;;  %v7698_v43 = vadd.f32 %v17091_v42, %v7607_v53  ;;  %v17093_v11 = vld [vmem:[#allocation379_spill] sm:$0xff]  ;;  %v8506_v36 = vpop.f32.mrf.mxu1 }
 0xc56   : > { %8117 = vst.msk [vmem:[%s13866_s14 + $0x12e] sm:$0x1] %vm2951_vm3, %v7939_v49  ;;  %v8573_v49 = vpop.f32.mrf.mxu2  ;;  %v5316_v9 = vadd.f32 %v5304_v45, %v14847_v62  ;;  %9246 = vmatmul.f32.gmra.mxu2 %v16403_v59 }
 0xc57   : > { %8118 = vst.msk [vmem:[%s13866_s14 + $0x132] sm:$0x1] %vm2951_vm3, %v7940_v0  ;;  %v7769_v13 = vadd.f32 %v17093_v11, %v7698_v43  ;;  %9155 = vmatmul.f32.gmra.mxu1 %v17095_v6  ;;  %v8574_v0 = vadd.f32 %v8573_v49, %v8503_v55  ;;  %v17101_v55 = vld [vmem:[#allocation72_spill] sm:$0xff] }
 0xc58   : > { %8119 = vst.msk [vmem:[%s13866_s14 + $0x136] sm:$0x1] %vm2951_vm3, %v7941_v23  ;;  %v8654_v20 = vpop.f32.mrf.mxu3  ;;  %9313 = vmatmul.f32.gmra.mxu3 %v16403_v59  ;;  %v5406_v53 = vrot.slane %v5316_v9, 1  ;;  %v5407_v59 = vrot.slane %v5316_v9, 2  ;;  %v17097_v23 = vld [vmem:[#allocation356_spill] sm:$0xff]  ;;  %v5409_v42 = vrot.slane %v5316_v9, 4 }
 0xc59   : > { %8120 = vst.msk [vmem:[%s13866_s14 + $0x13a] sm:$0x1] %vm2951_vm3, %v7942_v5  ;;  %v7836_v58 = vadd.f32 %v17096_v32, %v7769_v13  ;;  %v14906_v34 = vadd.f32 %v8654_v20, %v8574_v0  ;;  %v5408_v5 = vrot.slane %v5316_v9, 3  ;;  %v5411_v45 = vrot.slane %v5316_v9, 6 }
 0xc5a   : > { %8121 = vst.msk [vmem:[%s13866_s14 + $0x13e] sm:$0x1] %vm2951_vm3, %v7943_v10  ;;  %v5412_v13 = vrot.slane %v5316_v9, 7 }
 0xc5b   : > { %3040 = vst.msk [vmem:[%s13866_s14 + $0x160] sm:$0x1] %vm2951_vm3, %v2770_v50  ;;  %v7849_v8 = vadd.f32 %v7836_v58, %v17097_v23  ;;  %v8395_v50 = vpop.f32.mrf.mxu0  ;;  %9079 = vmatmul.f32.gmra.mxu0 %v17098_v29  ;;  %v17103_v23 = vld [vmem:[#allocation76_spill] sm:$0xff] }
 0xc5c   : > { %3041 = vst.msk [vmem:[%s13866_s14 + $0x164] sm:$0x1] %vm2951_vm3, %v2860_v18  ;;  %v8507_v43 = vadd.f32 %v8506_v36, %v8395_v50 }
 0xc5d   : > { %3042 = vst.msk [vmem:[%s13866_s14 + $0x168] sm:$0x1] %vm2951_vm3, %v2861_v41  ;;  %v5410_v41 = vrot.slane %v5316_v9, 5  ;;  %v7861_v31 = vadd.f32 %v7849_v8, %v14847_v62  ;;  %v8510_v6 = vpop.f32.mrf.mxu1 }
 0xc5e   : > { %3043 = vst.msk [vmem:[%s13866_s14 + $0x16c] sm:$0x1] %vm2951_vm3, %v2862_v44  ;;  %v8578_v10 = vpop.f32.mrf.mxu2  ;;  %9250 = vmatmul.f32.gmra.mxu2 %v16949_v46 }
 0xc5f   : > { %3044 = vst.msk [vmem:[%s13866_s14 + $0x170] sm:$0x1] %vm2951_vm3, %v2863_v52  ;;  %9161 = vmatmul.f32.gmra.mxu1 %v17099_v2  ;;  %v8579_v11 = vadd.f32 %v8578_v10, %v8507_v43  ;;  %v7951_v12 = vrot.slane %v7861_v31, 1  ;;  %v7952_v51 = vrot.slane %v7861_v31, 2  ;;  %v17100_v52 = vld [vmem:[#allocation70_spill] sm:$0xff]  ;;  %v7954_v49 = vrot.slane %v7861_v31, 4 }
 0xc60   : > { %3045 = vst.msk [vmem:[%s13866_s14 + $0x174] sm:$0x1] %vm2951_vm3, %v2864_v47  ;;  %v8660_v18 = vpop.f32.mrf.mxu3  ;;  %9317 = vmatmul.f32.gmra.mxu3 %v16949_v46  ;;  %v7953_v46 = vrot.slane %v7861_v31, 3  ;;  %v7956_v0 = vrot.slane %v7861_v31, 6  ;;  %v7957_v58 = vrot.slane %v7861_v31, 7  ;;  %v17104_v43 = vld [vmem:[#allocation78_spill] sm:$0xff] }
 0xc61   : > { %3046 = vst.msk [vmem:[%s13866_s14 + $0x178] sm:$0x1] %vm2951_vm3, %v2865_v48  ;;  %v14930_v44 = vadd.f32 %v8660_v18, %v8579_v11  ;;  %v7955_v48 = vrot.slane %v7861_v31, 5  ;;  %v17105_v10 = vld [vmem:[#allocation80_spill] sm:$0xff] }
 0xc62   : > { %3047 = vst.msk [vmem:[%s13866_s14 + $0x17c] sm:$0x1] %vm2951_vm3, %v2866_v22 }
 0xc63   : > { %5585 = vst.msk [vmem:[%s13866_s14 + $0x161] sm:$0x1] %vm2951_vm3, %v5316_v9  ;;  %v8403_v40 = vpop.f32.mrf.mxu0  ;;  %9084 = vmatmul.f32.gmra.mxu0 %v17100_v52 }
 0xc64   : > { %5586 = vst.msk [vmem:[%s13866_s14 + $0x165] sm:$0x1] %vm2951_vm3, %v5406_v53  ;;  %v8511_v20 = vadd.f32 %v8510_v6, %v8403_v40 }
 0xc65   : > { %5587 = vst.msk [vmem:[%s13866_s14 + $0x169] sm:$0x1] %vm2951_vm3, %v5407_v59  ;;  %v8514_v59 = vpop.f32.mrf.mxu1 }
 0xc66   : > { %5588 = vst.msk [vmem:[%s13866_s14 + $0x16d] sm:$0x1] %vm2951_vm3, %v5408_v5  ;;  %v8583_v47 = vpop.f32.mrf.mxu2  ;;  %9254 = vmatmul.f32.gmra.mxu2 %v16959_v60 }
 0xc67   : > { %5589 = vst.msk [vmem:[%s13866_s14 + $0x171] sm:$0x1] %vm2951_vm3, %v5409_v42  ;;  %9167 = vmatmul.f32.gmra.mxu1 %v17101_v55  ;;  %v8584_v32 = vadd.f32 %v8583_v47, %v8511_v20  ;;  %v17108_v20 = vld [vmem:[#allocation86_spill] sm:$0xff]  ;;  %v17109_v47 = vld [vmem:[#allocation88_spill] sm:$0xff] }
 0xc68   : > { %5590 = vst.msk [vmem:[%s13866_s14 + $0x175] sm:$0x1] %vm2951_vm3, %v5410_v41  ;;  %v8666_v9 = vpop.f32.mrf.mxu3  ;;  %9321 = vmatmul.f32.gmra.mxu3 %v16959_v60  ;;  %v17102_v60 = vld [vmem:[#allocation74_spill] sm:$0xff] }
 0xc69   : > { %5591 = vst.msk [vmem:[%s13866_s14 + $0x179] sm:$0x1] %vm2951_vm3, %v5411_v45  ;;  %v14952_v22 = vadd.f32 %v8666_v9, %v8584_v32 }
 0xc6a   : > { %5592 = vst.msk [vmem:[%s13866_s14 + $0x17d] sm:$0x1] %vm2951_vm3, %v5412_v13 }
 0xc6b   : > { %8130 = vst.msk [vmem:[%s13866_s14 + $0x162] sm:$0x1] %vm2951_vm3, %v7861_v31  ;;  %v8411_v53 = vpop.f32.mrf.mxu0  ;;  %9089 = vmatmul.f32.gmra.mxu0 %v17102_v60  ;;  %v17111_v60 = vld [vmem:[#allocation92_spill] sm:$0xff] }
 0xc6c   : > { %8131 = vst.msk [vmem:[%s13866_s14 + $0x166] sm:$0x1] %vm2951_vm3, %v7951_v12  ;;  %v8515_v8 = vadd.f32 %v8514_v59, %v8411_v53  ;;  %v17106_v12 = vld [vmem:[#allocation82_spill] sm:$0xff] }
 0xc6d   : > { %8132 = vst.msk [vmem:[%s13866_s14 + $0x16a] sm:$0x1] %vm2951_vm3, %v7952_v51  ;;  %v8518_v42 = vpop.f32.mrf.mxu1  ;;  %v17107_v51 = vld [vmem:[#allocation84_spill] sm:$0xff]  ;;  %v17110_v59 = vld [vmem:[#allocation90_spill] sm:$0xff] }
 0xc6e   : > { %8133 = vst.msk [vmem:[%s13866_s14 + $0x16e] sm:$0x1] %vm2951_vm3, %v7953_v46  ;;  %v8588_v5 = vpop.f32.mrf.mxu2  ;;  %9258 = vmatmul.f32.gmra.mxu2 %v16969_v38 }
 0xc6f   : > { %8134 = vst.msk [vmem:[%s13866_s14 + $0x172] sm:$0x1] %vm2951_vm3, %v7954_v49  ;;  %9173 = vmatmul.f32.gmra.mxu1 %v17103_v23  ;;  %v8589_v36 = vadd.f32 %v8588_v5, %v8515_v8 }
 0xc70   : > { %8135 = vst.msk [vmem:[%s13866_s14 + $0x176] sm:$0x1] %vm2951_vm3, %v7955_v48  ;;  %v8672_v50 = vpop.f32.mrf.mxu3  ;;  %9325 = vmatmul.f32.gmra.mxu3 %v16969_v38 }
 0xc71   : > { %8136 = vst.msk [vmem:[%s13866_s14 + $0x17a] sm:$0x1] %vm2951_vm3, %v7956_v0  ;;  %v14964_v29 = vadd.f32 %v8672_v50, %v8589_v36 }
 0xc72   : > { %8137 = vst.msk [vmem:[%s13866_s14 + $0x17e] sm:$0x1] %vm2951_vm3, %v7957_v58 }
 0xc73   : > { %v8419_v2 = vpop.f32.mrf.mxu0  ;;  %9094 = vmatmul.f32.gmra.mxu0 %v17104_v43  ;;  %v17113_v43 = vld [vmem:[#allocation96_spill] sm:$0xff] }
 0xc74   : > { %v8519_v18 = vadd.f32 %v8518_v42, %v8419_v2  ;;  %v17112_v42 = vld [vmem:[#allocation94_spill] sm:$0xff] }
 0xc75   : > { %v8522_v13 = vpop.f32.mrf.mxu1 }
 0xc76   : > { %v8593_v41 = vpop.f32.mrf.mxu2  ;;  %9262 = vmatmul.f32.gmra.mxu2 %v16978_v1 }
 0xc77   : > { %9179 = vmatmul.f32.gmra.mxu1 %v17105_v10  ;;  %v8594_v45 = vadd.f32 %v8593_v41, %v8519_v18 }
 0xc78   : > { %v8678_v31 = vpop.f32.mrf.mxu3  ;;  %9329 = vmatmul.f32.gmra.mxu3 %v16978_v1 }
 0xc79   : > { %v14970_v11 = vadd.f32 %v8678_v31, %v8594_v45 }
 0xc7b   : > { %v8427_v38 = vpop.f32.mrf.mxu0  ;;  %9099 = vmatmul.f32.gmra.mxu0 %v17106_v12  ;;  %v17115_v12 = vld [vmem:[#allocation100_spill] sm:$0xff] }
 0xc7c   : > { %v8523_v46 = vadd.f32 %v8522_v13, %v8427_v38  ;;  %v17114_v13 = vld [vmem:[#allocation98_spill] sm:$0xff] }
 0xc7d   : > { %v8526_v49 = vpop.f32.mrf.mxu1 }
 0xc7e   : > { %v8598_v40 = vpop.f32.mrf.mxu2  ;;  %9266 = vmatmul.f32.gmra.mxu2 %v16987_v54 }
 0xc7f   : > { %9185 = vmatmul.f32.gmra.mxu1 %v17107_v51  ;;  %v8599_v52 = vadd.f32 %v8598_v40, %v8523_v46 }
 0xc80   : > { %v8684_v6 = vpop.f32.mrf.mxu3  ;;  %9333 = vmatmul.f32.gmra.mxu3 %v16987_v54 }
 0xc81   : > { %v14976_v55 = vadd.f32 %v8684_v6, %v8599_v52 }
 0xc83   : > { %v8435_v1 = vpop.f32.mrf.mxu0  ;;  %9104 = vmatmul.f32.gmra.mxu0 %v17108_v20  ;;  %v17117_v20 = vld [vmem:[#allocation104_spill] sm:$0xff] }
 0xc84   : > { %v8527_v9 = vadd.f32 %v8526_v49, %v8435_v1  ;;  %v17116_v49 = vld [vmem:[#allocation102_spill] sm:$0xff] }
 0xc85   : > { %v8530_v53 = vpop.f32.mrf.mxu1 }
 0xc86   : > { %v8603_v48 = vpop.f32.mrf.mxu2  ;;  %9270 = vmatmul.f32.gmra.mxu2 %v16996_v15 }
 0xc87   : > { %9191 = vmatmul.f32.gmra.mxu1 %v17109_v47  ;;  %v8604_v32 = vadd.f32 %v8603_v48, %v8527_v9 }
 0xc88   : > { %v8690_v0 = vpop.f32.mrf.mxu3  ;;  %9337 = vmatmul.f32.gmra.mxu3 %v16996_v15 }
 0xc89   : > { %v14982_v58 = vadd.f32 %v8690_v0, %v8604_v32 }
 0xc8b   : > { %v8443_v54 = vpop.f32.mrf.mxu0  ;;  %9109 = vmatmul.f32.gmra.mxu0 %v17110_v59  ;;  %v17119_v59 = vld [vmem:[#allocation106_spill] sm:$0xff] }
 0xc8c   : > { %v8531_v23 = vadd.f32 %v8530_v53, %v8443_v54  ;;  %v17118_v53 = vld [vmem:[#allocation111_spill] sm:$0xff] }
 0xc8d   : > { %v8534_v2 = vpop.f32.mrf.mxu1 }
 0xc8e   : > { %v8608_v8 = vpop.f32.mrf.mxu2  ;;  %9274 = vmatmul.f32.gmra.mxu2 %v17005_v61 }
 0xc8f   : > { %9197 = vmatmul.f32.gmra.mxu1 %v17111_v60  ;;  %v8609_v50 = vadd.f32 %v8608_v8, %v8531_v23 }
 0xc90   : > { %v8696_v5 = vpop.f32.mrf.mxu3  ;;  %9341 = vmatmul.f32.gmra.mxu3 %v17005_v61 }
 0xc91   : > { %v14988_v36 = vadd.f32 %v8696_v5, %v8609_v50  ;;  %v17120_v5 = vld [vmem:[#allocation108_spill] sm:$0xff] }
 0xc93   : > { %v8451_v15 = vpop.f32.mrf.mxu0  ;;  %9114 = vmatmul.f32.gmra.mxu0 %v17112_v42 }
 0xc94   : > { %v8535_v10 = vadd.f32 %v8534_v2, %v8451_v15 }
 0xc95   : > { %v8538_v38 = vpop.f32.mrf.mxu1 }
 0xc96   : > { %v8613_v18 = vpop.f32.mrf.mxu2  ;;  %9278 = vmatmul.f32.gmra.mxu2 %v17014_v56 }
 0xc97   : > { %9203 = vmatmul.f32.gmra.mxu1 %v17113_v43  ;;  %v8614_v31 = vadd.f32 %v8613_v18, %v8535_v10  ;;  %v17122_v43 = vld [vmem:[#allocation115_spill] sm:$0xff]  ;;  %v17123_v10 = vld [vmem:[#allocation109_spill] sm:$0xff] }
 0xc98   : > { %v8702_v41 = vpop.f32.mrf.mxu3  ;;  %9345 = vmatmul.f32.gmra.mxu3 %v17014_v56 }
 0xc99   : > { %v14994_v45 = vadd.f32 %v8702_v41, %v8614_v31  ;;  %v17124_v41 = vld [vmem:[#allocation112_spill] sm:$0xff] }
 0xc9b   : > { %v8459_v61 = vpop.f32.mrf.mxu0  ;;  %9119 = vmatmul.f32.gmra.mxu0 %v17114_v13  ;;  %v17127_v13 = vld [vmem:[#allocation113_spill] sm:$0xff] }
 0xc9c   : > { %v8539_v51 = vadd.f32 %v8538_v38, %v8459_v61  ;;  %v17126_v38 = vld [vmem:[#allocation119_spill] sm:$0xff] }
 0xc9d   : > { %v8542_v1 = vpop.f32.mrf.mxu1 }
 0xc9e   : > { %v8618_v46 = vpop.f32.mrf.mxu2  ;;  %9282 = vmatmul.f32.gmra.mxu2 %v17023_v24 }
 0xc9f   : > { %9209 = vmatmul.f32.gmra.mxu1 %v17115_v12  ;;  %v8619_v6 = vadd.f32 %v8618_v46, %v8539_v51  ;;  %v17128_v46 = vld [vmem:[#allocation116_spill] sm:$0xff] }
 0xca0   : > { %v8708_v40 = vpop.f32.mrf.mxu3  ;;  %9349 = vmatmul.f32.gmra.mxu3 %v17023_v24 }
 0xca1   : > { %v15000_v52 = vadd.f32 %v8708_v40, %v8619_v6  ;;  %v17129_v40 = vld [vmem:[#allocation114_spill] sm:$0xff] }
 0xca3   : > { %v8467_v56 = vpop.f32.mrf.mxu0  ;;  %9124 = vmatmul.f32.gmra.mxu0 %v17116_v49 }
 0xca4   : > { %v8543_v47 = vadd.f32 %v8542_v1, %v8467_v56 }
 0xca5   : > { %v8808_v54 = vpop.f32.mrf.mxu1 }
 0xca6   : > { %v8623_v9 = vpop.f32.mrf.mxu2  ;;  %9286 = vmatmul.f32.gmra.mxu2 %v17032_v30 }
 0xca7   : > { %9215 = vmatmul.f32.gmra.mxu1 %v17117_v20  ;;  %v8624_v0 = vadd.f32 %v8623_v9, %v8543_v47  ;;  %v17130_v47 = vld [vmem:[#allocation123_spill] sm:$0xff]  ;;  %v17131_v9 = vld [vmem:[#allocation117_spill] sm:$0xff] }
 0xca8   : > { %v8714_v48 = vpop.f32.mrf.mxu3  ;;  %9353 = vmatmul.f32.gmra.mxu3 %v17032_v30  ;;  %v17121_v30 = vld [vmem:[#allocation107_spill] sm:$0xff] }
 0xca9   : > { %v15006_v32 = vadd.f32 %v8714_v48, %v8624_v0 }
 0xcab   : > { %v8741_v24 = vpop.f32.mrf.mxu0  ;;  %9387 = vmatmul.f32.vlgmr.msrb.gmra.mxu0 %v17118_v53 }
 0xcac   : > { %v8742_v60 = vadd.f32 %v8741_v24, %v14878_v3  ;;  %10089 = vmatpush.msrb.mxu0 %v14800_v27  ;;  %v17132_v24 = vld [vmem:[#allocation120_spill] sm:$0xff] }
 0xcad   : > { %v8812_v42 = vpop.f32.mrf.mxu1 }
 0xcae   : > { %v8881_v23 = vpop.f32.mrf.mxu2  ;;  %9576 = vmatmul.f32.vlgmr.msrb.gmra.mxu2 %v17121_v30  ;;  %v8809_v50 = vadd.f32 %v8808_v54, %v8742_v60  ;;  %10092 = vmatpush.msrb.mxu0 %v14808_v57  ;;  %v17133_v54 = vld [vmem:[#allocation118_spill] sm:$0xff]  ;;  %v17134_v30 = vld [vmem:[#allocation127_spill] sm:$0xff] }
 0xcaf   : > { %9506 = vmatmul.f32.vlgmr.msrb.gmra.mxu1 %v17119_v59  ;;  %10262 = vmatpush.msrb.mxu2 %v10014_v19 }
 0xcb0   : > { %v9000_v8 = vpop.f32.mrf.mxu3  ;;  %9656 = vmatmul.f32.vlgmr.msrb.gmra.mxu3 %v17120_v5  ;;  %10169 = vmatpush.msrb.mxu1 %v14782_v17  ;;  %v8882_v3 = vadd.f32 %v8881_v23, %v8809_v50  ;;  %v17135_v50 = vld [vmem:[#allocation121_spill] sm:$0xff] }
 0xcb1   : > { %10331 = vmatpush.msrb.mxu3 %v14782_v17  ;;  %10266 = vmatpush.msrb.mxu2 %v10020_v39  ;;  %v17125_v17 = vld [vmem:[#allocation110_spill] sm:$0xff] }
 0xcb2   : > { %10171 = vmatpush.msrb.mxu1 %v14790_v4  ;;  %v15023_v15 = vadd.f32 %v9000_v8, %v8882_v3 }
 0xcb3   : > { %10333 = vmatpush.msrb.mxu3 %v14790_v4  ;;  %v8745_v2 = vpop.f32.mrf.mxu0  ;;  %9395 = vmatmul.f32.gmra.mxu0 %v17122_v43  ;;  %v17137_v43 = vld [vmem:[#allocation122_spill] sm:$0xff] }
 0xcb4   : > { %v8746_v27 = vadd.f32 %v8745_v2, %v14906_v34 }
 0xcb5   : > { %v8816_v61 = vpop.f32.mrf.mxu1 }
 0xcb6   : > { %v8889_v19 = vpop.f32.mrf.mxu2  ;;  %9581 = vmatmul.f32.gmra.mxu2 %v17125_v17  ;;  %v8813_v57 = vadd.f32 %v8812_v42, %v8746_v27  ;;  %v17136_v42 = vld [vmem:[#allocation124_spill] sm:$0xff] }
 0xcb7   : > { %9510 = vmatmul.f32.gmra.mxu1 %v17123_v10 }
 0xcb8   : > { %v9004_v18 = vpop.f32.mrf.mxu3  ;;  %9662 = vmatmul.f32.gmra.mxu3 %v17124_v41  ;;  %v8890_v39 = vadd.f32 %v8889_v19, %v8813_v57  ;;  %v17138_v57 = vld [vmem:[#allocation131_spill] sm:$0xff] }
 0xcba   : > { %v15030_v31 = vadd.f32 %v9004_v18, %v8890_v39  ;;  %v17139_v39 = vld [vmem:[#allocation125_spill] sm:$0xff] }
 0xcbb   : > { %v8749_v4 = vpop.f32.mrf.mxu0  ;;  %9403 = vmatmul.f32.gmra.mxu0 %v17126_v38  ;;  %v17140_v38 = vld [vmem:[#allocation128_spill] sm:$0xff] }
 0xcbc   : > { %v8750_v12 = vadd.f32 %v8749_v4, %v14930_v44 }
 0xcbd   : > { %v8820_v20 = vpop.f32.mrf.mxu1 }
 0xcbe   : > { %v8897_v51 = vpop.f32.mrf.mxu2  ;;  %9586 = vmatmul.f32.gmra.mxu2 %v17129_v40  ;;  %v8817_v6 = vadd.f32 %v8816_v61, %v8750_v12  ;;  %v17141_v12 = vld [vmem:[#allocation126_spill] sm:$0xff] }
 0xcbf   : > { %9514 = vmatmul.f32.gmra.mxu1 %v17127_v13 }
 0xcc0   : > { %v9008_v34 = vpop.f32.mrf.mxu3  ;;  %9668 = vmatmul.f32.gmra.mxu3 %v17128_v46  ;;  %v8898_v56 = vadd.f32 %v8897_v51, %v8817_v6 }
 0xcc2   : > { %v15037_v1 = vadd.f32 %v9008_v34, %v8898_v56  ;;  %v17142_v56 = vld [vmem:[#allocation135_spill] sm:$0xff] }
 0xcc3   : > { %v8753_v49 = vpop.f32.mrf.mxu0  ;;  %9411 = vmatmul.f32.gmra.mxu0 %v17130_v47 }
 0xcc4   : > { %v8754_v48 = vadd.f32 %v8753_v49, %v14952_v22  ;;  %v17143_v49 = vld [vmem:[#allocation129_spill] sm:$0xff] }
 0xcc5   : > { %v8824_v5 = vpop.f32.mrf.mxu1 }
 0xcc6   : > { %v8905_v0 = vpop.f32.mrf.mxu2  ;;  %9591 = vmatmul.f32.gmra.mxu2 %v17133_v54  ;;  %v8821_v53 = vadd.f32 %v8820_v20, %v8754_v48  ;;  %v17144_v48 = vld [vmem:[#allocation132_spill] sm:$0xff] }
 0xcc7   : > { %9518 = vmatmul.f32.gmra.mxu1 %v17131_v9 }
 0xcc8   : > { %v9012_v44 = vpop.f32.mrf.mxu3  ;;  %9674 = vmatmul.f32.gmra.mxu3 %v17132_v24  ;;  %v8906_v60 = vadd.f32 %v8905_v0, %v8821_v53  ;;  %v17145_v0 = vld [vmem:[#allocation130_spill] sm:$0xff] }
 0xcca   : > { %v15044_v23 = vadd.f32 %v9012_v44, %v8906_v60 }
 0xccb   : > { %v8757_v8 = vpop.f32.mrf.mxu0  ;;  %9419 = vmatmul.f32.gmra.mxu0 %v17134_v30 }
 0xccc   : > { %v8758_v3 = vadd.f32 %v8757_v8, %v14964_v29  ;;  %v17146_v8 = vld [vmem:[#allocation139_spill] sm:$0xff] }
 0xccd   : > { %v8828_v17 = vpop.f32.mrf.mxu1 }
 0xcce   : > { %v8913_v2 = vpop.f32.mrf.mxu2  ;;  %9596 = vmatmul.f32.gmra.mxu2 %v17137_v43  ;;  %v8825_v27 = vadd.f32 %v8824_v5, %v8758_v3  ;;  %v17147_v5 = vld [vmem:[#allocation133_spill] sm:$0xff] }
 0xccf   : > { %9522 = vmatmul.f32.gmra.mxu1 %v17135_v50 }
 0xcd0   : > { %v9016_v22 = vpop.f32.mrf.mxu3  ;;  %9680 = vmatmul.f32.gmra.mxu3 %v17136_v42  ;;  %v8914_v19 = vadd.f32 %v8913_v2, %v8825_v27  ;;  %v17148_v2 = vld [vmem:[#allocation136_spill] sm:$0xff] }
 0xcd2   : > { %v15051_v18 = vadd.f32 %v9016_v22, %v8914_v19  ;;  %v17149_v22 = vld [vmem:[#allocation134_spill] sm:$0xff] }
 0xcd3   : > { %v8761_v41 = vpop.f32.mrf.mxu0  ;;  %9427 = vmatmul.f32.gmra.mxu0 %v17138_v57  ;;  %v17151_v57 = vld [vmem:[#allocation137_spill] sm:$0xff] }
 0xcd4   : > { %v8762_v4 = vadd.f32 %v8761_v41, %v14970_v11 }
 0xcd5   : > { %v8832_v6 = vpop.f32.mrf.mxu1 }
 0xcd6   : > { %v8921_v61 = vpop.f32.mrf.mxu2  ;;  %9601 = vmatmul.f32.gmra.mxu2 %v17141_v12  ;;  %v8829_v51 = vadd.f32 %v8828_v17, %v8762_v4  ;;  %v17150_v17 = vld [vmem:[#allocation143_spill] sm:$0xff] }
 0xcd7   : > { %9526 = vmatmul.f32.gmra.mxu1 %v17139_v39 }
 0xcd8   : > { %v9020_v29 = vpop.f32.mrf.mxu3  ;;  %9686 = vmatmul.f32.gmra.mxu3 %v17140_v38  ;;  %v8922_v34 = vadd.f32 %v8921_v61, %v8829_v51  ;;  %v17153_v38 = vld [vmem:[#allocation138_spill] sm:$0xff] }
 0xcda   : > { %v15058_v46 = vadd.f32 %v9020_v29, %v8922_v34  ;;  %v17152_v29 = vld [vmem:[#allocation140_spill] sm:$0xff] }
 0xcdb   : > { %v8765_v40 = vpop.f32.mrf.mxu0  ;;  %9435 = vmatmul.f32.gmra.mxu0 %v17142_v56  ;;  %v17154_v56 = vld [vmem:[#allocation147_spill] sm:$0xff] }
 0xcdc   : > { %v8766_v20 = vadd.f32 %v8765_v40, %v14976_v55 }
 0xcdd   : > { %v8836_v60 = vpop.f32.mrf.mxu1 }
 0xcde   : > { %v8929_v47 = vpop.f32.mrf.mxu2  ;;  %9606 = vmatmul.f32.gmra.mxu2 %v17145_v0  ;;  %v8833_v44 = vadd.f32 %v8832_v6, %v8766_v20  ;;  %v17155_v20 = vld [vmem:[#allocation141_spill] sm:$0xff]  ;;  %v17157_v0 = vld [vmem:[#allocation142_spill] sm:$0xff] }
 0xcdf   : > { %9530 = vmatmul.f32.gmra.mxu1 %v17143_v49 }
 0xce0   : > { %v9024_v11 = vpop.f32.mrf.mxu3  ;;  %9692 = vmatmul.f32.gmra.mxu3 %v17144_v48  ;;  %v8930_v24 = vadd.f32 %v8929_v47, %v8833_v44  ;;  %v17156_v48 = vld [vmem:[#allocation144_spill] sm:$0xff] }
 0xce2   : > { %v15065_v54 = vadd.f32 %v9024_v11, %v8930_v24 }
 0xce3   : > { %v8769_v53 = vpop.f32.mrf.mxu0  ;;  %9443 = vmatmul.f32.gmra.mxu0 %v17146_v8 }
 0xce4   : > { %v8770_v30 = vadd.f32 %v8769_v53, %v14982_v58 }
 0xce5   : > { %v8840_v41 = vpop.f32.mrf.mxu1 }
 0xce6   : > { %v8937_v3 = vpop.f32.mrf.mxu2  ;;  %9611 = vmatmul.f32.gmra.mxu2 %v17149_v22  ;;  %v8837_v42 = vadd.f32 %v8836_v60, %v8770_v30  ;;  %v17158_v30 = vld [vmem:[#allocation151_spill] sm:$0xff]  ;;  %v17160_v22 = vld [vmem:[#allocation148_spill] sm:$0xff] }
 0xce7   : > { %9534 = vmatmul.f32.gmra.mxu1 %v17147_v5 }
 0xce8   : > { %v9028_v55 = vpop.f32.mrf.mxu3  ;;  %9698 = vmatmul.f32.gmra.mxu3 %v17148_v2  ;;  %v8938_v43 = vadd.f32 %v8937_v3, %v8837_v42  ;;  %v17159_v3 = vld [vmem:[#allocation145_spill] sm:$0xff]  ;;  %v17161_v42 = vld [vmem:[#allocation146_spill] sm:$0xff] }
 0xcea   : > { %v15072_v27 = vadd.f32 %v9028_v55, %v8938_v43 }
 0xceb   : > { %v8773_v19 = vpop.f32.mrf.mxu0  ;;  %9451 = vmatmul.f32.gmra.mxu0 %v17150_v17 }
 0xcec   : > { %v8774_v4 = vadd.f32 %v8773_v19, %v14988_v36 }
 0xced   : > { %v8844_v6 = vpop.f32.mrf.mxu1 }
 0xcee   : > { %v8945_v61 = vpop.f32.mrf.mxu2  ;;  %9616 = vmatmul.f32.gmra.mxu2 %v17153_v38  ;;  %v8841_v12 = vadd.f32 %v8840_v41, %v8774_v4 }
 0xcef   : > { %9538 = vmatmul.f32.gmra.mxu1 %v17151_v57 }
 0xcf0   : > { %v9032_v58 = vpop.f32.mrf.mxu3  ;;  %9704 = vmatmul.f32.gmra.mxu3 %v17152_v29  ;;  %v8946_v51 = vadd.f32 %v8945_v61, %v8841_v12  ;;  %v17162_v61 = vld [vmem:[#allocation156_spill] sm:$0xff] }
 0xcf1   : > { %v17164_v12 = vld [vmem:[#allocation152_spill] sm:$0xff] }
 0xcf2   : > { %v15079_v34 = vadd.f32 %v9032_v58, %v8946_v51  ;;  %v17163_v58 = vld [vmem:[#allocation149_spill] sm:$0xff]  ;;  %v17165_v51 = vld [vmem:[#allocation150_spill] sm:$0xff] }
 0xcf3   : > { %v8777_v40 = vpop.f32.mrf.mxu0  ;;  %9459 = vmatmul.f32.gmra.mxu0 %v17154_v56 }
 0xcf4   : > { %v8778_v47 = vadd.f32 %v8777_v40, %v14994_v45 }
 0xcf5   : > { %v8848_v8 = vpop.f32.mrf.mxu1 }
 0xcf6   : > { %v8953_v11 = vpop.f32.mrf.mxu2  ;;  %9621 = vmatmul.f32.gmra.mxu2 %v17157_v0  ;;  %v8845_v44 = vadd.f32 %v8844_v6, %v8778_v47  ;;  %v17166_v0 = vld [vmem:[#allocation153_spill] sm:$0xff] }
 0xcf7   : > { %9542 = vmatmul.f32.gmra.mxu1 %v17155_v20 }
 0xcf8   : > { %v9036_v36 = vpop.f32.mrf.mxu3  ;;  %9710 = vmatmul.f32.gmra.mxu3 %v17156_v48  ;;  %v8954_v24 = vadd.f32 %v8953_v11, %v8845_v44  ;;  %v17167_v44 = vld [vmem:[#allocation161_spill] sm:$0xff] }
 0xcfa   : > { %v15086_v53 = vadd.f32 %v9036_v36, %v8954_v24 }
 0xcfb   : > { %v8781_v60 = vpop.f32.mrf.mxu0  ;;  %9467 = vmatmul.f32.gmra.mxu0 %v17158_v30 }
 0xcfc   : > { %v8782_v55 = vadd.f32 %v8781_v60, %v15000_v52 }
 0xcfd   : > { %v8852_v4 = vpop.f32.mrf.mxu1 }
 0xcfe   : > { %v8961_v2 = vpop.f32.mrf.mxu2  ;;  %9626 = vmatmul.f32.gmra.mxu2 %v17161_v42  ;;  %v8849_v43 = vadd.f32 %v8848_v8, %v8782_v55 }
 0xcff   : > { %9546 = vmatmul.f32.gmra.mxu1 %v17159_v3 }
 0xd00   : > { %v9040_v45 = vpop.f32.mrf.mxu3  ;;  %9716 = vmatmul.f32.gmra.mxu3 %v17160_v22  ;;  %v8962_v19 = vadd.f32 %v8961_v2, %v8849_v43  ;;  %v17169_v22 = vld [vmem:[#allocation165_spill] sm:$0xff] }
 0xd02   : > { %v15093_v41 = vadd.f32 %v9040_v45, %v8962_v19  ;;  %v17168_v45 = vld [vmem:[#allocation158_spill] sm:$0xff] }
 0xd03   : > { %v8785_v17 = vpop.f32.mrf.mxu0  ;;  %9475 = vmatmul.f32.gmra.mxu0 %v17162_v61 }
 0xd04   : > { %v8786_v29 = vadd.f32 %v8785_v17, %v15006_v32 }
 0xd05   : > { %v9150_v11 = vpop.f32.mrf.mxu1 }
 0xd06   : > { %v8969_v38 = vpop.f32.mrf.mxu2  ;;  %9631 = vmatmul.f32.gmra.mxu2 %v17165_v51  ;;  %v8853_v40 = vadd.f32 %v8852_v4, %v8786_v29  ;;  %v17170_v29 = vld [vmem:[#allocation163_spill] sm:$0xff] }
 0xd07   : > { %9550 = vmatmul.f32.gmra.mxu1 %v17163_v58 }
 0xd08   : > { %v9044_v52 = vpop.f32.mrf.mxu3  ;;  %9722 = vmatmul.f32.gmra.mxu3 %v17164_v12  ;;  %v8970_v6 = vadd.f32 %v8969_v38, %v8853_v40  ;;  %v17171_v38 = vld [vmem:[#allocation170_spill] sm:$0xff] }
 0xd0a   : > { %v15100_v56 = vadd.f32 %v9044_v52, %v8970_v6 }
 0xd0b   : > { %v9070_v47 = vpop.f32.mrf.mxu0  ;;  %9749 = vmatmul.f32.vlgmr.msra.gmra.mxu0 %v17119_v59 }
 0xd0c   : > { %v9071_v36 = vadd.f32 %v9070_v47, %v15023_v15 }
 0xd0d   : > { %v9156_v55 = vpop.f32.mrf.mxu1 }
 0xd0e   : > { %v9243_v48 = vpop.f32.mrf.mxu2  ;;  %9906 = vmatmul.f32.vlgmr.msra.gmra.mxu2 %v17167_v44  ;;  %v9151_v24 = vadd.f32 %v9150_v11, %v9071_v36  ;;  %v17172_v11 = vld [vmem:[#allocation167_spill] sm:$0xff] }
 0xd0f   : > { %9816 = vmatmul.f32.vlgmr.msra.gmra.mxu1 %v17119_v59  ;;  %v17173_v36 = vld [vmem:[#allocation175_spill] sm:$0xff] }
 0xd10   : > { %v9310_v32 = vpop.f32.mrf.mxu3  ;;  %10025 = vmatmul.f32.vlgmr.msra.gmra.mxu3 %v17166_v0  ;;  %v9244_v60 = vadd.f32 %v9243_v48, %v9151_v24 }
 0xd12   : > { %v15107_v8 = vadd.f32 %v9310_v32, %v9244_v60 }
 0xd13   : > { %v9075_v30 = vpop.f32.mrf.mxu0  ;;  %9753 = vmatmul.f32.gmra.mxu0 %v17123_v10 }
 0xd14   : > { %v9076_v59 = vadd.f32 %v9075_v30, %v15030_v31 }
 0xd15   : > { %v9162_v4 = vpop.f32.mrf.mxu1 }
 0xd16   : > { %v9247_v2 = vpop.f32.mrf.mxu2  ;;  %9914 = vmatmul.f32.gmra.mxu2 %v17169_v22  ;;  %v9157_v42 = vadd.f32 %v9156_v55, %v9076_v59  ;;  %v17174_v55 = vld [vmem:[#allocation172_spill] sm:$0xff] }
 0xd17   : > { %9820 = vmatmul.f32.gmra.mxu1 %v17123_v10  ;;  %v17175_v59 = vld [vmem:[#allocation180_spill] sm:$0xff] }
 0xd18   : > { %v9314_v15 = vpop.f32.mrf.mxu3  ;;  %10029 = vmatmul.f32.gmra.mxu3 %v17168_v45  ;;  %v9248_v43 = vadd.f32 %v9247_v2, %v9157_v42 }
 0xd1a   : > { %v15114_v19 = vadd.f32 %v9314_v15, %v9248_v43 }
 0xd1b   : > { %v9080_v17 = vpop.f32.mrf.mxu0  ;;  %9757 = vmatmul.f32.gmra.mxu0 %v17127_v13 }
 0xd1c   : > { %v9081_v10 = vadd.f32 %v9080_v17, %v15037_v1 }
 0xd1d   : > { %v9168_v6 = vpop.f32.mrf.mxu1 }
 0xd1e   : > { %v9251_v61 = vpop.f32.mrf.mxu2  ;;  %9922 = vmatmul.f32.gmra.mxu2 %v17171_v38  ;;  %v9163_v52 = vadd.f32 %v9162_v4, %v9081_v10  ;;  %v17176_v4 = vld [vmem:[#allocation177_spill] sm:$0xff] }
 0xd1f   : > { %9824 = vmatmul.f32.gmra.mxu1 %v17127_v13  ;;  %v17177_v10 = vld [vmem:[#allocation185_spill] sm:$0xff] }
 0xd20   : > { %v9318_v31 = vpop.f32.mrf.mxu3  ;;  %10033 = vmatmul.f32.gmra.mxu3 %v17170_v29  ;;  %v9252_v12 = vadd.f32 %v9251_v61, %v9163_v52 }
 0xd22   : > { %v15121_v51 = vadd.f32 %v9318_v31, %v9252_v12 }
 0xd23   : > { %v9085_v40 = vpop.f32.mrf.mxu0  ;;  %9761 = vmatmul.f32.gmra.mxu0 %v17131_v9 }
 0xd24   : > { %v9086_v13 = vadd.f32 %v9085_v40, %v15044_v23 }
 0xd25   : > { %v9174_v60 = vpop.f32.mrf.mxu1 }
 0xd26   : > { %v9255_v47 = vpop.f32.mrf.mxu2  ;;  %9930 = vmatmul.f32.gmra.mxu2 %v17173_v36  ;;  %v9169_v48 = vadd.f32 %v9168_v6, %v9086_v13  ;;  %v17178_v6 = vld [vmem:[#allocation182_spill] sm:$0xff] }
 0xd27   : > { %9828 = vmatmul.f32.gmra.mxu1 %v17131_v9  ;;  %v17179_v13 = vld [vmem:[#allocation190_spill] sm:$0xff] }
 0xd28   : > { %v9322_v1 = vpop.f32.mrf.mxu3  ;;  %10037 = vmatmul.f32.gmra.mxu3 %v17172_v11  ;;  %v9256_v32 = vadd.f32 %v9255_v47, %v9169_v48 }
 0xd2a   : > { %v15128_v44 = vadd.f32 %v9322_v1, %v9256_v32 }
 0xd2b   : > { %v9090_v24 = vpop.f32.mrf.mxu0  ;;  %9765 = vmatmul.f32.gmra.mxu0 %v17135_v50 }
 0xd2c   : > { %v9091_v9 = vadd.f32 %v9090_v24, %v15051_v18 }
 0xd2d   : > { %v9180_v43 = vpop.f32.mrf.mxu1 }
 0xd2e   : > { %v9259_v30 = vpop.f32.mrf.mxu2  ;;  %9938 = vmatmul.f32.gmra.mxu2 %v17175_v59  ;;  %v9175_v2 = vadd.f32 %v9174_v60, %v9091_v9  ;;  %v17180_v60 = vld [vmem:[#allocation187_spill] sm:$0xff]  ;;  %v17181_v9 = vld [vmem:[#allocation194_spill] sm:$0xff] }
 0xd2f   : > { %9832 = vmatmul.f32.gmra.mxu1 %v17135_v50 }
 0xd30   : > { %v9326_v23 = vpop.f32.mrf.mxu3  ;;  %10041 = vmatmul.f32.gmra.mxu3 %v17174_v55  ;;  %v9260_v15 = vadd.f32 %v9259_v30, %v9175_v2 }
 0xd32   : > { %v15135_v22 = vadd.f32 %v9326_v23, %v9260_v15 }
 0xd33   : > { %v9095_v42 = vpop.f32.mrf.mxu0  ;;  %9769 = vmatmul.f32.gmra.mxu0 %v17139_v39 }
 0xd34   : > { %v9096_v50 = vadd.f32 %v9095_v42, %v15058_v46 }
 0xd35   : > { %v9186_v12 = vpop.f32.mrf.mxu1 }
 0xd36   : > { %v9263_v17 = vpop.f32.mrf.mxu2  ;;  %9946 = vmatmul.f32.gmra.mxu2 %v17177_v10  ;;  %v9181_v61 = vadd.f32 %v9180_v43, %v9096_v50  ;;  %v17182_v43 = vld [vmem:[#allocation192_spill] sm:$0xff]  ;;  %v17183_v50 = vld [vmem:[#allocation198_spill] sm:$0xff] }
 0xd37   : > { %9836 = vmatmul.f32.gmra.mxu1 %v17139_v39 }
 0xd38   : > { %v9330_v18 = vpop.f32.mrf.mxu3  ;;  %10045 = vmatmul.f32.gmra.mxu3 %v17176_v4  ;;  %v9264_v31 = vadd.f32 %v9263_v17, %v9181_v61 }
 0xd3a   : > { %v15142_v38 = vadd.f32 %v9330_v18, %v9264_v31 }
 0xd3b   : > { %v9100_v52 = vpop.f32.mrf.mxu0  ;;  %9773 = vmatmul.f32.gmra.mxu0 %v17143_v49 }
 0xd3c   : > { %v9101_v39 = vadd.f32 %v9100_v52, %v15065_v54 }
 0xd3d   : > { %v9192_v32 = vpop.f32.mrf.mxu1 }
 0xd3e   : > { %v9267_v40 = vpop.f32.mrf.mxu2  ;;  %9954 = vmatmul.f32.gmra.mxu2 %v17179_v13  ;;  %v9187_v47 = vadd.f32 %v9186_v12, %v9101_v39  ;;  %v17184_v12 = vld [vmem:[#allocation196_spill] sm:$0xff]  ;;  %v17185_v39 = vld [vmem:[#allocation202_spill] sm:$0xff] }
 0xd3f   : > { %9840 = vmatmul.f32.gmra.mxu1 %v17143_v49 }
 0xd40   : > { %v9334_v46 = vpop.f32.mrf.mxu3  ;;  %10049 = vmatmul.f32.gmra.mxu3 %v17178_v6  ;;  %v9268_v1 = vadd.f32 %v9267_v40, %v9187_v47 }
 0xd42   : > { %v15149_v36 = vadd.f32 %v9334_v46, %v9268_v1 }
 0xd43   : > { %v9105_v48 = vpop.f32.mrf.mxu0  ;;  %9777 = vmatmul.f32.gmra.mxu0 %v17147_v5 }
 0xd44   : > { %v9106_v49 = vadd.f32 %v9105_v48, %v15072_v27 }
 0xd45   : > { %v9198_v15 = vpop.f32.mrf.mxu1 }
 0xd46   : > { %v9271_v24 = vpop.f32.mrf.mxu2  ;;  %9962 = vmatmul.f32.gmra.mxu2 %v17181_v9  ;;  %v9193_v30 = vadd.f32 %v9192_v32, %v9106_v49  ;;  %v17186_v32 = vld [vmem:[#allocation200_spill] sm:$0xff]  ;;  %v17187_v49 = vld [vmem:[#allocation206_spill] sm:$0xff] }
 0xd47   : > { %9844 = vmatmul.f32.gmra.mxu1 %v17147_v5 }
 0xd48   : > { %v9338_v54 = vpop.f32.mrf.mxu3  ;;  %10053 = vmatmul.f32.gmra.mxu3 %v17180_v60  ;;  %v9272_v23 = vadd.f32 %v9271_v24, %v9193_v30 }
 0xd4a   : > { %v15156_v59 = vadd.f32 %v9338_v54, %v9272_v23 }
 0xd4b   : > { %v9110_v2 = vpop.f32.mrf.mxu0  ;;  %9781 = vmatmul.f32.gmra.mxu0 %v17151_v57 }
 0xd4c   : > { %v9111_v5 = vadd.f32 %v9110_v2, %v15079_v34 }
 0xd4d   : > { %v9204_v31 = vpop.f32.mrf.mxu1 }
 0xd4e   : > { %v9275_v42 = vpop.f32.mrf.mxu2  ;;  %9970 = vmatmul.f32.gmra.mxu2 %v17183_v50  ;;  %v9199_v17 = vadd.f32 %v9198_v15, %v9111_v5  ;;  %v17188_v15 = vld [vmem:[#allocation204_spill] sm:$0xff] }
 0xd4f   : > { %9848 = vmatmul.f32.gmra.mxu1 %v17151_v57  ;;  %v17189_v5 = vld [vmem:[#allocation208_spill] sm:$0xff] }
 0xd50   : > { %v9342_v27 = vpop.f32.mrf.mxu3  ;;  %10057 = vmatmul.f32.gmra.mxu3 %v17182_v43  ;;  %v9276_v18 = vadd.f32 %v9275_v42, %v9199_v17 }
 0xd52   : > { %v15163_v10 = vadd.f32 %v9342_v27, %v9276_v18 }
 0xd53   : > { %v9115_v61 = vpop.f32.mrf.mxu0  ;;  %9785 = vmatmul.f32.gmra.mxu0 %v17155_v20 }
 0xd54   : > { %v9116_v57 = vadd.f32 %v9115_v61, %v15086_v53  ;;  %v17190_v61 = vld [vmem:[#allocation155_spill] sm:$0xff] }
 0xd55   : > { %v9210_v1 = vpop.f32.mrf.mxu1 }
 0xd56   : > { %v9279_v52 = vpop.f32.mrf.mxu2  ;;  %9978 = vmatmul.f32.gmra.mxu2 %v17185_v39  ;;  %v9205_v40 = vadd.f32 %v9204_v31, %v9116_v57  ;;  %v17191_v31 = vld [vmem:[#allocation157_spill] sm:$0xff] }
 0xd57   : > { %9852 = vmatmul.f32.gmra.mxu1 %v17155_v20 }
 0xd58   : > { %v9346_v34 = vpop.f32.mrf.mxu3  ;;  %10061 = vmatmul.f32.gmra.mxu3 %v17184_v12  ;;  %v9280_v46 = vadd.f32 %v9279_v52, %v9205_v40 }
 0xd5a   : > { %v15170_v13 = vadd.f32 %v9346_v34, %v9280_v46  ;;  %v17192_v46 = vld [vmem:[#allocation160_spill] sm:$0xff] }
 0xd5b   : > { %v9120_v47 = vpop.f32.mrf.mxu0  ;;  %9789 = vmatmul.f32.gmra.mxu0 %v17159_v3 }
 0xd5c   : > { %v9121_v20 = vadd.f32 %v9120_v47, %v15093_v41  ;;  %v17193_v47 = vld [vmem:[#allocation162_spill] sm:$0xff] }
 0xd5d   : > { %v9216_v23 = vpop.f32.mrf.mxu1 }
 0xd5e   : > { %v9283_v48 = vpop.f32.mrf.mxu2  ;;  %9986 = vmatmul.f32.gmra.mxu2 %v17187_v49  ;;  %v9211_v24 = vadd.f32 %v9210_v1, %v9121_v20 }
 0xd5f   : > { %9856 = vmatmul.f32.gmra.mxu1 %v17159_v3 }
 0xd60   : > { %v9350_v53 = vpop.f32.mrf.mxu3  ;;  %10065 = vmatmul.f32.gmra.mxu3 %v17186_v32  ;;  %v9284_v54 = vadd.f32 %v9283_v48, %v9211_v24 }
 0xd62   : > { %v15177_v9 = vadd.f32 %v9350_v53, %v9284_v54  ;;  %v17194_v54 = vld [vmem:[#allocation2_spill] sm:$0xff] }
 0xd63   : > { %v9125_v30 = vpop.f32.mrf.mxu0  ;;  %9793 = vmatmul.f32.gmra.mxu0 %v17163_v58 }
 0xd64   : > { %v9126_v3 = vadd.f32 %v9125_v30, %v15100_v56  ;;  %v17195_v30 = vld [vmem:[#allocation166_spill] sm:$0xff] }
 0xd65   : > { %v9507_v18 = vpop.f32.mrf.mxu1 }
 0xd66   : > { %v9287_v2 = vpop.f32.mrf.mxu2  ;;  %9994 = vmatmul.f32.gmra.mxu2 %v17189_v5  ;;  %v9217_v42 = vadd.f32 %v9216_v23, %v9126_v3 }
 0xd67   : > { %9860 = vmatmul.f32.gmra.mxu1 %v17163_v58 }
 0xd68   : > { %v9354_v41 = vpop.f32.mrf.mxu3  ;;  %10069 = vmatmul.f32.gmra.mxu3 %v17188_v15  ;;  %v9288_v27 = vadd.f32 %v9287_v2, %v9217_v42 }
 0xd6a   : > { %v15184_v50 = vadd.f32 %v9354_v41, %v9288_v27  ;;  %v17196_v27 = vld [vmem:[#allocation169_spill] sm:$0xff] }
 0xd6b   : > { %v9388_v17 = vpop.f32.mrf.mxu0  ;;  %10095 = vmatmul.f32.vlgmr.msrb.gmra.mxu0 %v17190_v61 }
 0xd6c   : > { %v9508_v57 = vadd.f32 %v9507_v18, %v9388_v17  ;;  %v17197_v17 = vld [vmem:[#allocation171_spill] sm:$0xff] }
 0xd6d   : > { %v9511_v40 = vpop.f32.mrf.mxu1 }
 0xd6e   : > { %v9577_v58 = vpop.f32.mrf.mxu2  ;;  %10268 = vmatmul.f32.vlgmr.msrb.gmra.mxu2 %v17166_v0 }
 0xd6f   : > { %10175 = vmatmul.f32.vlgmr.msrb.gmra.mxu1 %v17191_v31  ;;  %v9578_v56 = vadd.f32 %v9577_v58, %v9508_v57 }
 0xd70   : > { %v9657_v52 = vpop.f32.mrf.mxu3  ;;  %10335 = vmatmul.f32.vlgmr.msrb.gmra.mxu3 %v17166_v0 }
 0xd71   : > { %v15190_v34 = vadd.f32 %v9657_v52, %v9578_v56  ;;  %v17198_v56 = vld [vmem:[#allocation174_spill] sm:$0xff] }
 0xd73   : > { %v9396_v39 = vpop.f32.mrf.mxu0  ;;  %10100 = vmatmul.f32.gmra.mxu0 %v17192_v46 }
 0xd74   : > { %v9512_v1 = vadd.f32 %v9511_v40, %v9396_v39  ;;  %v17199_v39 = vld [vmem:[#allocation176_spill] sm:$0xff] }
 0xd75   : > { %v9515_v24 = vpop.f32.mrf.mxu1 }
 0xd76   : > { %v9582_v20 = vpop.f32.mrf.mxu2  ;;  %10272 = vmatmul.f32.gmra.mxu2 %v17168_v45 }
 0xd77   : > { %10181 = vmatmul.f32.gmra.mxu1 %v17193_v47  ;;  %v9583_v53 = vadd.f32 %v9582_v20, %v9512_v1 }
 0xd78   : > { %v9663_v48 = vpop.f32.mrf.mxu3  ;;  %10339 = vmatmul.f32.gmra.mxu3 %v17168_v45 }
 0xd79   : > { %v15196_v49 = vadd.f32 %v9663_v48, %v9583_v53  ;;  %v17200_v53 = vld [vmem:[#allocation179_spill] sm:$0xff] }
 0xd7b   : > { %v9404_v0 = vpop.f32.mrf.mxu0  ;;  %10105 = vmatmul.f32.gmra.mxu0 %v17194_v54 }
 0xd7c   : > { %v9516_v23 = vadd.f32 %v9515_v24, %v9404_v0  ;;  %v17201_v0 = vld [vmem:[#allocation181_spill] sm:$0xff] }
 0xd7d   : > { %v9519_v42 = vpop.f32.mrf.mxu1 }
 0xd7e   : > { %v9587_v3 = vpop.f32.mrf.mxu2  ;;  %10276 = vmatmul.f32.gmra.mxu2 %v17170_v29 }
 0xd7f   : > { %10187 = vmatmul.f32.gmra.mxu1 %v17195_v30  ;;  %v9588_v41 = vadd.f32 %v9587_v3, %v9516_v23 }
 0xd80   : > { %v9669_v2 = vpop.f32.mrf.mxu3  ;;  %10343 = vmatmul.f32.gmra.mxu3 %v17170_v29 }
 0xd81   : > { %v15202_v5 = vadd.f32 %v9669_v2, %v9588_v41  ;;  %v17202_v41 = vld [vmem:[#allocation184_spill] sm:$0xff] }
 0xd83   : > { %v9412_v45 = vpop.f32.mrf.mxu0  ;;  %10110 = vmatmul.f32.gmra.mxu0 %v17196_v27 }
 0xd84   : > { %v9520_v18 = vadd.f32 %v9519_v42, %v9412_v45  ;;  %v17203_v45 = vld [vmem:[#allocation186_spill] sm:$0xff] }
 0xd85   : > { %v9523_v52 = vpop.f32.mrf.mxu1 }
 0xd86   : > { %v9592_v61 = vpop.f32.mrf.mxu2  ;;  %10280 = vmatmul.f32.gmra.mxu2 %v17172_v11 }
 0xd87   : > { %10193 = vmatmul.f32.gmra.mxu1 %v17197_v17  ;;  %v9593_v57 = vadd.f32 %v9592_v61, %v9520_v18 }
 0xd88   : > { %v9675_v31 = vpop.f32.mrf.mxu3  ;;  %10347 = vmatmul.f32.gmra.mxu3 %v17172_v11 }
 0xd89   : > { %v15208_v58 = vadd.f32 %v9675_v31, %v9593_v57  ;;  %v17204_v57 = vld [vmem:[#allocation189_spill] sm:$0xff] }
 0xd8b   : > { %v9420_v29 = vpop.f32.mrf.mxu0  ;;  %10115 = vmatmul.f32.gmra.mxu0 %v17198_v56 }
 0xd8c   : > { %v9524_v40 = vadd.f32 %v9523_v52, %v9420_v29  ;;  %v17205_v29 = vld [vmem:[#allocation191_spill] sm:$0xff] }
 0xd8d   : > { %v9527_v48 = vpop.f32.mrf.mxu1 }
 0xd8e   : > { %v9597_v46 = vpop.f32.mrf.mxu2  ;;  %10284 = vmatmul.f32.gmra.mxu2 %v17174_v55 }
 0xd8f   : > { %10199 = vmatmul.f32.gmra.mxu1 %v17199_v39  ;;  %v9598_v1 = vadd.f32 %v9597_v46, %v9524_v40 }
 0xd90   : > { %v9681_v47 = vpop.f32.mrf.mxu3  ;;  %10351 = vmatmul.f32.gmra.mxu3 %v17174_v55 }
 0xd91   : > { %v15214_v20 = vadd.f32 %v9681_v47, %v9598_v1  ;;  %v17206_v1 = vld [vmem:[#allocation193_spill] sm:$0xff] }
 0xd93   : > { %v9428_v11 = vpop.f32.mrf.mxu0  ;;  %10120 = vmatmul.f32.gmra.mxu0 %v17200_v53 }
 0xd94   : > { %v9528_v24 = vadd.f32 %v9527_v48, %v9428_v11  ;;  %v17207_v11 = vld [vmem:[#allocation195_spill] sm:$0xff] }
 0xd95   : > { %v9531_v2 = vpop.f32.mrf.mxu1 }
 0xd96   : > { %v9602_v54 = vpop.f32.mrf.mxu2  ;;  %10288 = vmatmul.f32.gmra.mxu2 %v17176_v4 }
 0xd97   : > { %10205 = vmatmul.f32.gmra.mxu1 %v17201_v0  ;;  %v9603_v23 = vadd.f32 %v9602_v54, %v9528_v24 }
 0xd98   : > { %v9687_v30 = vpop.f32.mrf.mxu3  ;;  %10355 = vmatmul.f32.gmra.mxu3 %v17176_v4 }
 0xd99   : > { %v15220_v3 = vadd.f32 %v9687_v30, %v9603_v23  ;;  %v17208_v23 = vld [vmem:[#allocation197_spill] sm:$0xff] }
 0xd9b   : > { %v9436_v55 = vpop.f32.mrf.mxu0  ;;  %10125 = vmatmul.f32.gmra.mxu0 %v17202_v41 }
 0xd9c   : > { %v9532_v42 = vadd.f32 %v9531_v2, %v9436_v55  ;;  %v17209_v55 = vld [vmem:[#allocation199_spill] sm:$0xff] }
 0xd9d   : > { %v9535_v31 = vpop.f32.mrf.mxu1 }
 0xd9e   : > { %v9607_v27 = vpop.f32.mrf.mxu2  ;;  %10292 = vmatmul.f32.gmra.mxu2 %v17178_v6 }
 0xd9f   : > { %10211 = vmatmul.f32.gmra.mxu1 %v17203_v45  ;;  %v9608_v18 = vadd.f32 %v9607_v27, %v9532_v42 }
 0xda0   : > { %v9693_v17 = vpop.f32.mrf.mxu3  ;;  %10359 = vmatmul.f32.gmra.mxu3 %v17178_v6 }
 0xda1   : > { %v15226_v61 = vadd.f32 %v9693_v17, %v9608_v18  ;;  %v17210_v18 = vld [vmem:[#allocation201_spill] sm:$0xff] }
 0xda3   : > { %v9444_v4 = vpop.f32.mrf.mxu0  ;;  %10130 = vmatmul.f32.gmra.mxu0 %v17204_v57 }
 0xda4   : > { %v9536_v52 = vadd.f32 %v9535_v31, %v9444_v4  ;;  %v17211_v4 = vld [vmem:[#allocation203_spill] sm:$0xff] }
 0xda5   : > { %v9539_v47 = vpop.f32.mrf.mxu1 }
 0xda6   : > { %v9612_v56 = vpop.f32.mrf.mxu2  ;;  %10296 = vmatmul.f32.gmra.mxu2 %v17180_v60 }
 0xda7   : > { %10217 = vmatmul.f32.gmra.mxu1 %v17205_v29  ;;  %v9613_v40 = vadd.f32 %v9612_v56, %v9536_v52 }
 0xda8   : > { %v9699_v39 = vpop.f32.mrf.mxu3  ;;  %10363 = vmatmul.f32.gmra.mxu3 %v17180_v60 }
 0xda9   : > { %v15232_v46 = vadd.f32 %v9699_v39, %v9613_v40  ;;  %v17212_v40 = vld [vmem:[#allocation205_spill] sm:$0xff] }
 0xdab   : > { %v9452_v6 = vpop.f32.mrf.mxu0  ;;  %10135 = vmatmul.f32.gmra.mxu0 %v17206_v1 }
 0xdac   : > { %v9540_v48 = vadd.f32 %v9539_v47, %v9452_v6  ;;  %v17213_v6 = vld [vmem:[#allocation207_spill] sm:$0xff] }
 0xdad   : > { %v9543_v30 = vpop.f32.mrf.mxu1 }
 0xdae   : > { %v9617_v53 = vpop.f32.mrf.mxu2  ;;  %10300 = vmatmul.f32.gmra.mxu2 %v17182_v43 }
 0xdaf   : > { %10223 = vmatmul.f32.gmra.mxu1 %v17207_v11  ;;  %v9618_v24 = vadd.f32 %v9617_v53, %v9540_v48 }
 0xdb0   : > { %v9705_v0 = vpop.f32.mrf.mxu3  ;;  %10367 = vmatmul.f32.gmra.mxu3 %v17182_v43 }
 0xdb1   : > { %v15238_v54 = vadd.f32 %v9705_v0, %v9618_v24 }
 0xdb3   : > { %v9460_v60 = vpop.f32.mrf.mxu0  ;;  %10140 = vmatmul.f32.gmra.mxu0 %v17208_v23 }
 0xdb4   : > { %v9544_v2 = vadd.f32 %v9543_v30, %v9460_v60 }
 0xdb5   : > { %v9547_v17 = vpop.f32.mrf.mxu1 }
 0xdb6   : > { %v9622_v41 = vpop.f32.mrf.mxu2  ;;  %10304 = vmatmul.f32.gmra.mxu2 %v17184_v12 }
 0xdb7   : > { %10229 = vmatmul.f32.gmra.mxu1 %v17209_v55  ;;  %v9623_v42 = vadd.f32 %v9622_v41, %v9544_v2 }
 0xdb8   : > { %v9711_v45 = vpop.f32.mrf.mxu3  ;;  %10371 = vmatmul.f32.gmra.mxu3 %v17184_v12 }
 0xdb9   : > { %v15244_v27 = vadd.f32 %v9711_v45, %v9623_v42 }
 0xdbb   : > { %v9468_v43 = vpop.f32.mrf.mxu0  ;;  %10145 = vmatmul.f32.gmra.mxu0 %v17210_v18 }
 0xdbc   : > { %v9548_v31 = vadd.f32 %v9547_v17, %v9468_v43 }
 0xdbd   : > { %v9551_v39 = vpop.f32.mrf.mxu1 }
 0xdbe   : > { %v9627_v57 = vpop.f32.mrf.mxu2  ;;  %10308 = vmatmul.f32.gmra.mxu2 %v17186_v32 }
 0xdbf   : > { %10235 = vmatmul.f32.gmra.mxu1 %v17211_v4  ;;  %v9628_v52 = vadd.f32 %v9627_v57, %v9548_v31 }
 0xdc0   : > { %v9717_v29 = vpop.f32.mrf.mxu3  ;;  %10375 = vmatmul.f32.gmra.mxu3 %v17186_v32 }
 0xdc1   : > { %v15250_v56 = vadd.f32 %v9717_v29, %v9628_v52 }
 0xdc3   : > { %v9476_v12 = vpop.f32.mrf.mxu0  ;;  %10150 = vmatmul.f32.gmra.mxu0 %v17212_v40 }
 0xdc4   : > { %v9552_v47 = vadd.f32 %v9551_v39, %v9476_v12 }
 0xdc5   : > { %v9817_v0 = vpop.f32.mrf.mxu1 }
 0xdc6   : > { %v9632_v1 = vpop.f32.mrf.mxu2  ;;  %10312 = vmatmul.f32.gmra.mxu2 %v17188_v15 }
 0xdc7   : > { %10241 = vmatmul.f32.gmra.mxu1 %v17213_v6  ;;  %v9633_v48 = vadd.f32 %v9632_v1, %v9552_v47 }
 0xdc8   : > { %v9723_v11 = vpop.f32.mrf.mxu3  ;;  %10379 = vmatmul.f32.gmra.mxu3 %v17188_v15 }
 0xdc9   : > { %v15256_v53 = vadd.f32 %v9723_v11, %v9633_v48 }
 0xdcb   : > { %v9750_v32 = vpop.f32.mrf.mxu0 }
 0xdcc   : > { %v9751_v24 = vadd.f32 %v9750_v32, %v15190_v34 }
 0xdcd   : > { %v9821_v45 = vpop.f32.mrf.mxu1 }
 0xdce   : > { %v9907_v60 = vpop.f32.mrf.mxu2  ;;  %v9818_v55 = vadd.f32 %v9817_v0, %v9751_v24 }
 0xdd0   : > { %v10026_v30 = vpop.f32.mrf.mxu3  ;;  %v15262_v2 = vadd.f32 %v9818_v55, %v15107_v8 }
 0xdd1   : > { %v15259_v23 = vadd.f32 %v10026_v30, %v9907_v60 }
 0xdd3   : > { %v9754_v41 = vpop.f32.mrf.mxu0 }
 0xdd4   : > { %v9755_v42 = vadd.f32 %v9754_v41, %v15196_v49 }
 0xdd5   : > { %v9825_v31 = vpop.f32.mrf.mxu1 }
 0xdd6   : > { %v9915_v15 = vpop.f32.mrf.mxu2  ;;  %v9822_v18 = vadd.f32 %v9821_v45, %v9755_v42 }
 0xdd8   : > { %v10030_v43 = vpop.f32.mrf.mxu3  ;;  %v15268_v4 = vadd.f32 %v9822_v18, %v15114_v19 }
 0xdd9   : > { %v15265_v17 = vadd.f32 %v10030_v43, %v9915_v15 }
 0xddb   : > { %v9758_v34 = vpop.f32.mrf.mxu0 }
 0xddc   : > { %v9759_v57 = vadd.f32 %v9758_v34, %v15202_v5 }
 0xddd   : > { %v9829_v40 = vpop.f32.mrf.mxu1 }
 0xdde   : > { %v9923_v29 = vpop.f32.mrf.mxu2  ;;  %v9826_v12 = vadd.f32 %v9825_v31, %v9759_v57 }
 0xde0   : > { %v10034_v52 = vpop.f32.mrf.mxu3  ;;  %v15274_v39 = vadd.f32 %v9826_v12, %v15121_v51 }
 0xde1   : > { %v15271_v8 = vadd.f32 %v10034_v52, %v9923_v29 }
 0xde3   : > { %v9762_v49 = vpop.f32.mrf.mxu0 }
 0xde4   : > { %v9763_v6 = vadd.f32 %v9762_v49, %v15208_v58 }
 0xde5   : > { %v9833_v32 = vpop.f32.mrf.mxu1 }
 0xde6   : > { %v9931_v47 = vpop.f32.mrf.mxu2  ;;  %v9830_v11 = vadd.f32 %v9829_v40, %v9763_v6 }
 0xde8   : > { %v10038_v1 = vpop.f32.mrf.mxu3  ;;  %v15280_v48 = vadd.f32 %v9830_v11, %v15128_v44 }
 0xde9   : > { %v15277_v19 = vadd.f32 %v10038_v1, %v9931_v47 }
 0xdeb   : > { %v9766_v5 = vpop.f32.mrf.mxu0 }
 0xdec   : > { %v9767_v0 = vadd.f32 %v9766_v5, %v15214_v20 }
 0xded   : > { %v9837_v41 = vpop.f32.mrf.mxu1 }
 0xdee   : > { %v9939_v24 = vpop.f32.mrf.mxu2  ;;  %v9834_v30 = vadd.f32 %v9833_v32, %v9767_v0 }
 0xdf0   : > { %v10042_v60 = vpop.f32.mrf.mxu3  ;;  %v15286_v55 = vadd.f32 %v9834_v30, %v15135_v22 }
 0xdf1   : > { %v15283_v51 = vadd.f32 %v10042_v60, %v9939_v24 }
 0xdf3   : > { %v9770_v58 = vpop.f32.mrf.mxu0 }
 0xdf4   : > { %v9771_v45 = vadd.f32 %v9770_v58, %v15220_v3 }
 0xdf5   : > { %v9841_v34 = vpop.f32.mrf.mxu1 }
 0xdf6   : > { %v9947_v42 = vpop.f32.mrf.mxu2  ;;  %v9838_v43 = vadd.f32 %v9837_v41, %v9771_v45 }
 0xdf8   : > { %v10046_v15 = vpop.f32.mrf.mxu3  ;;  %v15292_v18 = vadd.f32 %v9838_v43, %v15142_v38 }
 0xdf9   : > { %v15289_v44 = vadd.f32 %v10046_v15, %v9947_v42 }
 0xdfb   : > { %v9774_v20 = vpop.f32.mrf.mxu0 }
 0xdfc   : > { %v9775_v31 = vadd.f32 %v9774_v20, %v15226_v61 }
 0xdfd   : > { %v9845_v49 = vpop.f32.mrf.mxu1 }
 0xdfe   : > { %v9955_v57 = vpop.f32.mrf.mxu2  ;;  %v9842_v52 = vadd.f32 %v9841_v34, %v9775_v31 }
 0xe00   : > { %v10050_v29 = vpop.f32.mrf.mxu3  ;;  %v15298_v12 = vadd.f32 %v9842_v52, %v15149_v36 }
 0xe01   : > { %v15295_v22 = vadd.f32 %v10050_v29, %v9955_v57 }
 0xe03   : > { %v9778_v3 = vpop.f32.mrf.mxu0 }
 0xe04   : > { %v9779_v40 = vadd.f32 %v9778_v3, %v15232_v46 }
 0xe05   : > { %v9849_v5 = vpop.f32.mrf.mxu1 }
 0xe06   : > { %v9963_v6 = vpop.f32.mrf.mxu2  ;;  %v9846_v1 = vadd.f32 %v9845_v49, %v9779_v40 }
 0xe08   : > { %v10054_v47 = vpop.f32.mrf.mxu3  ;;  %v15304_v11 = vadd.f32 %v9846_v1, %v15156_v59 }
 0xe09   : > { %v15301_v38 = vadd.f32 %v10054_v47, %v9963_v6 }
 0xe0b   : > { %v9782_v61 = vpop.f32.mrf.mxu0 }
 0xe0c   : > { %v9783_v32 = vadd.f32 %v9782_v61, %v15238_v54 }
 0xe0d   : > { %v9853_v58 = vpop.f32.mrf.mxu1 }
 0xe0e   : > { %v9971_v0 = vpop.f32.mrf.mxu2  ;;  %v9850_v60 = vadd.f32 %v9849_v5, %v9783_v32 }
 0xe10   : > { %v10058_v24 = vpop.f32.mrf.mxu3  ;;  %v15310_v30 = vadd.f32 %v9850_v60, %v15163_v10 }
 0xe11   : > { %v15307_v36 = vadd.f32 %v10058_v24, %v9971_v0 }
 0xe13   : > { %v9786_v46 = vpop.f32.mrf.mxu0 }
 0xe14   : > { %v9787_v41 = vadd.f32 %v9786_v46, %v15244_v27 }
 0xe15   : > { %v9857_v20 = vpop.f32.mrf.mxu1 }
 0xe16   : > { %v9979_v45 = vpop.f32.mrf.mxu2  ;;  %v9854_v15 = vadd.f32 %v9853_v58, %v9787_v41 }
 0xe18   : > { %v10062_v42 = vpop.f32.mrf.mxu3  ;;  %v15316_v43 = vadd.f32 %v9854_v15, %v15170_v13 }
 0xe19   : > { %v15313_v59 = vadd.f32 %v10062_v42, %v9979_v45 }
 0xe1b   : > { %v9790_v54 = vpop.f32.mrf.mxu0 }
 0xe1c   : > { %v9791_v34 = vadd.f32 %v9790_v54, %v15250_v56 }
 0xe1d   : > { %v9861_v3 = vpop.f32.mrf.mxu1 }
 0xe1e   : > { %v9987_v31 = vpop.f32.mrf.mxu2  ;;  %v9858_v29 = vadd.f32 %v9857_v20, %v9791_v34 }
 0xe20   : > { %v10066_v57 = vpop.f32.mrf.mxu3  ;;  %v15322_v52 = vadd.f32 %v9858_v29, %v15177_v9 }
 0xe21   : > { %v15319_v10 = vadd.f32 %v10066_v57, %v9987_v31 }
 0xe23   : > { %v9794_v27 = vpop.f32.mrf.mxu0 }
 0xe24   : > { %v9795_v49 = vadd.f32 %v9794_v27, %v15256_v53 }
 0xe25   : > { %v10176_v61 = vpop.f32.mrf.mxu1 }
 0xe26   : > { %v9995_v40 = vpop.f32.mrf.mxu2  ;;  %v9862_v47 = vadd.f32 %v9861_v3, %v9795_v49 }
 0xe28   : > { %v10070_v6 = vpop.f32.mrf.mxu3  ;;  %v15328_v1 = vadd.f32 %v9862_v47, %v15184_v50 }
 0xe29   : > { %v15325_v13 = vadd.f32 %v10070_v6, %v9995_v40 }
 0xe2b   : > { %v10096_v56 = vpop.f32.mrf.mxu0 }
 0xe2c   : > { %v10097_v5 = vadd.f32 %v10096_v56, %v15259_v23 }
 0xe2d   : > { %v10182_v46 = vpop.f32.mrf.mxu1 }
 0xe2e   : > { %v10269_v32 = vpop.f32.mrf.mxu2  ;;  %v10177_v0 = vadd.f32 %v10176_v61, %v10097_v5 }
 0xe30   : > { %v10336_v9 = vpop.f32.mrf.mxu3  ;;  %v10270_v24 = vadd.f32 %v10269_v32, %v10177_v0 }
 0xe32   : > { %v10337_v60 = vadd.f32 %v10336_v9, %v10270_v24 }
 0xe33   : > { %v10101_v53 = vpop.f32.mrf.mxu0 }
 0xe34   : > { %v10102_v58 = vadd.f32 %v10101_v53, %v15265_v17  ;;  %v10383_v41 = vadd.f32 %v10337_v60, %v15262_v2 }
 0xe35   : > { %v10188_v29 = vpop.f32.mrf.mxu1 }
 0xe36   : > { %v10273_v50 = vpop.f32.mrf.mxu2  ;;  %v10395_v42 = vadd.f32 %v10383_v41, %v14312_v16  ;;  %v10183_v23 = vadd.f32 %v10182_v46, %v10102_v58 }
 0xe38   : > { %v10340_v45 = vpop.f32.mrf.mxu3  ;;  %v10419_v15 = vrot.slane %v10395_v42, 1  ;;  %v10420_v54 = vrot.slane %v10395_v42, 2  ;;  %v10421_v20 = vrot.slane %v10395_v42, 3  ;;  %10587 = vst.msk [vmem:[%s13866_s14 + $0x3] sm:$0x1] %vm2951_vm3, %v10395_v42  ;;  %v10422_v34 = vrot.slane %v10395_v42, 4 }
 0xe39   : > { %v10274_v31 = vadd.f32 %v10273_v50, %v10183_v23  ;;  %v10423_v57 = vrot.slane %v10395_v42, 5  ;;  %v10424_v2 = vrot.slane %v10395_v42, 6  ;;  %v10425_v27 = vrot.slane %v10395_v42, 7 }
 0xe3a   : > { %10588 = vst.msk [vmem:[%s13866_s14 + $0x7] sm:$0x1] %vm2951_vm3, %v10419_v15 }
 0xe3b   : > { %10589 = vst.msk [vmem:[%s13866_s14 + $0xb] sm:$0x1] %vm2951_vm3, %v10420_v54  ;;  %v10106_v16 = vpop.f32.mrf.mxu0  ;;  %v10341_v17 = vadd.f32 %v10340_v45, %v10274_v31 }
 0xe3c   : > { %10590 = vst.msk [vmem:[%s13866_s14 + $0xf] sm:$0x1] %vm2951_vm3, %v10421_v20  ;;  %v10107_v3 = vadd.f32 %v10106_v16, %v15271_v8 }
 0xe3d   : > { %10591 = vst.msk [vmem:[%s13866_s14 + $0x13] sm:$0x1] %vm2951_vm3, %v10422_v34  ;;  %v10384_v6 = vadd.f32 %v10341_v17, %v15268_v4  ;;  %v10194_v60 = vpop.f32.mrf.mxu1 }
 0xe3e   : > { %v10277_v49 = vpop.f32.mrf.mxu2  ;;  %10592 = vst.msk [vmem:[%s13866_s14 + $0x17] sm:$0x1] %vm2951_vm3, %v10423_v57  ;;  %v10189_v47 = vadd.f32 %v10188_v29, %v10107_v3 }
 0xe3f   : > { %10593 = vst.msk [vmem:[%s13866_s14 + $0x1b] sm:$0x1] %vm2951_vm3, %v10424_v2  ;;  %v10396_v56 = vadd.f32 %v10384_v6, %v14144_v37 }
 0xe40   : > { %v10344_v40 = vpop.f32.mrf.mxu3  ;;  %10594 = vst.msk [vmem:[%s13866_s14 + $0x1f] sm:$0x1] %vm2951_vm3, %v10425_v27  ;;  %v10278_v61 = vadd.f32 %v10277_v49, %v10189_v47 }
 0xe41   : > { %v10426_v5 = vrot.slane %v10396_v56, 1  ;;  %v10427_v8 = vrot.slane %v10396_v56, 2  ;;  %v10428_v32 = vrot.slane %v10396_v56, 3  ;;  %10595 = vst.msk [vmem:[%s13866_s14 + $0x23] sm:$0x1] %vm2951_vm3, %v10396_v56  ;;  %v10429_v9 = vrot.slane %v10396_v56, 4 }
 0xe42   : > { %v10345_v4 = vadd.f32 %v10344_v40, %v10278_v61  ;;  %v10430_v0 = vrot.slane %v10396_v56, 5  ;;  %v10431_v37 = vrot.slane %v10396_v56, 6  ;;  %v10432_v50 = vrot.slane %v10396_v56, 7 }
 0xe43   : > { %10596 = vst.msk [vmem:[%s13866_s14 + $0x27] sm:$0x1] %vm2951_vm3, %v10426_v5  ;;  %v10111_v24 = vpop.f32.mrf.mxu0 }
 0xe44   : > { %10597 = vst.msk [vmem:[%s13866_s14 + $0x2b] sm:$0x1] %vm2951_vm3, %v10427_v8  ;;  %v10112_v53 = vadd.f32 %v10111_v24, %v15277_v19  ;;  %v10385_v46 = vadd.f32 %v10345_v4, %v15274_v39 }
 0xe45   : > { %10598 = vst.msk [vmem:[%s13866_s14 + $0x2f] sm:$0x1] %vm2951_vm3, %v10428_v32  ;;  %v10200_v31 = vpop.f32.mrf.mxu1 }
 0xe46   : > { %v10281_v58 = vpop.f32.mrf.mxu2  ;;  %10599 = vst.msk [vmem:[%s13866_s14 + $0x33] sm:$0x1] %vm2951_vm3, %v10429_v9  ;;  %v10397_v45 = vadd.f32 %v10385_v46, %v13870_v14  ;;  %v10195_v42 = vadd.f32 %v10194_v60, %v10112_v53 }
 0xe47   : > { %10600 = vst.msk [vmem:[%s13866_s14 + $0x37] sm:$0x1] %vm2951_vm3, %v10430_v0 }
 0xe48   : > { %v10348_v41 = vpop.f32.mrf.mxu3  ;;  %10601 = vst.msk [vmem:[%s13866_s14 + $0x3b] sm:$0x1] %vm2951_vm3, %v10431_v37  ;;  %v10433_v19 = vrot.slane %v10397_v45, 1  ;;  %v10434_v23 = vrot.slane %v10397_v45, 2  ;;  %v10435_v39 = vrot.slane %v10397_v45, 3  ;;  %v10282_v15 = vadd.f32 %v10281_v58, %v10195_v42 }
 0xe49   : > { %10602 = vst.msk [vmem:[%s13866_s14 + $0x3f] sm:$0x1] %vm2951_vm3, %v10432_v50  ;;  %v10436_v54 = vrot.slane %v10397_v45, 4  ;;  %v10437_v20 = vrot.slane %v10397_v45, 5  ;;  %v10438_v57 = vrot.slane %v10397_v45, 6  ;;  %v10439_v29 = vrot.slane %v10397_v45, 7 }
 0xe4a   : > { %10603 = vst.msk [vmem:[%s13866_s14 + $0x43] sm:$0x1] %vm2951_vm3, %v10397_v45  ;;  %v10349_v34 = vadd.f32 %v10348_v41, %v10282_v15 }
 0xe4b   : > { %10604 = vst.msk [vmem:[%s13866_s14 + $0x47] sm:$0x1] %vm2951_vm3, %v10433_v19  ;;  %v10116_v14 = vpop.f32.mrf.mxu0 }
 0xe4c   : > { %10605 = vst.msk [vmem:[%s13866_s14 + $0x4b] sm:$0x1] %vm2951_vm3, %v10434_v23  ;;  %v10117_v2 = vadd.f32 %v10116_v14, %v15283_v51  ;;  %v10386_v27 = vadd.f32 %v10349_v34, %v15280_v48 }
 0xe4d   : > { %10606 = vst.msk [vmem:[%s13866_s14 + $0x4f] sm:$0x1] %vm2951_vm3, %v10435_v39  ;;  %v10206_v5 = vpop.f32.mrf.mxu1 }
 0xe4e   : > { %v10285_v16 = vpop.f32.mrf.mxu2  ;;  %10607 = vst.msk [vmem:[%s13866_s14 + $0x53] sm:$0x1] %vm2951_vm3, %v10436_v54  ;;  %v10201_v3 = vadd.f32 %v10200_v31, %v10117_v2  ;;  %v10398_v49 = vadd.f32 %v10386_v27, %v14406_v63 }
 0xe4f   : > { %10608 = vst.msk [vmem:[%s13866_s14 + $0x57] sm:$0x1] %vm2951_vm3, %v10437_v20 }
 0xe50   : > { %v10352_v17 = vpop.f32.mrf.mxu3  ;;  %10609 = vst.msk [vmem:[%s13866_s14 + $0x5b] sm:$0x1] %vm2951_vm3, %v10438_v57  ;;  %v10286_v51 = vadd.f32 %v10285_v16, %v10201_v3  ;;  %v10440_v40 = vrot.slane %v10398_v49, 1  ;;  %v10441_v6 = vrot.slane %v10398_v49, 2  ;;  %v10442_v47 = vrot.slane %v10398_v49, 3 }
 0xe51   : > { %10610 = vst.msk [vmem:[%s13866_s14 + $0x5f] sm:$0x1] %vm2951_vm3, %v10439_v29  ;;  %v10443_v56 = vrot.slane %v10398_v49, 4  ;;  %v10444_v61 = vrot.slane %v10398_v49, 5  ;;  %v10445_v8 = vrot.slane %v10398_v49, 6  ;;  %v10446_v24 = vrot.slane %v10398_v49, 7 }
 0xe52   : > { %10611 = vst.msk [vmem:[%s13866_s14 + $0x63] sm:$0x1] %vm2951_vm3, %v10398_v49  ;;  %v10353_v48 = vadd.f32 %v10352_v17, %v10286_v51 }
 0xe53   : > { %10612 = vst.msk [vmem:[%s13866_s14 + $0x67] sm:$0x1] %vm2951_vm3, %v10440_v40  ;;  %v10121_v63 = vpop.f32.mrf.mxu0 }
 0xe54   : > { %10613 = vst.msk [vmem:[%s13866_s14 + $0x6b] sm:$0x1] %vm2951_vm3, %v10441_v6  ;;  %v10122_v32 = vadd.f32 %v10121_v63, %v15289_v44  ;;  %v10387_v9 = vadd.f32 %v10353_v48, %v15286_v55 }
 0xe55   : > { %10614 = vst.msk [vmem:[%s13866_s14 + $0x6f] sm:$0x1] %vm2951_vm3, %v10442_v47  ;;  %v10212_v45 = vpop.f32.mrf.mxu1 }
 0xe56   : > { %v10289_v4 = vpop.f32.mrf.mxu2  ;;  %10615 = vst.msk [vmem:[%s13866_s14 + $0x73] sm:$0x1] %vm2951_vm3, %v10443_v56  ;;  %v10399_v60 = vadd.f32 %v10387_v9, %v13965_v25  ;;  %v10207_v37 = vadd.f32 %v10206_v5, %v10122_v32 }
 0xe57   : > { %10616 = vst.msk [vmem:[%s13866_s14 + $0x77] sm:$0x1] %vm2951_vm3, %v10444_v61 }
 0xe58   : > { %v10356_v0 = vpop.f32.mrf.mxu3  ;;  %10617 = vst.msk [vmem:[%s13866_s14 + $0x7b] sm:$0x1] %vm2951_vm3, %v10445_v8  ;;  %v10447_v44 = vrot.slane %v10399_v60, 1  ;;  %v10448_v53 = vrot.slane %v10399_v60, 2  ;;  %v10449_v55 = vrot.slane %v10399_v60, 3  ;;  %v10290_v46 = vadd.f32 %v10289_v4, %v10207_v37 }
 0xe59   : > { %10618 = vst.msk [vmem:[%s13866_s14 + $0x7f] sm:$0x1] %vm2951_vm3, %v10446_v24  ;;  %v10450_v58 = vrot.slane %v10399_v60, 4  ;;  %v10451_v41 = vrot.slane %v10399_v60, 5  ;;  %v10452_v42 = vrot.slane %v10399_v60, 6  ;;  %v10453_v15 = vrot.slane %v10399_v60, 7 }
 0xe5a   : > { %10619 = vst.msk [vmem:[%s13866_s14 + $0x83] sm:$0x1] %vm2951_vm3, %v10399_v60  ;;  %v10357_v50 = vadd.f32 %v10356_v0, %v10290_v46 }
 0xe5b   : > { %10620 = vst.msk [vmem:[%s13866_s14 + $0x87] sm:$0x1] %vm2951_vm3, %v10447_v44  ;;  %v10126_v25 = vpop.f32.mrf.mxu0 }
 0xe5c   : > { %10621 = vst.msk [vmem:[%s13866_s14 + $0x8b] sm:$0x1] %vm2951_vm3, %v10448_v53  ;;  %v10127_v19 = vadd.f32 %v10126_v25, %v15295_v22  ;;  %v10388_v54 = vadd.f32 %v10357_v50, %v15292_v18 }
 0xe5d   : > { %10622 = vst.msk [vmem:[%s13866_s14 + $0x8f] sm:$0x1] %vm2951_vm3, %v10449_v55  ;;  %v10218_v17 = vpop.f32.mrf.mxu1 }
 0xe5e   : > { %v10293_v23 = vpop.f32.mrf.mxu2  ;;  %10623 = vst.msk [vmem:[%s13866_s14 + $0x93] sm:$0x1] %vm2951_vm3, %v10450_v58  ;;  %v10213_v20 = vadd.f32 %v10212_v45, %v10127_v19  ;;  %v10400_v14 = vadd.f32 %v10388_v54, %v14496_v21 }
 0xe5f   : > { %10624 = vst.msk [vmem:[%s13866_s14 + $0x97] sm:$0x1] %vm2951_vm3, %v10451_v41 }
 0xe60   : > { %v10360_v39 = vpop.f32.mrf.mxu3  ;;  %10625 = vst.msk [vmem:[%s13866_s14 + $0x9b] sm:$0x1] %vm2951_vm3, %v10452_v42  ;;  %v10294_v22 = vadd.f32 %v10293_v23, %v10213_v20  ;;  %v10454_v34 = vrot.slane %v10400_v14, 1  ;;  %v10455_v31 = vrot.slane %v10400_v14, 2  ;;  %v10456_v57 = vrot.slane %v10400_v14, 3 }
 0xe61   : > { %10626 = vst.msk [vmem:[%s13866_s14 + $0x9f] sm:$0x1] %vm2951_vm3, %v10453_v15  ;;  %v10457_v2 = vrot.slane %v10400_v14, 4  ;;  %v10458_v16 = vrot.slane %v10400_v14, 5  ;;  %v10459_v29 = vrot.slane %v10400_v14, 6  ;;  %v10460_v40 = vrot.slane %v10400_v14, 7 }
 0xe62   : > { %10627 = vst.msk [vmem:[%s13866_s14 + $0xa3] sm:$0x1] %vm2951_vm3, %v10400_v14  ;;  %v10361_v18 = vadd.f32 %v10360_v39, %v10294_v22 }
 0xe63   : > { %10628 = vst.msk [vmem:[%s13866_s14 + $0xa7] sm:$0x1] %vm2951_vm3, %v10454_v34  ;;  %v10131_v21 = vpop.f32.mrf.mxu0 }
 0xe64   : > { %10629 = vst.msk [vmem:[%s13866_s14 + $0xab] sm:$0x1] %vm2951_vm3, %v10455_v31  ;;  %v10132_v27 = vadd.f32 %v10131_v21, %v15301_v38  ;;  %v10389_v3 = vadd.f32 %v10361_v18, %v15298_v12 }
 0xe65   : > { %10630 = vst.msk [vmem:[%s13866_s14 + $0xaf] sm:$0x1] %vm2951_vm3, %v10456_v57  ;;  %v10224_v8 = vpop.f32.mrf.mxu1 }
 0xe66   : > { %v10297_v49 = vpop.f32.mrf.mxu2  ;;  %10631 = vst.msk [vmem:[%s13866_s14 + $0xb3] sm:$0x1] %vm2951_vm3, %v10457_v2  ;;  %v10401_v6 = vadd.f32 %v10389_v3, %v14582_v26  ;;  %v10219_v47 = vadd.f32 %v10218_v17, %v10132_v27 }
 0xe67   : > { %10632 = vst.msk [vmem:[%s13866_s14 + $0xb7] sm:$0x1] %vm2951_vm3, %v10458_v16 }
 0xe68   : > { %v10364_v51 = vpop.f32.mrf.mxu3  ;;  %10633 = vst.msk [vmem:[%s13866_s14 + $0xbb] sm:$0x1] %vm2951_vm3, %v10459_v29  ;;  %v10461_v38 = vrot.slane %v10401_v6, 1  ;;  %v10462_v56 = vrot.slane %v10401_v6, 2  ;;  %v10463_v12 = vrot.slane %v10401_v6, 3  ;;  %v10298_v48 = vadd.f32 %v10297_v49, %v10219_v47 }
 0xe69   : > { %10634 = vst.msk [vmem:[%s13866_s14 + $0xbf] sm:$0x1] %vm2951_vm3, %v10460_v40  ;;  %v10464_v61 = vrot.slane %v10401_v6, 4  ;;  %v10465_v63 = vrot.slane %v10401_v6, 5  ;;  %v10466_v32 = vrot.slane %v10401_v6, 6  ;;  %v10467_v24 = vrot.slane %v10401_v6, 7 }
 0xe6a   : > { %10635 = vst.msk [vmem:[%s13866_s14 + $0xc3] sm:$0x1] %vm2951_vm3, %v10401_v6  ;;  %v10365_v5 = vadd.f32 %v10364_v51, %v10298_v48 }
 0xe6b   : > { %10636 = vst.msk [vmem:[%s13866_s14 + $0xc7] sm:$0x1] %vm2951_vm3, %v10461_v38  ;;  %v10136_v26 = vpop.f32.mrf.mxu0 }
 0xe6c   : > { %10637 = vst.msk [vmem:[%s13866_s14 + $0xcb] sm:$0x1] %vm2951_vm3, %v10462_v56  ;;  %v10137_v9 = vadd.f32 %v10136_v26, %v15307_v36  ;;  %v10390_v60 = vadd.f32 %v10365_v5, %v15304_v11 }
 0xe6d   : > { %10638 = vst.msk [vmem:[%s13866_s14 + $0xcf] sm:$0x1] %vm2951_vm3, %v10463_v12  ;;  %v10230_v25 = vpop.f32.mrf.mxu1 }
 0xe6e   : > { %v10301_v4 = vpop.f32.mrf.mxu2  ;;  %10639 = vst.msk [vmem:[%s13866_s14 + $0xd3] sm:$0x1] %vm2951_vm3, %v10464_v61  ;;  %v10225_v37 = vadd.f32 %v10224_v8, %v10137_v9  ;;  %v10402_v44 = vadd.f32 %v10390_v60, %v14061_v28 }
 0xe6f   : > { %10640 = vst.msk [vmem:[%s13866_s14 + $0xd7] sm:$0x1] %vm2951_vm3, %v10465_v63 }
 0xe70   : > { %v10368_v0 = vpop.f32.mrf.mxu3  ;;  %10641 = vst.msk [vmem:[%s13866_s14 + $0xdb] sm:$0x1] %vm2951_vm3, %v10466_v32  ;;  %v10302_v36 = vadd.f32 %v10301_v4, %v10225_v37  ;;  %v10468_v53 = vrot.slane %v10402_v44, 1  ;;  %v10469_v55 = vrot.slane %v10402_v44, 2  ;;  %v10470_v46 = vrot.slane %v10402_v44, 3 }
 0xe71   : > { %10642 = vst.msk [vmem:[%s13866_s14 + $0xdf] sm:$0x1] %vm2951_vm3, %v10467_v24  ;;  %v10471_v58 = vrot.slane %v10402_v44, 4  ;;  %v10472_v41 = vrot.slane %v10402_v44, 5  ;;  %v10473_v50 = vrot.slane %v10402_v44, 6  ;;  %v10474_v39 = vrot.slane %v10402_v44, 7 }
 0xe72   : > { %10643 = vst.msk [vmem:[%s13866_s14 + $0xe3] sm:$0x1] %vm2951_vm3, %v10402_v44  ;;  %v10369_v11 = vadd.f32 %v10368_v0, %v10302_v36 }
 0xe73   : > { %10644 = vst.msk [vmem:[%s13866_s14 + $0xe7] sm:$0x1] %vm2951_vm3, %v10468_v53  ;;  %v10141_v28 = vpop.f32.mrf.mxu0 }
 0xe74   : > { %10645 = vst.msk [vmem:[%s13866_s14 + $0xeb] sm:$0x1] %vm2951_vm3, %v10469_v55  ;;  %v10142_v45 = vadd.f32 %v10141_v28, %v15313_v59  ;;  %v10391_v42 = vadd.f32 %v10369_v11, %v15310_v30 }
 0xe75   : > { %10646 = vst.msk [vmem:[%s13866_s14 + $0xef] sm:$0x1] %vm2951_vm3, %v10470_v46  ;;  %v10236_v57 = vpop.f32.mrf.mxu1 }
 0xe76   : > { %v10305_v19 = vpop.f32.mrf.mxu2  ;;  %10647 = vst.msk [vmem:[%s13866_s14 + $0xf3] sm:$0x1] %vm2951_vm3, %v10471_v58  ;;  %v10403_v15 = vadd.f32 %v10391_v42, %v14667_v7  ;;  %v10231_v54 = vadd.f32 %v10230_v25, %v10142_v45 }
 0xe77   : > { %10648 = vst.msk [vmem:[%s13866_s14 + $0xf7] sm:$0x1] %vm2951_vm3, %v10472_v41 }
 0xe78   : > { %v10372_v23 = vpop.f32.mrf.mxu3  ;;  %10649 = vst.msk [vmem:[%s13866_s14 + $0xfb] sm:$0x1] %vm2951_vm3, %v10473_v50  ;;  %v10475_v59 = vrot.slane %v10403_v15, 1  ;;  %v10476_v20 = vrot.slane %v10403_v15, 2  ;;  %v10477_v30 = vrot.slane %v10403_v15, 3  ;;  %v10306_v14 = vadd.f32 %v10305_v19, %v10231_v54 }
 0xe79   : > { %10650 = vst.msk [vmem:[%s13866_s14 + $0xff] sm:$0x1] %vm2951_vm3, %v10474_v39  ;;  %v10478_v22 = vrot.slane %v10403_v15, 4  ;;  %v10479_v34 = vrot.slane %v10403_v15, 5  ;;  %v10480_v2 = vrot.slane %v10403_v15, 6  ;;  %v10481_v21 = vrot.slane %v10403_v15, 7 }
 0xe7a   : > { %10651 = vst.msk [vmem:[%s13866_s14 + $0x103] sm:$0x1] %vm2951_vm3, %v10403_v15  ;;  %v10373_v31 = vadd.f32 %v10372_v23, %v10306_v14 }
 0xe7b   : > { %10652 = vst.msk [vmem:[%s13866_s14 + $0x107] sm:$0x1] %vm2951_vm3, %v10475_v59  ;;  %v10146_v7 = vpop.f32.mrf.mxu0 }
 0xe7c   : > { %10653 = vst.msk [vmem:[%s13866_s14 + $0x10b] sm:$0x1] %vm2951_vm3, %v10476_v20  ;;  %v10147_v18 = vadd.f32 %v10146_v7, %v15319_v10  ;;  %v10392_v17 = vadd.f32 %v10373_v31, %v15316_v43 }
 0xe7d   : > { %10654 = vst.msk [vmem:[%s13866_s14 + $0x10f] sm:$0x1] %vm2951_vm3, %v10477_v30  ;;  %v10242_v38 = vpop.f32.mrf.mxu1 }
 0xe7e   : > { %v10309_v16 = vpop.f32.mrf.mxu2  ;;  %10655 = vst.msk [vmem:[%s13866_s14 + $0x113] sm:$0x1] %vm2951_vm3, %v10478_v22  ;;  %v10237_v29 = vadd.f32 %v10236_v57, %v10147_v18  ;;  %v10404_v3 = vadd.f32 %v10392_v17, %v14748_v33 }
 0xe7f   : > { %10656 = vst.msk [vmem:[%s13866_s14 + $0x117] sm:$0x1] %vm2951_vm3, %v10479_v34 }
 0xe80   : > { %v10376_v27 = vpop.f32.mrf.mxu3  ;;  %10657 = vst.msk [vmem:[%s13866_s14 + $0x11b] sm:$0x1] %vm2951_vm3, %v10480_v2  ;;  %v10310_v10 = vadd.f32 %v10309_v16, %v10237_v29  ;;  %v10482_v49 = vrot.slane %v10404_v3, 1  ;;  %v10483_v51 = vrot.slane %v10404_v3, 2  ;;  %v10484_v43 = vrot.slane %v10404_v3, 3 }
 0xe81   : > { %10658 = vst.msk [vmem:[%s13866_s14 + $0x11f] sm:$0x1] %vm2951_vm3, %v10481_v21  ;;  %v10485_v40 = vrot.slane %v10404_v3, 4  ;;  %v10486_v47 = vrot.slane %v10404_v3, 5  ;;  %v10487_v56 = vrot.slane %v10404_v3, 6  ;;  %v10488_v61 = vrot.slane %v10404_v3, 7 }
 0xe82   : > { %10659 = vst.msk [vmem:[%s13866_s14 + $0x123] sm:$0x1] %vm2951_vm3, %v10404_v3  ;;  %v10377_v6 = vadd.f32 %v10376_v27, %v10310_v10 }
 0xe83   : > { %10660 = vst.msk [vmem:[%s13866_s14 + $0x127] sm:$0x1] %vm2951_vm3, %v10482_v49  ;;  %v10151_v33 = vpop.f32.mrf.mxu0 }
 0xe84   : > { %10661 = vst.msk [vmem:[%s13866_s14 + $0x12b] sm:$0x1] %vm2951_vm3, %v10483_v51  ;;  %v10152_v12 = vadd.f32 %v10151_v33, %v15325_v13  ;;  %v10393_v48 = vadd.f32 %v10377_v6, %v15322_v52 }
 0xe85   : > { %10662 = vst.msk [vmem:[%s13866_s14 + $0x12f] sm:$0x1] %vm2951_vm3, %v10484_v43 }
 0xe86   : > { %10663 = vst.msk [vmem:[%s13866_s14 + $0x133] sm:$0x1] %vm2951_vm3, %v10485_v40  ;;  %v10405_v63 = vadd.f32 %v10393_v48, %v14228_v35  ;;  %v10243_v26 = vadd.f32 %v10242_v38, %v10152_v12  ;;  %v10313_v5 = vpop.f32.mrf.mxu2 }
 0xe87   : > { %10664 = vst.msk [vmem:[%s13866_s14 + $0x137] sm:$0x1] %vm2951_vm3, %v10486_v47 }
 0xe88   : > { %10665 = vst.msk [vmem:[%s13866_s14 + $0x13b] sm:$0x1] %vm2951_vm3, %v10487_v56  ;;  %v10489_v13 = vrot.slane %v10405_v63, 1  ;;  %v10490_v52 = vrot.slane %v10405_v63, 2  ;;  %v10380_v8 = vpop.f32.mrf.mxu3  ;;  %v10491_v32 = vrot.slane %v10405_v63, 3  ;;  %v10314_v9 = vadd.f32 %v10313_v5, %v10243_v26 }
 0xe89   : > { %10666 = vst.msk [vmem:[%s13866_s14 + $0x13f] sm:$0x1] %vm2951_vm3, %v10488_v61  ;;  %v10492_v35 = vrot.slane %v10405_v63, 4  ;;  %v10493_v4 = vrot.slane %v10405_v63, 5  ;;  %v10494_v24 = vrot.slane %v10405_v63, 6  ;;  %v10495_v60 = vrot.slane %v10405_v63, 7 }
 0xe8a   : > { %10667 = vst.msk [vmem:[%s13866_s14 + $0x143] sm:$0x1] %vm2951_vm3, %v10405_v63  ;;  %v10381_v0 = vadd.f32 %v10380_v8, %v10314_v9 }
 0xe8b   : > { %10668 = vst.msk [vmem:[%s13866_s14 + $0x147] sm:$0x1] %vm2951_vm3, %v10489_v13 }
 0xe8c   : > { %10669 = vst.msk [vmem:[%s13866_s14 + $0x14b] sm:$0x1] %vm2951_vm3, %v10490_v52  ;;  %v10394_v37 = vadd.f32 %v10381_v0, %v15328_v1 }
 0xe8d   : > { %10670 = vst.msk [vmem:[%s13866_s14 + $0x14f] sm:$0x1] %vm2951_vm3, %v10491_v32 }
 0xe8e   : > { %10671 = vst.msk [vmem:[%s13866_s14 + $0x153] sm:$0x1] %vm2951_vm3, %v10492_v35  ;;  %v10406_v44 = vadd.f32 %v10394_v37, %v14847_v62 }
 0xe8f   : > { %10672 = vst.msk [vmem:[%s13866_s14 + $0x157] sm:$0x1] %vm2951_vm3, %v10493_v4 }
 0xe90   : > { %10673 = vst.msk [vmem:[%s13866_s14 + $0x15b] sm:$0x1] %vm2951_vm3, %v10494_v24  ;;  %v10496_v36 = vrot.slane %v10406_v44, 1  ;;  %v10497_v53 = vrot.slane %v10406_v44, 2  ;;  %v10498_v55 = vrot.slane %v10406_v44, 3  ;;  %v10499_v46 = vrot.slane %v10406_v44, 4 }
 0xe91   : > { %10674 = vst.msk [vmem:[%s13866_s14 + $0x15f] sm:$0x1] %vm2951_vm3, %v10495_v60  ;;  %v10500_v1 = vrot.slane %v10406_v44, 5  ;;  %v10501_v58 = vrot.slane %v10406_v44, 6  ;;  %v10502_v11 = vrot.slane %v10406_v44, 7 }
 0xe92   : > { %10675 = vst.msk [vmem:[%s13866_s14 + $0x163] sm:$0x1] %vm2951_vm3, %v10406_v44 }
 0xe93   : > { %10676 = vst.msk [vmem:[%s13866_s14 + $0x167] sm:$0x1] %vm2951_vm3, %v10496_v36 }
 0xe94   : > { %10677 = vst.msk [vmem:[%s13866_s14 + $0x16b] sm:$0x1] %vm2951_vm3, %v10497_v53 }
 0xe95   : > { %10678 = vst.msk [vmem:[%s13866_s14 + $0x16f] sm:$0x1] %vm2951_vm3, %v10498_v55 }
 0xe96   : > { %10679 = vst.msk [vmem:[%s13866_s14 + $0x173] sm:$0x1] %vm2951_vm3, %v10499_v46 }
 0xe97   : > { %10680 = vst.msk [vmem:[%s13866_s14 + $0x177] sm:$0x1] %vm2951_vm3, %v10500_v1 }
 0xe98   : > { %10681 = vst.msk [vmem:[%s13866_s14 + $0x17b] sm:$0x1] %vm2951_vm3, %v10501_v58 }
 0xe99   : > { %10682 = vst.msk [vmem:[%s13866_s14 + $0x17f] sm:$0x1] %vm2951_vm3, %v10502_v11 }
 0xe9a PF: > { %s14_s17 = sadd.s32 1, %s10839_s17   ;;  %s17214_s15 = smov %s10835_s16 }
 0xe9b   : > { %p11_p5 = scmp.ge.s32.totalorder %s14_s17, 4   ;;  %s17215_s16 = smov %s17217_s18 }
 0xe9d   :  { %13 = sbr.rel (!%p11_p5) target bundleno = 2 (0x2), region = 77 }

</bundles_post_ra>
